<compile_context>
chip_gen: v7x
topology: tpu7x:2x2x1
jax: 0.10.0
libtpu: 0.0.40
codegen_flags: <defaults>
</compile_context>

<pallas_src>
import functools

import jax
import jax.numpy as jnp
from jax import lax
from jax.experimental import pallas as pl
from jax.experimental.pallas import tpu as pltpu

# ----------------------------- model hyper-params (small) -----------------------------
NUM_SOURCES  = 2
INPUT_DIM    = 64      # MaskGenerator input_dim (= encoder feature dim)
MSK_K        = 3       # depthwise conv kernel size
MSK_B        = 32      # num_feats   (io channels of TCN blocks)
MSK_H        = 64      # num_hidden  (hidden channels of TCN blocks)
MSK_LAYERS   = 3
MSK_STACKS   = 2
MSK_ACTIVATE = "sigmoid"
GN_EPS       = 1e-8

N_BLOCKS  = MSK_LAYERS * MSK_STACKS
DILATIONS = tuple(2 ** l for _s in range(MSK_STACKS) for l in range(MSK_LAYERS))
HAS_RES   = tuple(not (l == MSK_LAYERS - 1 and s == MSK_STACKS - 1)
                  for s in range(MSK_STACKS) for l in range(MSK_LAYERS))
N_ALPHAS  = 2 * N_BLOCKS + 1      # 2 PReLUs per block + output PReLU


# ----------------------------------- fused kernel -----------------------------------
def _mask_generator_kernel(alphas_ref,                 # SMEM (N_ALPHAS,)
                           x_ref,                      # (INPUT_DIM, T)  (one sample)
                           icw_ref, icb_ref,           # input 1x1 conv (in-GN folded)
                           c1w_ref, c1b_ref,           # stacked per-block 1x1
                           g1g_ref, g1b_ref,           # stacked GN1 affine
                           dww_ref, dwb_ref,           # stacked depthwise conv
                           rsw_ref, rsb_ref,           # stacked merged res|skip (GN2 folded)
                           skw_ref, skb_ref,           # last-block skip-only conv (GN2 folded)
                           ocw_ref, ocb_ref,           # output 1x1 conv
                           out_ref,                    # (S*INPUT_DIM, T)
                           *, time):
    T = time

    def prelu(v, a):                                   # a: scalar from SMEM
        return jnp.where(v >= 0, v, a * v)

    def conv1x1(v, w, b):                              # (Co,Ci)x(Ci,T) + (Co,1)
        return jnp.dot(w, v, preferred_element_type=jnp.float32) + b

    def gn_norm(v):
        # GroupNorm(1, C) statistics over the whole (C, T) per-sample tile, one pass.
        inv_n = 1.0 / float(v.shape[0] * T)
        mean = jnp.sum(v, keepdims=True) * inv_n                       # (1,1)
        var = jnp.sum(v * v, keepdims=True) * inv_n - mean * mean      # (1,1)
        var = jnp.maximum(var, 0.0)                                    # fp32 clamp
        return (v - mean) * lax.rsqrt(var + GN_EPS)

    # Hoisted edge masks for the dilated depthwise conv (one per distinct nonzero
    # tap offset).  JAX does not CSE iota/broadcast, so build them once.
    tpos = lax.broadcasted_iota(jnp.int32, (1, T), 1)
    shift_masks = {}
    for dil in sorted(set(DILATIONS)):
        pad = dil * (MSK_K - 1) // 2
        for k in range(MSK_K):
            off = k * dil - pad
            if off != 0 and off not in shift_masks:
                shift_masks[off] = jnp.logical_and(tpos + off >= 0, tpos + off < T)

    def dwconv(v, w, b, dil):
        # Depthwise dilated conv, symmetric 'same' zero padding = dil*(K-1)//2.
        # Shifts via pltpu.roll (XLU) + hoisted edge masks; center tap unmasked.
        pad = dil * (MSK_K - 1) // 2
        acc = None
        for k in range(MSK_K):
            off = k * dil - pad
            if off == 0:
                term = w[:, k:k + 1] * v
            else:
                sh = pltpu.roll(v, shift=(-off) % T, axis=1)
                term = w[:, k:k + 1] * jnp.where(shift_masks[off], sh, 0.0)
            acc = term if acc is None else acc + term
        return acc + b

    # ---------------- forward (one sample) ----------------
    x = x_ref[...]                                            # (INPUT_DIM, T)
    feats = conv1x1(gn_norm(x), icw_ref[...], icb_ref[...])   # in-GN affine folded in

    skip_sum = jnp.zeros((MSK_B, T), jnp.float32)
    for i in range(N_BLOCKS):
        f = conv1x1(feats, c1w_ref[i], c1b_ref[i])            # (MSK_H, T)
        f = prelu(f, alphas_ref[2 * i])
        f = gn_norm(f) * g1g_ref[i] + g1b_ref[i]              # GN1 affine kept (edge-correct
                                                              # w.r.t. dwconv zero padding)
        f = dwconv(f, dww_ref[i], dwb_ref[i], DILATIONS[i])
        f = prelu(f, alphas_ref[2 * i + 1])
        f = gn_norm(f)                                        # GN2 affine folded into res/skip conv
        if HAS_RES[i]:
            rs = conv1x1(f, rsw_ref[i], rsb_ref[i])           # (2*MSK_B, T) = res | skip
            feats = feats + rs[:MSK_B]
            skip_sum = skip_sum + rs[MSK_B:]
        else:                                                 # last block: skip-only matmul
            skip_sum = skip_sum + conv1x1(f, skw_ref[...], skb_ref[...])

    out = prelu(skip_sum, alphas_ref[2 * N_BLOCKS])           # output PReLU
    out = conv1x1(out, ocw_ref[...], ocb_ref[...])            # (S*INPUT_DIM, T)
    if MSK_ACTIVATE == "sigmoid":
        out = jax.nn.sigmoid(out)
    else:
        out = jnp.maximum(out, 0.0)
    out_ref[...] = out


# --------------------------- exact GN-affine weight folding ---------------------------
def _fold_params(p):
    # input GroupNorm affine -> input 1x1 conv
    icw = p["in_conv_w"] * p["in_gn_g"].reshape(1, INPUT_DIM)
    icb = p["in_conv_b"] + p["in_conv_w"] @ p["in_gn_b"]
    # GN2 affine -> merged res|skip 1x1 conv (per block, exact)
    rsw = p["rs_w"] * jnp.swapaxes(p["gn2_g"], 1, 2)            # (N, 2B, H)
    rsb = p["rs_b"] + jnp.matmul(p["rs_w"], p["gn2_b"])         # (N, 2B, 1)
    return {
        "alphas": p["alphas"],
        "in_conv_w": icw, "in_conv_b": icb,
        "c1_w": p["c1_w"], "c1_b": p["c1_b"],
        "gn1_g": p["gn1_g"], "gn1_b": p["gn1_b"],
        "dw_w": p["dw_w"], "dw_b": p["dw_b"],
        "rs_w": rsw[:N_BLOCKS - 1], "rs_b": rsb[:N_BLOCKS - 1],
        "sk_w": rsw[N_BLOCKS - 1, MSK_B:], "sk_b": rsb[N_BLOCKS - 1, MSK_B:],
        "out_conv_w": p["out_conv_w"], "out_conv_b": p["out_conv_b"],
    }


# ------------------------------------- wrapper -------------------------------------
@jax.jit
def mask_generator_forward(x, params):
    """x: (B, INPUT_DIM, T) float32 -> masks (B, NUM_SOURCES, INPUT_DIM, T)."""
    B, C, T = x.shape
    assert C == INPUT_DIM
    fp = _fold_params(params)

    kernel = functools.partial(_mask_generator_kernel, time=T)

    def wspec(a):
        nd = a.ndim
        return pl.BlockSpec(a.shape, lambda b, _nd=nd: (0,) * _nd)   # VMEM-resident weights

    weights = [fp["in_conv_w"], fp["in_conv_b"],
               fp["c1_w"], fp["c1_b"], fp["gn1_g"], fp["gn1_b"],
               fp["dw_w"], fp["dw_b"],
               fp["rs_w"], fp["rs_b"], fp["sk_w"], fp["sk_b"],
               fp["out_conv_w"], fp["out_conv_b"]]

    out3d = pl.pallas_call(
        kernel,
        out_shape=jax.ShapeDtypeStruct((B, NUM_SOURCES * INPUT_DIM, T), jnp.float32),
        grid=(B,),
        in_specs=[pl.BlockSpec((N_ALPHAS,), lambda b: (0,),
                               memory_space=pltpu.MemorySpace.SMEM),
                  pl.BlockSpec((pl.Squeezed(), INPUT_DIM, T), lambda b: (b, 0, 0))]
                 + [wspec(w) for w in weights],
        out_specs=pl.BlockSpec((pl.Squeezed(), NUM_SOURCES * INPUT_DIM, T),
                               lambda b: (b, 0, 0)),
        compiler_params=pltpu.CompilerParams(dimension_semantics=("parallel",)),
    )(fp["alphas"], x, *weights)

    return out3d.reshape(B, NUM_SOURCES, INPUT_DIM, T)   # pure reshape, no transpose


# --------------------------------- parameter init ---------------------------------
def init_params(seed=0):
    key = jax.random.PRNGKey(seed)

    def nxt():
        nonlocal key
        key, sub = jax.random.split(key)
        return sub

    def rnd(shape, scale=0.05):
        return jax.random.normal(nxt(), shape, jnp.float32) * scale

    p = {}
    p["in_gn_g"] = jnp.ones((INPUT_DIM, 1), jnp.float32)
    p["in_gn_b"] = jnp.zeros((INPUT_DIM, 1), jnp.float32)
    p["in_conv_w"] = rnd((MSK_B, INPUT_DIM))
    p["in_conv_b"] = rnd((MSK_B, 1))

    c1_w, c1_b, gn1_g, gn1_b = [], [], [], []
    dw_w, dw_b, gn2_g, gn2_b = [], [], [], []
    rs_w, rs_b = [], []
    for i in range(N_BLOCKS):
        c1_w.append(rnd((MSK_H, MSK_B)));            c1_b.append(rnd((MSK_H, 1)))
        gn1_g.append(jnp.ones((MSK_H, 1), jnp.float32))
        gn1_b.append(jnp.zeros((MSK_H, 1), jnp.float32))
        dw_w.append(rnd((MSK_H, MSK_K)));            dw_b.append(rnd((MSK_H, 1)))
        gn2_g.append(jnp.ones((MSK_H, 1), jnp.float32))
        gn2_b.append(jnp.zeros((MSK_H, 1), jnp.float32))
        if HAS_RES[i]:
            res_w, res_b = rnd((MSK_B, MSK_H)), rnd((MSK_B, 1))
        else:  # last block has no residual branch; zero-pad (kernel uses skip-only half)
            res_w, res_b = jnp.zeros((MSK_B, MSK_H), jnp.float32), jnp.zeros((MSK_B, 1), jnp.float32)
        skip_w, skip_b = rnd((MSK_B, MSK_H)), rnd((MSK_B, 1))
        rs_w.append(jnp.concatenate([res_w, skip_w], axis=0))     # (2*MSK_B, MSK_H)
        rs_b.append(jnp.concatenate([res_b, skip_b], axis=0))     # (2*MSK_B, 1)

    p["c1_w"], p["c1_b"] = jnp.stack(c1_w), jnp.stack(c1_b)
    p["gn1_g"], p["gn1_b"] = jnp.stack(gn1_g), jnp.stack(gn1_b)
    p["dw_w"], p["dw_b"] = jnp.stack(dw_w), jnp.stack(dw_b)
    p["gn2_g"], p["gn2_b"] = jnp.stack(gn2_g), jnp.stack(gn2_b)
    p["rs_w"], p["rs_b"] = jnp.stack(rs_w), jnp.stack(rs_b)

    p["out_conv_w"] = rnd((NUM_SOURCES * INPUT_DIM, MSK_B))
    p["out_conv_b"] = rnd((NUM_SOURCES * INPUT_DIM, 1))
    # PReLU parameters (PyTorch init 0.25, one shared parameter per PReLU module)
    p["alphas"] = jnp.full((N_ALPHAS,), 0.25, jnp.float32)
    return p


# ------------------------------ pure-JAX reference ------------------------------
def mask_generator_reference(x, params):
    B, C, T = x.shape

    def gn(v, g, b):
        m = jnp.mean(v, axis=(1, 2), keepdims=True)
        var = jnp.mean(jnp.square(v - m), axis=(1, 2), keepdims=True)
        return (v - m) * lax.rsqrt(var + GN_EPS) * g[None] + b[None]

    def conv1x1(v, w, b):
        return jnp.einsum("oc,bct->bot", w, v) + b[None]

    def prelu(v, a):
        return jnp.where(v >= 0, v, a * v)

    def dwconv(v, w, b, dil):
        pad = dil * (MSK_K - 1) // 2
        vp = jnp.pad(v, ((0, 0), (0, 0), (pad, pad)))
        acc = 0.0
        for k in range(MSK_K):
            acc = acc + w[None, :, k:k + 1] * vp[:, :, k * dil:k * dil + T]
        return acc + b[None]

    al = params["alphas"]
    feats = gn(x, params["in_gn_g"], params["in_gn_b"])
    feats = conv1x1(feats, params["in_conv_w"], params["in_conv_b"])
    skip_sum = 0.0
    for i in range(N_BLOCKS):
        f = conv1x1(feats, params["c1_w"][i], params["c1_b"][i])
        f = prelu(f, al[2 * i])
        f = gn(f, params["gn1_g"][i], params["gn1_b"][i])
        f = dwconv(f, params["dw_w"][i], params["dw_b"][i], DILATIONS[i])
        f = prelu(f, al[2 * i + 1])
        f = gn(f, params["gn2_g"][i], params["gn2_b"][i])
        rs = conv1x1(f, params["rs_w"][i], params["rs_b"][i])
        if HAS_RES[i]:
            feats = feats + rs[:, :MSK_B]
        skip_sum = skip_sum + rs[:, MSK_B:]
    out = prelu(skip_sum, al[2 * N_BLOCKS])
    out = conv1x1(out, params["out_conv_w"], params["out_conv_b"])
    out = jax.nn.sigmoid(out) if MSK_ACTIVATE == "sigmoid" else jnp.maximum(out, 0.0)
    return out.reshape(B, NUM_SOURCES, INPUT_DIM, T)


# --------------------------------------- main ---------------------------------------
if __name__ == "__main__":
    B, T = 2, 128                    # per-sample lane width T = 128 -> lane-dense stores
    key = jax.random.PRNGKey(0)
    x = jax.random.normal(key, (B, INPUT_DIM, T), jnp.float32)

    params = init_params(seed=0)
    y = mask_generator_forward(x, params)
    y = jax.block_until_ready(y)

    assert y.shape == (B, NUM_SOURCES, INPUT_DIM, T), y.shape
    assert bool(jnp.all(jnp.isfinite(y)))

    y_ref = mask_generator_reference(x, params)
    err = float(jnp.max(jnp.abs(y - y_ref)))
    assert err < 1e-2, f"mismatch vs pure-JAX reference: max|diff| = {err}"

    print("KERNEL_OK")
</pallas_src>

<mosaic_0001>
module attributes {stable_mosaic.version = 11 : i64} {
  func.func @_mask_generator_kernel(%arg0: i32, %arg1: memref<13xf32, #tpu.memory_space<smem>>, %arg2: memref<1x64x128xf32, #tpu.memory_space<vmem>>, %arg3: memref<32x64xf32, #tpu.memory_space<vmem>>, %arg4: memref<32x1xf32, #tpu.memory_space<vmem>>, %arg5: memref<6x64x32xf32, #tpu.memory_space<vmem>>, %arg6: memref<6x64x1xf32, #tpu.memory_space<vmem>>, %arg7: memref<6x64x1xf32, #tpu.memory_space<vmem>>, %arg8: memref<6x64x1xf32, #tpu.memory_space<vmem>>, %arg9: memref<6x64x3xf32, #tpu.memory_space<vmem>>, %arg10: memref<6x64x1xf32, #tpu.memory_space<vmem>>, %arg11: memref<5x64x64xf32, #tpu.memory_space<vmem>>, %arg12: memref<5x64x1xf32, #tpu.memory_space<vmem>>, %arg13: memref<32x64xf32, #tpu.memory_space<vmem>>, %arg14: memref<32x1xf32, #tpu.memory_space<vmem>>, %arg15: memref<128x32xf32, #tpu.memory_space<vmem>>, %arg16: memref<128x1xf32, #tpu.memory_space<vmem>>, %arg17: memref<1x128x128xf32, #tpu.memory_space<vmem>>) attributes {dimension_semantics = [#tpu.dimension_semantics<parallel>], iteration_bounds = array<i64: 2>, scalar_prefetch = 0 : i64, scratch_operands = 0 : i64, tpu.core_type = #tpu.core_type<tc>, window_params = [{transform_indices = @transform_0, window_bounds = array<i64: 13>}, {transform_indices = @transform_1, window_bounds = array<i64: 1, 64, 128>}, {pipeline_mode = #tpu.pipeline_mode<synchronous>, transform_indices = @transform_2, window_bounds = array<i64: 32, 64>}, {pipeline_mode = #tpu.pipeline_mode<synchronous>, transform_indices = @transform_3, window_bounds = array<i64: 32, 1>}, {pipeline_mode = #tpu.pipeline_mode<synchronous>, transform_indices = @transform_4, window_bounds = array<i64: 6, 64, 32>}, {pipeline_mode = #tpu.pipeline_mode<synchronous>, transform_indices = @transform_5, window_bounds = array<i64: 6, 64, 1>}, {pipeline_mode = #tpu.pipeline_mode<synchronous>, transform_indices = @transform_6, window_bounds = array<i64: 6, 64, 1>}, {pipeline_mode = #tpu.pipeline_mode<synchronous>, transform_indices = @transform_7, window_bounds = array<i64: 6, 64, 1>}, {pipeline_mode = #tpu.pipeline_mode<synchronous>, transform_indices = @transform_8, window_bounds = array<i64: 6, 64, 3>}, {pipeline_mode = #tpu.pipeline_mode<synchronous>, transform_indices = @transform_9, window_bounds = array<i64: 6, 64, 1>}, {pipeline_mode = #tpu.pipeline_mode<synchronous>, transform_indices = @transform_10, window_bounds = array<i64: 5, 64, 64>}, {pipeline_mode = #tpu.pipeline_mode<synchronous>, transform_indices = @transform_11, window_bounds = array<i64: 5, 64, 1>}, {pipeline_mode = #tpu.pipeline_mode<synchronous>, transform_indices = @transform_12, window_bounds = array<i64: 32, 64>}, {pipeline_mode = #tpu.pipeline_mode<synchronous>, transform_indices = @transform_13, window_bounds = array<i64: 32, 1>}, {pipeline_mode = #tpu.pipeline_mode<synchronous>, transform_indices = @transform_14, window_bounds = array<i64: 128, 32>}, {pipeline_mode = #tpu.pipeline_mode<synchronous>, transform_indices = @transform_15, window_bounds = array<i64: 128, 1>}, {transform_indices = @transform_16, window_bounds = array<i64: 1, 128, 128>}]} {
    %0 = tpu.iota {dimensions = array<i32: 1>} : vector<1x128xi32>
    %c-1_i32 = arith.constant -1 : i32
    %1 = vector.broadcast %c-1_i32 : i32 to vector<1x128xi32>
    %2 = arith.addi %0, %1 : vector<1x128xi32>
    %c0_i32 = arith.constant 0 : i32
    %3 = vector.broadcast %c0_i32 : i32 to vector<1x128xi32>
    %4 = arith.cmpi sge, %2, %3 : vector<1x128xi32>
    %c-1_i32_0 = arith.constant -1 : i32
    %5 = vector.broadcast %c-1_i32_0 : i32 to vector<1x128xi32>
    %6 = arith.addi %0, %5 : vector<1x128xi32>
    %c128_i32 = arith.constant 128 : i32
    %7 = vector.broadcast %c128_i32 : i32 to vector<1x128xi32>
    %8 = arith.cmpi slt, %6, %7 : vector<1x128xi32>
    %9 = arith.andi %4, %8 : vector<1x128xi1>
    %c1_i32 = arith.constant 1 : i32
    %10 = vector.broadcast %c1_i32 : i32 to vector<1x128xi32>
    %11 = arith.addi %0, %10 : vector<1x128xi32>
    %c0_i32_1 = arith.constant 0 : i32
    %12 = vector.broadcast %c0_i32_1 : i32 to vector<1x128xi32>
    %13 = arith.cmpi sge, %11, %12 : vector<1x128xi32>
    %c1_i32_2 = arith.constant 1 : i32
    %14 = vector.broadcast %c1_i32_2 : i32 to vector<1x128xi32>
    %15 = arith.addi %0, %14 : vector<1x128xi32>
    %c128_i32_3 = arith.constant 128 : i32
    %16 = vector.broadcast %c128_i32_3 : i32 to vector<1x128xi32>
    %17 = arith.cmpi slt, %15, %16 : vector<1x128xi32>
    %18 = arith.andi %13, %17 : vector<1x128xi1>
    %c-2_i32 = arith.constant -2 : i32
    %19 = vector.broadcast %c-2_i32 : i32 to vector<1x128xi32>
    %20 = arith.addi %0, %19 : vector<1x128xi32>
    %c0_i32_4 = arith.constant 0 : i32
    %21 = vector.broadcast %c0_i32_4 : i32 to vector<1x128xi32>
    %22 = arith.cmpi sge, %20, %21 : vector<1x128xi32>
    %c-2_i32_5 = arith.constant -2 : i32
    %23 = vector.broadcast %c-2_i32_5 : i32 to vector<1x128xi32>
    %24 = arith.addi %0, %23 : vector<1x128xi32>
    %c128_i32_6 = arith.constant 128 : i32
    %25 = vector.broadcast %c128_i32_6 : i32 to vector<1x128xi32>
    %26 = arith.cmpi slt, %24, %25 : vector<1x128xi32>
    %27 = arith.andi %22, %26 : vector<1x128xi1>
    %c2_i32 = arith.constant 2 : i32
    %28 = vector.broadcast %c2_i32 : i32 to vector<1x128xi32>
    %29 = arith.addi %0, %28 : vector<1x128xi32>
    %c0_i32_7 = arith.constant 0 : i32
    %30 = vector.broadcast %c0_i32_7 : i32 to vector<1x128xi32>
    %31 = arith.cmpi sge, %29, %30 : vector<1x128xi32>
    %c2_i32_8 = arith.constant 2 : i32
    %32 = vector.broadcast %c2_i32_8 : i32 to vector<1x128xi32>
    %33 = arith.addi %0, %32 : vector<1x128xi32>
    %c128_i32_9 = arith.constant 128 : i32
    %34 = vector.broadcast %c128_i32_9 : i32 to vector<1x128xi32>
    %35 = arith.cmpi slt, %33, %34 : vector<1x128xi32>
    %36 = arith.andi %31, %35 : vector<1x128xi1>
    %c-4_i32 = arith.constant -4 : i32
    %37 = vector.broadcast %c-4_i32 : i32 to vector<1x128xi32>
    %38 = arith.addi %0, %37 : vector<1x128xi32>
    %c0_i32_10 = arith.constant 0 : i32
    %39 = vector.broadcast %c0_i32_10 : i32 to vector<1x128xi32>
    %40 = arith.cmpi sge, %38, %39 : vector<1x128xi32>
    %c-4_i32_11 = arith.constant -4 : i32
    %41 = vector.broadcast %c-4_i32_11 : i32 to vector<1x128xi32>
    %42 = arith.addi %0, %41 : vector<1x128xi32>
    %c128_i32_12 = arith.constant 128 : i32
    %43 = vector.broadcast %c128_i32_12 : i32 to vector<1x128xi32>
    %44 = arith.cmpi slt, %42, %43 : vector<1x128xi32>
    %45 = arith.andi %40, %44 : vector<1x128xi1>
    %c4_i32 = arith.constant 4 : i32
    %46 = vector.broadcast %c4_i32 : i32 to vector<1x128xi32>
    %47 = arith.addi %0, %46 : vector<1x128xi32>
    %c0_i32_13 = arith.constant 0 : i32
    %48 = vector.broadcast %c0_i32_13 : i32 to vector<1x128xi32>
    %49 = arith.cmpi sge, %47, %48 : vector<1x128xi32>
    %c4_i32_14 = arith.constant 4 : i32
    %50 = vector.broadcast %c4_i32_14 : i32 to vector<1x128xi32>
    %51 = arith.addi %0, %50 : vector<1x128xi32>
    %c128_i32_15 = arith.constant 128 : i32
    %52 = vector.broadcast %c128_i32_15 : i32 to vector<1x128xi32>
    %53 = arith.cmpi slt, %51, %52 : vector<1x128xi32>
    %54 = arith.andi %49, %53 : vector<1x128xi1>
    %c0 = arith.constant 0 : index
    %c0_16 = arith.constant 0 : index
    %c0_17 = arith.constant 0 : index
    %55 = vector.load %arg2[%c0, %c0_16, %c0_17] : memref<1x64x128xf32, #tpu.memory_space<vmem>>, vector<1x64x128xf32>
    %56 = vector.shape_cast %55 : vector<1x64x128xf32> to vector<64x128xf32>
    %57 = vector.shape_cast %56 : vector<64x128xf32> to vector<1x64x128xf32>
    %cst = arith.constant dense<0.000000e+00> : vector<1xf32>
    %58 = vector.multi_reduction <add>, %57, %cst [1, 2] : vector<1x64x128xf32> to vector<1xf32>
    %59 = vector.shape_cast %58 : vector<1xf32> to vector<1x1x1xf32>
    %60 = vector.extract %59[0, 0, 0] : f32 from vector<1x1x1xf32>
    %61 = vector.broadcast %60 : f32 to vector<1x1xf32>
    %cst_18 = arith.constant 1.22070313E-4 : f32
    %62 = vector.broadcast %cst_18 : f32 to vector<1x1xf32>
    %63 = arith.mulf %61, %62 : vector<1x1xf32>
    %64 = arith.mulf %56, %56 : vector<64x128xf32>
    %65 = vector.shape_cast %64 : vector<64x128xf32> to vector<1x64x128xf32>
    %cst_19 = arith.constant dense<0.000000e+00> : vector<1xf32>
    %66 = vector.multi_reduction <add>, %65, %cst_19 [1, 2] : vector<1x64x128xf32> to vector<1xf32>
    %67 = vector.shape_cast %66 : vector<1xf32> to vector<1x1x1xf32>
    %68 = vector.extract %67[0, 0, 0] : f32 from vector<1x1x1xf32>
    %69 = vector.broadcast %68 : f32 to vector<1x1xf32>
    %cst_20 = arith.constant 1.22070313E-4 : f32
    %70 = vector.broadcast %cst_20 : f32 to vector<1x1xf32>
    %71 = arith.mulf %69, %70 : vector<1x1xf32>
    %72 = arith.mulf %63, %63 : vector<1x1xf32>
    %73 = arith.subf %71, %72 : vector<1x1xf32>
    %cst_21 = arith.constant 0.000000e+00 : f32
    %74 = vector.broadcast %cst_21 : f32 to vector<1x1xf32>
    %75 = arith.maximumf %73, %74 : vector<1x1xf32>
    %76 = vector.broadcast %63 : vector<1x1xf32> to vector<64x128xf32>
    %77 = arith.subf %56, %76 : vector<64x128xf32>
    %cst_22 = arith.constant 9.99999993E-9 : f32
    %78 = vector.broadcast %cst_22 : f32 to vector<1x1xf32>
    %79 = arith.addf %75, %78 : vector<1x1xf32>
    %80 = math.rsqrt %79 : vector<1x1xf32>
    %81 = vector.broadcast %80 : vector<1x1xf32> to vector<64x128xf32>
    %82 = arith.mulf %77, %81 : vector<64x128xf32>
    %c0_23 = arith.constant 0 : index
    %c0_24 = arith.constant 0 : index
    %83 = vector.load %arg3[%c0_23, %c0_24] : memref<32x64xf32, #tpu.memory_space<vmem>>, vector<32x64xf32>
    %c0_25 = arith.constant 0 : index
    %c0_26 = arith.constant 0 : index
    %84 = vector.load %arg4[%c0_25, %c0_26] : memref<32x1xf32, #tpu.memory_space<vmem>>, vector<32x1xf32>
    %cst_27 = arith.constant dense<0.000000e+00> : vector<32x128xf32>
    %85 = tpu.matmul %83, %82, %cst_27 {dimension_numbers = #tpu.dot_dimension_numbers<[1], [0], [0], [1], [0, 0, 1, 1], [], []>} : vector<32x64xf32>, vector<64x128xf32>, vector<32x128xf32> -> vector<32x128xf32>
    %86 = vector.broadcast %84 : vector<32x1xf32> to vector<32x128xf32>
    %87 = arith.addf %85, %86 : vector<32x128xf32>
    %cst_28 = arith.constant 0.000000e+00 : f32
    %88 = vector.broadcast %cst_28 : f32 to vector<32x128xf32>
    %c0_29 = arith.constant 0 : index
    %c0_30 = arith.constant 0 : index
    %c0_31 = arith.constant 0 : index
    %89 = vector.load %arg5[%c0_29, %c0_30, %c0_31] : memref<6x64x32xf32, #tpu.memory_space<vmem>>, vector<1x64x32xf32>
    %90 = vector.shape_cast %89 : vector<1x64x32xf32> to vector<64x32xf32>
    %c0_32 = arith.constant 0 : index
    %c0_33 = arith.constant 0 : index
    %c0_34 = arith.constant 0 : index
    %91 = vector.load %arg6[%c0_32, %c0_33, %c0_34] : memref<6x64x1xf32, #tpu.memory_space<vmem>>, vector<1x64x1xf32>
    %92 = vector.shape_cast %91 : vector<1x64x1xf32> to vector<64x1xf32>
    %cst_35 = arith.constant dense<0.000000e+00> : vector<64x128xf32>
    %93 = tpu.matmul %90, %87, %cst_35 {dimension_numbers = #tpu.dot_dimension_numbers<[1], [0], [0], [1], [0, 0, 1, 1], [], []>} : vector<64x32xf32>, vector<32x128xf32>, vector<64x128xf32> -> vector<64x128xf32>
    %94 = vector.broadcast %92 : vector<64x1xf32> to vector<64x128xf32>
    %95 = arith.addf %93, %94 : vector<64x128xf32>
    %c0_36 = arith.constant 0 : index
    %96 = memref.load %arg1[%c0_36] : memref<13xf32, #tpu.memory_space<smem>>
    %cst_37 = arith.constant 0.000000e+00 : f32
    %97 = vector.broadcast %cst_37 : f32 to vector<64x128xf32>
    %98 = arith.cmpf oge, %95, %97 : vector<64x128xf32>
    %99 = vector.broadcast %96 : f32 to vector<64x128xf32>
    %100 = arith.mulf %99, %95 : vector<64x128xf32>
    %101 = arith.select %98, %95, %100 : vector<64x128xi1>, vector<64x128xf32>
    %102 = vector.shape_cast %101 : vector<64x128xf32> to vector<1x64x128xf32>
    %cst_38 = arith.constant dense<0.000000e+00> : vector<1xf32>
    %103 = vector.multi_reduction <add>, %102, %cst_38 [1, 2] : vector<1x64x128xf32> to vector<1xf32>
    %104 = vector.shape_cast %103 : vector<1xf32> to vector<1x1x1xf32>
    %105 = vector.extract %104[0, 0, 0] : f32 from vector<1x1x1xf32>
    %106 = vector.broadcast %105 : f32 to vector<1x1xf32>
    %cst_39 = arith.constant 1.22070313E-4 : f32
    %107 = vector.broadcast %cst_39 : f32 to vector<1x1xf32>
    %108 = arith.mulf %106, %107 : vector<1x1xf32>
    %109 = arith.mulf %101, %101 : vector<64x128xf32>
    %110 = vector.shape_cast %109 : vector<64x128xf32> to vector<1x64x128xf32>
    %cst_40 = arith.constant dense<0.000000e+00> : vector<1xf32>
    %111 = vector.multi_reduction <add>, %110, %cst_40 [1, 2] : vector<1x64x128xf32> to vector<1xf32>
    %112 = vector.shape_cast %111 : vector<1xf32> to vector<1x1x1xf32>
    %113 = vector.extract %112[0, 0, 0] : f32 from vector<1x1x1xf32>
    %114 = vector.broadcast %113 : f32 to vector<1x1xf32>
    %cst_41 = arith.constant 1.22070313E-4 : f32
    %115 = vector.broadcast %cst_41 : f32 to vector<1x1xf32>
    %116 = arith.mulf %114, %115 : vector<1x1xf32>
    %117 = arith.mulf %108, %108 : vector<1x1xf32>
    %118 = arith.subf %116, %117 : vector<1x1xf32>
    %cst_42 = arith.constant 0.000000e+00 : f32
    %119 = vector.broadcast %cst_42 : f32 to vector<1x1xf32>
    %120 = arith.maximumf %118, %119 : vector<1x1xf32>
    %121 = vector.broadcast %108 : vector<1x1xf32> to vector<64x128xf32>
    %122 = arith.subf %101, %121 : vector<64x128xf32>
    %cst_43 = arith.constant 9.99999993E-9 : f32
    %123 = vector.broadcast %cst_43 : f32 to vector<1x1xf32>
    %124 = arith.addf %120, %123 : vector<1x1xf32>
    %125 = math.rsqrt %124 : vector<1x1xf32>
    %126 = vector.broadcast %125 : vector<1x1xf32> to vector<64x128xf32>
    %127 = arith.mulf %122, %126 : vector<64x128xf32>
    %c0_44 = arith.constant 0 : index
    %c0_45 = arith.constant 0 : index
    %c0_46 = arith.constant 0 : index
    %128 = vector.load %arg7[%c0_44, %c0_45, %c0_46] : memref<6x64x1xf32, #tpu.memory_space<vmem>>, vector<1x64x1xf32>
    %129 = vector.shape_cast %128 : vector<1x64x1xf32> to vector<64x1xf32>
    %130 = vector.broadcast %129 : vector<64x1xf32> to vector<64x128xf32>
    %131 = arith.mulf %127, %130 : vector<64x128xf32>
    %c0_47 = arith.constant 0 : index
    %c0_48 = arith.constant 0 : index
    %c0_49 = arith.constant 0 : index
    %132 = vector.load %arg8[%c0_47, %c0_48, %c0_49] : memref<6x64x1xf32, #tpu.memory_space<vmem>>, vector<1x64x1xf32>
    %133 = vector.shape_cast %132 : vector<1x64x1xf32> to vector<64x1xf32>
    %134 = vector.broadcast %133 : vector<64x1xf32> to vector<64x128xf32>
    %135 = arith.addf %131, %134 : vector<64x128xf32>
    %c0_50 = arith.constant 0 : index
    %c0_51 = arith.constant 0 : index
    %c0_52 = arith.constant 0 : index
    %136 = vector.load %arg9[%c0_50, %c0_51, %c0_52] : memref<6x64x3xf32, #tpu.memory_space<vmem>>, vector<1x64x3xf32>
    %137 = vector.shape_cast %136 : vector<1x64x3xf32> to vector<64x3xf32>
    %c0_53 = arith.constant 0 : index
    %c0_54 = arith.constant 0 : index
    %c0_55 = arith.constant 0 : index
    %138 = vector.load %arg10[%c0_53, %c0_54, %c0_55] : memref<6x64x1xf32, #tpu.memory_space<vmem>>, vector<1x64x1xf32>
    %139 = vector.shape_cast %138 : vector<1x64x1xf32> to vector<64x1xf32>
    %c1_i32_56 = arith.constant 1 : i32
    %140 = tpu.dynamic_rotate %135 by %c1_i32_56 dim 1 : vector<64x128xf32>, i32 -> vector<64x128xf32>
    %141 = vector.extract_strided_slice %137 {offsets = [0, 0], sizes = [64, 1], strides = [1, 1]} : vector<64x3xf32> to vector<64x1xf32>
    %cst_57 = arith.constant 0.000000e+00 : f32
    %142 = vector.shape_cast %9 : vector<1x128xi1> to vector<1x128xi1>
    %143 = vector.broadcast %142 : vector<1x128xi1> to vector<64x128xi1>
    %144 = vector.broadcast %cst_57 : f32 to vector<64x128xf32>
    %145 = arith.select %143, %140, %144 : vector<64x128xi1>, vector<64x128xf32>
    %146 = vector.broadcast %141 : vector<64x1xf32> to vector<64x128xf32>
    %147 = arith.mulf %146, %145 : vector<64x128xf32>
    %148 = vector.extract_strided_slice %137 {offsets = [0, 1], sizes = [64, 1], strides = [1, 1]} : vector<64x3xf32> to vector<64x1xf32>
    %149 = vector.broadcast %148 : vector<64x1xf32> to vector<64x128xf32>
    %150 = arith.mulf %149, %135 : vector<64x128xf32>
    %151 = arith.addf %147, %150 : vector<64x128xf32>
    %c127_i32 = arith.constant 127 : i32
    %152 = tpu.dynamic_rotate %135 by %c127_i32 dim 1 : vector<64x128xf32>, i32 -> vector<64x128xf32>
    %153 = vector.extract_strided_slice %137 {offsets = [0, 2], sizes = [64, 1], strides = [1, 1]} : vector<64x3xf32> to vector<64x1xf32>
    %cst_58 = arith.constant 0.000000e+00 : f32
    %154 = vector.shape_cast %18 : vector<1x128xi1> to vector<1x128xi1>
    %155 = vector.broadcast %154 : vector<1x128xi1> to vector<64x128xi1>
    %156 = vector.broadcast %cst_58 : f32 to vector<64x128xf32>
    %157 = arith.select %155, %152, %156 : vector<64x128xi1>, vector<64x128xf32>
    %158 = vector.broadcast %153 : vector<64x1xf32> to vector<64x128xf32>
    %159 = arith.mulf %158, %157 : vector<64x128xf32>
    %160 = arith.addf %151, %159 : vector<64x128xf32>
    %161 = vector.broadcast %139 : vector<64x1xf32> to vector<64x128xf32>
    %162 = arith.addf %160, %161 : vector<64x128xf32>
    %c1 = arith.constant 1 : index
    %163 = memref.load %arg1[%c1] : memref<13xf32, #tpu.memory_space<smem>>
    %cst_59 = arith.constant 0.000000e+00 : f32
    %164 = vector.broadcast %cst_59 : f32 to vector<64x128xf32>
    %165 = arith.cmpf oge, %162, %164 : vector<64x128xf32>
    %166 = vector.broadcast %163 : f32 to vector<64x128xf32>
    %167 = arith.mulf %166, %162 : vector<64x128xf32>
    %168 = arith.select %165, %162, %167 : vector<64x128xi1>, vector<64x128xf32>
    %169 = vector.shape_cast %168 : vector<64x128xf32> to vector<1x64x128xf32>
    %cst_60 = arith.constant dense<0.000000e+00> : vector<1xf32>
    %170 = vector.multi_reduction <add>, %169, %cst_60 [1, 2] : vector<1x64x128xf32> to vector<1xf32>
    %171 = vector.shape_cast %170 : vector<1xf32> to vector<1x1x1xf32>
    %172 = vector.extract %171[0, 0, 0] : f32 from vector<1x1x1xf32>
    %173 = vector.broadcast %172 : f32 to vector<1x1xf32>
    %cst_61 = arith.constant 1.22070313E-4 : f32
    %174 = vector.broadcast %cst_61 : f32 to vector<1x1xf32>
    %175 = arith.mulf %173, %174 : vector<1x1xf32>
    %176 = arith.mulf %168, %168 : vector<64x128xf32>
    %177 = vector.shape_cast %176 : vector<64x128xf32> to vector<1x64x128xf32>
    %cst_62 = arith.constant dense<0.000000e+00> : vector<1xf32>
    %178 = vector.multi_reduction <add>, %177, %cst_62 [1, 2] : vector<1x64x128xf32> to vector<1xf32>
    %179 = vector.shape_cast %178 : vector<1xf32> to vector<1x1x1xf32>
    %180 = vector.extract %179[0, 0, 0] : f32 from vector<1x1x1xf32>
    %181 = vector.broadcast %180 : f32 to vector<1x1xf32>
    %cst_63 = arith.constant 1.22070313E-4 : f32
    %182 = vector.broadcast %cst_63 : f32 to vector<1x1xf32>
    %183 = arith.mulf %181, %182 : vector<1x1xf32>
    %184 = arith.mulf %175, %175 : vector<1x1xf32>
    %185 = arith.subf %183, %184 : vector<1x1xf32>
    %cst_64 = arith.constant 0.000000e+00 : f32
    %186 = vector.broadcast %cst_64 : f32 to vector<1x1xf32>
    %187 = arith.maximumf %185, %186 : vector<1x1xf32>
    %188 = vector.broadcast %175 : vector<1x1xf32> to vector<64x128xf32>
    %189 = arith.subf %168, %188 : vector<64x128xf32>
    %cst_65 = arith.constant 9.99999993E-9 : f32
    %190 = vector.broadcast %cst_65 : f32 to vector<1x1xf32>
    %191 = arith.addf %187, %190 : vector<1x1xf32>
    %192 = math.rsqrt %191 : vector<1x1xf32>
    %193 = vector.broadcast %192 : vector<1x1xf32> to vector<64x128xf32>
    %194 = arith.mulf %189, %193 : vector<64x128xf32>
    %c0_66 = arith.constant 0 : index
    %c0_67 = arith.constant 0 : index
    %c0_68 = arith.constant 0 : index
    %195 = vector.load %arg11[%c0_66, %c0_67, %c0_68] : memref<5x64x64xf32, #tpu.memory_space<vmem>>, vector<1x64x64xf32>
    %196 = vector.shape_cast %195 : vector<1x64x64xf32> to vector<64x64xf32>
    %c0_69 = arith.constant 0 : index
    %c0_70 = arith.constant 0 : index
    %c0_71 = arith.constant 0 : index
    %197 = vector.load %arg12[%c0_69, %c0_70, %c0_71] : memref<5x64x1xf32, #tpu.memory_space<vmem>>, vector<1x64x1xf32>
    %198 = vector.shape_cast %197 : vector<1x64x1xf32> to vector<64x1xf32>
    %cst_72 = arith.constant dense<0.000000e+00> : vector<64x128xf32>
    %199 = tpu.matmul %196, %194, %cst_72 {dimension_numbers = #tpu.dot_dimension_numbers<[1], [0], [0], [1], [0, 0, 1, 1], [], []>} : vector<64x64xf32>, vector<64x128xf32>, vector<64x128xf32> -> vector<64x128xf32>
    %200 = vector.broadcast %198 : vector<64x1xf32> to vector<64x128xf32>
    %201 = arith.addf %199, %200 : vector<64x128xf32>
    %202 = vector.extract_strided_slice %201 {offsets = [0, 0], sizes = [32, 128], strides = [1, 1]} : vector<64x128xf32> to vector<32x128xf32>
    %203 = arith.addf %87, %202 : vector<32x128xf32>
    %204 = vector.extract_strided_slice %201 {offsets = [32, 0], sizes = [32, 128], strides = [1, 1]} : vector<64x128xf32> to vector<32x128xf32>
    %205 = arith.addf %88, %204 : vector<32x128xf32>
    %c1_73 = arith.constant 1 : index
    %c0_74 = arith.constant 0 : index
    %c0_75 = arith.constant 0 : index
    %206 = vector.load %arg5[%c1_73, %c0_74, %c0_75] : memref<6x64x32xf32, #tpu.memory_space<vmem>>, vector<1x64x32xf32>
    %207 = vector.shape_cast %206 : vector<1x64x32xf32> to vector<64x32xf32>
    %c1_76 = arith.constant 1 : index
    %c0_77 = arith.constant 0 : index
    %c0_78 = arith.constant 0 : index
    %208 = vector.load %arg6[%c1_76, %c0_77, %c0_78] : memref<6x64x1xf32, #tpu.memory_space<vmem>>, vector<1x64x1xf32>
    %209 = vector.shape_cast %208 : vector<1x64x1xf32> to vector<64x1xf32>
    %cst_79 = arith.constant dense<0.000000e+00> : vector<64x128xf32>
    %210 = tpu.matmul %207, %203, %cst_79 {dimension_numbers = #tpu.dot_dimension_numbers<[1], [0], [0], [1], [0, 0, 1, 1], [], []>} : vector<64x32xf32>, vector<32x128xf32>, vector<64x128xf32> -> vector<64x128xf32>
    %211 = vector.broadcast %209 : vector<64x1xf32> to vector<64x128xf32>
    %212 = arith.addf %210, %211 : vector<64x128xf32>
    %c2 = arith.constant 2 : index
    %213 = memref.load %arg1[%c2] : memref<13xf32, #tpu.memory_space<smem>>
    %cst_80 = arith.constant 0.000000e+00 : f32
    %214 = vector.broadcast %cst_80 : f32 to vector<64x128xf32>
    %215 = arith.cmpf oge, %212, %214 : vector<64x128xf32>
    %216 = vector.broadcast %213 : f32 to vector<64x128xf32>
    %217 = arith.mulf %216, %212 : vector<64x128xf32>
    %218 = arith.select %215, %212, %217 : vector<64x128xi1>, vector<64x128xf32>
    %219 = vector.shape_cast %218 : vector<64x128xf32> to vector<1x64x128xf32>
    %cst_81 = arith.constant dense<0.000000e+00> : vector<1xf32>
    %220 = vector.multi_reduction <add>, %219, %cst_81 [1, 2] : vector<1x64x128xf32> to vector<1xf32>
    %221 = vector.shape_cast %220 : vector<1xf32> to vector<1x1x1xf32>
    %222 = vector.extract %221[0, 0, 0] : f32 from vector<1x1x1xf32>
    %223 = vector.broadcast %222 : f32 to vector<1x1xf32>
    %cst_82 = arith.constant 1.22070313E-4 : f32
    %224 = vector.broadcast %cst_82 : f32 to vector<1x1xf32>
    %225 = arith.mulf %223, %224 : vector<1x1xf32>
    %226 = arith.mulf %218, %218 : vector<64x128xf32>
    %227 = vector.shape_cast %226 : vector<64x128xf32> to vector<1x64x128xf32>
    %cst_83 = arith.constant dense<0.000000e+00> : vector<1xf32>
    %228 = vector.multi_reduction <add>, %227, %cst_83 [1, 2] : vector<1x64x128xf32> to vector<1xf32>
    %229 = vector.shape_cast %228 : vector<1xf32> to vector<1x1x1xf32>
    %230 = vector.extract %229[0, 0, 0] : f32 from vector<1x1x1xf32>
    %231 = vector.broadcast %230 : f32 to vector<1x1xf32>
    %cst_84 = arith.constant 1.22070313E-4 : f32
    %232 = vector.broadcast %cst_84 : f32 to vector<1x1xf32>
    %233 = arith.mulf %231, %232 : vector<1x1xf32>
    %234 = arith.mulf %225, %225 : vector<1x1xf32>
    %235 = arith.subf %233, %234 : vector<1x1xf32>
    %cst_85 = arith.constant 0.000000e+00 : f32
    %236 = vector.broadcast %cst_85 : f32 to vector<1x1xf32>
    %237 = arith.maximumf %235, %236 : vector<1x1xf32>
    %238 = vector.broadcast %225 : vector<1x1xf32> to vector<64x128xf32>
    %239 = arith.subf %218, %238 : vector<64x128xf32>
    %cst_86 = arith.constant 9.99999993E-9 : f32
    %240 = vector.broadcast %cst_86 : f32 to vector<1x1xf32>
    %241 = arith.addf %237, %240 : vector<1x1xf32>
    %242 = math.rsqrt %241 : vector<1x1xf32>
    %243 = vector.broadcast %242 : vector<1x1xf32> to vector<64x128xf32>
    %244 = arith.mulf %239, %243 : vector<64x128xf32>
    %c1_87 = arith.constant 1 : index
    %c0_88 = arith.constant 0 : index
    %c0_89 = arith.constant 0 : index
    %245 = vector.load %arg7[%c1_87, %c0_88, %c0_89] : memref<6x64x1xf32, #tpu.memory_space<vmem>>, vector<1x64x1xf32>
    %246 = vector.shape_cast %245 : vector<1x64x1xf32> to vector<64x1xf32>
    %247 = vector.broadcast %246 : vector<64x1xf32> to vector<64x128xf32>
    %248 = arith.mulf %244, %247 : vector<64x128xf32>
    %c1_90 = arith.constant 1 : index
    %c0_91 = arith.constant 0 : index
    %c0_92 = arith.constant 0 : index
    %249 = vector.load %arg8[%c1_90, %c0_91, %c0_92] : memref<6x64x1xf32, #tpu.memory_space<vmem>>, vector<1x64x1xf32>
    %250 = vector.shape_cast %249 : vector<1x64x1xf32> to vector<64x1xf32>
    %251 = vector.broadcast %250 : vector<64x1xf32> to vector<64x128xf32>
    %252 = arith.addf %248, %251 : vector<64x128xf32>
    %c1_93 = arith.constant 1 : index
    %c0_94 = arith.constant 0 : index
    %c0_95 = arith.constant 0 : index
    %253 = vector.load %arg9[%c1_93, %c0_94, %c0_95] : memref<6x64x3xf32, #tpu.memory_space<vmem>>, vector<1x64x3xf32>
    %254 = vector.shape_cast %253 : vector<1x64x3xf32> to vector<64x3xf32>
    %c1_96 = arith.constant 1 : index
    %c0_97 = arith.constant 0 : index
    %c0_98 = arith.constant 0 : index
    %255 = vector.load %arg10[%c1_96, %c0_97, %c0_98] : memref<6x64x1xf32, #tpu.memory_space<vmem>>, vector<1x64x1xf32>
    %256 = vector.shape_cast %255 : vector<1x64x1xf32> to vector<64x1xf32>
    %c2_i32_99 = arith.constant 2 : i32
    %257 = tpu.dynamic_rotate %252 by %c2_i32_99 dim 1 : vector<64x128xf32>, i32 -> vector<64x128xf32>
    %258 = vector.extract_strided_slice %254 {offsets = [0, 0], sizes = [64, 1], strides = [1, 1]} : vector<64x3xf32> to vector<64x1xf32>
    %cst_100 = arith.constant 0.000000e+00 : f32
    %259 = vector.shape_cast %27 : vector<1x128xi1> to vector<1x128xi1>
    %260 = vector.broadcast %259 : vector<1x128xi1> to vector<64x128xi1>
    %261 = vector.broadcast %cst_100 : f32 to vector<64x128xf32>
    %262 = arith.select %260, %257, %261 : vector<64x128xi1>, vector<64x128xf32>
    %263 = vector.broadcast %258 : vector<64x1xf32> to vector<64x128xf32>
    %264 = arith.mulf %263, %262 : vector<64x128xf32>
    %265 = vector.extract_strided_slice %254 {offsets = [0, 1], sizes = [64, 1], strides = [1, 1]} : vector<64x3xf32> to vector<64x1xf32>
    %266 = vector.broadcast %265 : vector<64x1xf32> to vector<64x128xf32>
    %267 = arith.mulf %266, %252 : vector<64x128xf32>
    %268 = arith.addf %264, %267 : vector<64x128xf32>
    %c126_i32 = arith.constant 126 : i32
    %269 = tpu.dynamic_rotate %252 by %c126_i32 dim 1 : vector<64x128xf32>, i32 -> vector<64x128xf32>
    %270 = vector.extract_strided_slice %254 {offsets = [0, 2], sizes = [64, 1], strides = [1, 1]} : vector<64x3xf32> to vector<64x1xf32>
    %cst_101 = arith.constant 0.000000e+00 : f32
    %271 = vector.shape_cast %36 : vector<1x128xi1> to vector<1x128xi1>
    %272 = vector.broadcast %271 : vector<1x128xi1> to vector<64x128xi1>
    %273 = vector.broadcast %cst_101 : f32 to vector<64x128xf32>
    %274 = arith.select %272, %269, %273 : vector<64x128xi1>, vector<64x128xf32>
    %275 = vector.broadcast %270 : vector<64x1xf32> to vector<64x128xf32>
    %276 = arith.mulf %275, %274 : vector<64x128xf32>
    %277 = arith.addf %268, %276 : vector<64x128xf32>
    %278 = vector.broadcast %256 : vector<64x1xf32> to vector<64x128xf32>
    %279 = arith.addf %277, %278 : vector<64x128xf32>
    %c3 = arith.constant 3 : index
    %280 = memref.load %arg1[%c3] : memref<13xf32, #tpu.memory_space<smem>>
    %cst_102 = arith.constant 0.000000e+00 : f32
    %281 = vector.broadcast %cst_102 : f32 to vector<64x128xf32>
    %282 = arith.cmpf oge, %279, %281 : vector<64x128xf32>
    %283 = vector.broadcast %280 : f32 to vector<64x128xf32>
    %284 = arith.mulf %283, %279 : vector<64x128xf32>
    %285 = arith.select %282, %279, %284 : vector<64x128xi1>, vector<64x128xf32>
    %286 = vector.shape_cast %285 : vector<64x128xf32> to vector<1x64x128xf32>
    %cst_103 = arith.constant dense<0.000000e+00> : vector<1xf32>
    %287 = vector.multi_reduction <add>, %286, %cst_103 [1, 2] : vector<1x64x128xf32> to vector<1xf32>
    %288 = vector.shape_cast %287 : vector<1xf32> to vector<1x1x1xf32>
    %289 = vector.extract %288[0, 0, 0] : f32 from vector<1x1x1xf32>
    %290 = vector.broadcast %289 : f32 to vector<1x1xf32>
    %cst_104 = arith.constant 1.22070313E-4 : f32
    %291 = vector.broadcast %cst_104 : f32 to vector<1x1xf32>
    %292 = arith.mulf %290, %291 : vector<1x1xf32>
    %293 = arith.mulf %285, %285 : vector<64x128xf32>
    %294 = vector.shape_cast %293 : vector<64x128xf32> to vector<1x64x128xf32>
    %cst_105 = arith.constant dense<0.000000e+00> : vector<1xf32>
    %295 = vector.multi_reduction <add>, %294, %cst_105 [1, 2] : vector<1x64x128xf32> to vector<1xf32>
    %296 = vector.shape_cast %295 : vector<1xf32> to vector<1x1x1xf32>
    %297 = vector.extract %296[0, 0, 0] : f32 from vector<1x1x1xf32>
    %298 = vector.broadcast %297 : f32 to vector<1x1xf32>
    %cst_106 = arith.constant 1.22070313E-4 : f32
    %299 = vector.broadcast %cst_106 : f32 to vector<1x1xf32>
    %300 = arith.mulf %298, %299 : vector<1x1xf32>
    %301 = arith.mulf %292, %292 : vector<1x1xf32>
    %302 = arith.subf %300, %301 : vector<1x1xf32>
    %cst_107 = arith.constant 0.000000e+00 : f32
    %303 = vector.broadcast %cst_107 : f32 to vector<1x1xf32>
    %304 = arith.maximumf %302, %303 : vector<1x1xf32>
    %305 = vector.broadcast %292 : vector<1x1xf32> to vector<64x128xf32>
    %306 = arith.subf %285, %305 : vector<64x128xf32>
    %cst_108 = arith.constant 9.99999993E-9 : f32
    %307 = vector.broadcast %cst_108 : f32 to vector<1x1xf32>
    %308 = arith.addf %304, %307 : vector<1x1xf32>
    %309 = math.rsqrt %308 : vector<1x1xf32>
    %310 = vector.broadcast %309 : vector<1x1xf32> to vector<64x128xf32>
    %311 = arith.mulf %306, %310 : vector<64x128xf32>
    %c1_109 = arith.constant 1 : index
    %c0_110 = arith.constant 0 : index
    %c0_111 = arith.constant 0 : index
    %312 = vector.load %arg11[%c1_109, %c0_110, %c0_111] : memref<5x64x64xf32, #tpu.memory_space<vmem>>, vector<1x64x64xf32>
    %313 = vector.shape_cast %312 : vector<1x64x64xf32> to vector<64x64xf32>
    %c1_112 = arith.constant 1 : index
    %c0_113 = arith.constant 0 : index
    %c0_114 = arith.constant 0 : index
    %314 = vector.load %arg12[%c1_112, %c0_113, %c0_114] : memref<5x64x1xf32, #tpu.memory_space<vmem>>, vector<1x64x1xf32>
    %315 = vector.shape_cast %314 : vector<1x64x1xf32> to vector<64x1xf32>
    %cst_115 = arith.constant dense<0.000000e+00> : vector<64x128xf32>
    %316 = tpu.matmul %313, %311, %cst_115 {dimension_numbers = #tpu.dot_dimension_numbers<[1], [0], [0], [1], [0, 0, 1, 1], [], []>} : vector<64x64xf32>, vector<64x128xf32>, vector<64x128xf32> -> vector<64x128xf32>
    %317 = vector.broadcast %315 : vector<64x1xf32> to vector<64x128xf32>
    %318 = arith.addf %316, %317 : vector<64x128xf32>
    %319 = vector.extract_strided_slice %318 {offsets = [0, 0], sizes = [32, 128], strides = [1, 1]} : vector<64x128xf32> to vector<32x128xf32>
    %320 = arith.addf %203, %319 : vector<32x128xf32>
    %321 = vector.extract_strided_slice %318 {offsets = [32, 0], sizes = [32, 128], strides = [1, 1]} : vector<64x128xf32> to vector<32x128xf32>
    %322 = arith.addf %205, %321 : vector<32x128xf32>
    %c2_116 = arith.constant 2 : index
    %c0_117 = arith.constant 0 : index
    %c0_118 = arith.constant 0 : index
    %323 = vector.load %arg5[%c2_116, %c0_117, %c0_118] : memref<6x64x32xf32, #tpu.memory_space<vmem>>, vector<1x64x32xf32>
    %324 = vector.shape_cast %323 : vector<1x64x32xf32> to vector<64x32xf32>
    %c2_119 = arith.constant 2 : index
    %c0_120 = arith.constant 0 : index
    %c0_121 = arith.constant 0 : index
    %325 = vector.load %arg6[%c2_119, %c0_120, %c0_121] : memref<6x64x1xf32, #tpu.memory_space<vmem>>, vector<1x64x1xf32>
    %326 = vector.shape_cast %325 : vector<1x64x1xf32> to vector<64x1xf32>
    %cst_122 = arith.constant dense<0.000000e+00> : vector<64x128xf32>
    %327 = tpu.matmul %324, %320, %cst_122 {dimension_numbers = #tpu.dot_dimension_numbers<[1], [0], [0], [1], [0, 0, 1, 1], [], []>} : vector<64x32xf32>, vector<32x128xf32>, vector<64x128xf32> -> vector<64x128xf32>
    %328 = vector.broadcast %326 : vector<64x1xf32> to vector<64x128xf32>
    %329 = arith.addf %327, %328 : vector<64x128xf32>
    %c4 = arith.constant 4 : index
    %330 = memref.load %arg1[%c4] : memref<13xf32, #tpu.memory_space<smem>>
    %cst_123 = arith.constant 0.000000e+00 : f32
    %331 = vector.broadcast %cst_123 : f32 to vector<64x128xf32>
    %332 = arith.cmpf oge, %329, %331 : vector<64x128xf32>
    %333 = vector.broadcast %330 : f32 to vector<64x128xf32>
    %334 = arith.mulf %333, %329 : vector<64x128xf32>
    %335 = arith.select %332, %329, %334 : vector<64x128xi1>, vector<64x128xf32>
    %336 = vector.shape_cast %335 : vector<64x128xf32> to vector<1x64x128xf32>
    %cst_124 = arith.constant dense<0.000000e+00> : vector<1xf32>
    %337 = vector.multi_reduction <add>, %336, %cst_124 [1, 2] : vector<1x64x128xf32> to vector<1xf32>
    %338 = vector.shape_cast %337 : vector<1xf32> to vector<1x1x1xf32>
    %339 = vector.extract %338[0, 0, 0] : f32 from vector<1x1x1xf32>
    %340 = vector.broadcast %339 : f32 to vector<1x1xf32>
    %cst_125 = arith.constant 1.22070313E-4 : f32
    %341 = vector.broadcast %cst_125 : f32 to vector<1x1xf32>
    %342 = arith.mulf %340, %341 : vector<1x1xf32>
    %343 = arith.mulf %335, %335 : vector<64x128xf32>
    %344 = vector.shape_cast %343 : vector<64x128xf32> to vector<1x64x128xf32>
    %cst_126 = arith.constant dense<0.000000e+00> : vector<1xf32>
    %345 = vector.multi_reduction <add>, %344, %cst_126 [1, 2] : vector<1x64x128xf32> to vector<1xf32>
    %346 = vector.shape_cast %345 : vector<1xf32> to vector<1x1x1xf32>
    %347 = vector.extract %346[0, 0, 0] : f32 from vector<1x1x1xf32>
    %348 = vector.broadcast %347 : f32 to vector<1x1xf32>
    %cst_127 = arith.constant 1.22070313E-4 : f32
    %349 = vector.broadcast %cst_127 : f32 to vector<1x1xf32>
    %350 = arith.mulf %348, %349 : vector<1x1xf32>
    %351 = arith.mulf %342, %342 : vector<1x1xf32>
    %352 = arith.subf %350, %351 : vector<1x1xf32>
    %cst_128 = arith.constant 0.000000e+00 : f32
    %353 = vector.broadcast %cst_128 : f32 to vector<1x1xf32>
    %354 = arith.maximumf %352, %353 : vector<1x1xf32>
    %355 = vector.broadcast %342 : vector<1x1xf32> to vector<64x128xf32>
    %356 = arith.subf %335, %355 : vector<64x128xf32>
    %cst_129 = arith.constant 9.99999993E-9 : f32
    %357 = vector.broadcast %cst_129 : f32 to vector<1x1xf32>
    %358 = arith.addf %354, %357 : vector<1x1xf32>
    %359 = math.rsqrt %358 : vector<1x1xf32>
    %360 = vector.broadcast %359 : vector<1x1xf32> to vector<64x128xf32>
    %361 = arith.mulf %356, %360 : vector<64x128xf32>
    %c2_130 = arith.constant 2 : index
    %c0_131 = arith.constant 0 : index
    %c0_132 = arith.constant 0 : index
    %362 = vector.load %arg7[%c2_130, %c0_131, %c0_132] : memref<6x64x1xf32, #tpu.memory_space<vmem>>, vector<1x64x1xf32>
    %363 = vector.shape_cast %362 : vector<1x64x1xf32> to vector<64x1xf32>
    %364 = vector.broadcast %363 : vector<64x1xf32> to vector<64x128xf32>
    %365 = arith.mulf %361, %364 : vector<64x128xf32>
    %c2_133 = arith.constant 2 : index
    %c0_134 = arith.constant 0 : index
    %c0_135 = arith.constant 0 : index
    %366 = vector.load %arg8[%c2_133, %c0_134, %c0_135] : memref<6x64x1xf32, #tpu.memory_space<vmem>>, vector<1x64x1xf32>
    %367 = vector.shape_cast %366 : vector<1x64x1xf32> to vector<64x1xf32>
    %368 = vector.broadcast %367 : vector<64x1xf32> to vector<64x128xf32>
    %369 = arith.addf %365, %368 : vector<64x128xf32>
    %c2_136 = arith.constant 2 : index
    %c0_137 = arith.constant 0 : index
    %c0_138 = arith.constant 0 : index
    %370 = vector.load %arg9[%c2_136, %c0_137, %c0_138] : memref<6x64x3xf32, #tpu.memory_space<vmem>>, vector<1x64x3xf32>
    %371 = vector.shape_cast %370 : vector<1x64x3xf32> to vector<64x3xf32>
    %c2_139 = arith.constant 2 : index
    %c0_140 = arith.constant 0 : index
    %c0_141 = arith.constant 0 : index
    %372 = vector.load %arg10[%c2_139, %c0_140, %c0_141] : memref<6x64x1xf32, #tpu.memory_space<vmem>>, vector<1x64x1xf32>
    %373 = vector.shape_cast %372 : vector<1x64x1xf32> to vector<64x1xf32>
    %c4_i32_142 = arith.constant 4 : i32
    %374 = tpu.dynamic_rotate %369 by %c4_i32_142 dim 1 : vector<64x128xf32>, i32 -> vector<64x128xf32>
    %375 = vector.extract_strided_slice %371 {offsets = [0, 0], sizes = [64, 1], strides = [1, 1]} : vector<64x3xf32> to vector<64x1xf32>
    %cst_143 = arith.constant 0.000000e+00 : f32
    %376 = vector.shape_cast %45 : vector<1x128xi1> to vector<1x128xi1>
    %377 = vector.broadcast %376 : vector<1x128xi1> to vector<64x128xi1>
    %378 = vector.broadcast %cst_143 : f32 to vector<64x128xf32>
    %379 = arith.select %377, %374, %378 : vector<64x128xi1>, vector<64x128xf32>
    %380 = vector.broadcast %375 : vector<64x1xf32> to vector<64x128xf32>
    %381 = arith.mulf %380, %379 : vector<64x128xf32>
    %382 = vector.extract_strided_slice %371 {offsets = [0, 1], sizes = [64, 1], strides = [1, 1]} : vector<64x3xf32> to vector<64x1xf32>
    %383 = vector.broadcast %382 : vector<64x1xf32> to vector<64x128xf32>
    %384 = arith.mulf %383, %369 : vector<64x128xf32>
    %385 = arith.addf %381, %384 : vector<64x128xf32>
    %c124_i32 = arith.constant 124 : i32
    %386 = tpu.dynamic_rotate %369 by %c124_i32 dim 1 : vector<64x128xf32>, i32 -> vector<64x128xf32>
    %387 = vector.extract_strided_slice %371 {offsets = [0, 2], sizes = [64, 1], strides = [1, 1]} : vector<64x3xf32> to vector<64x1xf32>
    %cst_144 = arith.constant 0.000000e+00 : f32
    %388 = vector.shape_cast %54 : vector<1x128xi1> to vector<1x128xi1>
    %389 = vector.broadcast %388 : vector<1x128xi1> to vector<64x128xi1>
    %390 = vector.broadcast %cst_144 : f32 to vector<64x128xf32>
    %391 = arith.select %389, %386, %390 : vector<64x128xi1>, vector<64x128xf32>
    %392 = vector.broadcast %387 : vector<64x1xf32> to vector<64x128xf32>
    %393 = arith.mulf %392, %391 : vector<64x128xf32>
    %394 = arith.addf %385, %393 : vector<64x128xf32>
    %395 = vector.broadcast %373 : vector<64x1xf32> to vector<64x128xf32>
    %396 = arith.addf %394, %395 : vector<64x128xf32>
    %c5 = arith.constant 5 : index
    %397 = memref.load %arg1[%c5] : memref<13xf32, #tpu.memory_space<smem>>
    %cst_145 = arith.constant 0.000000e+00 : f32
    %398 = vector.broadcast %cst_145 : f32 to vector<64x128xf32>
    %399 = arith.cmpf oge, %396, %398 : vector<64x128xf32>
    %400 = vector.broadcast %397 : f32 to vector<64x128xf32>
    %401 = arith.mulf %400, %396 : vector<64x128xf32>
    %402 = arith.select %399, %396, %401 : vector<64x128xi1>, vector<64x128xf32>
    %403 = vector.shape_cast %402 : vector<64x128xf32> to vector<1x64x128xf32>
    %cst_146 = arith.constant dense<0.000000e+00> : vector<1xf32>
    %404 = vector.multi_reduction <add>, %403, %cst_146 [1, 2] : vector<1x64x128xf32> to vector<1xf32>
    %405 = vector.shape_cast %404 : vector<1xf32> to vector<1x1x1xf32>
    %406 = vector.extract %405[0, 0, 0] : f32 from vector<1x1x1xf32>
    %407 = vector.broadcast %406 : f32 to vector<1x1xf32>
    %cst_147 = arith.constant 1.22070313E-4 : f32
    %408 = vector.broadcast %cst_147 : f32 to vector<1x1xf32>
    %409 = arith.mulf %407, %408 : vector<1x1xf32>
    %410 = arith.mulf %402, %402 : vector<64x128xf32>
    %411 = vector.shape_cast %410 : vector<64x128xf32> to vector<1x64x128xf32>
    %cst_148 = arith.constant dense<0.000000e+00> : vector<1xf32>
    %412 = vector.multi_reduction <add>, %411, %cst_148 [1, 2] : vector<1x64x128xf32> to vector<1xf32>
    %413 = vector.shape_cast %412 : vector<1xf32> to vector<1x1x1xf32>
    %414 = vector.extract %413[0, 0, 0] : f32 from vector<1x1x1xf32>
    %415 = vector.broadcast %414 : f32 to vector<1x1xf32>
    %cst_149 = arith.constant 1.22070313E-4 : f32
    %416 = vector.broadcast %cst_149 : f32 to vector<1x1xf32>
    %417 = arith.mulf %415, %416 : vector<1x1xf32>
    %418 = arith.mulf %409, %409 : vector<1x1xf32>
    %419 = arith.subf %417, %418 : vector<1x1xf32>
    %cst_150 = arith.constant 0.000000e+00 : f32
    %420 = vector.broadcast %cst_150 : f32 to vector<1x1xf32>
    %421 = arith.maximumf %419, %420 : vector<1x1xf32>
    %422 = vector.broadcast %409 : vector<1x1xf32> to vector<64x128xf32>
    %423 = arith.subf %402, %422 : vector<64x128xf32>
    %cst_151 = arith.constant 9.99999993E-9 : f32
    %424 = vector.broadcast %cst_151 : f32 to vector<1x1xf32>
    %425 = arith.addf %421, %424 : vector<1x1xf32>
    %426 = math.rsqrt %425 : vector<1x1xf32>
    %427 = vector.broadcast %426 : vector<1x1xf32> to vector<64x128xf32>
    %428 = arith.mulf %423, %427 : vector<64x128xf32>
    %c2_152 = arith.constant 2 : index
    %c0_153 = arith.constant 0 : index
    %c0_154 = arith.constant 0 : index
    %429 = vector.load %arg11[%c2_152, %c0_153, %c0_154] : memref<5x64x64xf32, #tpu.memory_space<vmem>>, vector<1x64x64xf32>
    %430 = vector.shape_cast %429 : vector<1x64x64xf32> to vector<64x64xf32>
    %c2_155 = arith.constant 2 : index
    %c0_156 = arith.constant 0 : index
    %c0_157 = arith.constant 0 : index
    %431 = vector.load %arg12[%c2_155, %c0_156, %c0_157] : memref<5x64x1xf32, #tpu.memory_space<vmem>>, vector<1x64x1xf32>
    %432 = vector.shape_cast %431 : vector<1x64x1xf32> to vector<64x1xf32>
    %cst_158 = arith.constant dense<0.000000e+00> : vector<64x128xf32>
    %433 = tpu.matmul %430, %428, %cst_158 {dimension_numbers = #tpu.dot_dimension_numbers<[1], [0], [0], [1], [0, 0, 1, 1], [], []>} : vector<64x64xf32>, vector<64x128xf32>, vector<64x128xf32> -> vector<64x128xf32>
    %434 = vector.broadcast %432 : vector<64x1xf32> to vector<64x128xf32>
    %435 = arith.addf %433, %434 : vector<64x128xf32>
    %436 = vector.extract_strided_slice %435 {offsets = [0, 0], sizes = [32, 128], strides = [1, 1]} : vector<64x128xf32> to vector<32x128xf32>
    %437 = arith.addf %320, %436 : vector<32x128xf32>
    %438 = vector.extract_strided_slice %435 {offsets = [32, 0], sizes = [32, 128], strides = [1, 1]} : vector<64x128xf32> to vector<32x128xf32>
    %439 = arith.addf %322, %438 : vector<32x128xf32>
    %c3_159 = arith.constant 3 : index
    %c0_160 = arith.constant 0 : index
    %c0_161 = arith.constant 0 : index
    %440 = vector.load %arg5[%c3_159, %c0_160, %c0_161] : memref<6x64x32xf32, #tpu.memory_space<vmem>>, vector<1x64x32xf32>
    %441 = vector.shape_cast %440 : vector<1x64x32xf32> to vector<64x32xf32>
    %c3_162 = arith.constant 3 : index
    %c0_163 = arith.constant 0 : index
    %c0_164 = arith.constant 0 : index
    %442 = vector.load %arg6[%c3_162, %c0_163, %c0_164] : memref<6x64x1xf32, #tpu.memory_space<vmem>>, vector<1x64x1xf32>
    %443 = vector.shape_cast %442 : vector<1x64x1xf32> to vector<64x1xf32>
    %cst_165 = arith.constant dense<0.000000e+00> : vector<64x128xf32>
    %444 = tpu.matmul %441, %437, %cst_165 {dimension_numbers = #tpu.dot_dimension_numbers<[1], [0], [0], [1], [0, 0, 1, 1], [], []>} : vector<64x32xf32>, vector<32x128xf32>, vector<64x128xf32> -> vector<64x128xf32>
    %445 = vector.broadcast %443 : vector<64x1xf32> to vector<64x128xf32>
    %446 = arith.addf %444, %445 : vector<64x128xf32>
    %c6 = arith.constant 6 : index
    %447 = memref.load %arg1[%c6] : memref<13xf32, #tpu.memory_space<smem>>
    %cst_166 = arith.constant 0.000000e+00 : f32
    %448 = vector.broadcast %cst_166 : f32 to vector<64x128xf32>
    %449 = arith.cmpf oge, %446, %448 : vector<64x128xf32>
    %450 = vector.broadcast %447 : f32 to vector<64x128xf32>
    %451 = arith.mulf %450, %446 : vector<64x128xf32>
    %452 = arith.select %449, %446, %451 : vector<64x128xi1>, vector<64x128xf32>
    %453 = vector.shape_cast %452 : vector<64x128xf32> to vector<1x64x128xf32>
    %cst_167 = arith.constant dense<0.000000e+00> : vector<1xf32>
    %454 = vector.multi_reduction <add>, %453, %cst_167 [1, 2] : vector<1x64x128xf32> to vector<1xf32>
    %455 = vector.shape_cast %454 : vector<1xf32> to vector<1x1x1xf32>
    %456 = vector.extract %455[0, 0, 0] : f32 from vector<1x1x1xf32>
    %457 = vector.broadcast %456 : f32 to vector<1x1xf32>
    %cst_168 = arith.constant 1.22070313E-4 : f32
    %458 = vector.broadcast %cst_168 : f32 to vector<1x1xf32>
    %459 = arith.mulf %457, %458 : vector<1x1xf32>
    %460 = arith.mulf %452, %452 : vector<64x128xf32>
    %461 = vector.shape_cast %460 : vector<64x128xf32> to vector<1x64x128xf32>
    %cst_169 = arith.constant dense<0.000000e+00> : vector<1xf32>
    %462 = vector.multi_reduction <add>, %461, %cst_169 [1, 2] : vector<1x64x128xf32> to vector<1xf32>
    %463 = vector.shape_cast %462 : vector<1xf32> to vector<1x1x1xf32>
    %464 = vector.extract %463[0, 0, 0] : f32 from vector<1x1x1xf32>
    %465 = vector.broadcast %464 : f32 to vector<1x1xf32>
    %cst_170 = arith.constant 1.22070313E-4 : f32
    %466 = vector.broadcast %cst_170 : f32 to vector<1x1xf32>
    %467 = arith.mulf %465, %466 : vector<1x1xf32>
    %468 = arith.mulf %459, %459 : vector<1x1xf32>
    %469 = arith.subf %467, %468 : vector<1x1xf32>
    %cst_171 = arith.constant 0.000000e+00 : f32
    %470 = vector.broadcast %cst_171 : f32 to vector<1x1xf32>
    %471 = arith.maximumf %469, %470 : vector<1x1xf32>
    %472 = vector.broadcast %459 : vector<1x1xf32> to vector<64x128xf32>
    %473 = arith.subf %452, %472 : vector<64x128xf32>
    %cst_172 = arith.constant 9.99999993E-9 : f32
    %474 = vector.broadcast %cst_172 : f32 to vector<1x1xf32>
    %475 = arith.addf %471, %474 : vector<1x1xf32>
    %476 = math.rsqrt %475 : vector<1x1xf32>
    %477 = vector.broadcast %476 : vector<1x1xf32> to vector<64x128xf32>
    %478 = arith.mulf %473, %477 : vector<64x128xf32>
    %c3_173 = arith.constant 3 : index
    %c0_174 = arith.constant 0 : index
    %c0_175 = arith.constant 0 : index
    %479 = vector.load %arg7[%c3_173, %c0_174, %c0_175] : memref<6x64x1xf32, #tpu.memory_space<vmem>>, vector<1x64x1xf32>
    %480 = vector.shape_cast %479 : vector<1x64x1xf32> to vector<64x1xf32>
    %481 = vector.broadcast %480 : vector<64x1xf32> to vector<64x128xf32>
    %482 = arith.mulf %478, %481 : vector<64x128xf32>
    %c3_176 = arith.constant 3 : index
    %c0_177 = arith.constant 0 : index
    %c0_178 = arith.constant 0 : index
    %483 = vector.load %arg8[%c3_176, %c0_177, %c0_178] : memref<6x64x1xf32, #tpu.memory_space<vmem>>, vector<1x64x1xf32>
    %484 = vector.shape_cast %483 : vector<1x64x1xf32> to vector<64x1xf32>
    %485 = vector.broadcast %484 : vector<64x1xf32> to vector<64x128xf32>
    %486 = arith.addf %482, %485 : vector<64x128xf32>
    %c3_179 = arith.constant 3 : index
    %c0_180 = arith.constant 0 : index
    %c0_181 = arith.constant 0 : index
    %487 = vector.load %arg9[%c3_179, %c0_180, %c0_181] : memref<6x64x3xf32, #tpu.memory_space<vmem>>, vector<1x64x3xf32>
    %488 = vector.shape_cast %487 : vector<1x64x3xf32> to vector<64x3xf32>
    %c3_182 = arith.constant 3 : index
    %c0_183 = arith.constant 0 : index
    %c0_184 = arith.constant 0 : index
    %489 = vector.load %arg10[%c3_182, %c0_183, %c0_184] : memref<6x64x1xf32, #tpu.memory_space<vmem>>, vector<1x64x1xf32>
    %490 = vector.shape_cast %489 : vector<1x64x1xf32> to vector<64x1xf32>
    %c1_i32_185 = arith.constant 1 : i32
    %491 = tpu.dynamic_rotate %486 by %c1_i32_185 dim 1 : vector<64x128xf32>, i32 -> vector<64x128xf32>
    %492 = vector.extract_strided_slice %488 {offsets = [0, 0], sizes = [64, 1], strides = [1, 1]} : vector<64x3xf32> to vector<64x1xf32>
    %cst_186 = arith.constant 0.000000e+00 : f32
    %493 = vector.shape_cast %9 : vector<1x128xi1> to vector<1x128xi1>
    %494 = vector.broadcast %493 : vector<1x128xi1> to vector<64x128xi1>
    %495 = vector.broadcast %cst_186 : f32 to vector<64x128xf32>
    %496 = arith.select %494, %491, %495 : vector<64x128xi1>, vector<64x128xf32>
    %497 = vector.broadcast %492 : vector<64x1xf32> to vector<64x128xf32>
    %498 = arith.mulf %497, %496 : vector<64x128xf32>
    %499 = vector.extract_strided_slice %488 {offsets = [0, 1], sizes = [64, 1], strides = [1, 1]} : vector<64x3xf32> to vector<64x1xf32>
    %500 = vector.broadcast %499 : vector<64x1xf32> to vector<64x128xf32>
    %501 = arith.mulf %500, %486 : vector<64x128xf32>
    %502 = arith.addf %498, %501 : vector<64x128xf32>
    %c127_i32_187 = arith.constant 127 : i32
    %503 = tpu.dynamic_rotate %486 by %c127_i32_187 dim 1 : vector<64x128xf32>, i32 -> vector<64x128xf32>
    %504 = vector.extract_strided_slice %488 {offsets = [0, 2], sizes = [64, 1], strides = [1, 1]} : vector<64x3xf32> to vector<64x1xf32>
    %cst_188 = arith.constant 0.000000e+00 : f32
    %505 = vector.shape_cast %18 : vector<1x128xi1> to vector<1x128xi1>
    %506 = vector.broadcast %505 : vector<1x128xi1> to vector<64x128xi1>
    %507 = vector.broadcast %cst_188 : f32 to vector<64x128xf32>
    %508 = arith.select %506, %503, %507 : vector<64x128xi1>, vector<64x128xf32>
    %509 = vector.broadcast %504 : vector<64x1xf32> to vector<64x128xf32>
    %510 = arith.mulf %509, %508 : vector<64x128xf32>
    %511 = arith.addf %502, %510 : vector<64x128xf32>
    %512 = vector.broadcast %490 : vector<64x1xf32> to vector<64x128xf32>
    %513 = arith.addf %511, %512 : vector<64x128xf32>
    %c7 = arith.constant 7 : index
    %514 = memref.load %arg1[%c7] : memref<13xf32, #tpu.memory_space<smem>>
    %cst_189 = arith.constant 0.000000e+00 : f32
    %515 = vector.broadcast %cst_189 : f32 to vector<64x128xf32>
    %516 = arith.cmpf oge, %513, %515 : vector<64x128xf32>
    %517 = vector.broadcast %514 : f32 to vector<64x128xf32>
    %518 = arith.mulf %517, %513 : vector<64x128xf32>
    %519 = arith.select %516, %513, %518 : vector<64x128xi1>, vector<64x128xf32>
    %520 = vector.shape_cast %519 : vector<64x128xf32> to vector<1x64x128xf32>
    %cst_190 = arith.constant dense<0.000000e+00> : vector<1xf32>
    %521 = vector.multi_reduction <add>, %520, %cst_190 [1, 2] : vector<1x64x128xf32> to vector<1xf32>
    %522 = vector.shape_cast %521 : vector<1xf32> to vector<1x1x1xf32>
    %523 = vector.extract %522[0, 0, 0] : f32 from vector<1x1x1xf32>
    %524 = vector.broadcast %523 : f32 to vector<1x1xf32>
    %cst_191 = arith.constant 1.22070313E-4 : f32
    %525 = vector.broadcast %cst_191 : f32 to vector<1x1xf32>
    %526 = arith.mulf %524, %525 : vector<1x1xf32>
    %527 = arith.mulf %519, %519 : vector<64x128xf32>
    %528 = vector.shape_cast %527 : vector<64x128xf32> to vector<1x64x128xf32>
    %cst_192 = arith.constant dense<0.000000e+00> : vector<1xf32>
    %529 = vector.multi_reduction <add>, %528, %cst_192 [1, 2] : vector<1x64x128xf32> to vector<1xf32>
    %530 = vector.shape_cast %529 : vector<1xf32> to vector<1x1x1xf32>
    %531 = vector.extract %530[0, 0, 0] : f32 from vector<1x1x1xf32>
    %532 = vector.broadcast %531 : f32 to vector<1x1xf32>
    %cst_193 = arith.constant 1.22070313E-4 : f32
    %533 = vector.broadcast %cst_193 : f32 to vector<1x1xf32>
    %534 = arith.mulf %532, %533 : vector<1x1xf32>
    %535 = arith.mulf %526, %526 : vector<1x1xf32>
    %536 = arith.subf %534, %535 : vector<1x1xf32>
    %cst_194 = arith.constant 0.000000e+00 : f32
    %537 = vector.broadcast %cst_194 : f32 to vector<1x1xf32>
    %538 = arith.maximumf %536, %537 : vector<1x1xf32>
    %539 = vector.broadcast %526 : vector<1x1xf32> to vector<64x128xf32>
    %540 = arith.subf %519, %539 : vector<64x128xf32>
    %cst_195 = arith.constant 9.99999993E-9 : f32
    %541 = vector.broadcast %cst_195 : f32 to vector<1x1xf32>
    %542 = arith.addf %538, %541 : vector<1x1xf32>
    %543 = math.rsqrt %542 : vector<1x1xf32>
    %544 = vector.broadcast %543 : vector<1x1xf32> to vector<64x128xf32>
    %545 = arith.mulf %540, %544 : vector<64x128xf32>
    %c3_196 = arith.constant 3 : index
    %c0_197 = arith.constant 0 : index
    %c0_198 = arith.constant 0 : index
    %546 = vector.load %arg11[%c3_196, %c0_197, %c0_198] : memref<5x64x64xf32, #tpu.memory_space<vmem>>, vector<1x64x64xf32>
    %547 = vector.shape_cast %546 : vector<1x64x64xf32> to vector<64x64xf32>
    %c3_199 = arith.constant 3 : index
    %c0_200 = arith.constant 0 : index
    %c0_201 = arith.constant 0 : index
    %548 = vector.load %arg12[%c3_199, %c0_200, %c0_201] : memref<5x64x1xf32, #tpu.memory_space<vmem>>, vector<1x64x1xf32>
    %549 = vector.shape_cast %548 : vector<1x64x1xf32> to vector<64x1xf32>
    %cst_202 = arith.constant dense<0.000000e+00> : vector<64x128xf32>
    %550 = tpu.matmul %547, %545, %cst_202 {dimension_numbers = #tpu.dot_dimension_numbers<[1], [0], [0], [1], [0, 0, 1, 1], [], []>} : vector<64x64xf32>, vector<64x128xf32>, vector<64x128xf32> -> vector<64x128xf32>
    %551 = vector.broadcast %549 : vector<64x1xf32> to vector<64x128xf32>
    %552 = arith.addf %550, %551 : vector<64x128xf32>
    %553 = vector.extract_strided_slice %552 {offsets = [0, 0], sizes = [32, 128], strides = [1, 1]} : vector<64x128xf32> to vector<32x128xf32>
    %554 = arith.addf %437, %553 : vector<32x128xf32>
    %555 = vector.extract_strided_slice %552 {offsets = [32, 0], sizes = [32, 128], strides = [1, 1]} : vector<64x128xf32> to vector<32x128xf32>
    %556 = arith.addf %439, %555 : vector<32x128xf32>
    %c4_203 = arith.constant 4 : index
    %c0_204 = arith.constant 0 : index
    %c0_205 = arith.constant 0 : index
    %557 = vector.load %arg5[%c4_203, %c0_204, %c0_205] : memref<6x64x32xf32, #tpu.memory_space<vmem>>, vector<1x64x32xf32>
    %558 = vector.shape_cast %557 : vector<1x64x32xf32> to vector<64x32xf32>
    %c4_206 = arith.constant 4 : index
    %c0_207 = arith.constant 0 : index
    %c0_208 = arith.constant 0 : index
    %559 = vector.load %arg6[%c4_206, %c0_207, %c0_208] : memref<6x64x1xf32, #tpu.memory_space<vmem>>, vector<1x64x1xf32>
    %560 = vector.shape_cast %559 : vector<1x64x1xf32> to vector<64x1xf32>
    %cst_209 = arith.constant dense<0.000000e+00> : vector<64x128xf32>
    %561 = tpu.matmul %558, %554, %cst_209 {dimension_numbers = #tpu.dot_dimension_numbers<[1], [0], [0], [1], [0, 0, 1, 1], [], []>} : vector<64x32xf32>, vector<32x128xf32>, vector<64x128xf32> -> vector<64x128xf32>
    %562 = vector.broadcast %560 : vector<64x1xf32> to vector<64x128xf32>
    %563 = arith.addf %561, %562 : vector<64x128xf32>
    %c8 = arith.constant 8 : index
    %564 = memref.load %arg1[%c8] : memref<13xf32, #tpu.memory_space<smem>>
    %cst_210 = arith.constant 0.000000e+00 : f32
    %565 = vector.broadcast %cst_210 : f32 to vector<64x128xf32>
    %566 = arith.cmpf oge, %563, %565 : vector<64x128xf32>
    %567 = vector.broadcast %564 : f32 to vector<64x128xf32>
    %568 = arith.mulf %567, %563 : vector<64x128xf32>
    %569 = arith.select %566, %563, %568 : vector<64x128xi1>, vector<64x128xf32>
    %570 = vector.shape_cast %569 : vector<64x128xf32> to vector<1x64x128xf32>
    %cst_211 = arith.constant dense<0.000000e+00> : vector<1xf32>
    %571 = vector.multi_reduction <add>, %570, %cst_211 [1, 2] : vector<1x64x128xf32> to vector<1xf32>
    %572 = vector.shape_cast %571 : vector<1xf32> to vector<1x1x1xf32>
    %573 = vector.extract %572[0, 0, 0] : f32 from vector<1x1x1xf32>
    %574 = vector.broadcast %573 : f32 to vector<1x1xf32>
    %cst_212 = arith.constant 1.22070313E-4 : f32
    %575 = vector.broadcast %cst_212 : f32 to vector<1x1xf32>
    %576 = arith.mulf %574, %575 : vector<1x1xf32>
    %577 = arith.mulf %569, %569 : vector<64x128xf32>
    %578 = vector.shape_cast %577 : vector<64x128xf32> to vector<1x64x128xf32>
    %cst_213 = arith.constant dense<0.000000e+00> : vector<1xf32>
    %579 = vector.multi_reduction <add>, %578, %cst_213 [1, 2] : vector<1x64x128xf32> to vector<1xf32>
    %580 = vector.shape_cast %579 : vector<1xf32> to vector<1x1x1xf32>
    %581 = vector.extract %580[0, 0, 0] : f32 from vector<1x1x1xf32>
    %582 = vector.broadcast %581 : f32 to vector<1x1xf32>
    %cst_214 = arith.constant 1.22070313E-4 : f32
    %583 = vector.broadcast %cst_214 : f32 to vector<1x1xf32>
    %584 = arith.mulf %582, %583 : vector<1x1xf32>
    %585 = arith.mulf %576, %576 : vector<1x1xf32>
    %586 = arith.subf %584, %585 : vector<1x1xf32>
    %cst_215 = arith.constant 0.000000e+00 : f32
    %587 = vector.broadcast %cst_215 : f32 to vector<1x1xf32>
    %588 = arith.maximumf %586, %587 : vector<1x1xf32>
    %589 = vector.broadcast %576 : vector<1x1xf32> to vector<64x128xf32>
    %590 = arith.subf %569, %589 : vector<64x128xf32>
    %cst_216 = arith.constant 9.99999993E-9 : f32
    %591 = vector.broadcast %cst_216 : f32 to vector<1x1xf32>
    %592 = arith.addf %588, %591 : vector<1x1xf32>
    %593 = math.rsqrt %592 : vector<1x1xf32>
    %594 = vector.broadcast %593 : vector<1x1xf32> to vector<64x128xf32>
    %595 = arith.mulf %590, %594 : vector<64x128xf32>
    %c4_217 = arith.constant 4 : index
    %c0_218 = arith.constant 0 : index
    %c0_219 = arith.constant 0 : index
    %596 = vector.load %arg7[%c4_217, %c0_218, %c0_219] : memref<6x64x1xf32, #tpu.memory_space<vmem>>, vector<1x64x1xf32>
    %597 = vector.shape_cast %596 : vector<1x64x1xf32> to vector<64x1xf32>
    %598 = vector.broadcast %597 : vector<64x1xf32> to vector<64x128xf32>
    %599 = arith.mulf %595, %598 : vector<64x128xf32>
    %c4_220 = arith.constant 4 : index
    %c0_221 = arith.constant 0 : index
    %c0_222 = arith.constant 0 : index
    %600 = vector.load %arg8[%c4_220, %c0_221, %c0_222] : memref<6x64x1xf32, #tpu.memory_space<vmem>>, vector<1x64x1xf32>
    %601 = vector.shape_cast %600 : vector<1x64x1xf32> to vector<64x1xf32>
    %602 = vector.broadcast %601 : vector<64x1xf32> to vector<64x128xf32>
    %603 = arith.addf %599, %602 : vector<64x128xf32>
    %c4_223 = arith.constant 4 : index
    %c0_224 = arith.constant 0 : index
    %c0_225 = arith.constant 0 : index
    %604 = vector.load %arg9[%c4_223, %c0_224, %c0_225] : memref<6x64x3xf32, #tpu.memory_space<vmem>>, vector<1x64x3xf32>
    %605 = vector.shape_cast %604 : vector<1x64x3xf32> to vector<64x3xf32>
    %c4_226 = arith.constant 4 : index
    %c0_227 = arith.constant 0 : index
    %c0_228 = arith.constant 0 : index
    %606 = vector.load %arg10[%c4_226, %c0_227, %c0_228] : memref<6x64x1xf32, #tpu.memory_space<vmem>>, vector<1x64x1xf32>
    %607 = vector.shape_cast %606 : vector<1x64x1xf32> to vector<64x1xf32>
    %c2_i32_229 = arith.constant 2 : i32
    %608 = tpu.dynamic_rotate %603 by %c2_i32_229 dim 1 : vector<64x128xf32>, i32 -> vector<64x128xf32>
    %609 = vector.extract_strided_slice %605 {offsets = [0, 0], sizes = [64, 1], strides = [1, 1]} : vector<64x3xf32> to vector<64x1xf32>
    %cst_230 = arith.constant 0.000000e+00 : f32
    %610 = vector.shape_cast %27 : vector<1x128xi1> to vector<1x128xi1>
    %611 = vector.broadcast %610 : vector<1x128xi1> to vector<64x128xi1>
    %612 = vector.broadcast %cst_230 : f32 to vector<64x128xf32>
    %613 = arith.select %611, %608, %612 : vector<64x128xi1>, vector<64x128xf32>
    %614 = vector.broadcast %609 : vector<64x1xf32> to vector<64x128xf32>
    %615 = arith.mulf %614, %613 : vector<64x128xf32>
    %616 = vector.extract_strided_slice %605 {offsets = [0, 1], sizes = [64, 1], strides = [1, 1]} : vector<64x3xf32> to vector<64x1xf32>
    %617 = vector.broadcast %616 : vector<64x1xf32> to vector<64x128xf32>
    %618 = arith.mulf %617, %603 : vector<64x128xf32>
    %619 = arith.addf %615, %618 : vector<64x128xf32>
    %c126_i32_231 = arith.constant 126 : i32
    %620 = tpu.dynamic_rotate %603 by %c126_i32_231 dim 1 : vector<64x128xf32>, i32 -> vector<64x128xf32>
    %621 = vector.extract_strided_slice %605 {offsets = [0, 2], sizes = [64, 1], strides = [1, 1]} : vector<64x3xf32> to vector<64x1xf32>
    %cst_232 = arith.constant 0.000000e+00 : f32
    %622 = vector.shape_cast %36 : vector<1x128xi1> to vector<1x128xi1>
    %623 = vector.broadcast %622 : vector<1x128xi1> to vector<64x128xi1>
    %624 = vector.broadcast %cst_232 : f32 to vector<64x128xf32>
    %625 = arith.select %623, %620, %624 : vector<64x128xi1>, vector<64x128xf32>
    %626 = vector.broadcast %621 : vector<64x1xf32> to vector<64x128xf32>
    %627 = arith.mulf %626, %625 : vector<64x128xf32>
    %628 = arith.addf %619, %627 : vector<64x128xf32>
    %629 = vector.broadcast %607 : vector<64x1xf32> to vector<64x128xf32>
    %630 = arith.addf %628, %629 : vector<64x128xf32>
    %c9 = arith.constant 9 : index
    %631 = memref.load %arg1[%c9] : memref<13xf32, #tpu.memory_space<smem>>
    %cst_233 = arith.constant 0.000000e+00 : f32
    %632 = vector.broadcast %cst_233 : f32 to vector<64x128xf32>
    %633 = arith.cmpf oge, %630, %632 : vector<64x128xf32>
    %634 = vector.broadcast %631 : f32 to vector<64x128xf32>
    %635 = arith.mulf %634, %630 : vector<64x128xf32>
    %636 = arith.select %633, %630, %635 : vector<64x128xi1>, vector<64x128xf32>
    %637 = vector.shape_cast %636 : vector<64x128xf32> to vector<1x64x128xf32>
    %cst_234 = arith.constant dense<0.000000e+00> : vector<1xf32>
    %638 = vector.multi_reduction <add>, %637, %cst_234 [1, 2] : vector<1x64x128xf32> to vector<1xf32>
    %639 = vector.shape_cast %638 : vector<1xf32> to vector<1x1x1xf32>
    %640 = vector.extract %639[0, 0, 0] : f32 from vector<1x1x1xf32>
    %641 = vector.broadcast %640 : f32 to vector<1x1xf32>
    %cst_235 = arith.constant 1.22070313E-4 : f32
    %642 = vector.broadcast %cst_235 : f32 to vector<1x1xf32>
    %643 = arith.mulf %641, %642 : vector<1x1xf32>
    %644 = arith.mulf %636, %636 : vector<64x128xf32>
    %645 = vector.shape_cast %644 : vector<64x128xf32> to vector<1x64x128xf32>
    %cst_236 = arith.constant dense<0.000000e+00> : vector<1xf32>
    %646 = vector.multi_reduction <add>, %645, %cst_236 [1, 2] : vector<1x64x128xf32> to vector<1xf32>
    %647 = vector.shape_cast %646 : vector<1xf32> to vector<1x1x1xf32>
    %648 = vector.extract %647[0, 0, 0] : f32 from vector<1x1x1xf32>
    %649 = vector.broadcast %648 : f32 to vector<1x1xf32>
    %cst_237 = arith.constant 1.22070313E-4 : f32
    %650 = vector.broadcast %cst_237 : f32 to vector<1x1xf32>
    %651 = arith.mulf %649, %650 : vector<1x1xf32>
    %652 = arith.mulf %643, %643 : vector<1x1xf32>
    %653 = arith.subf %651, %652 : vector<1x1xf32>
    %cst_238 = arith.constant 0.000000e+00 : f32
    %654 = vector.broadcast %cst_238 : f32 to vector<1x1xf32>
    %655 = arith.maximumf %653, %654 : vector<1x1xf32>
    %656 = vector.broadcast %643 : vector<1x1xf32> to vector<64x128xf32>
    %657 = arith.subf %636, %656 : vector<64x128xf32>
    %cst_239 = arith.constant 9.99999993E-9 : f32
    %658 = vector.broadcast %cst_239 : f32 to vector<1x1xf32>
    %659 = arith.addf %655, %658 : vector<1x1xf32>
    %660 = math.rsqrt %659 : vector<1x1xf32>
    %661 = vector.broadcast %660 : vector<1x1xf32> to vector<64x128xf32>
    %662 = arith.mulf %657, %661 : vector<64x128xf32>
    %c4_240 = arith.constant 4 : index
    %c0_241 = arith.constant 0 : index
    %c0_242 = arith.constant 0 : index
    %663 = vector.load %arg11[%c4_240, %c0_241, %c0_242] : memref<5x64x64xf32, #tpu.memory_space<vmem>>, vector<1x64x64xf32>
    %664 = vector.shape_cast %663 : vector<1x64x64xf32> to vector<64x64xf32>
    %c4_243 = arith.constant 4 : index
    %c0_244 = arith.constant 0 : index
    %c0_245 = arith.constant 0 : index
    %665 = vector.load %arg12[%c4_243, %c0_244, %c0_245] : memref<5x64x1xf32, #tpu.memory_space<vmem>>, vector<1x64x1xf32>
    %666 = vector.shape_cast %665 : vector<1x64x1xf32> to vector<64x1xf32>
    %cst_246 = arith.constant dense<0.000000e+00> : vector<64x128xf32>
    %667 = tpu.matmul %664, %662, %cst_246 {dimension_numbers = #tpu.dot_dimension_numbers<[1], [0], [0], [1], [0, 0, 1, 1], [], []>} : vector<64x64xf32>, vector<64x128xf32>, vector<64x128xf32> -> vector<64x128xf32>
    %668 = vector.broadcast %666 : vector<64x1xf32> to vector<64x128xf32>
    %669 = arith.addf %667, %668 : vector<64x128xf32>
    %670 = vector.extract_strided_slice %669 {offsets = [0, 0], sizes = [32, 128], strides = [1, 1]} : vector<64x128xf32> to vector<32x128xf32>
    %671 = arith.addf %554, %670 : vector<32x128xf32>
    %672 = vector.extract_strided_slice %669 {offsets = [32, 0], sizes = [32, 128], strides = [1, 1]} : vector<64x128xf32> to vector<32x128xf32>
    %673 = arith.addf %556, %672 : vector<32x128xf32>
    %c5_247 = arith.constant 5 : index
    %c0_248 = arith.constant 0 : index
    %c0_249 = arith.constant 0 : index
    %674 = vector.load %arg5[%c5_247, %c0_248, %c0_249] : memref<6x64x32xf32, #tpu.memory_space<vmem>>, vector<1x64x32xf32>
    %675 = vector.shape_cast %674 : vector<1x64x32xf32> to vector<64x32xf32>
    %c5_250 = arith.constant 5 : index
    %c0_251 = arith.constant 0 : index
    %c0_252 = arith.constant 0 : index
    %676 = vector.load %arg6[%c5_250, %c0_251, %c0_252] : memref<6x64x1xf32, #tpu.memory_space<vmem>>, vector<1x64x1xf32>
    %677 = vector.shape_cast %676 : vector<1x64x1xf32> to vector<64x1xf32>
    %cst_253 = arith.constant dense<0.000000e+00> : vector<64x128xf32>
    %678 = tpu.matmul %675, %671, %cst_253 {dimension_numbers = #tpu.dot_dimension_numbers<[1], [0], [0], [1], [0, 0, 1, 1], [], []>} : vector<64x32xf32>, vector<32x128xf32>, vector<64x128xf32> -> vector<64x128xf32>
    %679 = vector.broadcast %677 : vector<64x1xf32> to vector<64x128xf32>
    %680 = arith.addf %678, %679 : vector<64x128xf32>
    %c10 = arith.constant 10 : index
    %681 = memref.load %arg1[%c10] : memref<13xf32, #tpu.memory_space<smem>>
    %cst_254 = arith.constant 0.000000e+00 : f32
    %682 = vector.broadcast %cst_254 : f32 to vector<64x128xf32>
    %683 = arith.cmpf oge, %680, %682 : vector<64x128xf32>
    %684 = vector.broadcast %681 : f32 to vector<64x128xf32>
    %685 = arith.mulf %684, %680 : vector<64x128xf32>
    %686 = arith.select %683, %680, %685 : vector<64x128xi1>, vector<64x128xf32>
    %687 = vector.shape_cast %686 : vector<64x128xf32> to vector<1x64x128xf32>
    %cst_255 = arith.constant dense<0.000000e+00> : vector<1xf32>
    %688 = vector.multi_reduction <add>, %687, %cst_255 [1, 2] : vector<1x64x128xf32> to vector<1xf32>
    %689 = vector.shape_cast %688 : vector<1xf32> to vector<1x1x1xf32>
    %690 = vector.extract %689[0, 0, 0] : f32 from vector<1x1x1xf32>
    %691 = vector.broadcast %690 : f32 to vector<1x1xf32>
    %cst_256 = arith.constant 1.22070313E-4 : f32
    %692 = vector.broadcast %cst_256 : f32 to vector<1x1xf32>
    %693 = arith.mulf %691, %692 : vector<1x1xf32>
    %694 = arith.mulf %686, %686 : vector<64x128xf32>
    %695 = vector.shape_cast %694 : vector<64x128xf32> to vector<1x64x128xf32>
    %cst_257 = arith.constant dense<0.000000e+00> : vector<1xf32>
    %696 = vector.multi_reduction <add>, %695, %cst_257 [1, 2] : vector<1x64x128xf32> to vector<1xf32>
    %697 = vector.shape_cast %696 : vector<1xf32> to vector<1x1x1xf32>
    %698 = vector.extract %697[0, 0, 0] : f32 from vector<1x1x1xf32>
    %699 = vector.broadcast %698 : f32 to vector<1x1xf32>
    %cst_258 = arith.constant 1.22070313E-4 : f32
    %700 = vector.broadcast %cst_258 : f32 to vector<1x1xf32>
    %701 = arith.mulf %699, %700 : vector<1x1xf32>
    %702 = arith.mulf %693, %693 : vector<1x1xf32>
    %703 = arith.subf %701, %702 : vector<1x1xf32>
    %cst_259 = arith.constant 0.000000e+00 : f32
    %704 = vector.broadcast %cst_259 : f32 to vector<1x1xf32>
    %705 = arith.maximumf %703, %704 : vector<1x1xf32>
    %706 = vector.broadcast %693 : vector<1x1xf32> to vector<64x128xf32>
    %707 = arith.subf %686, %706 : vector<64x128xf32>
    %cst_260 = arith.constant 9.99999993E-9 : f32
    %708 = vector.broadcast %cst_260 : f32 to vector<1x1xf32>
    %709 = arith.addf %705, %708 : vector<1x1xf32>
    %710 = math.rsqrt %709 : vector<1x1xf32>
    %711 = vector.broadcast %710 : vector<1x1xf32> to vector<64x128xf32>
    %712 = arith.mulf %707, %711 : vector<64x128xf32>
    %c5_261 = arith.constant 5 : index
    %c0_262 = arith.constant 0 : index
    %c0_263 = arith.constant 0 : index
    %713 = vector.load %arg7[%c5_261, %c0_262, %c0_263] : memref<6x64x1xf32, #tpu.memory_space<vmem>>, vector<1x64x1xf32>
    %714 = vector.shape_cast %713 : vector<1x64x1xf32> to vector<64x1xf32>
    %715 = vector.broadcast %714 : vector<64x1xf32> to vector<64x128xf32>
    %716 = arith.mulf %712, %715 : vector<64x128xf32>
    %c5_264 = arith.constant 5 : index
    %c0_265 = arith.constant 0 : index
    %c0_266 = arith.constant 0 : index
    %717 = vector.load %arg8[%c5_264, %c0_265, %c0_266] : memref<6x64x1xf32, #tpu.memory_space<vmem>>, vector<1x64x1xf32>
    %718 = vector.shape_cast %717 : vector<1x64x1xf32> to vector<64x1xf32>
    %719 = vector.broadcast %718 : vector<64x1xf32> to vector<64x128xf32>
    %720 = arith.addf %716, %719 : vector<64x128xf32>
    %c5_267 = arith.constant 5 : index
    %c0_268 = arith.constant 0 : index
    %c0_269 = arith.constant 0 : index
    %721 = vector.load %arg9[%c5_267, %c0_268, %c0_269] : memref<6x64x3xf32, #tpu.memory_space<vmem>>, vector<1x64x3xf32>
    %722 = vector.shape_cast %721 : vector<1x64x3xf32> to vector<64x3xf32>
    %c5_270 = arith.constant 5 : index
    %c0_271 = arith.constant 0 : index
    %c0_272 = arith.constant 0 : index
    %723 = vector.load %arg10[%c5_270, %c0_271, %c0_272] : memref<6x64x1xf32, #tpu.memory_space<vmem>>, vector<1x64x1xf32>
    %724 = vector.shape_cast %723 : vector<1x64x1xf32> to vector<64x1xf32>
    %c4_i32_273 = arith.constant 4 : i32
    %725 = tpu.dynamic_rotate %720 by %c4_i32_273 dim 1 : vector<64x128xf32>, i32 -> vector<64x128xf32>
    %726 = vector.extract_strided_slice %722 {offsets = [0, 0], sizes = [64, 1], strides = [1, 1]} : vector<64x3xf32> to vector<64x1xf32>
    %cst_274 = arith.constant 0.000000e+00 : f32
    %727 = vector.shape_cast %45 : vector<1x128xi1> to vector<1x128xi1>
    %728 = vector.broadcast %727 : vector<1x128xi1> to vector<64x128xi1>
    %729 = vector.broadcast %cst_274 : f32 to vector<64x128xf32>
    %730 = arith.select %728, %725, %729 : vector<64x128xi1>, vector<64x128xf32>
    %731 = vector.broadcast %726 : vector<64x1xf32> to vector<64x128xf32>
    %732 = arith.mulf %731, %730 : vector<64x128xf32>
    %733 = vector.extract_strided_slice %722 {offsets = [0, 1], sizes = [64, 1], strides = [1, 1]} : vector<64x3xf32> to vector<64x1xf32>
    %734 = vector.broadcast %733 : vector<64x1xf32> to vector<64x128xf32>
    %735 = arith.mulf %734, %720 : vector<64x128xf32>
    %736 = arith.addf %732, %735 : vector<64x128xf32>
    %c124_i32_275 = arith.constant 124 : i32
    %737 = tpu.dynamic_rotate %720 by %c124_i32_275 dim 1 : vector<64x128xf32>, i32 -> vector<64x128xf32>
    %738 = vector.extract_strided_slice %722 {offsets = [0, 2], sizes = [64, 1], strides = [1, 1]} : vector<64x3xf32> to vector<64x1xf32>
    %cst_276 = arith.constant 0.000000e+00 : f32
    %739 = vector.shape_cast %54 : vector<1x128xi1> to vector<1x128xi1>
    %740 = vector.broadcast %739 : vector<1x128xi1> to vector<64x128xi1>
    %741 = vector.broadcast %cst_276 : f32 to vector<64x128xf32>
    %742 = arith.select %740, %737, %741 : vector<64x128xi1>, vector<64x128xf32>
    %743 = vector.broadcast %738 : vector<64x1xf32> to vector<64x128xf32>
    %744 = arith.mulf %743, %742 : vector<64x128xf32>
    %745 = arith.addf %736, %744 : vector<64x128xf32>
    %746 = vector.broadcast %724 : vector<64x1xf32> to vector<64x128xf32>
    %747 = arith.addf %745, %746 : vector<64x128xf32>
    %c11 = arith.constant 11 : index
    %748 = memref.load %arg1[%c11] : memref<13xf32, #tpu.memory_space<smem>>
    %cst_277 = arith.constant 0.000000e+00 : f32
    %749 = vector.broadcast %cst_277 : f32 to vector<64x128xf32>
    %750 = arith.cmpf oge, %747, %749 : vector<64x128xf32>
    %751 = vector.broadcast %748 : f32 to vector<64x128xf32>
    %752 = arith.mulf %751, %747 : vector<64x128xf32>
    %753 = arith.select %750, %747, %752 : vector<64x128xi1>, vector<64x128xf32>
    %754 = vector.shape_cast %753 : vector<64x128xf32> to vector<1x64x128xf32>
    %cst_278 = arith.constant dense<0.000000e+00> : vector<1xf32>
    %755 = vector.multi_reduction <add>, %754, %cst_278 [1, 2] : vector<1x64x128xf32> to vector<1xf32>
    %756 = vector.shape_cast %755 : vector<1xf32> to vector<1x1x1xf32>
    %757 = vector.extract %756[0, 0, 0] : f32 from vector<1x1x1xf32>
    %758 = vector.broadcast %757 : f32 to vector<1x1xf32>
    %cst_279 = arith.constant 1.22070313E-4 : f32
    %759 = vector.broadcast %cst_279 : f32 to vector<1x1xf32>
    %760 = arith.mulf %758, %759 : vector<1x1xf32>
    %761 = arith.mulf %753, %753 : vector<64x128xf32>
    %762 = vector.shape_cast %761 : vector<64x128xf32> to vector<1x64x128xf32>
    %cst_280 = arith.constant dense<0.000000e+00> : vector<1xf32>
    %763 = vector.multi_reduction <add>, %762, %cst_280 [1, 2] : vector<1x64x128xf32> to vector<1xf32>
    %764 = vector.shape_cast %763 : vector<1xf32> to vector<1x1x1xf32>
    %765 = vector.extract %764[0, 0, 0] : f32 from vector<1x1x1xf32>
    %766 = vector.broadcast %765 : f32 to vector<1x1xf32>
    %cst_281 = arith.constant 1.22070313E-4 : f32
    %767 = vector.broadcast %cst_281 : f32 to vector<1x1xf32>
    %768 = arith.mulf %766, %767 : vector<1x1xf32>
    %769 = arith.mulf %760, %760 : vector<1x1xf32>
    %770 = arith.subf %768, %769 : vector<1x1xf32>
    %cst_282 = arith.constant 0.000000e+00 : f32
    %771 = vector.broadcast %cst_282 : f32 to vector<1x1xf32>
    %772 = arith.maximumf %770, %771 : vector<1x1xf32>
    %773 = vector.broadcast %760 : vector<1x1xf32> to vector<64x128xf32>
    %774 = arith.subf %753, %773 : vector<64x128xf32>
    %cst_283 = arith.constant 9.99999993E-9 : f32
    %775 = vector.broadcast %cst_283 : f32 to vector<1x1xf32>
    %776 = arith.addf %772, %775 : vector<1x1xf32>
    %777 = math.rsqrt %776 : vector<1x1xf32>
    %778 = vector.broadcast %777 : vector<1x1xf32> to vector<64x128xf32>
    %779 = arith.mulf %774, %778 : vector<64x128xf32>
    %c0_284 = arith.constant 0 : index
    %c0_285 = arith.constant 0 : index
    %780 = vector.load %arg13[%c0_284, %c0_285] : memref<32x64xf32, #tpu.memory_space<vmem>>, vector<32x64xf32>
    %c0_286 = arith.constant 0 : index
    %c0_287 = arith.constant 0 : index
    %781 = vector.load %arg14[%c0_286, %c0_287] : memref<32x1xf32, #tpu.memory_space<vmem>>, vector<32x1xf32>
    %cst_288 = arith.constant dense<0.000000e+00> : vector<32x128xf32>
    %782 = tpu.matmul %780, %779, %cst_288 {dimension_numbers = #tpu.dot_dimension_numbers<[1], [0], [0], [1], [0, 0, 1, 1], [], []>} : vector<32x64xf32>, vector<64x128xf32>, vector<32x128xf32> -> vector<32x128xf32>
    %783 = vector.broadcast %781 : vector<32x1xf32> to vector<32x128xf32>
    %784 = arith.addf %782, %783 : vector<32x128xf32>
    %785 = arith.addf %673, %784 : vector<32x128xf32>
    %c12 = arith.constant 12 : index
    %786 = memref.load %arg1[%c12] : memref<13xf32, #tpu.memory_space<smem>>
    %cst_289 = arith.constant 0.000000e+00 : f32
    %787 = vector.broadcast %cst_289 : f32 to vector<32x128xf32>
    %788 = arith.cmpf oge, %785, %787 : vector<32x128xf32>
    %789 = vector.broadcast %786 : f32 to vector<32x128xf32>
    %790 = arith.mulf %789, %785 : vector<32x128xf32>
    %791 = arith.select %788, %785, %790 : vector<32x128xi1>, vector<32x128xf32>
    %c0_290 = arith.constant 0 : index
    %c0_291 = arith.constant 0 : index
    %792 = vector.load %arg15[%c0_290, %c0_291] : memref<128x32xf32, #tpu.memory_space<vmem>>, vector<128x32xf32>
    %c0_292 = arith.constant 0 : index
    %c0_293 = arith.constant 0 : index
    %793 = vector.load %arg16[%c0_292, %c0_293] : memref<128x1xf32, #tpu.memory_space<vmem>>, vector<128x1xf32>
    %cst_294 = arith.constant dense<0.000000e+00> : vector<128x128xf32>
    %794 = tpu.matmul %792, %791, %cst_294 {dimension_numbers = #tpu.dot_dimension_numbers<[1], [0], [0], [1], [0, 0, 1, 1], [], []>} : vector<128x32xf32>, vector<32x128xf32>, vector<128x128xf32> -> vector<128x128xf32>
    %795 = vector.broadcast %793 : vector<128x1xf32> to vector<128x128xf32>
    %796 = arith.addf %794, %795 : vector<128x128xf32>
    %797 = arith.negf %796 : vector<128x128xf32>
    %798 = math.exp %797 : vector<128x128xf32>
    %cst_295 = arith.constant 1.000000e+00 : f32
    %799 = vector.broadcast %cst_295 : f32 to vector<128x128xf32>
    %800 = arith.addf %799, %798 : vector<128x128xf32>
    %801 = arith.divf %799, %800 : vector<128x128xf32>
    %c0_296 = arith.constant 0 : index
    %c0_297 = arith.constant 0 : index
    %c0_298 = arith.constant 0 : index
    %802 = vector.load %arg17[%c0_296, %c0_297, %c0_298] : memref<1x128x128xf32, #tpu.memory_space<vmem>>, vector<1x128x128xf32>
    %803 = vector.shape_cast %802 : vector<1x128x128xf32> to vector<128x128xf32>
    %804 = vector.shape_cast %801 : vector<128x128xf32> to vector<1x128x128xf32>
    tpu.vector_store %arg17[%c0_296, %c0_297, %c0_298], %804 {strides = array<i32>} : memref<1x128x128xf32, #tpu.memory_space<vmem>>, vector<1x128x128xf32>,
    return
  }
  func.func @transform_0(%arg0: i32) -> i32 {
    %c0_i32 = arith.constant 0 : i32
    %c0_i32_0 = arith.constant 0 : i32
    return %c0_i32 : i32
  }
  func.func @transform_1(%arg0: i32) -> (i32, i32, i32) {
    %c0_i32 = arith.constant 0 : i32
    %c0_i32_0 = arith.constant 0 : i32
    %c0_i32_1 = arith.constant 0 : i32
    return %arg0, %c0_i32, %c0_i32_0 : i32, i32, i32
  }
  func.func @transform_2(%arg0: i32) -> (i32, i32) {
    %c0_i32 = arith.constant 0 : i32
    %c0_i32_0 = arith.constant 0 : i32
    %c0_i32_1 = arith.constant 0 : i32
    return %c0_i32, %c0_i32_0 : i32, i32
  }
  func.func @transform_3(%arg0: i32) -> (i32, i32) {
    %c0_i32 = arith.constant 0 : i32
    %c0_i32_0 = arith.constant 0 : i32
    %c0_i32_1 = arith.constant 0 : i32
    return %c0_i32, %c0_i32_0 : i32, i32
  }
  func.func @transform_4(%arg0: i32) -> (i32, i32, i32) {
    %c0_i32 = arith.constant 0 : i32
    %c0_i32_0 = arith.constant 0 : i32
    %c0_i32_1 = arith.constant 0 : i32
    %c0_i32_2 = arith.constant 0 : i32
    return %c0_i32, %c0_i32_0, %c0_i32_1 : i32, i32, i32
  }
  func.func @transform_5(%arg0: i32) -> (i32, i32, i32) {
    %c0_i32 = arith.constant 0 : i32
    %c0_i32_0 = arith.constant 0 : i32
    %c0_i32_1 = arith.constant 0 : i32
    %c0_i32_2 = arith.constant 0 : i32
    return %c0_i32, %c0_i32_0, %c0_i32_1 : i32, i32, i32
  }
  func.func @transform_6(%arg0: i32) -> (i32, i32, i32) {
    %c0_i32 = arith.constant 0 : i32
    %c0_i32_0 = arith.constant 0 : i32
    %c0_i32_1 = arith.constant 0 : i32
    %c0_i32_2 = arith.constant 0 : i32
    return %c0_i32, %c0_i32_0, %c0_i32_1 : i32, i32, i32
  }
  func.func @transform_7(%arg0: i32) -> (i32, i32, i32) {
    %c0_i32 = arith.constant 0 : i32
    %c0_i32_0 = arith.constant 0 : i32
    %c0_i32_1 = arith.constant 0 : i32
    %c0_i32_2 = arith.constant 0 : i32
    return %c0_i32, %c0_i32_0, %c0_i32_1 : i32, i32, i32
  }
  func.func @transform_8(%arg0: i32) -> (i32, i32, i32) {
    %c0_i32 = arith.constant 0 : i32
    %c0_i32_0 = arith.constant 0 : i32
    %c0_i32_1 = arith.constant 0 : i32
    %c0_i32_2 = arith.constant 0 : i32
    return %c0_i32, %c0_i32_0, %c0_i32_1 : i32, i32, i32
  }
  func.func @transform_9(%arg0: i32) -> (i32, i32, i32) {
    %c0_i32 = arith.constant 0 : i32
    %c0_i32_0 = arith.constant 0 : i32
    %c0_i32_1 = arith.constant 0 : i32
    %c0_i32_2 = arith.constant 0 : i32
    return %c0_i32, %c0_i32_0, %c0_i32_1 : i32, i32, i32
  }
  func.func @transform_10(%arg0: i32) -> (i32, i32, i32) {
    %c0_i32 = arith.constant 0 : i32
    %c0_i32_0 = arith.constant 0 : i32
    %c0_i32_1 = arith.constant 0 : i32
    %c0_i32_2 = arith.constant 0 : i32
    return %c0_i32, %c0_i32_0, %c0_i32_1 : i32, i32, i32
  }
  func.func @transform_11(%arg0: i32) -> (i32, i32, i32) {
    %c0_i32 = arith.constant 0 : i32
    %c0_i32_0 = arith.constant 0 : i32
    %c0_i32_1 = arith.constant 0 : i32
    %c0_i32_2 = arith.constant 0 : i32
    return %c0_i32, %c0_i32_0, %c0_i32_1 : i32, i32, i32
  }
  func.func @transform_12(%arg0: i32) -> (i32, i32) {
    %c0_i32 = arith.constant 0 : i32
    %c0_i32_0 = arith.constant 0 : i32
    %c0_i32_1 = arith.constant 0 : i32
    return %c0_i32, %c0_i32_0 : i32, i32
  }
  func.func @transform_13(%arg0: i32) -> (i32, i32) {
    %c0_i32 = arith.constant 0 : i32
    %c0_i32_0 = arith.constant 0 : i32
    %c0_i32_1 = arith.constant 0 : i32
    return %c0_i32, %c0_i32_0 : i32, i32
  }
  func.func @transform_14(%arg0: i32) -> (i32, i32) {
    %c0_i32 = arith.constant 0 : i32
    %c0_i32_0 = arith.constant 0 : i32
    %c0_i32_1 = arith.constant 0 : i32
    return %c0_i32, %c0_i32_0 : i32, i32
  }
  func.func @transform_15(%arg0: i32) -> (i32, i32) {
    %c0_i32 = arith.constant 0 : i32
    %c0_i32_0 = arith.constant 0 : i32
    %c0_i32_1 = arith.constant 0 : i32
    return %c0_i32, %c0_i32_0 : i32, i32
  }
  func.func @transform_16(%arg0: i32) -> (i32, i32, i32) {
    %c0_i32 = arith.constant 0 : i32
    %c0_i32_0 = arith.constant 0 : i32
    %c0_i32_1 = arith.constant 0 : i32
    return %arg0, %c0_i32, %c0_i32_0 : i32, i32, i32
  }
}

</mosaic_0001>

<bundles_post_ra>
// kernel: mask_generator_forward.1
= control target key start
LH: loop header
LB: loop body
LE: loop exit
PB: predicated region body
PF: predicated region fallthrough
CT: control target
= control target key end

     0   :  { %s11881_s0 = inlined_call_operand.vmem [shape: f32[13], index: 0, kind: input, shape index: {}]   ;;  %s11882_s1 = inlined_call_operand.vmem [shape: f32[2,64,128], index: 1, kind: input, shape index: {}]   ;;  %s11883_s2 = inlined_call_operand.vmem [shape: f32[32,64], index: 2, kind: input, shape index: {}]   ;;  %s11884_s3 = inlined_call_operand.vmem [shape: f32[32,1], index: 3, kind: input, shape index: {}]   ;;  %s11885_s4 = inlined_call_operand.vmem [shape: f32[6,64,32], index: 4, kind: input, shape index: {}]   ;;  %s11886_s5 = inlined_call_operand.vmem [shape: f32[6,64,1], index: 5, kind: input, shape index: {}]   ;;  %s11887_s6 = inlined_call_operand.vmem [shape: f32[6,64,1], index: 6, kind: input, shape index: {}]   ;;  %s11888_s7 = inlined_call_operand.vmem [shape: f32[6,64,1], index: 7, kind: input, shape index: {}]   ;;  %s11889_s8 = inlined_call_operand.vmem [shape: f32[6,64,3], index: 8, kind: input, shape index: {}]   ;;  %s11890_s9 = inlined_call_operand.vmem [shape: f32[6,64,1], index: 9, kind: input, shape index: {}]   ;;  %s11891_s10 = inlined_call_operand.vmem [shape: f32[5,64,64], index: 10, kind: input, shape index: {}]   ;;  %s11892_s11 = inlined_call_operand.vmem [shape: f32[5,64,1], index: 11, kind: input, shape index: {}]   ;;  %s11893_s12 = inlined_call_operand.vmem [shape: f32[32,64], index: 12, kind: input, shape index: {}]   ;;  %s11894_s13 = inlined_call_operand.vmem [shape: f32[32,1], index: 13, kind: input, shape index: {}]   ;;  %s11895_s14 = inlined_call_operand.vmem [shape: f32[128,32], index: 14, kind: input, shape index: {}]   ;;  %s11896_s15 = inlined_call_operand.vmem [shape: f32[128,1], index: 15, kind: input, shape index: {}]   ;;  %s11897_s16 = inlined_call_operand.hbm [shape: f32[2,128,128], index: 16, kind: output, shape index: {}]  }
   0x1   :  { %11945 = sst [smem:[#allocation17_spill]] %s11881_s0 }
   0x2   :  { %11946 = sst [smem:[#allocation18_spill]] %s11882_s1 }
   0x3   :  { %21 = vsyncpa [#allocation4], 0 }
   0x4   :  { %22 = vsyncpa [#allocation3], 0 }
   0x5   :  { %24 = vsyncpa [#allocation3 + $0x1], 0  ;;  %s8544_s21 = smov 0   ;;  %s8546_s22 = smov 0  }
   0x6   :  { %s8548_s23 = smov 0   ;;  %s8550_s24 = smov 0  }
   0x7 LB: > { %11947 = sst [smem:[#allocation8_spill]] %s8440_s23  ;;  %s8565_s25 = sadd.s32 4294967295, %s8444_s24   ;;  %s8444_s24 = sphi %s8550_s24, %s11990_s24   ;;  %s8440_s23 = sphi %s8548_s23, %s11992_s23   ;;  %s8436_s22 = sphi %s8546_s22, %s11994_s22   ;;  %s8432_s21 = sphi %s8544_s21, %s11993_s21  }
   0x8   : > { %s6833_s26 = sadd.s32 4294967294, %s8444_s24   ;;  %s8569_s27 = sadd.s32 1, %s8444_s24  }
   0x9   : > { %11948 = sst [smem:[#allocation9_spill]] %s8569_s27  ;;  %s378_s28 = sadd.s32 1, %s8440_s23 }
   0xa   : > { %s375_s29 = ssub.s32 %s8444_s24, %s8569_s27  ;;  %p388_p0 = scmp.ne.s32.totalorder %s8440_s23, %s8436_s22 }
   0xb   : > { %p376_p1 = scmp.eq.s32.totalorder %s375_s29, 0  ;;  %p389_p2 = scmp.eq.s32.totalorder %s8565_s25, 1 }
   0xc   : > { %p394_p3 = scmp.ne.s32.totalorder %s8436_s22, %s8432_s21  ;;  %p395_p4 = scmp.eq.s32.totalorder %s6833_s26, 1 }
   0xd   : > { %s8580_s30 = scalar_select %p376_p1, %s8440_s23, %s378_s28  }
   0xe   : > { %p8582_p5 = por %p389_p2, %p388_p0  ;;  %p8586_p6 = por %p395_p4, %p394_p3 }
   0xf   : > { %11949 = sst [smem:[#allocation10_spill]] %s8580_s30  ;;  %p6834_p7 = scmp.ge.s32.totalorder %s8444_s24, 1 }
  0x10   : > { %p402_p8 = scmp.lt.s32.totalorder %s8444_s24, 3  ;;  %p8107_p9 = scmp.eq.s32.totalorder %s8565_s25, 0 }
  0x11   : > { %s11953_s26 = sld [smem:[#allocation17_spill]] }
  0x12   : > { %p8593_p10 = pnand %p6834_p7, %p402_p8 }
  0x14   : > { %p8099_p11 = pneg %p8593_p10 }
  0x16   : > { %p8100_p12 = pnand %p8107_p9, %p8099_p11 }
  0x17   : > { %s415_s28 = sshll.u32 %s11953_s26, 4  ;;  %s416_s28 = int_to_ptr.vmem [resolvable:$true] %s415_s28 }
  0x18   : > { %s8363_s29 = scalar_lea.vmem %s416_s28, 16  ;;  %p8365_p0 = pneg %p8100_p12 }
  0x19   : > { %p8364_p13 = scmp.ne.s32.totalorder %s416_s28, %s8363_s29  ;;  %p8371_p3 = scmp.lt.s32.totalorder %s416_s28, %s416_s28 }
  0x1a   : > { %p8372_p4 = scmp.lt.s32.totalorder %s8363_s29, %s8363_s29 }
  0x1b   : > { %p8366_p1 = pnand %p8365_p0, %p8364_p13 }
  0x1c   : > { %p8373_p7 = por %p8372_p4, %p8371_p3 }
  0x1d   : > { %p8367_p2 = pneg %p8366_p1 }
  0x1f   : > { %p8374_p8 = pnand %p8373_p7, %p8367_p2 }
  0x21   : > { %8377 = shalt.err (!%p8374_p8)
}
  0x22   : > { %s8446_s30 = smov [#allocation2]   ;;  %478 = sbr.rel (%p8593_p10) target bundleno = 7537 (0x1d71), region = 84 }
  0x23   : > { %8102 = dma.vmem_to_smem (!%p8100_p12), %s416_s28, 16, %s8446_s30, [#allocation4]  }
  0x29   : > { %8423 = dma.done.wait (%p8107_p9), [#allocation4], 16  }
  0x2a   : > { %8425 = vsyncadd (%p8107_p9), [#allocation4], 4294967280 }
  0x2b   : > { %484 = sfence }
  0x2c   : > { %p529_p11 = scmp.lt.s32.totalorder %s8565_s25, 1  ;;  %s11954_s1 = sld [smem:[#allocation18_spill]]  ;;  %v633_v30 = vld [vmem:[%s11883_s2] sm:$0xff]  ;;  %vm661_vm0 = vcmask 523264   ;;  %v11903_v32 = vmov 0   ;;  %v638_v33 = vld [vmem:[%s11884_s3 + $0x8] sm:$0xff] }
  0x2d   : > { %7505 = vmatprep.mubr.msk.f32.mxu0 %vm661_vm0, %v633_v30  ;;  %v637_v31 = vld [vmem:[%s11884_s3] sm:$0xff]  ;;  %8154 = vset.pattern.permute.xlu1 %v11903_v32  ;;  %v639_v34 = vld [vmem:[%s11884_s3 + $0x10] sm:$0xff]  ;;  %v640_v35 = vld [vmem:[%s11884_s3 + $0x18] sm:$0xff]  ;;  %vm815_vm1 = vcmask 261120   ;;  %s945_s30 = sld [smem:[#allocation2]]  ;;  %s11909_s28 = smov 1  }
  0x2e   : > { %s530_s19 = scalar_select %p529_p11, %s8565_s25, 1  ;;  %8155 = vset.pattern.permute.xlu0 %v11903_v32  ;;  %643 = vperm.xlu1 %8154, %v637_v31   ;;  %v767_v36 = vld [vmem:[%s11886_s5] sm:$0xff]  ;;  %v768_v37 = vld [vmem:[%s11886_s5 + $0x8] sm:$0xff]  ;;  %v769_v40 = vld [vmem:[%s11886_s5 + $0x10] sm:$0xff] }
  0x2f   : > { %v770_v45 = vld [vmem:[%s11886_s5 + $0x18] sm:$0xff]  ;;  %v771_v50 = vld [vmem:[%s11886_s5 + $0x20] sm:$0xff]  ;;  %v772_v54 = vld [vmem:[%s11886_s5 + $0x28] sm:$0xff]  ;;  %s6854_s27 = sld [smem:[#allocation2 + $0x1]] }
  0x30   : > { %s7291_s20 = sshll.u32 %s530_s19, 6  ;;  %v773_v56 = vld [vmem:[%s11886_s5 + $0x30] sm:$0xff]  ;;  %v774_v57 = vld [vmem:[%s11886_s5 + $0x38] sm:$0xff] }
  0x32   : > { %s533_s23 = scalar_lea.vmem %s11954_s1, %s7291_s20  ;;  %648 = vperm.xlu1 %8154, %v638_v33  }
  0x33   : > { %v8615_v0 = vld [vmem:[%s533_s23] sm:$0xff]  ;;  %v8617_v1 = vld [vmem:[%s533_s23 + $0x8] sm:$0xff]  ;;  %v8619_v2 = vld [vmem:[%s533_s23 + $0x10] sm:$0xff] }
  0x34   : > { %v568_v3 = vadd.f32 %v8617_v1, %v8615_v0  ;;  %v586_v4 = vmul.f32 %v8615_v0, %v8615_v0  ;;  %v587_v5 = vmul.f32 %v8617_v1, %v8617_v1  ;;  %v588_v6 = vmul.f32 %v8619_v2, %v8619_v2  ;;  %v8629_v7 = vld [vmem:[%s533_s23 + $0x18] sm:$0xff]  ;;  %v8634_v11 = vld [vmem:[%s533_s23 + $0x20] sm:$0xff]  ;;  %v8639_v15 = vld [vmem:[%s533_s23 + $0x28] sm:$0xff] }
  0x35   : > { %v589_v9 = vmul.f32 %v8629_v7, %v8629_v7  ;;  %v590_v13 = vmul.f32 %v8634_v11, %v8634_v11  ;;  %v591_v17 = vmul.f32 %v8639_v15, %v8639_v15  ;;  %v8644_v19 = vld [vmem:[%s533_s23 + $0x30] sm:$0xff]  ;;  %v8649_v23 = vld [vmem:[%s533_s23 + $0x38] sm:$0xff] }
  0x36   : > { %v569_v8 = vadd.f32 %v568_v3, %v8619_v2  ;;  %v594_v10 = vadd.f32 %v587_v5, %v586_v4  ;;  %v592_v21 = vmul.f32 %v8644_v19, %v8644_v19  ;;  %v593_v25 = vmul.f32 %v8649_v23, %v8649_v23  ;;  %658 = vperm.xlu1 %8154, %v640_v35  }
  0x38   : > { %v570_v12 = vadd.f32 %v569_v8, %v8629_v7  ;;  %v595_v14 = vadd.f32 %v594_v10, %v588_v6 }
  0x3a   : > { %v571_v16 = vadd.f32 %v570_v12, %v8634_v11  ;;  %v596_v18 = vadd.f32 %v595_v14, %v589_v9  ;;  %777 = vperm.xlu1 %8154, %v767_v36  }
  0x3c   : > { %v572_v20 = vadd.f32 %v571_v16, %v8639_v15  ;;  %v597_v22 = vadd.f32 %v596_v18, %v590_v13 }
  0x3e   : > { %v573_v24 = vadd.f32 %v572_v20, %v8644_v19  ;;  %v598_v26 = vadd.f32 %v597_v22, %v591_v17  ;;  %782 = vperm.xlu1 %8154, %v768_v37  }
  0x40   : > { %v574_v27 = vadd.f32 %v573_v24, %v8649_v23  ;;  %v599_v28 = vadd.f32 %v598_v26, %v592_v21 }
  0x42   : > { %575 = vadd.xlane.f32.xlu0 %v574_v27  ;;  %v600_v29 = vadd.f32 %v599_v28, %v593_v25  ;;  %787 = vperm.xlu1 %8154, %v769_v40  }
  0x46   : > { %601 = vadd.xlane.f32.xlu0 %v600_v29  ;;  %792 = vperm.xlu1 %8154, %v770_v45   ;;  %v763_v45 = vld [vmem:[%s11885_s4 + $0x20] sm:$0xff] }
  0x4a   : > { %797 = vperm.xlu1 %8154, %v771_v50  }
  0x4e   : > { %802 = vperm.xlu1 %8154, %v772_v54  }
  0x52   : > { %807 = vperm.xlu1 %8154, %v773_v56   ;;  %v954_v56 = vstv %s945_s30  ;;  %s6887_s30 = sld [smem:[#allocation2 + $0x2]] }
  0x56   : > { %812 = vperm.xlu1 %8154, %v774_v57  }
  0x5c   : > { %653 = vperm.xlu0 %8155, %v639_v34  }
  0xad   : > { %v644_v27 = vpop.permute.xlu1 %643 }
  0xb1   : > { %v649_v28 = vpop.permute.xlu1 %648 }
  0xb5   : > { %v659_v35 = vpop.permute.xlu1 %658 }
  0xcf   : > { %v576_v38 = vpop.xlane.xlu0 %575 }
  0xd0   : > { %v577_v39 = vrot.slane %v576_v38, 4 }
  0xd2   : > { %v578_v41 = vadd.f32 %v577_v39, %v576_v38 }
  0xd3   : > { %v602_v42 = vpop.xlane.xlu0 %601 }
  0xd4   : > { %v603_v43 = vrot.slane %v602_v42, 4  ;;  %v579_v44 = vrot.slane %v578_v41, 2 }
  0xd6   : > { %v604_v46 = vadd.f32 %v603_v43, %v602_v42  ;;  %v580_v47 = vadd.f32 %v579_v44, %v578_v41  ;;  %v760_v42 = vld [vmem:[%s11885_s4 + $0x8] sm:$0xff]  ;;  %v761_v43 = vld [vmem:[%s11885_s4 + $0x10] sm:$0xff]  ;;  %v762_v44 = vld [vmem:[%s11885_s4 + $0x18] sm:$0xff] }
  0xd8   : > { %v581_v48 = vrot.slane %v580_v47, 1  ;;  %v605_v49 = vrot.slane %v604_v46, 2 }
  0xda   : > { %v582_v51 = vadd.f32 %v581_v48, %v580_v47  ;;  %v606_v52 = vadd.f32 %v605_v49, %v604_v46  ;;  %v764_v46 = vld [vmem:[%s11885_s4 + $0x28] sm:$0xff]  ;;  %v765_v47 = vld [vmem:[%s11885_s4 + $0x30] sm:$0xff]  ;;  %v766_v48 = vld [vmem:[%s11885_s4 + $0x38] sm:$0xff]  ;;  %v778_v49 = vpop.permute.xlu1 %777 }
  0xdb   : > { %v654_v34 = vpop.permute.xlu0 %653 }
  0xdc   : > { %8041 = vpush %v582_v51  ;;  %v607_v53 = vrot.slane %v606_v52, 1 }
  0xde   : > { %v608_v55 = vadd.f32 %v607_v53, %v606_v52  ;;  %v783_v50 = vpop.permute.xlu1 %782 }
  0xe0   : > { %8043 = vpush %v608_v55 }
  0xe2   : > { %v788_v51 = vpop.permute.xlu1 %787 }
  0xe6   : > { %v793_v52 = vpop.permute.xlu1 %792 }
  0xea   : > { %v798_v53 = vpop.permute.xlu1 %797 }
  0xee   : > { %v803_v54 = vpop.permute.xlu1 %802 }
 0x10d   : > { %s8042_s26 = spop %8041 }
 0x10e   : > { %v584_v58 = vstv %s8042_s26  ;;  %s11907_s26 = smov 127  }
 0x10f   : > { %v585_v59 = vmul.f32 0.00012207031, %v584_v58 }
 0x111   : > { %s8044_s29 = spop %8043  ;;  %v612_v62 = vmul.f32 %v585_v59, %v585_v59  ;;  %v615_v5 = vsub.f32 %v8615_v0, %v585_v59  ;;  %v616_v6 = vsub.f32 %v8617_v1, %v585_v59  ;;  %v617_v8 = vsub.f32 %v8619_v2, %v585_v59 }
 0x112   : > { %v610_v60 = vstv %s8044_s29  ;;  %v618_v9 = vsub.f32 %v8629_v7, %v585_v59  ;;  %v619_v18 = vsub.f32 %v8634_v11, %v585_v59  ;;  %v620_v20 = vsub.f32 %v8639_v15, %v585_v59  ;;  %v634_v11 = vld [vmem:[%s11883_s2 + $0x8] sm:$0xff]  ;;  %v635_v15 = vld [vmem:[%s11883_s2 + $0x10] sm:$0xff]  ;;  %s11922_s29 = smov 2  }
 0x113   : > { %v611_v61 = vmul.f32 0.00012207031, %v610_v60  ;;  %v621_v1 = vsub.f32 %v8644_v19, %v585_v59  ;;  %v622_v2 = vsub.f32 %v8649_v23, %v585_v59  ;;  %v636_v19 = vld [vmem:[%s11883_s2 + $0x18] sm:$0xff]  ;;  %v759_v23 = vld [vmem:[%s11885_s4] sm:$0xff] }
 0x114   : > { %7519 = vmatprep.mubr.msk.f32.mxu1 %vm815_vm1, %v759_v23 }
 0x115   : > { %v613_v63 = vsub.f32 %v611_v61, %v612_v62 }
 0x117   : > { %v614_v3 = vmax.f32 %v613_v63, 0.0 }
 0x119   : > { %v623_v4 = vadd.f32 1e-08, %v614_v3 }
 0x11b   : > { %8273 = vrsqrt.f32 %v623_v4 }
 0x125   : > { %v8274_v10 = vpop.eup %8273 }
 0x126   : > { %v625_v12 = vmul.f32 %v8274_v10, %v615_v5  ;;  %v626_v13 = vmul.f32 %v8274_v10, %v616_v6  ;;  %v627_v14 = vmul.f32 %v8274_v10, %v617_v8  ;;  %v628_v16 = vmul.f32 %v8274_v10, %v618_v9  ;;  %v808_v5 = vpop.permute.xlu1 %807 }
 0x127   : > { %v629_v22 = vmul.f32 %v8274_v10, %v619_v18  ;;  %v630_v0 = vmul.f32 %v8274_v10, %v620_v20  ;;  %v631_v24 = vmul.f32 %v8274_v10, %v621_v1  ;;  %v632_v25 = vmul.f32 %v8274_v10, %v622_v2 }
 0x128   : > { %v7825_v17 = vpack.c.bf16 %v626_v13, %v625_v12  ;;  %v7829_v21 = vpack.c.bf16 %v628_v16, %v627_v14 }
 0x129   : > { %v7833_v7 = vpack.c.bf16 %v630_v0, %v629_v22  ;;  %v7837_v26 = vpack.c.bf16 %v632_v25, %v631_v24 }
 0x12a   : > { %7826 = vmatprep.subr.bf16.mxu0 %v7825_v17  ;;  %v813_v24 = vpop.permute.xlu1 %812 }
 0x12b   : > { %7828 = vmatpush3.bf16.msra.mxu0 %v7825_v17 }
 0x12c   : > { %7830 = vmatprep.subr.bf16.mxu0 %v7829_v21 }
 0x12f   : > { %7832 = vmatpush3.bf16.msra.mxu0 %v7829_v21 }
 0x130   : > { %7834 = vmatprep.subr.bf16.mxu0 %v7833_v7 }
 0x133   : > { %7836 = vmatpush3.bf16.msra.mxu0 %v7833_v7 }
 0x134   : > { %7838 = vmatprep.subr.bf16.mxu0 %v7837_v26 }
 0x137   : > { %7840 = vmatpush3.bf16.msra.mxu0 %v7837_v26 }
 0x13a   : > { %7506 = vmatmul.mubr.msk.f32.vlgmr.msra.gmra.mrb[0].mxu0 %vm661_vm0, %v634_v11 }
 0x13b   : > { %7508 = vmatprep.mubr.msk.f32.mxu0 %vm661_vm0, %v635_v15 }
 0x13e   : > { %7509 = vmatmul.mubr.msk.f32.gmra.mrb[2].mxu0 %vm661_vm0, %v636_v19 }
 0x20d   : > { %v7507_v29 = vpop.f32.mrb[0].mxu0 }
 0x20e   : > { %v8721_v30 = vadd.f32 %v7507_v29, %v649_v28  ;;  %v740_v31 = vpop.f32.mrb[1].mxu0 }
 0x20f   : > { %v8723_v33 = vadd.f32 %v740_v31, %v644_v27 }
 0x211   : > { %v7510_v36 = vpop.f32.mrb[2].mxu0  ;;  %v7841_v37 = vpack.c.bf16 %v8721_v30, %v8723_v33 }
 0x212   : > { %v8727_v38 = vadd.f32 %v7510_v36, %v659_v35  ;;  %v750_v39 = vpop.f32.mrb[3].mxu0 }
 0x213   : > { %v8729_v40 = vadd.f32 %v750_v39, %v654_v34  ;;  %7842 = vmatprep.subr.bf16.mxu1 %v7841_v37 }
 0x214   : > { %7844 = vmatpush3.bf16.msra.mxu1 %v7841_v37 }
 0x215   : > { %v7845_v41 = vpack.c.bf16 %v8727_v38, %v8729_v40 }
 0x217   : > { %7846 = vmatprep.subr.bf16.mxu1 %v7845_v41 }
 0x218   : > { %7848 = vmatpush3.bf16.msra.mxu1 %v7845_v41 }
 0x21b   : > { %7520 = vmatmul.mubr.msk.f32.vlgmr.msra.gmra.mrb[0].mxu1 %vm815_vm1, %v760_v42 }
 0x21c   : > { %7522 = vmatprep.mubr.msk.f32.mxu1 %vm815_vm1, %v761_v43 }
 0x21f   : > { %7523 = vmatmul.mubr.msk.f32.gmra.mrb[2].mxu1 %vm815_vm1, %v762_v44 }
 0x220   : > { %7525 = vmatprep.mubr.msk.f32.mxu1 %vm815_vm1, %v763_v45 }
 0x223   : > { %7526 = vmatmul.mubr.msk.f32.gmra.mrb[4].mxu1 %vm815_vm1, %v764_v46 }
 0x224   : > { %7528 = vmatprep.mubr.msk.f32.mxu1 %vm815_vm1, %v765_v47 }
 0x227   : > { %7529 = vmatmul.mubr.msk.f32.gmra.mrb[6].mxu1 %vm815_vm1, %v766_v48 }
 0x2ee   : > { %v7521_v55 = vpop.f32.mrb[0].mxu1 }
 0x2ef   : > { %v912_v57 = vadd.f32 %v7521_v55, %v783_v50  ;;  %v906_v58 = vpop.f32.mrb[1].mxu1  ;;  %v1037_v55 = vld [vmem:[%s11887_s6 + $0x8] sm:$0xff] }
 0x2f0   : > { %v907_v59 = vadd.f32 %v906_v58, %v778_v49  ;;  %v1039_v58 = vld [vmem:[%s11887_s6 + $0x18] sm:$0xff] }
 0x2f1   : > { %vm947_vm2 = vcmp.ge.f32.partialorder %v912_v57, 0.0  ;;  %v956_v60 = vmul.f32 %v954_v56, %v912_v57 }
 0x2f2   : > { %vm946_vm3 = vcmp.ge.f32.partialorder %v907_v59, 0.0  ;;  %v955_v61 = vmul.f32 %v954_v56, %v907_v59  ;;  %v7524_v62 = vpop.f32.mrb[2].mxu1 }
 0x2f3   : > { %v8761_v63 = vsel %vm947_vm2, %v912_v57, %v956_v60  ;;  %v922_v3 = vadd.f32 %v7524_v62, %v793_v52  ;;  %v916_v4 = vpop.f32.mrb[3].mxu1  ;;  %v1093_v57 = vld [vmem:[%s11888_s7 + $0x8] sm:$0xff]  ;;  %v1040_v60 = vld [vmem:[%s11887_s6 + $0x20] sm:$0xff] }
 0x2f4   : > { %v990_v6 = vmul.f32 %v8761_v63, %v8761_v63  ;;  %v8765_v8 = vsel %vm946_vm3, %v907_v59, %v955_v61  ;;  %v917_v9 = vadd.f32 %v916_v4, %v788_v51  ;;  %v1094_v59 = vld [vmem:[%s11888_s7 + $0x10] sm:$0xff]  ;;  %v1095_v61 = vld [vmem:[%s11888_s7 + $0x18] sm:$0xff]  ;;  %v1041_v62 = vld [vmem:[%s11887_s6 + $0x28] sm:$0xff] }
 0x2f5   : > { %v989_v10 = vmul.f32 %v8765_v8, %v8765_v8  ;;  %v958_v12 = vmul.f32 %v954_v56, %v922_v3  ;;  %vm949_vm4 = vcmp.ge.f32.partialorder %v922_v3, 0.0  ;;  %v971_v16 = vadd.f32 %v8761_v63, %v8765_v8  ;;  %v1042_v4 = vld [vmem:[%s11887_s6 + $0x30] sm:$0xff] }
 0x2f6   : > { %vm948_vm5 = vcmp.ge.f32.partialorder %v917_v9, 0.0  ;;  %v957_v13 = vmul.f32 %v954_v56, %v917_v9  ;;  %v7527_v14 = vpop.f32.mrb[4].mxu1 }
 0x2f7   : > { %v932_v17 = vadd.f32 %v7527_v14, %v803_v54  ;;  %v926_v18 = vpop.f32.mrb[5].mxu1  ;;  %v997_v20 = vadd.f32 %v990_v6, %v989_v10  ;;  %v8773_v0 = vsel %vm949_vm4, %v922_v3, %v958_v12  ;;  %v1038_v54 = vld [vmem:[%s11887_s6 + $0x10] sm:$0xff]  ;;  %v1096_v3 = vld [vmem:[%s11888_s7 + $0x20] sm:$0xff]  ;;  %v1043_v6 = vld [vmem:[%s11887_s6 + $0x38] sm:$0xff]  ;;  %v11905_v14 = vmov 1  }
 0x2f8   : > { %v8771_v21 = vsel %vm948_vm5, %v917_v9, %v957_v13  ;;  %v927_v22 = vadd.f32 %v926_v18, %v798_v53  ;;  %v992_v27 = vmul.f32 %v8773_v0, %v8773_v0  ;;  %v1036_v53 = vld [vmem:[%s11887_s6] sm:$0xff]  ;;  %v1098_v9 = vld [vmem:[%s11888_s7 + $0x30] sm:$0xff]  ;;  %v1099_v10 = vld [vmem:[%s11888_s7 + $0x38] sm:$0xff] }
 0x2f9   : > { %v972_v1 = vadd.f32 %v971_v16, %v8771_v21  ;;  %v991_v2 = vmul.f32 %v8771_v21, %v8771_v21  ;;  %v960_v7 = vmul.f32 %v954_v56, %v932_v17  ;;  %vm951_vm6 = vcmp.ge.f32.partialorder %v932_v17, 0.0  ;;  %v1149_v12 = vld [vmem:[%s11889_s8 + $0x8] sm:$0xff]  ;;  %v1148_v13 = vld [vmem:[%s11889_s8] sm:$0xff]  ;;  %v1150_v16 = vld [vmem:[%s11889_s8 + $0x10] sm:$0xff] }
 0x2fa   : > { %vm950_vm7 = vcmp.ge.f32.partialorder %v927_v22, 0.0  ;;  %v959_v25 = vmul.f32 %v954_v56, %v927_v22  ;;  %v7530_v26 = vpop.f32.mrb[6].mxu1  ;;  %v1153_v18 = vld [vmem:[%s11889_s8 + $0x28] sm:$0xff] }
 0x2fb   : > { %v998_v11 = vadd.f32 %v997_v20, %v991_v2  ;;  %v973_v15 = vadd.f32 %v972_v1, %v8773_v0  ;;  %v942_v19 = vadd.f32 %v7530_v26, %v813_v24  ;;  %v936_v23 = vpop.f32.mrb[7].mxu1  ;;  %v8783_v31 = vsel %vm951_vm6, %v932_v17, %v960_v7  ;;  %v1152_v17 = vld [vmem:[%s11889_s8 + $0x20] sm:$0xff]  ;;  %v1154_v1 = vld [vmem:[%s11889_s8 + $0x30] sm:$0xff]  ;;  %v1157_v7 = vld [vmem:[%s11890_s9 + $0x8] sm:$0xff] }
 0x2fc   : > { %v8781_v28 = vsel %vm950_vm7, %v927_v22, %v959_v25  ;;  %v937_v29 = vadd.f32 %v936_v23, %v808_v5  ;;  %v994_v42 = vmul.f32 %v8783_v31, %v8783_v31  ;;  %v1097_v5 = vld [vmem:[%s11888_s7 + $0x28] sm:$0xff]  ;;  %v11901_v20 = vmov 2   ;;  %v1151_v22 = vld [vmem:[%s11889_s8 + $0x18] sm:$0xff]  ;;  %v1156_v2 = vld [vmem:[%s11890_s9] sm:$0xff] }
 0x2fd   : > { %v974_v34 = vadd.f32 %v973_v15, %v8781_v28  ;;  %v993_v35 = vmul.f32 %v8781_v28, %v8781_v28  ;;  %v962_v36 = vmul.f32 %v954_v56, %v942_v19  ;;  %vm953_vm8 = vcmp.ge.f32.partialorder %v942_v19, 0.0  ;;  %v1158_v24 = vld [vmem:[%s11890_s9 + $0x10] sm:$0xff]  ;;  %v1155_v25 = vld [vmem:[%s11889_s8 + $0x38] sm:$0xff]  ;;  %v1161_v26 = vld [vmem:[%s11890_s9 + $0x28] sm:$0xff] }
 0x2fe   : > { %vm952_vm9 = vcmp.ge.f32.partialorder %v937_v29, 0.0  ;;  %v961_v37 = vmul.f32 %v954_v56, %v937_v29  ;;  %v999_v39 = vadd.f32 %v998_v11, %v992_v27  ;;  %v1092_v56 = vld [vmem:[%s11888_s7] sm:$0xff]  ;;  %v1159_v11 = vld [vmem:[%s11890_s9 + $0x18] sm:$0xff] }
 0x2ff   : > { %v975_v41 = vadd.f32 %v974_v34, %v8783_v31  ;;  %v8793_v45 = vsel %vm953_vm8, %v942_v19, %v962_v36  ;;  %v1160_v15 = vld [vmem:[%s11890_s9 + $0x20] sm:$0xff] }
 0x300   : > { %v8791_v43 = vsel %vm952_vm9, %v937_v29, %v961_v37  ;;  %v1000_v44 = vadd.f32 %v999_v39, %v993_v35  ;;  %v996_v50 = vmul.f32 %v8793_v45, %v8793_v45 }
 0x301   : > { %v976_v46 = vadd.f32 %v975_v41, %v8791_v43  ;;  %v995_v47 = vmul.f32 %v8791_v43, %v8791_v43 }
 0x302   : > { %v1001_v48 = vadd.f32 %v1000_v44, %v994_v42 }
 0x303   : > { %v977_v49 = vadd.f32 %v976_v46, %v8793_v45 }
 0x304   : > { %v1002_v51 = vadd.f32 %v1001_v48, %v995_v47 }
 0x305   : > { %978 = vadd.xlane.f32.xlu1 %v977_v49 }
 0x306   : > { %v1003_v52 = vadd.f32 %v1002_v51, %v996_v50 }
 0x308   : > { %1004 = vadd.xlane.f32.xlu0 %v1003_v52 }
 0x316   : > { %1046 = vperm.xlu1 %8154, %v1036_v53  }
 0x31a   : > { %1056 = vperm.xlu1 %8154, %v1038_v54  }
 0x31e   : > { %1051 = vperm.xlu0 %8155, %v1037_v55   ;;  %1102 = vperm.xlu1 %8154, %v1092_v56  }
 0x322   : > { %1107 = vperm.xlu0 %8155, %v1093_v57   ;;  %1061 = vperm.xlu1 %8154, %v1039_v58  }
 0x326   : > { %1112 = vperm.xlu0 %8155, %v1094_v59   ;;  %1066 = vperm.xlu1 %8154, %v1040_v60  }
 0x32a   : > { %1117 = vperm.xlu0 %8155, %v1095_v61   ;;  %1071 = vperm.xlu1 %8154, %v1041_v62  }
 0x32e   : > { %1122 = vperm.xlu0 %8155, %v1096_v3   ;;  %1076 = vperm.xlu1 %8154, %v1042_v4  }
 0x332   : > { %1127 = vperm.xlu0 %8155, %v1097_v5   ;;  %1081 = vperm.xlu1 %8154, %v1043_v6  }
 0x336   : > { %1132 = vperm.xlu0 %8155, %v1098_v9   ;;  %1137 = vperm.xlu1 %8154, %v1099_v10  }
 0x33a   : > { %1197 = vperm.xlu1 %8154, %v1149_v12   ;;  %8156 = vset.pattern.permute.xlu0 %v11905_v14 }
 0x33b   : > { %1239 = vperm.xlu0 %8156, %v1148_v13  }
 0x33e   : > { %8157 = vset.pattern.permute.xlu1 %v11905_v14 }
 0x33f   : > { %1243 = vperm.xlu1 %8157, %v1149_v12   ;;  %1247 = vperm.xlu0 %8156, %v1150_v16  }
 0x343   : > { %8158 = vset.pattern.permute.xlu1 %v11903_v32  ;;  %1255 = vperm.xlu0 %8156, %v1152_v17  }
 0x344   : > { %1202 = vperm.xlu1 %8158, %v1150_v16  }
 0x347   : > { %1259 = vperm.xlu0 %8156, %v1153_v18  }
 0x348   : > { %8159 = vset.pattern.permute.xlu1 %v11901_v20 }
 0x349   : > { %1313 = vperm.xlu1 %8159, %v1148_v13  }
 0x34b   : > { %8165 = vset.pattern.permute.xlu0 %v11901_v20 }
 0x34c   : > { %1317 = vperm.xlu0 %8165, %v1149_v12  }
 0x34d   : > { %8160 = vset.pattern.permute.xlu1 %v11903_v32 }
 0x34e   : > { %1207 = vperm.xlu1 %8160, %v1151_v22  }
 0x350   : > { %1321 = vperm.xlu0 %8165, %v1150_v16  }
 0x352   : > { %8161 = vset.pattern.permute.xlu1 %v11905_v14 }
 0x353   : > { %1251 = vperm.xlu1 %8161, %v1151_v22  }
 0x354   : > { %1329 = vperm.xlu0 %8165, %v1152_v17  }
 0x357   : > { %8162 = vset.pattern.permute.xlu1 %v11903_v32 }
 0x358   : > { %1212 = vperm.xlu1 %8162, %v1152_v17   ;;  %1333 = vperm.xlu0 %8165, %v1153_v18  }
 0x35c   : > { %8163 = vset.pattern.permute.xlu1 %v11901_v20  ;;  %1337 = vperm.xlu0 %8165, %v1154_v1  }
 0x35d   : > { %1325 = vperm.xlu1 %8163, %v1151_v22  }
 0x360   : > { %8169 = vset.pattern.permute.xlu0 %v11903_v32 }
 0x361   : > { %8164 = vset.pattern.permute.xlu1 %v11903_v32  ;;  %1192 = vperm.xlu0 %8169, %v1148_v13  }
 0x362   : > { %1362 = vperm.xlu1 %8164, %v1156_v2  }
 0x365   : > { %1367 = vperm.xlu0 %8169, %v1157_v7  }
 0x366   : > { %1217 = vperm.xlu1 %8164, %v1153_v18  }
 0x369   : > { %1222 = vperm.xlu0 %8169, %v1154_v1  }
 0x36a   : > { %1372 = vperm.xlu1 %8164, %v1158_v24  }
 0x36d   : > { %1227 = vperm.xlu0 %8169, %v1155_v25  }
 0x36e   : > { %8166 = vset.pattern.permute.xlu1 %v11905_v14 }
 0x36f   : > { %1263 = vperm.xlu1 %8166, %v1154_v1  }
 0x371   : > { %1387 = vperm.xlu0 %8169, %v1161_v26   ;;  %v1162_v26 = vld [vmem:[%s11890_s9 + $0x30] sm:$0xff] }
 0x373   : > { %8167 = vset.pattern.permute.xlu1 %v11903_v32 }
 0x374   : > { %1377 = vperm.xlu1 %8167, %v1159_v11  }
 0x378   : > { %8168 = vset.pattern.permute.xlu1 %v11905_v14 }
 0x379   : > { %1267 = vperm.xlu1 %8168, %v1155_v25  }
 0x37d   : > { %8170 = vset.pattern.permute.xlu1 %v11903_v32 }
 0x37e   : > { %1382 = vperm.xlu1 %8170, %v1160_v15  }
 0x382   : > { %8171 = vset.pattern.permute.xlu1 %v11901_v20 }
 0x383   : > { %1341 = vperm.xlu1 %8171, %v1155_v25  }
 0x387   : > { %8172 = vset.pattern.permute.xlu1 %v11903_v32 }
 0x392   : > { %v979_v19 = vpop.xlane.xlu1 %978 }
 0x393   : > { %v980_v23 = vrot.slane %v979_v19, 4 }
 0x395   : > { %v981_v27 = vadd.f32 %v980_v23, %v979_v19  ;;  %v1005_v29 = vpop.xlane.xlu0 %1004 }
 0x396   : > { %v1006_v34 = vrot.slane %v1005_v29, 4  ;;  %v1047_v48 = vpop.permute.xlu1 %1046 }
 0x397   : > { %v982_v35 = vrot.slane %v981_v27, 2 }
 0x398   : > { %v1007_v36 = vadd.f32 %v1006_v34, %v1005_v29 }
 0x399   : > { %v983_v37 = vadd.f32 %v982_v35, %v981_v27 }
 0x39a   : > { %v1008_v39 = vrot.slane %v1007_v36, 2  ;;  %v1057_v50 = vpop.permute.xlu1 %1056 }
 0x39b   : > { %v984_v41 = vrot.slane %v983_v37, 1 }
 0x39c   : > { %v1009_v42 = vadd.f32 %v1008_v39, %v1007_v36 }
 0x39d   : > { %v985_v44 = vadd.f32 %v984_v41, %v983_v37  ;;  %v1052_v52 = vpop.permute.xlu0 %1051 }
 0x39e   : > { %v1010_v46 = vrot.slane %v1009_v42, 1  ;;  %v1103_v57 = vpop.permute.xlu1 %1102 }
 0x39f   : > { %8045 = vpush %v985_v44 }
 0x3a0   : > { %v1011_v47 = vadd.f32 %v1010_v46, %v1009_v42 }
 0x3a1   : > { %v1108_v59 = vpop.permute.xlu0 %1107 }
 0x3a2   : > { %8047 = vpush %v1011_v47  ;;  %v1062_v61 = vpop.permute.xlu1 %1061 }
 0x3a5   : > { %v1113_v62 = vpop.permute.xlu0 %1112 }
 0x3a6   : > { %v1067_v3 = vpop.permute.xlu1 %1066 }
 0x3a9   : > { %v1118_v4 = vpop.permute.xlu0 %1117 }
 0x3aa   : > { %v1072_v17 = vpop.permute.xlu1 %1071 }
 0x3ad   : > { %v1123_v2 = vpop.permute.xlu0 %1122 }
 0x3b1   : > { %v1128_v19 = vpop.permute.xlu0 %1127 }
 0x3d0   : > { %s8046_s18 = spop %8045 }
 0x3d1   : > { %v987_v49 = vstv %s8046_s18 }
 0x3d2   : > { %v8908_v51 = vmul.f32 0.00012207031, %v987_v49 }
 0x3d3   : > { %s8048_s23 = spop %8047 }
 0x3d4   : > { %v1013_v53 = vstv %s8048_s23  ;;  %v1015_v54 = vmul.f32 %v8908_v51, %v8908_v51  ;;  %v1018_v5 = vsub.f32 %v8765_v8, %v8908_v51  ;;  %v1020_v6 = vsub.f32 %v8771_v21, %v8908_v51  ;;  %v1077_v21 = vpop.permute.xlu1 %1076 }
 0x3d5   : > { %v1014_v55 = vmul.f32 0.00012207031, %v1013_v53  ;;  %v1019_v10 = vsub.f32 %v8761_v63, %v8908_v51  ;;  %v1022_v22 = vsub.f32 %v8781_v28, %v8908_v51  ;;  %v1024_v63 = vsub.f32 %v8791_v43, %v8908_v51 }
 0x3d6   : > { %v1021_v23 = vsub.f32 %v8773_v0, %v8908_v51  ;;  %v1025_v43 = vsub.f32 %v8793_v45, %v8908_v51  ;;  %v1133_v0 = vpop.permute.xlu0 %1132  ;;  %v1023_v46 = vsub.f32 %v8783_v31, %v8908_v51  ;;  %v1163_v51 = vld [vmem:[%s11890_s9 + $0x38] sm:$0xff] }
 0x3d7   : > { %v1016_v56 = vsub.f32 %v1014_v55, %v1015_v54 }
 0x3d8   : > { %v1082_v36 = vpop.permute.xlu1 %1081 }
 0x3d9   : > { %v1017_v58 = vmax.f32 %v1016_v56, 0.0 }
 0x3da   : > { %v1240_v56 = vpop.permute.xlu0 %1239 }
 0x3db   : > { %v1026_v60 = vadd.f32 1e-08, %v1017_v58 }
 0x3dc   : > { %v1138_v45 = vpop.permute.xlu1 %1137 }
 0x3dd   : > { %8275 = vrsqrt.f32 %v1026_v60 }
 0x3de   : > { %v1248_v58 = vpop.permute.xlu0 %1247 }
 0x3e2   : > { %v8988_v60 = vpop.permute.xlu0 %1255 }
 0x3e7   : > { %v8276_v9 = vpop.eup %8275 }
 0x3e8   : > { %v1028_v12 = vmul.f32 %v8276_v9, %v1018_v5  ;;  %v1030_v13 = vmul.f32 %v8276_v9, %v1020_v6  ;;  %v1029_v16 = vmul.f32 %v8276_v9, %v1019_v10  ;;  %v1032_v24 = vmul.f32 %v8276_v9, %v1022_v22 }
 0x3e9   : > { %v1034_v15 = vmul.f32 %v8276_v9, %v1024_v63  ;;  %v1031_v27 = vmul.f32 %v8276_v9, %v1021_v23  ;;  %v1035_v35 = vmul.f32 %v8276_v9, %v1025_v43  ;;  %v1033_v47 = vmul.f32 %v8276_v9, %v1023_v46 }
 0x3ea   : > { %v1084_v18 = vmul.f32 %v1047_v48, %v1028_v12  ;;  %v1085_v1 = vmul.f32 %v1052_v52, %v1029_v16  ;;  %v1086_v8 = vmul.f32 %v1057_v50, %v1030_v13  ;;  %v1088_v11 = vmul.f32 %v1067_v3, %v1032_v24  ;;  %v1198_v48 = vpop.permute.xlu1 %1197 }
 0x3eb   : > { %v1090_v34 = vmul.f32 %v1077_v21, %v1034_v15  ;;  %v1087_v37 = vmul.f32 %v1062_v61, %v1031_v27  ;;  %v1091_v41 = vmul.f32 %v1082_v36, %v1035_v35  ;;  %v1089_v49 = vmul.f32 %v1072_v17, %v1033_v47 }
 0x3ec   : > { %v8920_v7 = vadd.f32 %v1103_v57, %v1084_v18  ;;  %v8922_v25 = vadd.f32 %v1108_v59, %v1085_v1  ;;  %v8930_v28 = vadd.f32 %v1113_v62, %v1086_v8  ;;  %v8941_v29 = vadd.f32 %v1123_v2, %v1088_v11  ;;  %v8992_v62 = vpop.permute.xlu0 %1259 }
 0x3ed   : > { %v8947_v39 = vadd.f32 %v1133_v0, %v1090_v34  ;;  %v8953_v42 = vadd.f32 %v1118_v4, %v1087_v37  ;;  %v8955_v44 = vadd.f32 %v1138_v45, %v1091_v41  ;;  %v8969_v52 = vadd.f32 %v1128_v19, %v1089_v49 }
 0x3ee   : > { %1164 = vrot.lane.b32.xlu1 %v8920_v7, %s11909_s28  ;;  %1166 = vrot.lane.b32.xlu0 %v8922_v25, %s11909_s28  ;;  %v1244_v50 = vpop.permute.xlu1 %1243 }
 0x3ef   : > { %v1271_v49 = vmul.f32 %v1244_v50, %v8922_v25 }
 0x3f0   : > { %v1318_v3 = vpop.permute.xlu0 %1317 }
 0x3f2   : > { %1168 = vrot.lane.b32.xlu1 %v8930_v28, %s11909_s28  ;;  %1392 = vperm.xlu0 %8169, %v1162_v26   ;;  %v1203_v53 = vpop.permute.xlu1 %1202  ;;  %v534_v26 = vlaneseq }
 0x3f4   : > { %v1322_v5 = vpop.permute.xlu0 %1321  ;;  %v9018_v15 = vand.u32 127, %v534_v26 }
 0x3f6   : > { %1286 = vrot.lane.b32.xlu1 %v8920_v7, %s11907_s26  ;;  %1294 = vrot.lane.b32.xlu0 %v8941_v29, %s11907_s26  ;;  %v1314_v31 = vpop.permute.xlu1 %1313  ;;  %11955 = vst [vmem:[#allocation11_spill] sm:$0xff] %v9018_v15  ;;  %v9023_v43 = vadd.s32 4294967295, %v9018_v15  ;;  %v9027_v35 = vadd.s32 1, %v9018_v15 }
 0x3f8   : > { %v8998_v9 = vpop.permute.xlu0 %1329  ;;  %11956 = vst [vmem:[#allocation12_spill] sm:$0xff] %v9023_v43  ;;  %vm537_vm10 = vcmp.ge.s32.totalorder %v9023_v43, 0  ;;  %11957 = vst [vmem:[#allocation13_spill] sm:$0xff] %v9027_v35  ;;  %vm542_vm11 = vcmp.lt.s32.totalorder %v9027_v35, 128 }
 0x3fa   : > { %1288 = vrot.lane.b32.xlu1 %v8922_v25, %s11907_s26  ;;  %1298 = vrot.lane.b32.xlu0 %v8947_v39, %s11907_s26  ;;  %v1208_v54 = vpop.permute.xlu1 %1207 }
 0x3fc   : > { %v9004_v13 = vpop.permute.xlu0 %1333 }
 0x3fe   : > { %1170 = vrot.lane.b32.xlu1 %v8953_v42, %s11909_s28  ;;  %1300 = vrot.lane.b32.xlu0 %v8955_v44, %s11907_s26  ;;  %v8982_v55 = vpop.permute.xlu1 %1251 }
 0x400   : > { %v9008_v17 = vpop.permute.xlu0 %1337 }
 0x402   : > { %1290 = vrot.lane.b32.xlu1 %v8930_v28, %s11907_s26  ;;  %v8984_v57 = vpop.permute.xlu1 %1212 }
 0x404   : > { %v1193_v22 = vpop.permute.xlu0 %1192 }
 0x406   : > { %1172 = vrot.lane.b32.xlu1 %v8941_v29, %s11909_s28  ;;  %v8986_v59 = vpop.permute.xlu1 %1325 }
 0x408   : > { %v1368_v2 = vpop.permute.xlu0 %1367 }
 0x40a   : > { %1292 = vrot.lane.b32.xlu1 %v8953_v42, %s11907_s26  ;;  %v8990_v61 = vpop.permute.xlu1 %1362 }
 0x40c   : > { %v9014_v24 = vpop.permute.xlu0 %1222 }
 0x40e   : > { %1174 = vrot.lane.b32.xlu1 %v8969_v52, %s11909_s28  ;;  %v8994_v4 = vpop.permute.xlu1 %1217 }
 0x410   : > { %v9016_v21 = vpop.permute.xlu0 %1227 }
 0x412   : > { %1176 = vrot.lane.b32.xlu1 %v8947_v39, %s11909_s28  ;;  %v8996_v6 = vpop.permute.xlu1 %1372 }
 0x414   : > { %v9020_v23 = vpop.permute.xlu0 %1387 }
 0x416   : > { %1296 = vrot.lane.b32.xlu1 %v8969_v52, %s11907_s26  ;;  %v9000_v10 = vpop.permute.xlu1 %1263  ;;  %s6920_s26 = sld [smem:[#allocation2 + $0x3]] }
 0x41a   : > { %1178 = vrot.lane.b32.xlu1 %v8955_v44, %s11909_s28  ;;  %v9002_v12 = vpop.permute.xlu1 %1377  ;;  %s7133_s28 = sld [smem:[#allocation2 + $0x8]] }
 0x41e   : > { %1397 = vperm.xlu1 %8172, %v1163_v51   ;;  %v9006_v16 = vpop.permute.xlu1 %1267 }
 0x422   : > { %v9010_v18 = vpop.permute.xlu1 %1382 }
 0x426   : > { %v9012_v1 = vpop.permute.xlu1 %1341 }
 0x460   : > { %v1165_v8 = vpop.permute.xlu1 %1164  ;;  %v1167_v34 = vpop.permute.xlu0 %1166 }
 0x461   : > { %v1183_v0 = vsel %vm537_vm10, %v1167_v34, 0.0  ;;  %v1182_v46 = vsel %vm537_vm10, %v1165_v8, 0.0 }
 0x462   : > { %v1231_v45 = vmul.f32 %v1198_v48, %v1183_v0  ;;  %v1230_v20 = vmul.f32 %v1193_v22, %v1182_v46 }
 0x464   : > { %v1169_v63 = vpop.permute.xlu1 %1168  ;;  %v1279_v8 = vadd.f32 %v1271_v49, %v1231_v45 }
 0x465   : > { %v1184_v47 = vsel %vm537_vm10, %v1169_v63, 0.0  ;;  %v1270_v63 = vmul.f32 %v1240_v56, %v8920_v7 }
 0x468   : > { %v1287_v11 = vpop.permute.xlu1 %1286 }
 0x469   : > { %v1304_v51 = vsel %vm542_vm11, %v1287_v11, 0.0 }
 0x46a   : > { %v1344_v25 = vmul.f32 %v1314_v31, %v1304_v51 }
 0x46c   : > { %v1289_v19 = vpop.permute.xlu1 %1288 }
 0x46d   : > { %v1305_v41 = vsel %vm542_vm11, %v1289_v19, 0.0  ;;  %v1232_v19 = vmul.f32 %v1203_v53, %v1184_v47  ;;  %v1273_v53 = vmul.f32 %v8982_v55, %v8953_v42 }
 0x46e   : > { %v1345_v26 = vmul.f32 %v1318_v3, %v1305_v41  ;;  %v1272_v3 = vmul.f32 %v1248_v58, %v8930_v28  ;;  %v1278_v41 = vadd.f32 %v1270_v63, %v1230_v20 }
 0x470   : > { %v1171_v27 = vpop.permute.xlu1 %1170  ;;  %v1353_v22 = vadd.f32 %v1345_v26, %v1279_v8  ;;  %v1352_v31 = vadd.f32 %v1344_v25, %v1278_v41 }
 0x471   : > { %v1185_v32 = vsel %vm537_vm10, %v1171_v27, 0.0  ;;  %v9043_v14 = vpop.permute.xlu0 %1392 }
 0x472   : > { %v1233_v11 = vmul.f32 %v1208_v54, %v1185_v32  ;;  %v1401_v28 = vadd.f32 %v1368_v2, %v1353_v22  ;;  %v1400_v47 = vadd.f32 %v8990_v61, %v1352_v31 }
 0x474   : > { %v1291_v36 = vpop.permute.xlu1 %1290  ;;  %v1281_v58 = vadd.f32 %v1273_v53, %v1233_v11  ;;  %vm1410_vm12 = vcmp.ge.f32.partialorder %v1401_v28, 0.0  ;;  %vm1409_vm13 = vcmp.ge.f32.partialorder %v1400_v47, 0.0 }
 0x475   : > { %v1306_v48 = vsel %vm542_vm11, %v1291_v36, 0.0  ;;  %v1280_v36 = vadd.f32 %v1272_v3, %v1232_v19  ;;  %v1295_v56 = vpop.permute.xlu0 %1294 }
 0x476   : > { %v1346_v0 = vmul.f32 %v1322_v5, %v1306_v48  ;;  %v1274_v5 = vmul.f32 %v8988_v60, %v8941_v29  ;;  %v1308_v42 = vsel %vm542_vm11, %v1295_v56, 0.0 }
 0x477   : > { %v1348_v26 = vmul.f32 %v8998_v9, %v1308_v42 }
 0x478   : > { %v1173_v37 = vpop.permute.xlu1 %1172  ;;  %v1354_v32 = vadd.f32 %v1346_v0, %v1280_v36 }
 0x479   : > { %v1186_v46 = vsel %vm537_vm10, %v1173_v37, 0.0  ;;  %v9064_v37 = vstv %s6854_s27 }
 0x47a   : > { %v1234_v54 = vmul.f32 %v8984_v57, %v1186_v46  ;;  %v1275_v57 = vmul.f32 %v8992_v62, %v8969_v52  ;;  %v1419_v49 = vmul.f32 %v9064_v37, %v1401_v28  ;;  %v1402_v29 = vadd.f32 %v8996_v6, %v1354_v32 }
 0x47b   : > { %v1276_v62 = vmul.f32 %v9000_v10, %v8947_v39  ;;  %v1418_v6 = vmul.f32 %v9064_v37, %v1400_v47 }
 0x47c   : > { %v1293_v34 = vpop.permute.xlu1 %1292  ;;  %v1282_v60 = vadd.f32 %v1274_v5, %v1234_v54  ;;  %v9082_v19 = vsel %vm1410_vm12, %v1401_v28, %v1419_v49  ;;  %v1420_v9 = vmul.f32 %v9064_v37, %v1402_v29  ;;  %vm1411_vm14 = vcmp.ge.f32.partialorder %v1402_v29, 0.0 }
 0x47d   : > { %v1307_v50 = vsel %vm542_vm11, %v1293_v34, 0.0  ;;  %v1299_v34 = vpop.permute.xlu0 %1298  ;;  %v9088_v3 = vsel %vm1409_vm13, %v1400_v47, %v1418_v6  ;;  %v1453_v39 = vmul.f32 %v9082_v19, %v9082_v19 }
 0x47e   : > { %v1347_v7 = vmul.f32 %v8986_v59, %v1307_v50  ;;  %v1356_v63 = vadd.f32 %v1348_v26, %v1282_v60  ;;  %v9092_v10 = vsel %vm1411_vm14, %v1402_v29, %v1420_v9  ;;  %v1452_v41 = vmul.f32 %v9088_v3, %v9088_v3  ;;  %v1509_v9 = vld [vmem:[%s11892_s11 + $0x10] sm:$0xff] }
 0x47f   : > { %v1434_v36 = vadd.f32 %v9082_v19, %v9088_v3 }
 0x480   : > { %v1175_v27 = vpop.permute.xlu1 %1174  ;;  %v1355_v55 = vadd.f32 %v1347_v7, %v1281_v58  ;;  %v1404_v22 = vadd.f32 %v9010_v18, %v1356_v63  ;;  %v1454_v7 = vmul.f32 %v9092_v10, %v9092_v10  ;;  %v1460_v56 = vadd.f32 %v1453_v39, %v1452_v41  ;;  %v1507_v63 = vld [vmem:[%s11892_s11] sm:$0xff]  ;;  %v6874_v39 = vld [vmem:[%s11886_s5 + $0x58] sm:$0xff] }
 0x481   : > { %v1187_v45 = vsel %vm537_vm10, %v1175_v27, 0.0  ;;  %v1277_v58 = vmul.f32 %v9006_v16, %v8955_v44 }
 0x482   : > { %v1235_v59 = vmul.f32 %v8994_v4, %v1187_v45  ;;  %v1403_v61 = vadd.f32 %v9002_v12, %v1355_v55  ;;  %v1310_v12 = vsel %vm542_vm11, %v1299_v34, 0.0  ;;  %v1422_v18 = vmul.f32 %v9064_v37, %v1404_v22 }
 0x483   : > { %v1350_v11 = vmul.f32 %v9008_v17, %v1310_v12  ;;  %v1301_v17 = vpop.permute.xlu0 %1300  ;;  %v1435_v45 = vadd.f32 %v1434_v36, %v9092_v10  ;;  %vm1413_vm2 = vcmp.ge.f32.partialorder %v1404_v22, 0.0  ;;  %v1461_v5 = vadd.f32 %v1460_v56, %v1454_v7  ;;  %v1510_v12 = vld [vmem:[%s11892_s11 + $0x18] sm:$0xff] }
 0x484   : > { %v1177_v20 = vpop.permute.xlu1 %1176  ;;  %v1283_v48 = vadd.f32 %v1275_v57, %v1235_v59  ;;  %vm1412_vm15 = vcmp.ge.f32.partialorder %v1403_v61, 0.0  ;;  %v1311_v54 = vsel %vm542_vm11, %v1301_v17, 0.0  ;;  %v9119_v42 = vsel %vm1413_vm2, %v1404_v22, %v1422_v18  ;;  %v6877_v22 = vld [vmem:[%s11886_s5 + $0x70] sm:$0xff] }
 0x485   : > { %v1188_v2 = vsel %vm537_vm10, %v1177_v20, 0.0  ;;  %v1351_v47 = vmul.f32 %v9012_v1, %v1311_v54 }
 0x486   : > { %v1236_v8 = vmul.f32 %v9014_v24, %v1188_v2  ;;  %v1421_v24 = vmul.f32 %v9064_v37, %v1403_v61 }
 0x488   : > { %v1297_v51 = vpop.permute.xlu1 %1296  ;;  %v1284_v50 = vadd.f32 %v1276_v62, %v1236_v8  ;;  %v9101_v46 = vsel %vm1412_vm15, %v1403_v61, %v1421_v24  ;;  %v6873_v24 = vld [vmem:[%s11886_s5 + $0x50] sm:$0xff] }
 0x489   : > { %v1309_v4 = vsel %vm542_vm11, %v1297_v51, 0.0  ;;  %v1455_v28 = vmul.f32 %v9101_v46, %v9101_v46  ;;  %v1436_v20 = vadd.f32 %v1435_v45, %v9101_v46 }
 0x48a   : > { %v1349_v52 = vmul.f32 %v9004_v13, %v1309_v4  ;;  %v1358_v53 = vadd.f32 %v1350_v11, %v1284_v50  ;;  %v6872_v50 = vld [vmem:[%s11886_s5 + $0x48] sm:$0xff] }
 0x48b   : > { %v1462_v59 = vadd.f32 %v1461_v5, %v1455_v28  ;;  %v1437_v44 = vadd.f32 %v1436_v20, %v9119_v42  ;;  %v6876_v11 = vld [vmem:[%s11886_s5 + $0x68] sm:$0xff] }
 0x48c   : > { %v1357_v25 = vadd.f32 %v1349_v52, %v1283_v48  ;;  %v1179_v13 = vpop.permute.xlu1 %1178  ;;  %v1406_v32 = vadd.f32 %v9043_v14, %v1358_v53  ;;  %v1456_v14 = vmul.f32 %v9119_v42, %v9119_v42 }
 0x48d   : > { %v1189_v27 = vsel %vm537_vm10, %v1179_v13, 0.0  ;;  %v6875_v13 = vld [vmem:[%s11886_s5 + $0x60] sm:$0xff] }
 0x48e   : > { %v1405_v0 = vadd.f32 %v9020_v23, %v1357_v25  ;;  %v1237_v31 = vmul.f32 %v9016_v21, %v1189_v27  ;;  %v1424_v2 = vmul.f32 %v9064_v37, %v1406_v32  ;;  %vm1415_vm4 = vcmp.ge.f32.partialorder %v1406_v32, 0.0  ;;  %v6871_v25 = vld [vmem:[%s11886_s5 + $0x40] sm:$0xff] }
 0x48f   : > { %v1463_v60 = vadd.f32 %v1462_v59, %v1456_v14  ;;  %v1499_v27 = vld [vmem:[%s11891_s10] sm:$0xff] }
 0x490   : > { %v1423_v23 = vmul.f32 %v9064_v37, %v1405_v0  ;;  %vm1414_vm3 = vcmp.ge.f32.partialorder %v1405_v0, 0.0  ;;  %v1285_v21 = vadd.f32 %v1277_v58, %v1237_v31  ;;  %v9131_v26 = vsel %vm1415_vm4, %v1406_v32, %v1424_v2  ;;  %7547 = vmatprep.mubr.msk.f32.mxu1 %vm661_vm0, %v1499_v27 }
 0x491   : > { %v1458_v61 = vmul.f32 %v9131_v26, %v9131_v26 }
 0x492   : > { %v9121_v55 = vsel %vm1414_vm3, %v1405_v0, %v1423_v23  ;;  %v1359_v57 = vadd.f32 %v1351_v47, %v1285_v21  ;;  %v6878_v0 = vld [vmem:[%s11886_s5 + $0x78] sm:$0xff] }
 0x493   : > { %v1457_v16 = vmul.f32 %v9121_v55, %v9121_v55  ;;  %v1438_v29 = vadd.f32 %v1437_v44, %v9121_v55 }
 0x495   : > { %v1464_v1 = vadd.f32 %v1463_v60, %v1457_v16  ;;  %v1439_v34 = vadd.f32 %v1438_v29, %v9131_v26 }
 0x497   : > { %v1465_v62 = vadd.f32 %v1464_v1, %v1458_v61 }
 0x49d   : > { %v1398_v49 = vpop.permute.xlu1 %1397 }
 0x49e   : > { %v1407_v51 = vadd.f32 %v1398_v49, %v1359_v57 }
 0x4a0   : > { %vm1416_vm5 = vcmp.ge.f32.partialorder %v1407_v51, 0.0  ;;  %v1425_v4 = vmul.f32 %v9064_v37, %v1407_v51  ;;  %v1508_v37 = vld [vmem:[%s11892_s11 + $0x8] sm:$0xff] }
 0x4a2   : > { %v9137_v48 = vsel %vm1416_vm5, %v1407_v51, %v1425_v4 }
 0x4a3   : > { %v1440_v8 = vadd.f32 %v1439_v34, %v9137_v48  ;;  %v1459_v52 = vmul.f32 %v9137_v48, %v9137_v48 }
 0x4a5   : > { %1441 = vadd.xlane.f32.xlu1 %v1440_v8  ;;  %v1466_v6 = vadd.f32 %v1465_v62, %v1459_v52 }
 0x4a7   : > { %1467 = vadd.xlane.f32.xlu0 %v1466_v6 }
 0x4b6   : > { %1522 = vperm.xlu1 %8172, %v1508_v37  }
 0x4ba   : > { %1527 = vperm.xlu1 %8172, %v1509_v9  }
 0x4bd   : > { %1517 = vperm.xlu0 %8169, %v1507_v63  }
 0x4be   : > { %1712 = vperm.xlu1 %8172, %v6871_v25  }
 0x4c1   : > { %1532 = vperm.xlu0 %8169, %v1510_v12  }
 0x4c2   : > { %1722 = vperm.xlu1 %8172, %v6873_v24  }
 0x4c5   : > { %1717 = vperm.xlu0 %8169, %v6872_v50  }
 0x4c6   : > { %1732 = vperm.xlu1 %8172, %v6875_v13  }
 0x4c9   : > { %1727 = vperm.xlu0 %8169, %v6874_v39  }
 0x4ca   : > { %1742 = vperm.xlu1 %8172, %v6877_v22  }
 0x4cd   : > { %1737 = vperm.xlu0 %8169, %v6876_v11  }
 0x4d1   : > { %1747 = vperm.xlu0 %8169, %v6878_v0  }
 0x532   : > { %v1442_v41 = vpop.xlane.xlu1 %1441 }
 0x533   : > { %v1443_v53 = vrot.slane %v1442_v41, 4 }
 0x534   : > { %v1468_v36 = vpop.xlane.xlu0 %1467 }
 0x535   : > { %v1444_v7 = vadd.f32 %v1443_v53, %v1442_v41  ;;  %v1469_v18 = vrot.slane %v1468_v36, 4 }
 0x536   : > { %v1523_v12 = vpop.permute.xlu1 %1522 }
 0x537   : > { %v1470_v17 = vadd.f32 %v1469_v18, %v1468_v36  ;;  %v1445_v23 = vrot.slane %v1444_v7, 2 }
 0x539   : > { %v1446_v31 = vadd.f32 %v1445_v23, %v1444_v7  ;;  %v1471_v56 = vrot.slane %v1470_v17, 2 }
 0x53a   : > { %v1528_v41 = vpop.permute.xlu1 %1527 }
 0x53b   : > { %v1447_v45 = vrot.slane %v1446_v31, 1  ;;  %v1472_v28 = vadd.f32 %v1471_v56, %v1470_v17  ;;  %v6868_v56 = vld [vmem:[%s11885_s4 + $0x68] sm:$0xff] }
 0x53c   : > { %v1518_v25 = vpop.permute.xlu0 %1517 }
 0x53d   : > { %v1448_v58 = vadd.f32 %v1447_v45, %v1446_v31  ;;  %v1473_v32 = vrot.slane %v1472_v28, 1  ;;  %v6865_v31 = vld [vmem:[%s11885_s4 + $0x50] sm:$0xff] }
 0x53e   : > { %v6869_v45 = vld [vmem:[%s11885_s4 + $0x70] sm:$0xff] }
 0x53f   : > { %8049 = vpush %v1448_v58  ;;  %v1474_v54 = vadd.f32 %v1473_v32, %v1472_v28  ;;  %v6870_v28 = vld [vmem:[%s11885_s4 + $0x78] sm:$0xff]  ;;  %v1713_v32 = vpop.permute.xlu1 %1712 }
 0x540   : > { %v1533_v11 = vpop.permute.xlu0 %1532 }
 0x541   : > { %8051 = vpush %v1474_v54 }
 0x544   : > { %v1718_v58 = vpop.permute.xlu0 %1717 }
 0x548   : > { %v1728_v54 = vpop.permute.xlu0 %1727 }
 0x570   : > { %s8050_s1 = spop %8049 }
 0x571   : > { %v1450_v20 = vstv %s8050_s1  ;;  %s11920_s1 = smov 126  }
 0x572   : > { %v1451_v5 = vmul.f32 0.00012207031, %v1450_v20  ;;  %s8052_s27 = spop %8051 }
 0x573   : > { %v1476_v21 = vstv %s8052_s27 }
 0x574   : > { %v1477_v59 = vmul.f32 0.00012207031, %v1476_v21  ;;  %v1478_v47 = vmul.f32 %v1451_v5, %v1451_v5  ;;  %v1481_v16 = vsub.f32 %v9088_v3, %v1451_v5  ;;  %v1482_v57 = vsub.f32 %v9082_v19, %v1451_v5  ;;  %v1723_v21 = vpop.permute.xlu1 %1722 }
 0x575   : > { %v1483_v49 = vsub.f32 %v9092_v10, %v1451_v5  ;;  %v1484_v29 = vsub.f32 %v9101_v46, %v1451_v5  ;;  %v1485_v8 = vsub.f32 %v9119_v42, %v1451_v5  ;;  %v1486_v52 = vsub.f32 %v9121_v55, %v1451_v5  ;;  %v1500_v42 = vld [vmem:[%s11891_s10 + $0x8] sm:$0xff]  ;;  %v1501_v55 = vld [vmem:[%s11891_s10 + $0x10] sm:$0xff] }
 0x576   : > { %v1479_v2 = vsub.f32 %v1477_v59, %v1478_v47  ;;  %v1487_v19 = vsub.f32 %v9131_v26, %v1451_v5  ;;  %v1488_v10 = vsub.f32 %v9137_v48, %v1451_v5  ;;  %v1502_v26 = vld [vmem:[%s11891_s10 + $0x18] sm:$0xff]  ;;  %v6863_v48 = vld [vmem:[%s11885_s4 + $0x40] sm:$0xff]  ;;  %v1888_v5 = vstv %s6887_s30 }
 0x577   : > { %7567 = vmatprep.mubr.msk.f32.mxu0 %vm815_vm1, %v6863_v48 }
 0x578   : > { %v1480_v44 = vmax.f32 %v1479_v2, 0.0 }
 0x57a   : > { %v1489_v14 = vadd.f32 1e-08, %v1480_v44 }
 0x57c   : > { %8277 = vrsqrt.f32 %v1489_v14 }
 0x586   : > { %v8278_v60 = vpop.eup %8277 }
 0x587   : > { %v1491_v51 = vmul.f32 %v8278_v60, %v1481_v16  ;;  %v1492_v1 = vmul.f32 %v8278_v60, %v1482_v57  ;;  %v1493_v4 = vmul.f32 %v8278_v60, %v1483_v49  ;;  %v1494_v34 = vmul.f32 %v8278_v60, %v1484_v29 }
 0x588   : > { %v1495_v6 = vmul.f32 %v8278_v60, %v1485_v8  ;;  %v1496_v3 = vmul.f32 %v8278_v60, %v1486_v52  ;;  %v1497_v37 = vmul.f32 %v8278_v60, %v1487_v19  ;;  %v1498_v9 = vmul.f32 %v8278_v60, %v1488_v10  ;;  %v1738_v60 = vpop.permute.xlu0 %1737 }
 0x589   : > { %v7849_v61 = vpack.c.bf16 %v1492_v1, %v1491_v51  ;;  %v7853_v62 = vpack.c.bf16 %v1494_v34, %v1493_v4  ;;  %v1733_v34 = vpop.permute.xlu1 %1732 }
 0x58a   : > { %v7857_v46 = vpack.c.bf16 %v1496_v3, %v1495_v6  ;;  %v7861_v63 = vpack.c.bf16 %v1498_v9, %v1497_v37 }
 0x58b   : > { %7850 = vmatprep.subr.bf16.mxu1 %v7849_v61 }
 0x58c   : > { %7852 = vmatpush3.bf16.msra.mxu1 %v7849_v61 }
 0x58d   : > { %7854 = vmatprep.subr.bf16.mxu1 %v7853_v62 }
 0x590   : > { %7856 = vmatpush3.bf16.msra.mxu1 %v7853_v62 }
 0x591   : > { %7858 = vmatprep.subr.bf16.mxu1 %v7857_v46 }
 0x594   : > { %7860 = vmatpush3.bf16.msra.mxu1 %v7857_v46 }
 0x595   : > { %7862 = vmatprep.subr.bf16.mxu1 %v7861_v63 }
 0x598   : > { %7864 = vmatpush3.bf16.msra.mxu1 %v7861_v63 }
 0x59b   : > { %7548 = vmatmul.mubr.msk.f32.vlgmr.msra.gmra.mrb[8].mxu1 %vm661_vm0, %v1500_v42 }
 0x59c   : > { %7550 = vmatprep.mubr.msk.f32.mxu1 %vm661_vm0, %v1501_v55 }
 0x59f   : > { %7551 = vmatmul.mubr.msk.f32.gmra.mrb[10].mxu1 %vm661_vm0, %v1502_v26  ;;  %v1748_v26 = vpop.permute.xlu0 %1747 }
 0x66e   : > { %v7549_v24 = vpop.f32.mrb[8].mxu1 }
 0x66f   : > { %v1651_v50 = vadd.f32 %v7549_v24, %v1523_v12  ;;  %v1645_v13 = vpop.f32.mrb[9].mxu1  ;;  %v1743_v12 = vpop.permute.xlu1 %1742 }
 0x670   : > { %v1646_v39 = vadd.f32 %v1645_v13, %v1518_v25 }
 0x671   : > { %v9207_v22 = vadd.f32 %v1651_v50, %v8721_v30 }
 0x672   : > { %v9210_v0 = vadd.f32 %v1646_v39, %v8723_v33  ;;  %v7552_v27 = vpop.f32.mrb[10].mxu1  ;;  %v6864_v33 = vld [vmem:[%s11885_s4 + $0x48] sm:$0xff] }
 0x673   : > { %v1661_v53 = vadd.f32 %v7552_v27, %v1533_v11  ;;  %v1655_v36 = vpop.f32.mrb[11].mxu1 }
 0x674   : > { %v1656_v7 = vadd.f32 %v1655_v36, %v1528_v41  ;;  %v7865_v18 = vpack.c.bf16 %v9207_v22, %v9210_v0 }
 0x675   : > { %v9215_v17 = vadd.f32 %v1661_v53, %v8727_v38  ;;  %v6866_v38 = vld [vmem:[%s11885_s4 + $0x58] sm:$0xff] }
 0x676   : > { %v9218_v23 = vadd.f32 %v1656_v7, %v8729_v40  ;;  %7866 = vmatprep.subr.bf16.mxu0 %v7865_v18  ;;  %v6867_v40 = vld [vmem:[%s11885_s4 + $0x60] sm:$0xff] }
 0x677   : > { %7868 = vmatpush3.bf16.msra.mxu0 %v7865_v18 }
 0x678   : > { %v7869_v30 = vpack.c.bf16 %v9215_v17, %v9218_v23 }
 0x67a   : > { %7870 = vmatprep.subr.bf16.mxu0 %v7869_v30 }
 0x67b   : > { %7872 = vmatpush3.bf16.msra.mxu0 %v7869_v30 }
 0x67e   : > { %7568 = vmatmul.mubr.msk.f32.vlgmr.msra.gmra.mrb[4].mxu0 %vm815_vm1, %v6864_v33 }
 0x67f   : > { %7570 = vmatprep.mubr.msk.f32.mxu0 %vm815_vm1, %v6865_v31 }
 0x682   : > { %7571 = vmatmul.mubr.msk.f32.gmra.mrb[6].mxu0 %vm815_vm1, %v6866_v38 }
 0x683   : > { %7573 = vmatprep.mubr.msk.f32.mxu0 %vm815_vm1, %v6867_v40 }
 0x686   : > { %7574 = vmatmul.mubr.msk.f32.gmra.mrb[8].mxu0 %vm815_vm1, %v6868_v56 }
 0x687   : > { %7576 = vmatprep.mubr.msk.f32.mxu0 %vm815_vm1, %v6869_v45 }
 0x68a   : > { %7577 = vmatmul.mubr.msk.f32.gmra.mrb[10].mxu0 %vm815_vm1, %v6870_v28 }
 0x751   : > { %v7569_v20 = vpop.f32.mrb[4].mxu0 }
 0x752   : > { %v1846_v59 = vadd.f32 %v7569_v20, %v1718_v58  ;;  %v1840_v47 = vpop.f32.mrb[5].mxu0 }
 0x753   : > { %v1841_v2 = vadd.f32 %v1840_v47, %v1713_v32  ;;  %v6890_v47 = vld [vmem:[%s11887_s6 + $0x50] sm:$0xff] }
 0x754   : > { %vm1881_vm6 = vcmp.ge.f32.partialorder %v1846_v59, 0.0  ;;  %v1890_v44 = vmul.f32 %v1888_v5, %v1846_v59 }
 0x755   : > { %vm1880_vm7 = vcmp.ge.f32.partialorder %v1841_v2, 0.0  ;;  %v1889_v14 = vmul.f32 %v1888_v5, %v1841_v2  ;;  %v7572_v16 = vpop.f32.mrb[6].mxu0 }
 0x756   : > { %v9250_v57 = vsel %vm1881_vm6, %v1846_v59, %v1890_v44  ;;  %v1856_v49 = vadd.f32 %v7572_v16, %v1728_v54  ;;  %v1850_v29 = vpop.f32.mrb[7].mxu0  ;;  %v6889_v59 = vld [vmem:[%s11887_s6 + $0x48] sm:$0xff]  ;;  %v6898_v16 = vld [vmem:[%s11888_s7 + $0x50] sm:$0xff] }
 0x757   : > { %v1924_v51 = vmul.f32 %v9250_v57, %v9250_v57  ;;  %v9254_v1 = vsel %vm1880_vm7, %v1841_v2, %v1889_v14  ;;  %v1851_v4 = vadd.f32 %v1850_v29, %v1723_v21  ;;  %v6888_v2 = vld [vmem:[%s11887_s6 + $0x40] sm:$0xff]  ;;  %v6897_v44 = vld [vmem:[%s11888_s7 + $0x48] sm:$0xff]  ;;  %v6899_v29 = vld [vmem:[%s11888_s7 + $0x58] sm:$0xff] }
 0x758   : > { %v1923_v61 = vmul.f32 %v9254_v1, %v9254_v1  ;;  %v1892_v8 = vmul.f32 %v1888_v5, %v1856_v49  ;;  %vm1883_vm8 = vcmp.ge.f32.partialorder %v1856_v49, 0.0  ;;  %v1905_v6 = vadd.f32 %v9250_v57, %v9254_v1  ;;  %v6896_v14 = vld [vmem:[%s11888_s7 + $0x40] sm:$0xff] }
 0x759   : > { %vm1882_vm9 = vcmp.ge.f32.partialorder %v1851_v4, 0.0  ;;  %v1891_v52 = vmul.f32 %v1888_v5, %v1851_v4  ;;  %v7575_v62 = vpop.f32.mrb[8].mxu0 }
 0x75a   : > { %v1866_v3 = vadd.f32 %v7575_v62, %v1738_v60  ;;  %v1860_v19 = vpop.f32.mrb[9].mxu0  ;;  %v1931_v10 = vadd.f32 %v1924_v51, %v1923_v61  ;;  %v9262_v9 = vsel %vm1883_vm8, %v1856_v49, %v1892_v8  ;;  %v6891_v49 = vld [vmem:[%s11887_s6 + $0x58] sm:$0xff]  ;;  %v6892_v60 = vld [vmem:[%s11887_s6 + $0x60] sm:$0xff]  ;;  %v6894_v61 = vld [vmem:[%s11887_s6 + $0x70] sm:$0xff] }
 0x75b   : > { %v9260_v46 = vsel %vm1882_vm9, %v1851_v4, %v1891_v52  ;;  %v1861_v37 = vadd.f32 %v1860_v19, %v1733_v34  ;;  %v1926_v11 = vmul.f32 %v9262_v9, %v9262_v9  ;;  %v6900_v51 = vld [vmem:[%s11888_s7 + $0x60] sm:$0xff]  ;;  %v6893_v4 = vld [vmem:[%s11887_s6 + $0x68] sm:$0xff]  ;;  %v6902_v8 = vld [vmem:[%s11888_s7 + $0x70] sm:$0xff] }
 0x75c   : > { %v1906_v63 = vadd.f32 %v1905_v6, %v9260_v46  ;;  %v1925_v42 = vmul.f32 %v9260_v46, %v9260_v46  ;;  %v1894_v55 = vmul.f32 %v1888_v5, %v1866_v3  ;;  %vm1885_vm12 = vcmp.ge.f32.partialorder %v1866_v3, 0.0  ;;  %v6901_v34 = vld [vmem:[%s11888_s7 + $0x68] sm:$0xff]  ;;  %v6895_v52 = vld [vmem:[%s11887_s6 + $0x78] sm:$0xff]  ;;  %v6904_v62 = vld [vmem:[%s11889_s8 + $0x40] sm:$0xff] }
 0x75d   : > { %vm1884_vm13 = vcmp.ge.f32.partialorder %v1861_v37, 0.0  ;;  %v1893_v48 = vmul.f32 %v1888_v5, %v1861_v37  ;;  %v7578_v25 = vpop.f32.mrb[10].mxu0  ;;  %v6903_v6 = vld [vmem:[%s11888_s7 + $0x78] sm:$0xff]  ;;  %v6906_v19 = vld [vmem:[%s11889_s8 + $0x50] sm:$0xff] }
 0x75e   : > { %v1932_v24 = vadd.f32 %v1931_v10, %v1925_v42  ;;  %v1907_v50 = vadd.f32 %v1906_v63, %v9262_v9  ;;  %v1876_v13 = vadd.f32 %v7578_v25, %v1748_v26  ;;  %v1870_v39 = vpop.f32.mrb[11].mxu0  ;;  %v9272_v53 = vsel %vm1885_vm12, %v1866_v3, %v1894_v55  ;;  %v6905_v10 = vld [vmem:[%s11889_s8 + $0x48] sm:$0xff]  ;;  %v6907_v63 = vld [vmem:[%s11889_s8 + $0x58] sm:$0xff]  ;;  %v6908_v42 = vld [vmem:[%s11889_s8 + $0x60] sm:$0xff] }
 0x75f   : > { %v9270_v27 = vsel %vm1884_vm13, %v1861_v37, %v1893_v48  ;;  %v1871_v41 = vadd.f32 %v1870_v39, %v1743_v12  ;;  %v1928_v38 = vmul.f32 %v9272_v53, %v9272_v53  ;;  %v11958_v3 = vmov 1   ;;  %v6909_v26 = vld [vmem:[%s11889_s8 + $0x68] sm:$0xff]  ;;  %v6910_v48 = vld [vmem:[%s11889_s8 + $0x70] sm:$0xff]  ;;  %v6912_v25 = vld [vmem:[%s11890_s9 + $0x40] sm:$0xff] }
 0x760   : > { %v1908_v36 = vadd.f32 %v1907_v50, %v9270_v27  ;;  %v1927_v7 = vmul.f32 %v9270_v27, %v9270_v27  ;;  %v1896_v18 = vmul.f32 %v1888_v5, %v1876_v13  ;;  %vm1887_vm14 = vcmp.ge.f32.partialorder %v1876_v13, 0.0  ;;  %v6913_v12 = vld [vmem:[%s11890_s9 + $0x48] sm:$0xff]  ;;  %v6911_v50 = vld [vmem:[%s11889_s8 + $0x78] sm:$0xff]  ;;  %v6918_v39 = vld [vmem:[%s11890_s9 + $0x70] sm:$0xff] }
 0x761   : > { %vm1886_vm15 = vcmp.ge.f32.partialorder %v1871_v41, 0.0  ;;  %v1895_v30 = vmul.f32 %v1888_v5, %v1871_v41  ;;  %v1933_v33 = vadd.f32 %v1932_v24, %v1926_v11  ;;  %v11959_v37 = vmov 0   ;;  %v6914_v24 = vld [vmem:[%s11890_s9 + $0x50] sm:$0xff]  ;;  %v6915_v11 = vld [vmem:[%s11890_s9 + $0x58] sm:$0xff] }
 0x762   : > { %v1909_v31 = vadd.f32 %v1908_v36, %v9272_v53  ;;  %v9282_v45 = vsel %vm1887_vm14, %v1876_v13, %v1896_v18  ;;  %v11960_v55 = vmov 2   ;;  %v6917_v13 = vld [vmem:[%s11890_s9 + $0x68] sm:$0xff] }
 0x763   : > { %v9280_v40 = vsel %vm1886_vm15, %v1871_v41, %v1895_v30  ;;  %v1934_v56 = vadd.f32 %v1933_v33, %v1927_v7  ;;  %v1930_v20 = vmul.f32 %v9282_v45, %v9282_v45  ;;  %v6916_v41 = vld [vmem:[%s11890_s9 + $0x60] sm:$0xff] }
 0x764   : > { %v1910_v28 = vadd.f32 %v1909_v31, %v9280_v40  ;;  %v1929_v58 = vmul.f32 %v9280_v40, %v9280_v40 }
 0x765   : > { %v1935_v32 = vadd.f32 %v1934_v56, %v1928_v38 }
 0x766   : > { %v1911_v54 = vadd.f32 %v1910_v28, %v9282_v45 }
 0x767   : > { %v1936_v5 = vadd.f32 %v1935_v32, %v1929_v58 }
 0x768   : > { %1912 = vadd.xlane.f32.xlu1 %v1911_v54 }
 0x769   : > { %v1937_v21 = vadd.f32 %v1936_v5, %v1930_v20 }
 0x76b   : > { %1938 = vadd.xlane.f32.xlu0 %v1937_v21 }
 0x779   : > { %1986 = vperm.xlu1 %8172, %v6889_v59  }
 0x77d   : > { %1991 = vperm.xlu1 %8172, %v6890_v47  }
 0x781   : > { %1981 = vperm.xlu0 %8169, %v6888_v2   ;;  %2043 = vperm.xlu1 %8172, %v6897_v44  }
 0x785   : > { %2038 = vperm.xlu0 %8169, %v6896_v14   ;;  %2048 = vperm.xlu1 %8172, %v6898_v16  }
 0x789   : > { %1996 = vperm.xlu0 %8169, %v6891_v49   ;;  %2053 = vperm.xlu1 %8172, %v6899_v29  }
 0x78d   : > { %2001 = vperm.xlu0 %8169, %v6892_v60   ;;  %2058 = vperm.xlu1 %8172, %v6900_v51  }
 0x791   : > { %2006 = vperm.xlu0 %8169, %v6893_v4   ;;  %2063 = vperm.xlu1 %8172, %v6901_v34  }
 0x795   : > { %2011 = vperm.xlu0 %8169, %v6894_v61   ;;  %2068 = vperm.xlu1 %8172, %v6902_v8  }
 0x799   : > { %2016 = vperm.xlu0 %8169, %v6895_v52   ;;  %2130 = vperm.xlu1 %8172, %v6904_v62  }
 0x79d   : > { %2073 = vperm.xlu0 %8169, %v6903_v6   ;;  %8173 = vset.pattern.permute.xlu1 %v11958_v3 }
 0x79e   : > { %2177 = vperm.xlu1 %8173, %v6904_v62  }
 0x7a1   : > { %8174 = vset.pattern.permute.xlu0 %v11958_v3 }
 0x7a2   : > { %8175 = vset.pattern.permute.xlu1 %v11959_v37  ;;  %2181 = vperm.xlu0 %8174, %v6905_v10  }
 0x7a3   : > { %2140 = vperm.xlu1 %8175, %v6906_v19  }
 0x7a6   : > { %2189 = vperm.xlu0 %8174, %v6907_v63  }
 0x7a7   : > { %8176 = vset.pattern.permute.xlu1 %v11958_v3 }
 0x7a8   : > { %2185 = vperm.xlu1 %8176, %v6906_v19  }
 0x7aa   : > { %2193 = vperm.xlu0 %8174, %v6908_v42  }
 0x7ac   : > { %8177 = vset.pattern.permute.xlu1 %v11960_v55 }
 0x7ad   : > { %2255 = vperm.xlu1 %8177, %v6905_v10  }
 0x7ae   : > { %8181 = vset.pattern.permute.xlu0 %v11960_v55 }
 0x7af   : > { %2251 = vperm.xlu0 %8181, %v6904_v62  }
 0x7b1   : > { %8178 = vset.pattern.permute.xlu1 %v11959_v37 }
 0x7b2   : > { %2145 = vperm.xlu1 %8178, %v6907_v63  }
 0x7b3   : > { %2267 = vperm.xlu0 %8181, %v6908_v42  }
 0x7b6   : > { %8179 = vset.pattern.permute.xlu1 %v11960_v55 }
 0x7b7   : > { %2259 = vperm.xlu1 %8179, %v6906_v19   ;;  %2271 = vperm.xlu0 %8181, %v6909_v26  }
 0x7bb   : > { %8180 = vset.pattern.permute.xlu1 %v11959_v37  ;;  %2275 = vperm.xlu0 %8181, %v6910_v48  }
 0x7bc   : > { %2150 = vperm.xlu1 %8180, %v6908_v42  }
 0x7bf   : > { %8189 = vset.pattern.permute.xlu0 %v11959_v37 }
 0x7c0   : > { %8182 = vset.pattern.permute.xlu1 %v11960_v55  ;;  %2135 = vperm.xlu0 %8189, %v6905_v10  }
 0x7c1   : > { %2263 = vperm.xlu1 %8182, %v6907_v63  }
 0x7c4   : > { %2300 = vperm.xlu0 %8189, %v6912_v25  }
 0x7c5   : > { %8183 = vset.pattern.permute.xlu1 %v11959_v37 }
 0x7c6   : > { %2305 = vperm.xlu1 %8183, %v6913_v12  }
 0x7c8   : > { %2155 = vperm.xlu0 %8189, %v6909_v26  }
 0x7ca   : > { %8184 = vset.pattern.permute.xlu1 %v11958_v3 }
 0x7cb   : > { %2197 = vperm.xlu1 %8184, %v6909_v26  }
 0x7cc   : > { %2160 = vperm.xlu0 %8189, %v6910_v48  }
 0x7cf   : > { %8185 = vset.pattern.permute.xlu1 %v11959_v37 }
 0x7d0   : > { %2310 = vperm.xlu1 %8185, %v6914_v24   ;;  %2165 = vperm.xlu0 %8189, %v6911_v50  }
 0x7d4   : > { %8186 = vset.pattern.permute.xlu1 %v11958_v3  ;;  %2325 = vperm.xlu0 %8189, %v6917_v13  }
 0x7d5   : > { %2201 = vperm.xlu1 %8186, %v6910_v48  }
 0x7d8   : > { %2330 = vperm.xlu0 %8189, %v6918_v39  }
 0x7d9   : > { %8187 = vset.pattern.permute.xlu1 %v11959_v37 }
 0x7da   : > { %2315 = vperm.xlu1 %8187, %v6915_v11  }
 0x7de   : > { %8188 = vset.pattern.permute.xlu1 %v11958_v3 }
 0x7df   : > { %2205 = vperm.xlu1 %8188, %v6911_v50  }
 0x7e3   : > { %8190 = vset.pattern.permute.xlu1 %v11959_v37 }
 0x7e4   : > { %2320 = vperm.xlu1 %8190, %v6916_v41  }
 0x7e8   : > { %8191 = vset.pattern.permute.xlu1 %v11960_v55 }
 0x7e9   : > { %2279 = vperm.xlu1 %8191, %v6911_v50  }
 0x7ed   : > { %8192 = vset.pattern.permute.xlu1 %v11959_v37 }
 0x7f5   : > { %v1913_v36 = vpop.xlane.xlu1 %1912 }
 0x7f6   : > { %v1914_v7 = vrot.slane %v1913_v36, 4 }
 0x7f8   : > { %v1915_v18 = vadd.f32 %v1914_v7, %v1913_v36  ;;  %v1939_v30 = vpop.xlane.xlu0 %1938 }
 0x7f9   : > { %v1940_v33 = vrot.slane %v1939_v30, 4  ;;  %v1987_v21 = vpop.permute.xlu1 %1986 }
 0x7fa   : > { %v1916_v31 = vrot.slane %v1915_v18, 2 }
 0x7fb   : > { %v1941_v38 = vadd.f32 %v1940_v33, %v1939_v30 }
 0x7fc   : > { %v1917_v56 = vadd.f32 %v1916_v31, %v1915_v18 }
 0x7fd   : > { %v1942_v28 = vrot.slane %v1941_v38, 2  ;;  %v1992_v44 = vpop.permute.xlu1 %1991 }
 0x7fe   : > { %v1918_v58 = vrot.slane %v1917_v56, 1 }
 0x7ff   : > { %v1943_v32 = vadd.f32 %v1942_v28, %v1941_v38 }
 0x800   : > { %v1919_v54 = vadd.f32 %v1918_v58, %v1917_v56  ;;  %v1982_v59 = vpop.permute.xlu0 %1981 }
 0x801   : > { %v1944_v20 = vrot.slane %v1943_v32, 1  ;;  %v2044_v51 = vpop.permute.xlu1 %2043 }
 0x802   : > { %8053 = vpush %v1919_v54 }
 0x803   : > { %v1945_v5 = vadd.f32 %v1944_v20, %v1943_v32 }
 0x804   : > { %v2039_v29 = vpop.permute.xlu0 %2038 }
 0x805   : > { %8055 = vpush %v1945_v5  ;;  %v2049_v8 = vpop.permute.xlu1 %2048 }
 0x808   : > { %v1997_v61 = vpop.permute.xlu0 %1996 }
 0x809   : > { %v2054_v62 = vpop.permute.xlu1 %2053 }
 0x80c   : > { %v2002_v52 = vpop.permute.xlu0 %2001 }
 0x80d   : > { %v2059_v50 = vpop.permute.xlu1 %2058 }
 0x810   : > { %v2007_v26 = vpop.permute.xlu0 %2006 }
 0x811   : > { %v2064_v18 = vpop.permute.xlu1 %2063 }
 0x815   : > { %v2069_v58 = vpop.permute.xlu1 %2068 }
 0x833   : > { %s8054_s19 = spop %8053 }
 0x834   : > { %v1921_v47 = vstv %s8054_s19  ;;  %s11933_s19 = smov 4  }
 0x835   : > { %v9403_v2 = vmul.f32 0.00012207031, %v1921_v47 }
 0x836   : > { %s8056_s20 = spop %8055 }
 0x837   : > { %v1947_v14 = vstv %s8056_s20  ;;  %v1949_v16 = vmul.f32 %v9403_v2, %v9403_v2  ;;  %v1953_v6 = vsub.f32 %v9250_v57, %v9403_v2  ;;  %v1952_v10 = vsub.f32 %v9254_v1, %v9403_v2 }
 0x838   : > { %v1948_v49 = vmul.f32 0.00012207031, %v1947_v14  ;;  %v1954_v63 = vsub.f32 %v9260_v46, %v9403_v2  ;;  %v1956_v24 = vsub.f32 %v9270_v27, %v9403_v2  ;;  %v1958_v1 = vsub.f32 %v9280_v40, %v9403_v2  ;;  %v2012_v46 = vpop.permute.xlu0 %2011 }
 0x839   : > { %v1955_v36 = vsub.f32 %v9262_v9, %v9403_v2  ;;  %v1959_v40 = vsub.f32 %v9282_v45, %v9403_v2 }
 0x83a   : > { %v1950_v60 = vsub.f32 %v1948_v49, %v1949_v16 }
 0x83c   : > { %v1951_v4 = vmax.f32 %v1950_v60, 0.0  ;;  %v2017_v56 = vpop.permute.xlu0 %2016 }
 0x83e   : > { %v1960_v34 = vadd.f32 1e-08, %v1951_v4 }
 0x840   : > { %8279 = vrsqrt.f32 %v1960_v34  ;;  %v2074_v20 = vpop.permute.xlu0 %2073 }
 0x84a   : > { %v8280_v19 = vpop.eup %8279 }
 0x84b   : > { %v1963_v42 = vmul.f32 %v8280_v19, %v1953_v6  ;;  %v1962_v48 = vmul.f32 %v8280_v19, %v1952_v10  ;;  %v1964_v25 = vmul.f32 %v8280_v19, %v1954_v63  ;;  %v1966_v57 = vmul.f32 %v8280_v19, %v1956_v24 }
 0x84c   : > { %v1968_v7 = vmul.f32 %v8280_v19, %v1958_v1  ;;  %v1965_v30 = vmul.f32 %v8280_v19, %v1955_v36  ;;  %v1969_v38 = vmul.f32 %v8280_v19, %v1959_v40 }
 0x84d   : > { %v2020_v12 = vmul.f32 %v1987_v21, %v1963_v42  ;;  %v2019_v13 = vmul.f32 %v1982_v59, %v1962_v48  ;;  %v2021_v41 = vmul.f32 %v1992_v44, %v1964_v25  ;;  %v2023_v27 = vmul.f32 %v2002_v52, %v1966_v57  ;;  %v2131_v59 = vpop.permute.xlu1 %2130 }
 0x84e   : > { %v2025_v31 = vmul.f32 %v2012_v46, %v1968_v7  ;;  %v2022_v28 = vmul.f32 %v1997_v61, %v1965_v30  ;;  %v2026_v54 = vmul.f32 %v2017_v56, %v1969_v38  ;;  %v1957_v21 = vsub.f32 %v9272_v53, %v9403_v2 }
 0x84f   : > { %v9415_v39 = vadd.f32 %v2044_v51, %v2020_v12  ;;  %v9417_v11 = vadd.f32 %v2039_v29, %v2019_v13  ;;  %v9427_v33 = vadd.f32 %v2049_v8, %v2021_v41  ;;  %v9435_v9 = vadd.f32 %v2059_v50, %v2023_v27  ;;  %v6919_v29 = vld [vmem:[%s11890_s9 + $0x78] sm:$0xff]  ;;  %v2182_v51 = vpop.permute.xlu0 %2181 }
 0x850   : > { %v9441_v32 = vadd.f32 %v2069_v58, %v2025_v31  ;;  %v9443_v45 = vadd.f32 %v2054_v62, %v2022_v28  ;;  %v9449_v5 = vadd.f32 %v2074_v20, %v2026_v54  ;;  %v1967_v47 = vmul.f32 %v8280_v19, %v1957_v21 }
 0x851   : > { %2104 = vrot.lane.b32.xlu0 %v9415_v39, %s11922_s29  ;;  %2102 = vrot.lane.b32.xlu1 %v9417_v11, %s11922_s29  ;;  %v9459_v44 = vpop.permute.xlu1 %2177  ;;  %v9511_v31 = vadd.s32 4294967294, %v9018_v15  ;;  %v9515_v28 = vadd.s32 2, %v9018_v15  ;;  %v2209_v35 = vmul.f32 %v2182_v51, %v9415_v39 }
 0x852   : > { %v2024_v14 = vmul.f32 %v2007_v26, %v1967_v47 }
 0x853   : > { %v2190_v34 = vpop.permute.xlu0 %2189  ;;  %11961 = vst [vmem:[#allocation14_spill] sm:$0xff] %v9511_v31  ;;  %vm545_vm2 = vcmp.ge.s32.totalorder %v9511_v31, 0  ;;  %11962 = vst [vmem:[#allocation15_spill] sm:$0xff] %v9515_v28  ;;  %vm550_vm3 = vcmp.lt.s32.totalorder %v9515_v28, 128 }
 0x854   : > { %v9463_v16 = vadd.f32 %v2064_v18, %v2024_v14 }
 0x855   : > { %2224 = vrot.lane.b32.xlu0 %v9417_v11, %s11920_s1  ;;  %2106 = vrot.lane.b32.xlu1 %v9427_v33, %s11922_s29  ;;  %v2141_v49 = vpop.permute.xlu1 %2140 }
 0x857   : > { %v9478_v8 = vpop.permute.xlu0 %2193 }
 0x859   : > { %2232 = vrot.lane.b32.xlu0 %v9435_v9, %s11920_s1  ;;  %2226 = vrot.lane.b32.xlu1 %v9415_v39, %s11920_s1  ;;  %v2186_v53 = vpop.permute.xlu1 %2185 }
 0x85a   : > { %v2210_v51 = vmul.f32 %v2186_v53, %v9427_v33 }
 0x85b   : > { %v2252_v52 = vpop.permute.xlu0 %2251 }
 0x85d   : > { %2236 = vrot.lane.b32.xlu0 %v9441_v32, %s11920_s1  ;;  %2108 = vrot.lane.b32.xlu1 %v9443_v45, %s11922_s29  ;;  %v2256_v2 = vpop.permute.xlu1 %2255 }
 0x85f   : > { %v9480_v6 = vpop.permute.xlu0 %2267 }
 0x861   : > { %2238 = vrot.lane.b32.xlu0 %v9449_v5, %s11920_s1  ;;  %2228 = vrot.lane.b32.xlu1 %v9427_v33, %s11920_s1  ;;  %v2146_v60 = vpop.permute.xlu1 %2145 }
 0x863   : > { %v9484_v10 = vpop.permute.xlu0 %2271 }
 0x865   : > { %2110 = vrot.lane.b32.xlu1 %v9435_v9, %s11922_s29  ;;  %v2260_v4 = vpop.permute.xlu1 %2259 }
 0x867   : > { %v9488_v42 = vpop.permute.xlu0 %2275 }
 0x869   : > { %2230 = vrot.lane.b32.xlu1 %v9443_v45, %s11920_s1  ;;  %v9476_v61 = vpop.permute.xlu1 %2150 }
 0x86b   : > { %v2136_v48 = vpop.permute.xlu0 %2135 }
 0x86d   : > { %2112 = vrot.lane.b32.xlu1 %v9463_v16, %s11922_s29  ;;  %v2264_v62 = vpop.permute.xlu1 %2263 }
 0x86f   : > { %v2301_v24 = vpop.permute.xlu0 %2300 }
 0x871   : > { %2114 = vrot.lane.b32.xlu1 %v9441_v32, %s11922_s29  ;;  %v9482_v19 = vpop.permute.xlu1 %2305 }
 0x873   : > { %v2156_v13 = vpop.permute.xlu0 %2155 }
 0x875   : > { %2234 = vrot.lane.b32.xlu1 %v9463_v16, %s11920_s1  ;;  %v9486_v63 = vpop.permute.xlu1 %2197 }
 0x877   : > { %v9500_v41 = vpop.permute.xlu0 %2160 }
 0x879   : > { %2116 = vrot.lane.b32.xlu1 %v9449_v5, %s11922_s29  ;;  %v9490_v26 = vpop.permute.xlu1 %2310  ;;  %s6969_s29 = sld [smem:[#allocation2 + $0x4]] }
 0x87b   : > { %v9504_v46 = vpop.permute.xlu0 %2165 }
 0x87d   : > { %2335 = vperm.xlu1 %8192, %v6919_v29   ;;  %v9492_v25 = vpop.permute.xlu1 %2201 }
 0x87f   : > { %v9506_v27 = vpop.permute.xlu0 %2325 }
 0x881   : > { %v9494_v12 = vpop.permute.xlu1 %2315 }
 0x883   : > { %v9508_v30 = vpop.permute.xlu0 %2330 }
 0x885   : > { %v9496_v50 = vpop.permute.xlu1 %2205 }
 0x889   : > { %v9498_v57 = vpop.permute.xlu1 %2320 }
 0x88d   : > { %v9502_v1 = vpop.permute.xlu1 %2279 }
 0x8c3   : > { %v2103_v36 = vpop.permute.xlu1 %2102  ;;  %v2105_v38 = vpop.permute.xlu0 %2104 }
 0x8c4   : > { %v2121_v58 = vsel %vm545_vm2, %v2105_v38, 0.0  ;;  %v2120_v21 = vsel %vm545_vm2, %v2103_v36, 0.0 }
 0x8c5   : > { %v2169_v14 = vmul.f32 %v2136_v48, %v2121_v58  ;;  %v2168_v15 = vmul.f32 %v2131_v59, %v2120_v21  ;;  %v2208_v48 = vmul.f32 %v9459_v44, %v9417_v11 }
 0x8c7   : > { %v2107_v7 = vpop.permute.xlu1 %2106  ;;  %v2225_v20 = vpop.permute.xlu0 %2224 }
 0x8c8   : > { %v2122_v29 = vsel %vm545_vm2, %v2107_v7, 0.0  ;;  %v2242_v43 = vsel %vm550_vm3, %v2225_v20, 0.0  ;;  %v2216_v20 = vadd.f32 %v2208_v48, %v2168_v15 }
 0x8c9   : > { %v2170_v3 = vmul.f32 %v2141_v49, %v2122_v29  ;;  %v2282_v7 = vmul.f32 %v2252_v52, %v2242_v43 }
 0x8cb   : > { %v2227_v18 = vpop.permute.xlu1 %2226  ;;  %v2218_v49 = vadd.f32 %v2210_v51, %v2170_v3  ;;  %v2290_v11 = vadd.f32 %v2282_v7, %v2216_v20  ;;  %v2233_v43 = vpop.permute.xlu0 %2232 }
 0x8cc   : > { %v2243_v47 = vsel %vm550_vm3, %v2227_v18, 0.0  ;;  %v2217_v18 = vadd.f32 %v2209_v35, %v2169_v14  ;;  %v2211_v35 = vmul.f32 %v2190_v34, %v9443_v45  ;;  %v2246_v45 = vsel %vm550_vm3, %v2233_v43, 0.0 }
 0x8cd   : > { %v2283_v55 = vmul.f32 %v2256_v2, %v2243_v47  ;;  %v2213_v34 = vmul.f32 %v9486_v63, %v9463_v16 }
 0x8cf   : > { %v2109_v40 = vpop.permute.xlu1 %2108  ;;  %v2237_v14 = vpop.permute.xlu0 %2236 }
 0x8d0   : > { %v2123_v37 = vsel %vm545_vm2, %v2109_v40, 0.0  ;;  %v2291_v40 = vadd.f32 %v2283_v55, %v2217_v18  ;;  %v2212_v55 = vmul.f32 %v9478_v8, %v9435_v9  ;;  %v2286_v9 = vmul.f32 %v9480_v6, %v2246_v45 }
 0x8d1   : > { %v2171_v59 = vmul.f32 %v2146_v60, %v2123_v37  ;;  %v2338_v60 = vadd.f32 %v2301_v24, %v2290_v11 }
 0x8d2   : > { %v2339_v15 = vadd.f32 %v9482_v19, %v2291_v40 }
 0x8d3   : > { %v2229_v56 = vpop.permute.xlu1 %2228  ;;  %v2219_v52 = vadd.f32 %v2211_v35, %v2171_v59  ;;  %vm2347_vm5 = vcmp.ge.f32.partialorder %v2338_v60, 0.0 }
 0x8d4   : > { %v2244_v36 = vsel %vm550_vm3, %v2229_v56, 0.0  ;;  %vm2348_vm4 = vcmp.ge.f32.partialorder %v2339_v15, 0.0 }
 0x8d5   : > { %v2284_v2 = vmul.f32 %v2260_v4, %v2244_v36 }
 0x8d7   : > { %v2111_v54 = vpop.permute.xlu1 %2110  ;;  %v2292_v47 = vadd.f32 %v2284_v2, %v2218_v49 }
 0x8d8   : > { %v2124_v56 = vsel %vm545_vm2, %v2111_v54, 0.0 }
 0x8d9   : > { %v2172_v37 = vmul.f32 %v9476_v61, %v2124_v56  ;;  %v2340_v61 = vadd.f32 %v9490_v26, %v2292_v47  ;;  %v2214_v26 = vmul.f32 %v9492_v25, %v9441_v32 }
 0x8db   : > { %v2231_v38 = vpop.permute.xlu1 %2230  ;;  %v2220_v19 = vadd.f32 %v2212_v55, %v2172_v37  ;;  %vm2349_vm6 = vcmp.ge.f32.partialorder %v2340_v61, 0.0 }
 0x8dc   : > { %v2245_v39 = vsel %vm550_vm3, %v2231_v38, 0.0  ;;  %v2248_v38 = vsel %vm550_vm3, %v2237_v14, 0.0 }
 0x8dd   : > { %v2285_v21 = vmul.f32 %v2264_v62, %v2245_v39  ;;  %v9553_v62 = vstv %s6920_s26  ;;  %v2294_v18 = vadd.f32 %v2286_v9, %v2220_v19  ;;  %v2288_v32 = vmul.f32 %v9488_v42, %v2248_v38  ;;  %v6929_v38 = vld [vmem:[%s11892_s11 + $0x40] sm:$0xff]  ;;  %s7002_s26 = sld [smem:[#allocation2 + $0x5]] }
 0x8de   : > { %v2357_v8 = vmul.f32 %v9553_v62, %v2339_v15  ;;  %v2356_v6 = vmul.f32 %v9553_v62, %v2338_v60  ;;  %v2358_v36 = vmul.f32 %v9553_v62, %v2340_v61 }
 0x8df   : > { %v2113_v58 = vpop.permute.xlu1 %2112  ;;  %v2293_v3 = vadd.f32 %v2285_v21, %v2219_v52  ;;  %v2342_v59 = vadd.f32 %v9498_v57, %v2294_v18  ;;  %v2239_v21 = vpop.permute.xlu0 %2238  ;;  %v2215_v52 = vmul.f32 %v9496_v50, %v9449_v5  ;;  %v6932_v18 = vld [vmem:[%s11892_s11 + $0x58] sm:$0xff] }
 0x8e0   : > { %v2125_v44 = vsel %vm545_vm2, %v2113_v58, 0.0  ;;  %v9569_v7 = vsel %vm2348_vm4, %v2339_v15, %v2357_v8  ;;  %v9572_v39 = vsel %vm2347_vm5, %v2338_v60, %v2356_v6  ;;  %v9577_v51 = vsel %vm2349_vm6, %v2340_v61, %v2358_v36  ;;  %v6931_v6 = vld [vmem:[%s11892_s11 + $0x50] sm:$0xff]  ;;  %v6953_v36 = vld [vmem:[%s11886_s5 + $0x80] sm:$0xff] }
 0x8e1   : > { %v2173_v53 = vmul.f32 %v2156_v13, %v2125_v44  ;;  %v2341_v13 = vadd.f32 %v9494_v12, %v2293_v3  ;;  %v2391_v25 = vmul.f32 %v9569_v7, %v9569_v7  ;;  %v2390_v20 = vmul.f32 %v9572_v39, %v9572_v39 }
 0x8e2   : > { %v2372_v42 = vadd.f32 %v9569_v7, %v9572_v39  ;;  %v2392_v35 = vmul.f32 %v9577_v51, %v9577_v51  ;;  %v2360_v57 = vmul.f32 %v9553_v62, %v2342_v59  ;;  %vm2351_vm8 = vcmp.ge.f32.partialorder %v2342_v59, 0.0 }
 0x8e3   : > { %v2115_v33 = vpop.permute.xlu1 %2114  ;;  %v2221_v29 = vadd.f32 %v2213_v34, %v2173_v53  ;;  %v2359_v12 = vmul.f32 %v9553_v62, %v2341_v13  ;;  %vm2350_vm7 = vcmp.ge.f32.partialorder %v2341_v13, 0.0  ;;  %v2398_v49 = vadd.f32 %v2391_v25, %v2390_v20  ;;  %v6958_v25 = vld [vmem:[%s11886_s5 + $0xa8] sm:$0xff]  ;;  %v1505_v20 = vld [vmem:[%s11891_s10 + $0x30] sm:$0xff] }
 0x8e4   : > { %v2126_v4 = vsel %vm545_vm2, %v2115_v33, 0.0  ;;  %v2373_v43 = vadd.f32 %v2372_v42, %v9577_v51  ;;  %v2249_v37 = vsel %vm550_vm3, %v2239_v21, 0.0  ;;  %v6921_v42 = vld [vmem:[%s11891_s10 + $0x40] sm:$0xff] }
 0x8e5   : > { %v2174_v16 = vmul.f32 %v9500_v41, %v2126_v4  ;;  %v9585_v40 = vsel %vm2350_vm7, %v2341_v13, %v2359_v12  ;;  %v2399_v15 = vadd.f32 %v2398_v49, %v2392_v35  ;;  %v2289_v53 = vmul.f32 %v9502_v1, %v2249_v37  ;;  %v6954_v12 = vld [vmem:[%s11886_s5 + $0x88] sm:$0xff] }
 0x8e6   : > { %v2393_v44 = vmul.f32 %v9585_v40, %v9585_v40  ;;  %v2374_v33 = vadd.f32 %v2373_v43, %v9585_v40 }
 0x8e7   : > { %v2235_v54 = vpop.permute.xlu1 %2234  ;;  %v2222_v41 = vadd.f32 %v2214_v26, %v2174_v16 }
 0x8e8   : > { %v2247_v24 = vsel %vm550_vm3, %v2235_v54, 0.0  ;;  %v2400_v3 = vadd.f32 %v2399_v15, %v2393_v44 }
 0x8e9   : > { %v2287_v63 = vmul.f32 %v9484_v10, %v2247_v24  ;;  %v2296_v56 = vadd.f32 %v2288_v32, %v2222_v41  ;;  %v6957_v41 = vld [vmem:[%s11886_s5 + $0xa0] sm:$0xff]  ;;  %v6959_v32 = vld [vmem:[%s11886_s5 + $0xb0] sm:$0xff] }
 0x8eb   : > { %v2295_v48 = vadd.f32 %v2287_v63, %v2221_v29  ;;  %v2117_v10 = vpop.permute.xlu1 %2116  ;;  %v2344_v47 = vadd.f32 %v9508_v30, %v2296_v56  ;;  %v1506_v56 = vld [vmem:[%s11891_s10 + $0x38] sm:$0xff] }
 0x8ec   : > { %v2127_v58 = vsel %vm545_vm2, %v2117_v10, 0.0  ;;  %v6956_v10 = vld [vmem:[%s11886_s5 + $0x98] sm:$0xff] }
 0x8ed   : > { %v2343_v2 = vadd.f32 %v9506_v27, %v2295_v48  ;;  %v2175_v11 = vmul.f32 %v9504_v46, %v2127_v58  ;;  %v9603_v46 = vsel %vm2351_vm8, %v2342_v59, %v2360_v57  ;;  %v2362_v60 = vmul.f32 %v9553_v62, %v2344_v47  ;;  %v6955_v48 = vld [vmem:[%s11886_s5 + $0x90] sm:$0xff]  ;;  %v6960_v59 = vld [vmem:[%s11886_s5 + $0xb8] sm:$0xff]  ;;  %v1504_v58 = vld [vmem:[%s11891_s10 + $0x28] sm:$0xff] }
 0x8ee   : > { %vm2353_vm12 = vcmp.ge.f32.partialorder %v2344_v47, 0.0  ;;  %v2375_v5 = vadd.f32 %v2374_v33, %v9603_v46  ;;  %v2394_v50 = vmul.f32 %v9603_v46, %v9603_v46 }
 0x8ef   : > { %v2361_v27 = vmul.f32 %v9553_v62, %v2343_v2  ;;  %vm2352_vm9 = vcmp.ge.f32.partialorder %v2343_v2, 0.0  ;;  %v2223_v55 = vadd.f32 %v2215_v52, %v2175_v11  ;;  %v9615_v9 = vsel %vm2353_vm12, %v2344_v47, %v2362_v60 }
 0x8f0   : > { %v2401_v19 = vadd.f32 %v2400_v3, %v2394_v50  ;;  %v2396_v24 = vmul.f32 %v9615_v9, %v9615_v9 }
 0x8f1   : > { %v9605_v45 = vsel %vm2352_vm9, %v2343_v2, %v2361_v27  ;;  %v2297_v4 = vadd.f32 %v2289_v53, %v2223_v55  ;;  %v1503_v2 = vld [vmem:[%s11891_s10 + $0x20] sm:$0xff] }
 0x8f2   : > { %v2395_v30 = vmul.f32 %v9605_v45, %v9605_v45  ;;  %v2376_v61 = vadd.f32 %v2375_v5, %v9605_v45  ;;  %7553 = vmatprep.mubr.msk.f32.mxu1 %vm661_vm0, %v1503_v2 }
 0x8f3   : > { %7554 = vmatmul.mubr.msk.f32.gmra.mrb[12].mxu1 %vm661_vm0, %v1504_v58 }
 0x8f4   : > { %v2402_v1 = vadd.f32 %v2401_v19, %v2395_v30  ;;  %v2377_v14 = vadd.f32 %v2376_v61, %v9615_v9  ;;  %7556 = vmatprep.mubr.msk.f32.mxu1 %vm661_vm0, %v1505_v20 }
 0x8f6   : > { %v2403_v63 = vadd.f32 %v2402_v1, %v2396_v24 }
 0x8f7   : > { %7557 = vmatmul.mubr.msk.f32.gmra.mrb[14].mxu1 %vm661_vm0, %v1506_v56 }
 0x8f8   : > { %7595 = vmatprep.mubr.msk.f32.mxu1 %vm661_vm0, %v6921_v42 }
 0x8fc   : > { %v2336_v34 = vpop.permute.xlu1 %2335 }
 0x8fd   : > { %v2345_v54 = vadd.f32 %v2336_v34, %v2297_v4 }
 0x8ff   : > { %vm2354_vm13 = vcmp.ge.f32.partialorder %v2345_v54, 0.0  ;;  %v2363_v8 = vmul.f32 %v9553_v62, %v2345_v54  ;;  %v6930_v62 = vld [vmem:[%s11892_s11 + $0x48] sm:$0xff] }
 0x901   : > { %v9621_v13 = vsel %vm2354_vm13, %v2345_v54, %v2363_v8 }
 0x902   : > { %v2378_v29 = vadd.f32 %v2377_v14, %v9621_v13  ;;  %v2397_v16 = vmul.f32 %v9621_v13, %v9621_v13 }
 0x904   : > { %2379 = vadd.xlane.f32.xlu1 %v2378_v29  ;;  %v2404_v26 = vadd.f32 %v2403_v63, %v2397_v16 }
 0x906   : > { %2405 = vadd.xlane.f32.xlu0 %v2404_v26 }
 0x915   : > { %2462 = vperm.xlu1 %8192, %v6930_v62  }
 0x919   : > { %2467 = vperm.xlu1 %8192, %v6931_v6  }
 0x91c   : > { %2457 = vperm.xlu0 %8189, %v6929_v38  }
 0x91d   : > { %2652 = vperm.xlu1 %8192, %v6953_v36  }
 0x920   : > { %2472 = vperm.xlu0 %8189, %v6932_v18  }
 0x921   : > { %2662 = vperm.xlu1 %8192, %v6955_v48  }
 0x924   : > { %2657 = vperm.xlu0 %8189, %v6954_v12  }
 0x925   : > { %2672 = vperm.xlu1 %8192, %v6957_v41  }
 0x928   : > { %2667 = vperm.xlu0 %8189, %v6956_v10  }
 0x929   : > { %2682 = vperm.xlu1 %8192, %v6959_v32  }
 0x92c   : > { %2677 = vperm.xlu0 %8189, %v6958_v25  }
 0x930   : > { %2687 = vperm.xlu0 %8189, %v6960_v59  }
 0x991   : > { %v2380_v35 = vpop.xlane.xlu1 %2379 }
 0x992   : > { %v2381_v49 = vrot.slane %v2380_v35, 4 }
 0x993   : > { %v2406_v21 = vpop.xlane.xlu0 %2405 }
 0x994   : > { %v2382_v57 = vadd.f32 %v2381_v49, %v2380_v35  ;;  %v2407_v27 = vrot.slane %v2406_v21, 4 }
 0x995   : > { %v2463_v41 = vpop.permute.xlu1 %2462 }
 0x996   : > { %v2408_v11 = vadd.f32 %v2407_v27, %v2406_v21  ;;  %v2383_v43 = vrot.slane %v2382_v57, 2 }
 0x998   : > { %v2384_v44 = vadd.f32 %v2383_v43, %v2382_v57  ;;  %v2409_v52 = vrot.slane %v2408_v11, 2  ;;  %v6947_v43 = vld [vmem:[%s11885_s4 + $0x90] sm:$0xff] }
 0x999   : > { %v2468_v42 = vpop.permute.xlu1 %2467 }
 0x99a   : > { %v2385_v47 = vrot.slane %v2384_v44, 1  ;;  %v2410_v37 = vadd.f32 %v2409_v52, %v2408_v11  ;;  %v6951_v52 = vld [vmem:[%s11885_s4 + $0xb0] sm:$0xff] }
 0x99b   : > { %v2458_v12 = vpop.permute.xlu0 %2457 }
 0x99c   : > { %v2386_v33 = vadd.f32 %v2385_v47, %v2384_v44  ;;  %v2411_v15 = vrot.slane %v2410_v37, 1  ;;  %v6950_v44 = vld [vmem:[%s11885_s4 + $0xa8] sm:$0xff]  ;;  %v6952_v47 = vld [vmem:[%s11885_s4 + $0xb8] sm:$0xff] }
 0x99e   : > { %8057 = vpush %v2386_v33  ;;  %v2412_v55 = vadd.f32 %v2411_v15, %v2410_v37  ;;  %v2653_v33 = vpop.permute.xlu1 %2652 }
 0x99f   : > { %v2473_v58 = vpop.permute.xlu0 %2472 }
 0x9a0   : > { %8059 = vpush %v2412_v55 }
 0x9a3   : > { %v2658_v37 = vpop.permute.xlu0 %2657 }
 0x9a7   : > { %v2668_v15 = vpop.permute.xlu0 %2667 }
 0x9cf   : > { %s8058_s20 = spop %8057 }
 0x9d0   : > { %v2388_v3 = vstv %s8058_s20  ;;  %s11931_s20 = smov 124  }
 0x9d1   : > { %v2389_v53 = vmul.f32 0.00012207031, %v2388_v3  ;;  %s8060_s27 = spop %8059  ;;  %v2828_v3 = vstv %s6969_s29 }
 0x9d2   : > { %v2414_v60 = vstv %s8060_s27 }
 0x9d3   : > { %v2415_v5 = vmul.f32 0.00012207031, %v2414_v60  ;;  %v2416_v50 = vmul.f32 %v2389_v53, %v2389_v53  ;;  %v2419_v61 = vsub.f32 %v9572_v39, %v2389_v53  ;;  %v2420_v19 = vsub.f32 %v9569_v7, %v2389_v53 }
 0x9d4   : > { %v2421_v54 = vsub.f32 %v9577_v51, %v2389_v53  ;;  %v2422_v1 = vsub.f32 %v9585_v40, %v2389_v53  ;;  %v2423_v26 = vsub.f32 %v9603_v46, %v2389_v53  ;;  %v2424_v62 = vsub.f32 %v9605_v45, %v2389_v53  ;;  %v6922_v46 = vld [vmem:[%s11891_s10 + $0x48] sm:$0xff]  ;;  %v6923_v45 = vld [vmem:[%s11891_s10 + $0x50] sm:$0xff] }
 0x9d5   : > { %v2417_v30 = vsub.f32 %v2415_v5, %v2416_v50  ;;  %v2425_v7 = vsub.f32 %v9615_v9, %v2389_v53  ;;  %v2426_v51 = vsub.f32 %v9621_v13, %v2389_v53  ;;  %v6924_v9 = vld [vmem:[%s11891_s10 + $0x58] sm:$0xff]  ;;  %v6945_v13 = vld [vmem:[%s11885_s4 + $0x80] sm:$0xff]  ;;  %v2663_v53 = vpop.permute.xlu1 %2662 }
 0x9d6   : > { %7615 = vmatprep.mubr.msk.f32.mxu0 %vm815_vm1, %v6945_v13 }
 0x9d7   : > { %v2418_v4 = vmax.f32 %v2417_v30, 0.0 }
 0x9d9   : > { %v2427_v34 = vadd.f32 1e-08, %v2418_v4 }
 0x9db   : > { %8281 = vrsqrt.f32 %v2427_v34 }
 0x9e5   : > { %v8282_v8 = vpop.eup %8281 }
 0x9e6   : > { %v2429_v14 = vmul.f32 %v8282_v8, %v2419_v61  ;;  %v2430_v24 = vmul.f32 %v8282_v8, %v2420_v19  ;;  %v2431_v29 = vmul.f32 %v8282_v8, %v2421_v54  ;;  %v2432_v16 = vmul.f32 %v8282_v8, %v2422_v1  ;;  %v2678_v1 = vpop.permute.xlu0 %2677 }
 0x9e7   : > { %v2433_v38 = vmul.f32 %v8282_v8, %v2423_v26  ;;  %v2434_v39 = vmul.f32 %v8282_v8, %v2424_v62  ;;  %v2435_v36 = vmul.f32 %v8282_v8, %v2425_v7  ;;  %v2436_v18 = vmul.f32 %v8282_v8, %v2426_v51 }
 0x9e8   : > { %v7873_v63 = vpack.c.bf16 %v2430_v24, %v2429_v14  ;;  %v7877_v6 = vpack.c.bf16 %v2432_v16, %v2431_v29  ;;  %v2673_v29 = vpop.permute.xlu1 %2672 }
 0x9e9   : > { %v7881_v40 = vpack.c.bf16 %v2434_v39, %v2433_v38  ;;  %v7885_v48 = vpack.c.bf16 %v2436_v18, %v2435_v36 }
 0x9ea   : > { %7874 = vmatprep.subr.bf16.mxu1 %v7873_v63 }
 0x9eb   : > { %7876 = vmatpush3.bf16.msra.mxu1 %v7873_v63 }
 0x9ec   : > { %7878 = vmatprep.subr.bf16.mxu1 %v7877_v6 }
 0x9ef   : > { %7880 = vmatpush3.bf16.msra.mxu1 %v7877_v6 }
 0x9f0   : > { %7882 = vmatprep.subr.bf16.mxu1 %v7881_v40 }
 0x9f3   : > { %7884 = vmatpush3.bf16.msra.mxu1 %v7881_v40 }
 0x9f4   : > { %7886 = vmatprep.subr.bf16.mxu1 %v7885_v48 }
 0x9f7   : > { %7888 = vmatpush3.bf16.msra.mxu1 %v7885_v48 }
 0x9fa   : > { %7596 = vmatmul.mubr.msk.f32.vlgmr.msra.gmra.mrb[16].mxu1 %vm661_vm0, %v6922_v46 }
 0x9fb   : > { %7598 = vmatprep.mubr.msk.f32.mxu1 %vm661_vm0, %v6923_v45  ;;  %v2688_v45 = vpop.permute.xlu0 %2687 }
 0x9fe   : > { %7599 = vmatmul.mubr.msk.f32.gmra.mrb[18].mxu1 %vm661_vm0, %v6924_v9 }
 0xacd   : > { %v7597_v10 = vpop.f32.mrb[16].mxu1 }
 0xace   : > { %v2591_v32 = vadd.f32 %v7597_v10, %v2463_v41  ;;  %v2585_v25 = vpop.f32.mrb[17].mxu1 }
 0xacf   : > { %v2586_v59 = vadd.f32 %v2585_v25, %v2458_v12  ;;  %v2683_v12 = vpop.permute.xlu1 %2682 }
 0xad0   : > { %v9707_v2 = vadd.f32 %v2591_v32, %v9207_v22 }
 0xad1   : > { %v9710_v20 = vadd.f32 %v2586_v59, %v9210_v0  ;;  %v7600_v56 = vpop.f32.mrb[18].mxu1  ;;  %v6946_v0 = vld [vmem:[%s11885_s4 + $0x88] sm:$0xff] }
 0xad2   : > { %v2601_v35 = vadd.f32 %v7600_v56, %v2473_v58  ;;  %v2595_v49 = vpop.f32.mrb[19].mxu1 }
 0xad3   : > { %v2596_v21 = vadd.f32 %v2595_v49, %v2468_v42  ;;  %v7889_v57 = vpack.c.bf16 %v9707_v2, %v9710_v20 }
 0xad4   : > { %v9715_v27 = vadd.f32 %v2601_v35, %v9215_v17  ;;  %v6948_v17 = vld [vmem:[%s11885_s4 + $0x98] sm:$0xff] }
 0xad5   : > { %v9718_v11 = vadd.f32 %v2596_v21, %v9218_v23  ;;  %7890 = vmatprep.subr.bf16.mxu0 %v7889_v57  ;;  %v6949_v23 = vld [vmem:[%s11885_s4 + $0xa0] sm:$0xff] }
 0xad6   : > { %7892 = vmatpush3.bf16.msra.mxu0 %v7889_v57 }
 0xad7   : > { %v7893_v22 = vpack.c.bf16 %v9715_v27, %v9718_v11 }
 0xad9   : > { %7894 = vmatprep.subr.bf16.mxu0 %v7893_v22 }
 0xada   : > { %7896 = vmatpush3.bf16.msra.mxu0 %v7893_v22 }
 0xadd   : > { %7616 = vmatmul.mubr.msk.f32.vlgmr.msra.gmra.mrb[12].mxu0 %vm815_vm1, %v6946_v0 }
 0xade   : > { %7618 = vmatprep.mubr.msk.f32.mxu0 %vm815_vm1, %v6947_v43 }
 0xae1   : > { %7619 = vmatmul.mubr.msk.f32.gmra.mrb[14].mxu0 %vm815_vm1, %v6948_v17 }
 0xae2   : > { %7621 = vmatprep.mubr.msk.f32.mxu0 %vm815_vm1, %v6949_v23 }
 0xae5   : > { %7622 = vmatmul.mubr.msk.f32.gmra.mrb[16].mxu0 %vm815_vm1, %v6950_v44 }
 0xae6   : > { %7624 = vmatprep.mubr.msk.f32.mxu0 %vm815_vm1, %v6951_v52 }
 0xae9   : > { %7625 = vmatmul.mubr.msk.f32.gmra.mrb[18].mxu0 %vm815_vm1, %v6952_v47 }
 0xbb0   : > { %v7617_v55 = vpop.f32.mrb[12].mxu0 }
 0xbb1   : > { %v2786_v60 = vadd.f32 %v7617_v55, %v2658_v37  ;;  %v2780_v5 = vpop.f32.mrb[13].mxu0 }
 0xbb2   : > { %v2781_v50 = vadd.f32 %v2780_v5, %v2653_v33  ;;  %v6970_v5 = vld [vmem:[%s11887_s6 + $0x80] sm:$0xff] }
 0xbb3   : > { %vm2821_vm14 = vcmp.ge.f32.partialorder %v2786_v60, 0.0  ;;  %v2830_v30 = vmul.f32 %v2828_v3, %v2786_v60 }
 0xbb4   : > { %vm2820_vm15 = vcmp.ge.f32.partialorder %v2781_v50, 0.0  ;;  %v2829_v4 = vmul.f32 %v2828_v3, %v2781_v50  ;;  %v7620_v34 = vpop.f32.mrb[14].mxu0 }
 0xbb5   : > { %v9750_v61 = vsel %vm2821_vm14, %v2786_v60, %v2830_v30  ;;  %v2796_v19 = vadd.f32 %v7620_v34, %v2668_v15  ;;  %v2790_v54 = vpop.f32.mrb[15].mxu0  ;;  %v6972_v60 = vld [vmem:[%s11887_s6 + $0x90] sm:$0xff]  ;;  %v6978_v30 = vld [vmem:[%s11888_s7 + $0x80] sm:$0xff]  ;;  %v6973_v34 = vld [vmem:[%s11887_s6 + $0x98] sm:$0xff] }
 0xbb6   : > { %v2864_v8 = vmul.f32 %v9750_v61, %v9750_v61  ;;  %v9754_v14 = vsel %vm2820_vm15, %v2781_v50, %v2829_v4  ;;  %v2791_v24 = vadd.f32 %v2790_v54, %v2663_v53  ;;  %v6971_v53 = vld [vmem:[%s11887_s6 + $0x88] sm:$0xff]  ;;  %v6980_v4 = vld [vmem:[%s11888_s7 + $0x90] sm:$0xff]  ;;  %v6974_v54 = vld [vmem:[%s11887_s6 + $0xa0] sm:$0xff] }
 0xbb7   : > { %v2863_v16 = vmul.f32 %v9754_v14, %v9754_v14  ;;  %vm2823_vm4 = vcmp.ge.f32.partialorder %v2796_v19, 0.0  ;;  %v2832_v63 = vmul.f32 %v2828_v3, %v2796_v19  ;;  %v2845_v6 = vadd.f32 %v9750_v61, %v9754_v14  ;;  %v6979_v50 = vld [vmem:[%s11888_s7 + $0x88] sm:$0xff] }
 0xbb8   : > { %vm2822_vm5 = vcmp.ge.f32.partialorder %v2791_v24, 0.0  ;;  %v2831_v26 = vmul.f32 %v2828_v3, %v2791_v24  ;;  %v7623_v62 = vpop.f32.mrb[16].mxu0 }
 0xbb9   : > { %v2806_v38 = vadd.f32 %v7623_v62, %v2678_v1  ;;  %v2800_v39 = vpop.f32.mrb[17].mxu0  ;;  %v2871_v7 = vadd.f32 %v2864_v8, %v2863_v16  ;;  %v9760_v51 = vsel %vm2823_vm4, %v2796_v19, %v2832_v63  ;;  %v6981_v19 = vld [vmem:[%s11888_s7 + $0x98] sm:$0xff]  ;;  %v6982_v1 = vld [vmem:[%s11888_s7 + $0xa0] sm:$0xff]  ;;  %v6975_v8 = vld [vmem:[%s11887_s6 + $0xa8] sm:$0xff] }
 0xbba   : > { %v9762_v40 = vsel %vm2822_vm5, %v2791_v24, %v2831_v26  ;;  %v2801_v36 = vadd.f32 %v2800_v39, %v2673_v29  ;;  %v2866_v41 = vmul.f32 %v9760_v51, %v9760_v51  ;;  %v6983_v24 = vld [vmem:[%s11888_s7 + $0xa8] sm:$0xff]  ;;  %v6976_v29 = vld [vmem:[%s11887_s6 + $0xb0] sm:$0xff]  ;;  %v6977_v63 = vld [vmem:[%s11887_s6 + $0xb8] sm:$0xff] }
 0xbbb   : > { %v2846_v18 = vadd.f32 %v2845_v6, %v9762_v40  ;;  %v2865_v48 = vmul.f32 %v9762_v40, %v9762_v40  ;;  %vm2825_vm6 = vcmp.ge.f32.partialorder %v2806_v38, 0.0  ;;  %v2834_v46 = vmul.f32 %v2828_v3, %v2806_v38  ;;  %v6984_v16 = vld [vmem:[%s11888_s7 + $0xb0] sm:$0xff]  ;;  %v6986_v26 = vld [vmem:[%s11889_s8 + $0x80] sm:$0xff]  ;;  %v6985_v62 = vld [vmem:[%s11888_s7 + $0xb8] sm:$0xff] }
 0xbbc   : > { %vm2824_vm7 = vcmp.ge.f32.partialorder %v2801_v36, 0.0  ;;  %v2833_v9 = vmul.f32 %v2828_v3, %v2801_v36  ;;  %v7626_v13 = vpop.f32.mrb[18].mxu0  ;;  %v11963_v6 = vmov 1   ;;  %v6987_v39 = vld [vmem:[%s11889_s8 + $0x88] sm:$0xff] }
 0xbbd   : > { %v2872_v10 = vadd.f32 %v2871_v7, %v2865_v48  ;;  %v2847_v32 = vadd.f32 %v2846_v18, %v9760_v51  ;;  %v2816_v25 = vadd.f32 %v7626_v13, %v2688_v45  ;;  %v2810_v59 = vpop.f32.mrb[19].mxu0  ;;  %v9770_v58 = vsel %vm2825_vm6, %v2806_v38, %v2834_v46  ;;  %v6988_v38 = vld [vmem:[%s11889_s8 + $0x90] sm:$0xff]  ;;  %v6990_v18 = vld [vmem:[%s11889_s8 + $0xa0] sm:$0xff]  ;;  %v6991_v46 = vld [vmem:[%s11889_s8 + $0xa8] sm:$0xff] }
 0xbbe   : > { %v9772_v56 = vsel %vm2824_vm7, %v2801_v36, %v2833_v9  ;;  %v2811_v42 = vadd.f32 %v2810_v59, %v2683_v12  ;;  %v2868_v0 = vmul.f32 %v9770_v58, %v9770_v58  ;;  %v11964_v7 = vmov 0   ;;  %v6989_v36 = vld [vmem:[%s11889_s8 + $0x98] sm:$0xff]  ;;  %v6992_v45 = vld [vmem:[%s11889_s8 + $0xb0] sm:$0xff]  ;;  %v6994_v9 = vld [vmem:[%s11890_s9 + $0x80] sm:$0xff] }
 0xbbf   : > { %v2848_v35 = vadd.f32 %v2847_v32, %v9772_v56  ;;  %v2867_v49 = vmul.f32 %v9772_v56, %v9772_v56  ;;  %v2873_v21 = vadd.f32 %v2872_v10, %v2866_v41  ;;  %vm2827_vm8 = vcmp.ge.f32.partialorder %v2816_v25, 0.0  ;;  %v6995_v13 = vld [vmem:[%s11890_s9 + $0x88] sm:$0xff]  ;;  %v6996_v12 = vld [vmem:[%s11890_s9 + $0x90] sm:$0xff]  ;;  %v6993_v41 = vld [vmem:[%s11889_s8 + $0xb8] sm:$0xff] }
 0xbc0   : > { %v2836_v57 = vmul.f32 %v2828_v3, %v2816_v25  ;;  %vm2826_vm9 = vcmp.ge.f32.partialorder %v2811_v42, 0.0  ;;  %v2835_v22 = vmul.f32 %v2828_v3, %v2811_v42  ;;  %v11965_v48 = vmov 2   ;;  %v6999_v10 = vld [vmem:[%s11890_s9 + $0xa8] sm:$0xff]  ;;  %v7000_v32 = vld [vmem:[%s11890_s9 + $0xb0] sm:$0xff]  ;;  %v6998_v59 = vld [vmem:[%s11890_s9 + $0xa0] sm:$0xff] }
 0xbc1   : > { %v2874_v43 = vadd.f32 %v2873_v21, %v2867_v49  ;;  %v2849_v17 = vadd.f32 %v2848_v35, %v9770_v58 }
 0xbc2   : > { %v9780_v23 = vsel %vm2827_vm8, %v2816_v25, %v2836_v57  ;;  %v9782_v44 = vsel %vm2826_vm9, %v2811_v42, %v2835_v22  ;;  %v6997_v25 = vld [vmem:[%s11890_s9 + $0x98] sm:$0xff] }
 0xbc3   : > { %v2869_v52 = vmul.f32 %v9782_v44, %v9782_v44  ;;  %v2850_v47 = vadd.f32 %v2849_v17, %v9782_v44  ;;  %v2875_v37 = vadd.f32 %v2874_v43, %v2868_v0  ;;  %v2870_v15 = vmul.f32 %v9780_v23, %v9780_v23 }
 0xbc5   : > { %v2851_v33 = vadd.f32 %v2850_v47, %v9780_v23  ;;  %v2876_v55 = vadd.f32 %v2875_v37, %v2869_v52 }
 0xbc7   : > { %2852 = vadd.xlane.f32.xlu1 %v2851_v33  ;;  %v2877_v3 = vadd.f32 %v2876_v55, %v2870_v15 }
 0xbc9   : > { %2878 = vadd.xlane.f32.xlu0 %v2877_v3 }
 0xbd8   : > { %2926 = vperm.xlu1 %8192, %v6971_v53  }
 0xbdc   : > { %2931 = vperm.xlu1 %8192, %v6972_v60  }
 0xbdf   : > { %2921 = vperm.xlu0 %8189, %v6970_v5  }
 0xbe0   : > { %2983 = vperm.xlu1 %8192, %v6979_v50  }
 0xbe3   : > { %2978 = vperm.xlu0 %8189, %v6978_v30  }
 0xbe4   : > { %2988 = vperm.xlu1 %8192, %v6980_v4  }
 0xbe7   : > { %2936 = vperm.xlu0 %8189, %v6973_v34  }
 0xbe8   : > { %2993 = vperm.xlu1 %8192, %v6981_v19  }
 0xbeb   : > { %2941 = vperm.xlu0 %8189, %v6974_v54  }
 0xbec   : > { %2998 = vperm.xlu1 %8192, %v6982_v1  }
 0xbef   : > { %2946 = vperm.xlu0 %8189, %v6975_v8  }
 0xbf0   : > { %3003 = vperm.xlu1 %8192, %v6983_v24  }
 0xbf3   : > { %2951 = vperm.xlu0 %8189, %v6976_v29  }
 0xbf4   : > { %3008 = vperm.xlu1 %8192, %v6984_v16  }
 0xbf7   : > { %2956 = vperm.xlu0 %8189, %v6977_v63  }
 0xbf8   : > { %3070 = vperm.xlu1 %8192, %v6986_v26  }
 0xbfb   : > { %3013 = vperm.xlu0 %8189, %v6985_v62  }
 0xbfc   : > { %8193 = vset.pattern.permute.xlu1 %v11963_v6 }
 0xbfd   : > { %3117 = vperm.xlu1 %8193, %v6986_v26  }
 0xbff   : > { %8194 = vset.pattern.permute.xlu0 %v11963_v6 }
 0xc00   : > { %3121 = vperm.xlu0 %8194, %v6987_v39  }
 0xc01   : > { %8195 = vset.pattern.permute.xlu1 %v11964_v7 }
 0xc02   : > { %3080 = vperm.xlu1 %8195, %v6988_v38  }
 0xc04   : > { %3129 = vperm.xlu0 %8194, %v6989_v36  }
 0xc06   : > { %8196 = vset.pattern.permute.xlu1 %v11963_v6 }
 0xc07   : > { %3125 = vperm.xlu1 %8196, %v6988_v38  }
 0xc08   : > { %3133 = vperm.xlu0 %8194, %v6990_v18  }
 0xc0b   : > { %8197 = vset.pattern.permute.xlu1 %v11965_v48 }
 0xc0c   : > { %3195 = vperm.xlu1 %8197, %v6987_v39   ;;  %8201 = vset.pattern.permute.xlu0 %v11965_v48 }
 0xc0d   : > { %3191 = vperm.xlu0 %8201, %v6986_v26  }
 0xc10   : > { %8198 = vset.pattern.permute.xlu1 %v11964_v7 }
 0xc11   : > { %3085 = vperm.xlu1 %8198, %v6989_v36   ;;  %3207 = vperm.xlu0 %8201, %v6990_v18  }
 0xc15   : > { %8199 = vset.pattern.permute.xlu1 %v11965_v48  ;;  %3211 = vperm.xlu0 %8201, %v6991_v46  }
 0xc16   : > { %3199 = vperm.xlu1 %8199, %v6988_v38  }
 0xc19   : > { %3215 = vperm.xlu0 %8201, %v6992_v45  }
 0xc1a   : > { %8200 = vset.pattern.permute.xlu1 %v11964_v7 }
 0xc1b   : > { %3090 = vperm.xlu1 %8200, %v6990_v18  }
 0xc1d   : > { %8209 = vset.pattern.permute.xlu0 %v11964_v7 }
 0xc1e   : > { %3075 = vperm.xlu0 %8209, %v6987_v39  }
 0xc1f   : > { %8202 = vset.pattern.permute.xlu1 %v11965_v48 }
 0xc20   : > { %3203 = vperm.xlu1 %8202, %v6989_v36  }
 0xc22   : > { %3240 = vperm.xlu0 %8209, %v6994_v9  }
 0xc24   : > { %8203 = vset.pattern.permute.xlu1 %v11964_v7 }
 0xc25   : > { %3245 = vperm.xlu1 %8203, %v6995_v13  }
 0xc26   : > { %3095 = vperm.xlu0 %8209, %v6991_v46  }
 0xc29   : > { %8204 = vset.pattern.permute.xlu1 %v11963_v6 }
 0xc2a   : > { %3137 = vperm.xlu1 %8204, %v6991_v46   ;;  %3100 = vperm.xlu0 %8209, %v6992_v45  }
 0xc2e   : > { %8205 = vset.pattern.permute.xlu1 %v11964_v7  ;;  %3105 = vperm.xlu0 %8209, %v6993_v41  }
 0xc2f   : > { %3250 = vperm.xlu1 %8205, %v6996_v12  }
 0xc32   : > { %3265 = vperm.xlu0 %8209, %v6999_v10  }
 0xc33   : > { %8206 = vset.pattern.permute.xlu1 %v11963_v6 }
 0xc34   : > { %3141 = vperm.xlu1 %8206, %v6992_v45  }
 0xc36   : > { %3270 = vperm.xlu0 %8209, %v7000_v32  }
 0xc38   : > { %8207 = vset.pattern.permute.xlu1 %v11964_v7 }
 0xc39   : > { %3255 = vperm.xlu1 %8207, %v6997_v25  }
 0xc3d   : > { %8208 = vset.pattern.permute.xlu1 %v11963_v6 }
 0xc3e   : > { %3145 = vperm.xlu1 %8208, %v6993_v41  }
 0xc42   : > { %8210 = vset.pattern.permute.xlu1 %v11964_v7 }
 0xc43   : > { %3260 = vperm.xlu1 %8210, %v6998_v59  }
 0xc47   : > { %8211 = vset.pattern.permute.xlu1 %v11965_v48 }
 0xc48   : > { %3219 = vperm.xlu1 %8211, %v6993_v41  }
 0xc4c   : > { %8212 = vset.pattern.permute.xlu1 %v11964_v7 }
 0xc54   : > { %v2853_v42 = vpop.xlane.xlu1 %2852 }
 0xc55   : > { %v2854_v35 = vrot.slane %v2853_v42, 4 }
 0xc56   : > { %v2879_v49 = vpop.xlane.xlu0 %2878 }
 0xc57   : > { %v2855_v21 = vadd.f32 %v2854_v35, %v2853_v42  ;;  %v2880_v57 = vrot.slane %v2879_v49, 4 }
 0xc58   : > { %v2927_v55 = vpop.permute.xlu1 %2926 }
 0xc59   : > { %v2881_v22 = vadd.f32 %v2880_v57, %v2879_v49  ;;  %v2856_v0 = vrot.slane %v2855_v21, 2 }
 0xc5b   : > { %v2857_v43 = vadd.f32 %v2856_v0, %v2855_v21  ;;  %v2882_v17 = vrot.slane %v2881_v22, 2 }
 0xc5c   : > { %v2932_v60 = vpop.permute.xlu1 %2931 }
 0xc5d   : > { %v2858_v52 = vrot.slane %v2857_v43, 1  ;;  %v2883_v47 = vadd.f32 %v2882_v17, %v2881_v22 }
 0xc5e   : > { %v2922_v3 = vpop.permute.xlu0 %2921 }
 0xc5f   : > { %v2859_v37 = vadd.f32 %v2858_v52, %v2857_v43  ;;  %v2884_v33 = vrot.slane %v2883_v47, 1 }
 0xc60   : > { %v2984_v54 = vpop.permute.xlu1 %2983 }
 0xc61   : > { %8061 = vpush %v2859_v37  ;;  %v2885_v15 = vadd.f32 %v2884_v33, %v2883_v47 }
 0xc62   : > { %v2979_v34 = vpop.permute.xlu0 %2978 }
 0xc63   : > { %8063 = vpush %v2885_v15 }
 0xc64   : > { %v2989_v29 = vpop.permute.xlu1 %2988 }
 0xc66   : > { %v2937_v24 = vpop.permute.xlu0 %2936 }
 0xc68   : > { %v2994_v63 = vpop.permute.xlu1 %2993 }
 0xc6a   : > { %v2942_v16 = vpop.permute.xlu0 %2941 }
 0xc6c   : > { %v2999_v12 = vpop.permute.xlu1 %2998 }
 0xc6e   : > { %v2947_v18 = vpop.permute.xlu0 %2946 }
 0xc70   : > { %v3004_v35 = vpop.permute.xlu1 %3003 }
 0xc74   : > { %v3009_v17 = vpop.permute.xlu1 %3008 }
 0xc92   : > { %s8062_s18 = spop %8061 }
 0xc93   : > { %v2861_v53 = vstv %s8062_s18  ;;  %s11972_s18 = smov 1  }
 0xc94   : > { %v9903_v5 = vmul.f32 0.00012207031, %v2861_v53  ;;  %s8064_s23 = spop %8063 }
 0xc95   : > { %v2887_v50 = vstv %s8064_s23 }
 0xc96   : > { %v2888_v30 = vmul.f32 0.00012207031, %v2887_v50  ;;  %v2889_v4 = vmul.f32 %v9903_v5, %v9903_v5  ;;  %v2893_v26 = vsub.f32 %v9750_v61, %v9903_v5  ;;  %v2892_v38 = vsub.f32 %v9754_v14, %v9903_v5 }
 0xc97   : > { %v2894_v39 = vsub.f32 %v9762_v40, %v9903_v5  ;;  %v2896_v13 = vsub.f32 %v9772_v56, %v9903_v5  ;;  %v2898_v14 = vsub.f32 %v9782_v44, %v9903_v5  ;;  %v2952_v40 = vpop.permute.xlu0 %2951  ;;  %v2895_v59 = vsub.f32 %v9760_v51, %v9903_v5 }
 0xc98   : > { %v2890_v19 = vsub.f32 %v2888_v30, %v2889_v4  ;;  %v2899_v44 = vsub.f32 %v9780_v23, %v9903_v5  ;;  %v2897_v15 = vsub.f32 %v9770_v58, %v9903_v5  ;;  %v7001_v4 = vld [vmem:[%s11890_s9 + $0xb8] sm:$0xff] }
 0xc9a   : > { %v2891_v1 = vmax.f32 %v2890_v19, 0.0 }
 0xc9b   : > { %v2957_v0 = vpop.permute.xlu0 %2956 }
 0xc9c   : > { %v2900_v8 = vadd.f32 1e-08, %v2891_v1 }
 0xc9e   : > { %8283 = vrsqrt.f32 %v2900_v8 }
 0xc9f   : > { %v3014_v37 = vpop.permute.xlu0 %3013 }
 0xca3   : > { %v3122_v19 = vpop.permute.xlu0 %3121 }
 0xca7   : > { %v3130_v1 = vpop.permute.xlu0 %3129 }
 0xca8   : > { %v8284_v62 = vpop.eup %8283 }
 0xca9   : > { %v2903_v36 = vmul.f32 %v8284_v62, %v2893_v26  ;;  %v2902_v46 = vmul.f32 %v8284_v62, %v2892_v38  ;;  %v2904_v45 = vmul.f32 %v8284_v62, %v2894_v39  ;;  %v2906_v61 = vmul.f32 %v8284_v62, %v2896_v13 }
 0xcaa   : > { %v2908_v42 = vmul.f32 %v8284_v62, %v2898_v14  ;;  %v2905_v49 = vmul.f32 %v8284_v62, %v2895_v59  ;;  %v2909_v22 = vmul.f32 %v8284_v62, %v2899_v44  ;;  %v11966_v44 = vld [vmem:[#allocation11_spill] sm:$0xff] }
 0xcab   : > { %v2960_v9 = vmul.f32 %v2927_v55, %v2903_v36  ;;  %v2959_v41 = vmul.f32 %v2922_v3, %v2902_v46  ;;  %v2961_v25 = vmul.f32 %v2932_v60, %v2904_v45  ;;  %v2963_v56 = vmul.f32 %v2942_v16, %v2906_v61  ;;  %v3071_v55 = vpop.permute.xlu1 %3070 }
 0xcac   : > { %v2965_v57 = vmul.f32 %v2952_v40, %v2908_v42  ;;  %v2962_v43 = vmul.f32 %v2937_v24, %v2905_v49  ;;  %v2966_v47 = vmul.f32 %v2957_v0, %v2909_v22  ;;  %v2907_v3 = vmul.f32 %v8284_v62, %v2897_v15  ;;  %v9978_v24 = vpop.permute.xlu0 %3133 }
 0xcad   : > { %v9915_v10 = vadd.f32 %v2984_v54, %v2960_v9  ;;  %v9917_v32 = vadd.f32 %v2979_v34, %v2959_v41  ;;  %v9927_v21 = vadd.f32 %v2989_v29, %v2961_v25  ;;  %v9935_v51 = vadd.f32 %v2999_v12, %v2963_v56 }
 0xcae   : > { %v9941_v52 = vadd.f32 %v3009_v17, %v2965_v57  ;;  %v9943_v23 = vadd.f32 %v2994_v63, %v2962_v43  ;;  %v9949_v33 = vadd.f32 %v3014_v37, %v2966_v47  ;;  %v2964_v60 = vmul.f32 %v2947_v18, %v2907_v3 }
 0xcaf   : > { %3044 = vrot.lane.b32.xlu0 %v9915_v10, %s11933_s19  ;;  %3042 = vrot.lane.b32.xlu1 %v9917_v32, %s11933_s19  ;;  %v9959_v53 = vpop.permute.xlu1 %3117  ;;  %v10011_v57 = vadd.s32 4294967292, %v11966_v44  ;;  %v10015_v43 = vadd.s32 4, %v11966_v44  ;;  %v3149_v44 = vmul.f32 %v3122_v19, %v9915_v10 }
 0xcb0   : > { %v9963_v50 = vadd.f32 %v3004_v35, %v2964_v60  ;;  %v3192_v29 = vpop.permute.xlu0 %3191 }
 0xcb1   : > { %11967 = vst [vmem:[#allocation11_spill] sm:$0xff] %v10011_v57  ;;  %vm553_vm12 = vcmp.ge.s32.totalorder %v10011_v57, 0  ;;  %11968 = vst [vmem:[#allocation16_spill] sm:$0xff] %v10015_v43  ;;  %vm558_vm13 = vcmp.lt.s32.totalorder %v10015_v43, 128 }
 0xcb3   : > { %3164 = vrot.lane.b32.xlu0 %v9917_v32, %s11931_s20  ;;  %3046 = vrot.lane.b32.xlu1 %v9927_v21, %s11933_s19  ;;  %v3081_v30 = vpop.permute.xlu1 %3080 }
 0xcb4   : > { %v9980_v63 = vpop.permute.xlu0 %3207 }
 0xcb7   : > { %3172 = vrot.lane.b32.xlu0 %v9935_v51, %s11931_s20  ;;  %3166 = vrot.lane.b32.xlu1 %v9915_v10, %s11931_s20  ;;  %v3126_v58 = vpop.permute.xlu1 %3125 }
 0xcb8   : > { %v9984_v62 = vpop.permute.xlu0 %3211  ;;  %v3150_v19 = vmul.f32 %v3126_v58, %v9927_v21 }
 0xcbb   : > { %3176 = vrot.lane.b32.xlu0 %v9941_v52, %s11931_s20  ;;  %3048 = vrot.lane.b32.xlu1 %v9943_v23, %s11933_s19  ;;  %v3196_v5 = vpop.permute.xlu1 %3195 }
 0xcbc   : > { %v9988_v39 = vpop.permute.xlu0 %3215 }
 0xcbf   : > { %3178 = vrot.lane.b32.xlu0 %v9949_v33, %s11931_s20  ;;  %3168 = vrot.lane.b32.xlu1 %v9927_v21, %s11931_s20  ;;  %v3086_v34 = vpop.permute.xlu1 %3085 }
 0xcc0   : > { %v3076_v18 = vpop.permute.xlu0 %3075 }
 0xcc3   : > { %3050 = vrot.lane.b32.xlu1 %v9935_v51, %s11933_s19  ;;  %v3200_v54 = vpop.permute.xlu1 %3199 }
 0xcc4   : > { %v3241_v9 = vpop.permute.xlu0 %3240 }
 0xcc7   : > { %3170 = vrot.lane.b32.xlu1 %v9943_v23, %s11931_s20  ;;  %v9976_v8 = vpop.permute.xlu1 %3090 }
 0xcc8   : > { %v3096_v12 = vpop.permute.xlu0 %3095 }
 0xccb   : > { %3052 = vrot.lane.b32.xlu1 %v9963_v50, %s11933_s19  ;;  %v3204_v16 = vpop.permute.xlu1 %3203 }
 0xccc   : > { %v10000_v61 = vpop.permute.xlu0 %3100 }
 0xccf   : > { %3054 = vrot.lane.b32.xlu1 %v9941_v52, %s11933_s19  ;;  %v9982_v26 = vpop.permute.xlu1 %3245 }
 0xcd0   : > { %v10004_v14 = vpop.permute.xlu0 %3105 }
 0xcd3   : > { %3174 = vrot.lane.b32.xlu1 %v9963_v50, %s11931_s20  ;;  %v9986_v38 = vpop.permute.xlu1 %3137 }
 0xcd4   : > { %v10006_v59 = vpop.permute.xlu0 %3265 }
 0xcd7   : > { %3056 = vrot.lane.b32.xlu1 %v9949_v33, %s11933_s19  ;;  %v9990_v36 = vpop.permute.xlu1 %3250  ;;  %s7051_s19 = sld [smem:[#allocation2 + $0x6]] }
 0xcd8   : > { %v10008_v35 = vpop.permute.xlu0 %3270 }
 0xcdb   : > { %3275 = vperm.xlu1 %8212, %v7001_v4   ;;  %v9992_v46 = vpop.permute.xlu1 %3141 }
 0xcdf   : > { %v9994_v45 = vpop.permute.xlu1 %3255 }
 0xce3   : > { %v9996_v13 = vpop.permute.xlu1 %3145 }
 0xce7   : > { %v9998_v41 = vpop.permute.xlu1 %3260 }
 0xceb   : > { %v10002_v25 = vpop.permute.xlu1 %3219 }
 0xd21   : > { %v3043_v40 = vpop.permute.xlu1 %3042  ;;  %v3045_v22 = vpop.permute.xlu0 %3044 }
 0xd22   : > { %v3061_v17 = vsel %vm553_vm12, %v3045_v22, 0.0  ;;  %v3060_v15 = vsel %vm553_vm12, %v3043_v40, 0.0 }
 0xd23   : > { %v3109_v60 = vmul.f32 %v3076_v18, %v3061_v17  ;;  %v3108_v31 = vmul.f32 %v3071_v55, %v3060_v15  ;;  %v3148_v18 = vmul.f32 %v9959_v53, %v9917_v32 }
 0xd25   : > { %v3047_v56 = vpop.permute.xlu1 %3046  ;;  %v3165_v37 = vpop.permute.xlu0 %3164 }
 0xd26   : > { %v3062_v4 = vsel %vm553_vm12, %v3047_v56, 0.0  ;;  %v3182_v28 = vsel %vm558_vm13, %v3165_v37, 0.0  ;;  %v3156_v37 = vadd.f32 %v3148_v18, %v3108_v31 }
 0xd27   : > { %v3110_v6 = vmul.f32 %v3081_v30, %v3062_v4  ;;  %v3222_v56 = vmul.f32 %v3192_v29, %v3182_v28  ;;  %v3151_v30 = vmul.f32 %v3130_v1, %v9943_v23  ;;  %v3153_v1 = vmul.f32 %v9986_v38, %v9963_v50 }
 0xd29   : > { %v3167_v42 = vpop.permute.xlu1 %3166  ;;  %v3158_v15 = vadd.f32 %v3150_v19, %v3110_v6  ;;  %v3230_v32 = vadd.f32 %v3222_v56, %v3156_v37  ;;  %v3173_v28 = vpop.permute.xlu0 %3172 }
 0xd2a   : > { %v3183_v3 = vsel %vm558_vm13, %v3167_v42, 0.0  ;;  %v3157_v42 = vadd.f32 %v3149_v44, %v3109_v60  ;;  %v3186_v23 = vsel %vm558_vm13, %v3173_v28, 0.0 }
 0xd2b   : > { %v3223_v48 = vmul.f32 %v3196_v5, %v3183_v3 }
 0xd2d   : > { %v3049_v49 = vpop.permute.xlu1 %3048  ;;  %v3177_v4 = vpop.permute.xlu0 %3176 }
 0xd2e   : > { %v3063_v7 = vsel %vm553_vm12, %v3049_v49, 0.0  ;;  %v3231_v49 = vadd.f32 %v3223_v48, %v3157_v42  ;;  %v3152_v48 = vmul.f32 %v9978_v24, %v9935_v51  ;;  %v3226_v51 = vmul.f32 %v9980_v63, %v3186_v23 }
 0xd2f   : > { %v3111_v55 = vmul.f32 %v3086_v34, %v3063_v7  ;;  %v3278_v34 = vadd.f32 %v3241_v9, %v3230_v32 }
 0xd30   : > { %v3279_v31 = vadd.f32 %v9982_v26, %v3231_v49 }
 0xd31   : > { %v3169_v0 = vpop.permute.xlu1 %3168  ;;  %v3159_v29 = vadd.f32 %v3151_v30, %v3111_v55  ;;  %vm3287_vm15 = vcmp.ge.f32.partialorder %v3278_v34, 0.0 }
 0xd32   : > { %v3184_v40 = vsel %vm558_vm13, %v3169_v0, 0.0  ;;  %vm3288_vm14 = vcmp.ge.f32.partialorder %v3279_v31, 0.0 }
 0xd33   : > { %v3224_v5 = vmul.f32 %v3200_v54, %v3184_v40 }
 0xd35   : > { %v3051_v47 = vpop.permute.xlu1 %3050  ;;  %v3232_v60 = vadd.f32 %v3224_v5, %v3158_v15 }
 0xd36   : > { %v3064_v0 = vsel %vm553_vm12, %v3051_v47, 0.0 }
 0xd37   : > { %v3112_v7 = vmul.f32 %v9976_v8, %v3064_v0  ;;  %v3280_v8 = vadd.f32 %v9990_v36, %v3232_v60  ;;  %v3154_v36 = vmul.f32 %v9992_v46, %v9941_v52 }
 0xd39   : > { %v3171_v22 = vpop.permute.xlu1 %3170  ;;  %v3160_v26 = vadd.f32 %v3152_v48, %v3112_v7  ;;  %vm3289_vm4 = vcmp.ge.f32.partialorder %v3280_v8, 0.0 }
 0xd3a   : > { %v3185_v10 = vsel %vm558_vm13, %v3171_v22, 0.0  ;;  %v3188_v22 = vsel %vm558_vm13, %v3177_v4, 0.0 }
 0xd3b   : > { %v3225_v3 = vmul.f32 %v3204_v16, %v3185_v10  ;;  %v10053_v16 = vstv %s7002_s26  ;;  %v3234_v42 = vadd.f32 %v3226_v51, %v3160_v26  ;;  %v3228_v52 = vmul.f32 %v9988_v39, %v3188_v22  ;;  %v7011_v22 = vld [vmem:[%s11892_s11 + $0x80] sm:$0xff]  ;;  %s7084_s26 = sld [smem:[#allocation2 + $0x7]] }
 0xd3c   : > { %v3297_v24 = vmul.f32 %v10053_v16, %v3279_v31  ;;  %v3296_v63 = vmul.f32 %v10053_v16, %v3278_v34  ;;  %v3298_v40 = vmul.f32 %v10053_v16, %v3280_v8 }
 0xd3d   : > { %v3053_v17 = vpop.permute.xlu1 %3052  ;;  %v3233_v6 = vadd.f32 %v3225_v3, %v3159_v29  ;;  %v3282_v55 = vadd.f32 %v9998_v41, %v3234_v42  ;;  %v3179_v3 = vpop.permute.xlu0 %3178  ;;  %v3155_v29 = vmul.f32 %v9996_v13, %v9949_v33  ;;  %v7014_v42 = vld [vmem:[%s11892_s11 + $0x98] sm:$0xff] }
 0xd3e   : > { %v3065_v53 = vsel %vm553_vm12, %v3053_v17, 0.0  ;;  %v10069_v56 = vsel %vm3288_vm14, %v3279_v31, %v3297_v24  ;;  %v10072_v10 = vsel %vm3287_vm15, %v3278_v34, %v3296_v63  ;;  %v10077_v19 = vsel %vm3289_vm4, %v3280_v8, %v3298_v40  ;;  %v7013_v63 = vld [vmem:[%s11892_s11 + $0x90] sm:$0xff]  ;;  %v7035_v40 = vld [vmem:[%s11886_s5 + $0xc0] sm:$0xff] }
 0xd3f   : > { %v3113_v58 = vmul.f32 %v3096_v12, %v3065_v53  ;;  %v3281_v12 = vadd.f32 %v9994_v45, %v3233_v6  ;;  %v3331_v46 = vmul.f32 %v10069_v56, %v10069_v56  ;;  %v3330_v37 = vmul.f32 %v10072_v10, %v10072_v10 }
 0xd40   : > { %v3312_v39 = vadd.f32 %v10069_v56, %v10072_v10  ;;  %v3332_v30 = vmul.f32 %v10077_v19, %v10077_v19  ;;  %v3300_v41 = vmul.f32 %v10053_v16, %v3282_v55  ;;  %vm3291_vm6 = vcmp.ge.f32.partialorder %v3282_v55, 0.0 }
 0xd41   : > { %v3055_v21 = vpop.permute.xlu1 %3054  ;;  %v3161_v44 = vadd.f32 %v3153_v1, %v3113_v58  ;;  %v3299_v45 = vmul.f32 %v10053_v16, %v3281_v12  ;;  %vm3290_vm5 = vcmp.ge.f32.partialorder %v3281_v12, 0.0  ;;  %v3338_v15 = vadd.f32 %v3331_v46, %v3330_v37  ;;  %v7040_v46 = vld [vmem:[%s11886_s5 + $0xe8] sm:$0xff]  ;;  %v6927_v37 = vld [vmem:[%s11891_s10 + $0x70] sm:$0xff] }
 0xd42   : > { %v3066_v54 = vsel %vm553_vm12, %v3055_v21, 0.0  ;;  %v3313_v28 = vadd.f32 %v3312_v39, %v10077_v19  ;;  %v3189_v7 = vsel %vm558_vm13, %v3179_v3, 0.0  ;;  %v7003_v39 = vld [vmem:[%s11891_s10 + $0x80] sm:$0xff] }
 0xd43   : > { %v3114_v50 = vmul.f32 %v10000_v61, %v3066_v54  ;;  %v10085_v49 = vsel %vm3290_vm5, %v3281_v12, %v3299_v45  ;;  %v3339_v31 = vadd.f32 %v3338_v15, %v3332_v30  ;;  %v3229_v58 = vmul.f32 %v10002_v25, %v3189_v7  ;;  %v7036_v45 = vld [vmem:[%s11886_s5 + $0xc8] sm:$0xff] }
 0xd44   : > { %v3333_v53 = vmul.f32 %v10085_v49, %v10085_v49  ;;  %v3314_v21 = vadd.f32 %v3313_v28, %v10085_v49 }
 0xd45   : > { %v3175_v47 = vpop.permute.xlu1 %3174  ;;  %v3162_v61 = vadd.f32 %v3154_v36, %v3114_v50 }
 0xd46   : > { %v3187_v9 = vsel %vm558_vm13, %v3175_v47, 0.0  ;;  %v3340_v6 = vadd.f32 %v3339_v31, %v3333_v53 }
 0xd47   : > { %v3227_v38 = vmul.f32 %v9984_v62, %v3187_v9  ;;  %v3236_v0 = vadd.f32 %v3228_v52, %v3162_v61  ;;  %v7039_v61 = vld [vmem:[%s11886_s5 + $0xe0] sm:$0xff]  ;;  %v7041_v52 = vld [vmem:[%s11886_s5 + $0xf0] sm:$0xff] }
 0xd49   : > { %v3235_v18 = vadd.f32 %v3227_v38, %v3161_v44  ;;  %v3057_v62 = vpop.permute.xlu1 %3056  ;;  %v3284_v60 = vadd.f32 %v10008_v35, %v3236_v0  ;;  %v6928_v0 = vld [vmem:[%s11891_s10 + $0x78] sm:$0xff] }
 0xd4a   : > { %v3067_v17 = vsel %vm553_vm12, %v3057_v62, 0.0  ;;  %v7038_v62 = vld [vmem:[%s11886_s5 + $0xd8] sm:$0xff] }
 0xd4b   : > { %v3283_v5 = vadd.f32 %v10006_v59, %v3235_v18  ;;  %v3115_v32 = vmul.f32 %v10004_v14, %v3067_v17  ;;  %v10103_v14 = vsel %vm3291_vm6, %v3282_v55, %v3300_v41  ;;  %v3302_v34 = vmul.f32 %v10053_v16, %v3284_v60  ;;  %v7037_v18 = vld [vmem:[%s11886_s5 + $0xd0] sm:$0xff]  ;;  %v7042_v55 = vld [vmem:[%s11886_s5 + $0xf8] sm:$0xff]  ;;  %v6926_v17 = vld [vmem:[%s11891_s10 + $0x68] sm:$0xff] }
 0xd4c   : > { %vm3293_vm8 = vcmp.ge.f32.partialorder %v3284_v60, 0.0  ;;  %v3315_v33 = vadd.f32 %v3314_v21, %v10103_v14  ;;  %v3334_v13 = vmul.f32 %v10103_v14, %v10103_v14 }
 0xd4d   : > { %v3301_v59 = vmul.f32 %v10053_v16, %v3283_v5  ;;  %vm3292_vm7 = vcmp.ge.f32.partialorder %v3283_v5, 0.0  ;;  %v3163_v48 = vadd.f32 %v3155_v29, %v3115_v32  ;;  %v10115_v51 = vsel %vm3293_vm8, %v3284_v60, %v3302_v34 }
 0xd4e   : > { %v3341_v26 = vadd.f32 %v3340_v6, %v3334_v13  ;;  %v3336_v9 = vmul.f32 %v10115_v51, %v10115_v51 }
 0xd4f   : > { %v10105_v23 = vsel %vm3292_vm7, %v3283_v5, %v3301_v59  ;;  %v3237_v54 = vadd.f32 %v3229_v58, %v3163_v48  ;;  %v6925_v5 = vld [vmem:[%s11891_s10 + $0x60] sm:$0xff] }
 0xd50   : > { %v3335_v35 = vmul.f32 %v10105_v23, %v10105_v23  ;;  %v3316_v8 = vadd.f32 %v3315_v33, %v10105_v23  ;;  %7601 = vmatprep.mubr.msk.f32.mxu1 %vm661_vm0, %v6925_v5 }
 0xd51   : > { %7602 = vmatmul.mubr.msk.f32.gmra.mrb[12].mxu1 %vm661_vm0, %v6926_v17 }
 0xd52   : > { %v3342_v25 = vadd.f32 %v3341_v26, %v3335_v35  ;;  %v3317_v4 = vadd.f32 %v3316_v8, %v10115_v51  ;;  %7604 = vmatprep.mubr.msk.f32.mxu1 %vm661_vm0, %v6927_v37 }
 0xd54   : > { %v3343_v38 = vadd.f32 %v3342_v25, %v3336_v9 }
 0xd55   : > { %7605 = vmatmul.mubr.msk.f32.gmra.mrb[14].mxu1 %vm661_vm0, %v6928_v0 }
 0xd56   : > { %7643 = vmatprep.mubr.msk.f32.mxu1 %vm661_vm0, %v7003_v39 }
 0xd5a   : > { %v3276_v1 = vpop.permute.xlu1 %3275 }
 0xd5b   : > { %v3285_v47 = vadd.f32 %v3276_v1, %v3237_v54 }
 0xd5d   : > { %vm3294_vm9 = vcmp.ge.f32.partialorder %v3285_v47, 0.0  ;;  %v3303_v24 = vmul.f32 %v10053_v16, %v3285_v47  ;;  %v7012_v16 = vld [vmem:[%s11892_s11 + $0x88] sm:$0xff] }
 0xd5f   : > { %v10121_v12 = vsel %vm3294_vm9, %v3285_v47, %v3303_v24 }
 0xd60   : > { %v3318_v44 = vadd.f32 %v3317_v4, %v10121_v12  ;;  %v3337_v50 = vmul.f32 %v10121_v12, %v10121_v12 }
 0xd62   : > { %3319 = vadd.xlane.f32.xlu1 %v3318_v44  ;;  %v3344_v36 = vadd.f32 %v3343_v38, %v3337_v50 }
 0xd64   : > { %3345 = vadd.xlane.f32.xlu0 %v3344_v36 }
 0xd73   : > { %3402 = vperm.xlu1 %8212, %v7012_v16  }
 0xd77   : > { %3407 = vperm.xlu1 %8212, %v7013_v63  }
 0xd7a   : > { %3397 = vperm.xlu0 %8209, %v7011_v22  }
 0xd7b   : > { %3592 = vperm.xlu1 %8212, %v7035_v40  }
 0xd7e   : > { %3412 = vperm.xlu0 %8209, %v7014_v42  }
 0xd7f   : > { %3602 = vperm.xlu1 %8212, %v7037_v18  }
 0xd82   : > { %3597 = vperm.xlu0 %8209, %v7036_v45  }
 0xd83   : > { %3612 = vperm.xlu1 %8212, %v7039_v61  }
 0xd86   : > { %3607 = vperm.xlu0 %8209, %v7038_v62  }
 0xd87   : > { %3622 = vperm.xlu1 %8212, %v7041_v52  }
 0xd8a   : > { %3617 = vperm.xlu0 %8209, %v7040_v46  }
 0xd8e   : > { %3627 = vperm.xlu0 %8209, %v7042_v55  }
 0xdef   : > { %v3320_v30 = vpop.xlane.xlu1 %3319 }
 0xdf0   : > { %v3321_v15 = vrot.slane %v3320_v30, 4 }
 0xdf1   : > { %v3346_v3 = vpop.xlane.xlu0 %3345 }
 0xdf2   : > { %v3322_v41 = vadd.f32 %v3321_v15, %v3320_v30  ;;  %v3347_v59 = vrot.slane %v3346_v3, 4 }
 0xdf3   : > { %v3403_v61 = vpop.permute.xlu1 %3402 }
 0xdf4   : > { %v3348_v32 = vadd.f32 %v3347_v59, %v3346_v3  ;;  %v3323_v28 = vrot.slane %v3322_v41, 2 }
 0xdf6   : > { %v3324_v53 = vadd.f32 %v3323_v28, %v3322_v41  ;;  %v3349_v29 = vrot.slane %v3348_v32, 2  ;;  %v7029_v28 = vld [vmem:[%s11885_s4 + $0xd0] sm:$0xff] }
 0xdf7   : > { %v3408_v39 = vpop.permute.xlu1 %3407 }
 0xdf8   : > { %v3325_v60 = vrot.slane %v3324_v53, 1  ;;  %v3350_v7 = vadd.f32 %v3349_v29, %v3348_v32  ;;  %v7033_v29 = vld [vmem:[%s11885_s4 + $0xf0] sm:$0xff] }
 0xdf9   : > { %v3398_v45 = vpop.permute.xlu0 %3397 }
 0xdfa   : > { %v3326_v21 = vadd.f32 %v3325_v60, %v3324_v53  ;;  %v3351_v31 = vrot.slane %v3350_v7, 1  ;;  %v7032_v53 = vld [vmem:[%s11885_s4 + $0xe8] sm:$0xff]  ;;  %v7034_v60 = vld [vmem:[%s11885_s4 + $0xf8] sm:$0xff] }
 0xdfc   : > { %8065 = vpush %v3326_v21  ;;  %v3352_v48 = vadd.f32 %v3351_v31, %v3350_v7  ;;  %v3593_v21 = vpop.permute.xlu1 %3592 }
 0xdfd   : > { %v3413_v17 = vpop.permute.xlu0 %3412 }
 0xdfe   : > { %8067 = vpush %v3352_v48 }
 0xe01   : > { %v3598_v7 = vpop.permute.xlu0 %3597 }
 0xe05   : > { %v3608_v31 = vpop.permute.xlu0 %3607 }
 0xe2d   : > { %s8066_s23 = spop %8065 }
 0xe2e   : > { %v3328_v6 = vstv %s8066_s23  ;;  %s11973_s23 = smov 127  }
 0xe2f   : > { %v3329_v58 = vmul.f32 0.00012207031, %v3328_v6  ;;  %s8068_s27 = spop %8067  ;;  %v3768_v6 = vstv %s7051_s19 }
 0xe30   : > { %v3354_v34 = vstv %s8068_s27  ;;  %s7166_s27 = sld [smem:[#allocation2 + $0x9]] }
 0xe31   : > { %v3355_v33 = vmul.f32 0.00012207031, %v3354_v34  ;;  %v3356_v13 = vmul.f32 %v3329_v58, %v3329_v58  ;;  %v3359_v8 = vsub.f32 %v10072_v10, %v3329_v58  ;;  %v3360_v26 = vsub.f32 %v10069_v56, %v3329_v58 }
 0xe32   : > { %v3361_v47 = vsub.f32 %v10077_v19, %v3329_v58  ;;  %v3362_v25 = vsub.f32 %v10085_v49, %v3329_v58  ;;  %v3363_v36 = vsub.f32 %v10103_v14, %v3329_v58  ;;  %v3364_v16 = vsub.f32 %v10105_v23, %v3329_v58  ;;  %v7004_v14 = vld [vmem:[%s11891_s10 + $0x88] sm:$0xff]  ;;  %v7005_v23 = vld [vmem:[%s11891_s10 + $0x90] sm:$0xff] }
 0xe33   : > { %v3357_v35 = vsub.f32 %v3355_v33, %v3356_v13  ;;  %v3365_v56 = vsub.f32 %v10115_v51, %v3329_v58  ;;  %v3366_v19 = vsub.f32 %v10121_v12, %v3329_v58  ;;  %v7006_v51 = vld [vmem:[%s11891_s10 + $0x98] sm:$0xff]  ;;  %v7027_v12 = vld [vmem:[%s11885_s4 + $0xc0] sm:$0xff]  ;;  %v3603_v58 = vpop.permute.xlu1 %3602 }
 0xe34   : > { %7663 = vmatprep.mubr.msk.f32.mxu0 %vm815_vm1, %v7027_v12 }
 0xe35   : > { %v3358_v54 = vmax.f32 %v3357_v35, 0.0 }
 0xe37   : > { %v3367_v1 = vadd.f32 1e-08, %v3358_v54 }
 0xe39   : > { %8285 = vrsqrt.f32 %v3367_v1 }
 0xe43   : > { %v8286_v24 = vpop.eup %8285 }
 0xe44   : > { %v3369_v4 = vmul.f32 %v8286_v24, %v3359_v8  ;;  %v3370_v9 = vmul.f32 %v8286_v24, %v3360_v26  ;;  %v3371_v44 = vmul.f32 %v8286_v24, %v3361_v47  ;;  %v3372_v50 = vmul.f32 %v8286_v24, %v3362_v25  ;;  %v3618_v25 = vpop.permute.xlu0 %3617 }
 0xe45   : > { %v3373_v22 = vmul.f32 %v8286_v24, %v3363_v36  ;;  %v3374_v10 = vmul.f32 %v8286_v24, %v3364_v16  ;;  %v3375_v40 = vmul.f32 %v8286_v24, %v3365_v56  ;;  %v3376_v42 = vmul.f32 %v8286_v24, %v3366_v19 }
 0xe46   : > { %v7897_v38 = vpack.c.bf16 %v3370_v9, %v3369_v4  ;;  %v7901_v63 = vpack.c.bf16 %v3372_v50, %v3371_v44  ;;  %v3613_v44 = vpop.permute.xlu1 %3612 }
 0xe47   : > { %v7905_v49 = vpack.c.bf16 %v3374_v10, %v3373_v22  ;;  %v7909_v18 = vpack.c.bf16 %v3376_v42, %v3375_v40 }
 0xe48   : > { %7898 = vmatprep.subr.bf16.mxu1 %v7897_v38 }
 0xe49   : > { %7900 = vmatpush3.bf16.msra.mxu1 %v7897_v38 }
 0xe4a   : > { %7902 = vmatprep.subr.bf16.mxu1 %v7901_v63 }
 0xe4d   : > { %7904 = vmatpush3.bf16.msra.mxu1 %v7901_v63 }
 0xe4e   : > { %7906 = vmatprep.subr.bf16.mxu1 %v7905_v49 }
 0xe51   : > { %7908 = vmatpush3.bf16.msra.mxu1 %v7905_v49 }
 0xe52   : > { %7910 = vmatprep.subr.bf16.mxu1 %v7909_v18 }
 0xe55   : > { %7912 = vmatpush3.bf16.msra.mxu1 %v7909_v18 }
 0xe58   : > { %7644 = vmatmul.mubr.msk.f32.vlgmr.msra.gmra.mrb[20].mxu1 %vm661_vm0, %v7004_v14 }
 0xe59   : > { %7646 = vmatprep.mubr.msk.f32.mxu1 %vm661_vm0, %v7005_v23  ;;  %v3628_v23 = vpop.permute.xlu0 %3627 }
 0xe5c   : > { %7647 = vmatmul.mubr.msk.f32.gmra.mrb[22].mxu1 %vm661_vm0, %v7006_v51 }
 0xf2b   : > { %v7645_v62 = vpop.f32.mrb[20].mxu1 }
 0xf2c   : > { %v3531_v52 = vadd.f32 %v7645_v62, %v3403_v61  ;;  %v3525_v46 = vpop.f32.mrb[21].mxu1 }
 0xf2d   : > { %v3526_v55 = vadd.f32 %v3525_v46, %v3398_v45  ;;  %v3623_v45 = vpop.permute.xlu1 %3622 }
 0xf2e   : > { %v10207_v5 = vadd.f32 %v3531_v52, %v9707_v2 }
 0xf2f   : > { %v10210_v37 = vadd.f32 %v3526_v55, %v9710_v20  ;;  %v7648_v0 = vpop.f32.mrb[22].mxu1  ;;  %v7028_v20 = vld [vmem:[%s11885_s4 + $0xc8] sm:$0xff] }
 0xf30   : > { %v3541_v30 = vadd.f32 %v7648_v0, %v3413_v17  ;;  %v3535_v15 = vpop.f32.mrb[23].mxu1 }
 0xf31   : > { %v3536_v3 = vadd.f32 %v3535_v15, %v3408_v39  ;;  %v7913_v41 = vpack.c.bf16 %v10207_v5, %v10210_v37 }
 0xf32   : > { %v10215_v59 = vadd.f32 %v3541_v30, %v9715_v27  ;;  %v7030_v27 = vld [vmem:[%s11885_s4 + $0xd8] sm:$0xff] }
 0xf33   : > { %v10218_v32 = vadd.f32 %v3536_v3, %v9718_v11  ;;  %7914 = vmatprep.subr.bf16.mxu0 %v7913_v41  ;;  %v7031_v11 = vld [vmem:[%s11885_s4 + $0xe0] sm:$0xff] }
 0xf34   : > { %7916 = vmatpush3.bf16.msra.mxu0 %v7913_v41 }
 0xf35   : > { %v7917_v2 = vpack.c.bf16 %v10215_v59, %v10218_v32 }
 0xf37   : > { %7918 = vmatprep.subr.bf16.mxu0 %v7917_v2 }
 0xf38   : > { %7920 = vmatpush3.bf16.msra.mxu0 %v7917_v2 }
 0xf3b   : > { %7664 = vmatmul.mubr.msk.f32.vlgmr.msra.gmra.mrb[20].mxu0 %vm815_vm1, %v7028_v20 }
 0xf3c   : > { %7666 = vmatprep.mubr.msk.f32.mxu0 %vm815_vm1, %v7029_v28 }
 0xf3f   : > { %7667 = vmatmul.mubr.msk.f32.gmra.mrb[22].mxu0 %vm815_vm1, %v7030_v27 }
 0xf40   : > { %7669 = vmatprep.mubr.msk.f32.mxu0 %vm815_vm1, %v7031_v11 }
 0xf43   : > { %7670 = vmatmul.mubr.msk.f32.gmra.mrb[24].mxu0 %vm815_vm1, %v7032_v53 }
 0xf44   : > { %7672 = vmatprep.mubr.msk.f32.mxu0 %vm815_vm1, %v7033_v29 }
 0xf47   : > { %7673 = vmatmul.mubr.msk.f32.gmra.mrb[26].mxu0 %vm815_vm1, %v7034_v60 }
0x100e   : > { %v7665_v48 = vpop.f32.mrb[20].mxu0 }
0x100f   : > { %v3726_v34 = vadd.f32 %v7665_v48, %v3598_v7  ;;  %v3720_v33 = vpop.f32.mrb[21].mxu0 }
0x1010   : > { %v3721_v13 = vadd.f32 %v3720_v33, %v3593_v21  ;;  %v7052_v33 = vld [vmem:[%s11887_s6 + $0xc0] sm:$0xff] }
0x1011   : > { %vm3761_vm14 = vcmp.ge.f32.partialorder %v3726_v34, 0.0  ;;  %v3770_v35 = vmul.f32 %v3768_v6, %v3726_v34 }
0x1012   : > { %vm3760_vm15 = vcmp.ge.f32.partialorder %v3721_v13, 0.0  ;;  %v3769_v54 = vmul.f32 %v3768_v6, %v3721_v13  ;;  %v7668_v1 = vpop.f32.mrb[22].mxu0 }
0x1013   : > { %v10250_v8 = vsel %vm3761_vm14, %v3726_v34, %v3770_v35  ;;  %v3736_v26 = vadd.f32 %v7668_v1, %v3608_v31  ;;  %v3730_v47 = vpop.f32.mrb[23].mxu0  ;;  %v7054_v34 = vld [vmem:[%s11887_s6 + $0xd0] sm:$0xff]  ;;  %v7060_v35 = vld [vmem:[%s11888_s7 + $0xc0] sm:$0xff]  ;;  %v7055_v1 = vld [vmem:[%s11887_s6 + $0xd8] sm:$0xff] }
0x1014   : > { %v3804_v24 = vmul.f32 %v10250_v8, %v10250_v8  ;;  %v10254_v4 = vsel %vm3760_vm15, %v3721_v13, %v3769_v54  ;;  %v3731_v9 = vadd.f32 %v3730_v47, %v3603_v58  ;;  %v7053_v58 = vld [vmem:[%s11887_s6 + $0xc8] sm:$0xff]  ;;  %v7062_v54 = vld [vmem:[%s11888_s7 + $0xd0] sm:$0xff]  ;;  %v7056_v47 = vld [vmem:[%s11887_s6 + $0xe0] sm:$0xff] }
0x1015   : > { %v3803_v50 = vmul.f32 %v10254_v4, %v10254_v4  ;;  %vm3763_vm4 = vcmp.ge.f32.partialorder %v3736_v26, 0.0  ;;  %v3772_v38 = vmul.f32 %v3768_v6, %v3736_v26  ;;  %v3785_v63 = vadd.f32 %v10250_v8, %v10254_v4  ;;  %v7061_v13 = vld [vmem:[%s11888_s7 + $0xc8] sm:$0xff] }
0x1016   : > { %vm3762_vm5 = vcmp.ge.f32.partialorder %v3731_v9, 0.0  ;;  %v3771_v36 = vmul.f32 %v3768_v6, %v3731_v9  ;;  %v7671_v16 = vpop.f32.mrb[24].mxu0 }
0x1017   : > { %v3746_v22 = vadd.f32 %v7671_v16, %v3618_v25  ;;  %v3740_v10 = vpop.f32.mrb[25].mxu0  ;;  %v3811_v56 = vadd.f32 %v3804_v24, %v3803_v50  ;;  %v10260_v19 = vsel %vm3763_vm4, %v3736_v26, %v3772_v38  ;;  %v7063_v26 = vld [vmem:[%s11888_s7 + $0xd8] sm:$0xff]  ;;  %v7064_v25 = vld [vmem:[%s11888_s7 + $0xe0] sm:$0xff]  ;;  %v7057_v24 = vld [vmem:[%s11887_s6 + $0xe8] sm:$0xff] }
0x1018   : > { %v10262_v49 = vsel %vm3762_vm5, %v3731_v9, %v3771_v36  ;;  %v3741_v40 = vadd.f32 %v3740_v10, %v3613_v44  ;;  %v3806_v61 = vmul.f32 %v10260_v19, %v10260_v19  ;;  %v7065_v9 = vld [vmem:[%s11888_s7 + $0xe8] sm:$0xff]  ;;  %v7058_v44 = vld [vmem:[%s11887_s6 + $0xf0] sm:$0xff]  ;;  %v7059_v38 = vld [vmem:[%s11887_s6 + $0xf8] sm:$0xff] }
0x1019   : > { %v3786_v42 = vadd.f32 %v3785_v63, %v10262_v49  ;;  %v3805_v18 = vmul.f32 %v10262_v49, %v10262_v49  ;;  %vm3765_vm6 = vcmp.ge.f32.partialorder %v3746_v22, 0.0  ;;  %v3774_v14 = vmul.f32 %v3768_v6, %v3746_v22  ;;  %v7066_v50 = vld [vmem:[%s11888_s7 + $0xf0] sm:$0xff]  ;;  %v7068_v36 = vld [vmem:[%s11889_s8 + $0xc0] sm:$0xff]  ;;  %v7067_v16 = vld [vmem:[%s11888_s7 + $0xf8] sm:$0xff] }
0x101a   : > { %vm3764_vm7 = vcmp.ge.f32.partialorder %v3741_v40, 0.0  ;;  %v3773_v51 = vmul.f32 %v3768_v6, %v3741_v40  ;;  %v7674_v12 = vpop.f32.mrb[26].mxu0  ;;  %v11969_v63 = vmov 1   ;;  %v7069_v10 = vld [vmem:[%s11889_s8 + $0xc8] sm:$0xff] }
0x101b   : > { %v3812_v62 = vadd.f32 %v3811_v56, %v3805_v18  ;;  %v3787_v52 = vadd.f32 %v3786_v42, %v10260_v19  ;;  %v3756_v46 = vadd.f32 %v7674_v12, %v3628_v23  ;;  %v3750_v55 = vpop.f32.mrb[27].mxu0  ;;  %v10270_v17 = vsel %vm3765_vm6, %v3746_v22, %v3774_v14  ;;  %v7070_v22 = vld [vmem:[%s11889_s8 + $0xd0] sm:$0xff]  ;;  %v7072_v42 = vld [vmem:[%s11889_s8 + $0xe0] sm:$0xff]  ;;  %v7073_v14 = vld [vmem:[%s11889_s8 + $0xe8] sm:$0xff] }
0x101c   : > { %v10272_v0 = vsel %vm3764_vm7, %v3741_v40, %v3773_v51  ;;  %v3751_v39 = vadd.f32 %v3750_v55, %v3623_v45  ;;  %v3808_v20 = vmul.f32 %v10270_v17, %v10270_v17  ;;  %v11970_v56 = vmov 0   ;;  %v7071_v40 = vld [vmem:[%s11889_s8 + $0xd8] sm:$0xff]  ;;  %v7074_v23 = vld [vmem:[%s11889_s8 + $0xf0] sm:$0xff]  ;;  %v7076_v51 = vld [vmem:[%s11890_s9 + $0xc0] sm:$0xff] }
0x101d   : > { %v3788_v30 = vadd.f32 %v3787_v52, %v10272_v0  ;;  %v3807_v15 = vmul.f32 %v10272_v0, %v10272_v0  ;;  %v3813_v3 = vadd.f32 %v3812_v62, %v3806_v61  ;;  %vm3767_vm8 = vcmp.ge.f32.partialorder %v3756_v46, 0.0  ;;  %v7077_v12 = vld [vmem:[%s11890_s9 + $0xc8] sm:$0xff]  ;;  %v7078_v45 = vld [vmem:[%s11890_s9 + $0xd0] sm:$0xff]  ;;  %v7075_v61 = vld [vmem:[%s11889_s8 + $0xf8] sm:$0xff] }
0x101e   : > { %v3776_v41 = vmul.f32 %v3768_v6, %v3756_v46  ;;  %vm3766_vm9 = vcmp.ge.f32.partialorder %v3751_v39, 0.0  ;;  %v3775_v2 = vmul.f32 %v3768_v6, %v3751_v39  ;;  %v11971_v18 = vmov 2   ;;  %v7081_v62 = vld [vmem:[%s11890_s9 + $0xe8] sm:$0xff]  ;;  %v7082_v52 = vld [vmem:[%s11890_s9 + $0xf0] sm:$0xff]  ;;  %v7080_v55 = vld [vmem:[%s11890_s9 + $0xe0] sm:$0xff] }
0x101f   : > { %v3814_v28 = vadd.f32 %v3813_v3, %v3807_v15  ;;  %v3789_v27 = vadd.f32 %v3788_v30, %v10270_v17 }
0x1020   : > { %v10280_v11 = vsel %vm3767_vm8, %v3756_v46, %v3776_v41  ;;  %v10282_v53 = vsel %vm3766_vm9, %v3751_v39, %v3775_v2  ;;  %v7079_v46 = vld [vmem:[%s11890_s9 + $0xd8] sm:$0xff] }
0x1021   : > { %v3809_v29 = vmul.f32 %v10282_v53, %v10282_v53  ;;  %v3790_v60 = vadd.f32 %v3789_v27, %v10282_v53  ;;  %v3815_v7 = vadd.f32 %v3814_v28, %v3808_v20  ;;  %v3810_v31 = vmul.f32 %v10280_v11, %v10280_v11 }
0x1023   : > { %v3791_v21 = vadd.f32 %v3790_v60, %v10280_v11  ;;  %v3816_v48 = vadd.f32 %v3815_v7, %v3809_v29 }
0x1025   : > { %3792 = vadd.xlane.f32.xlu1 %v3791_v21  ;;  %v3817_v6 = vadd.f32 %v3816_v48, %v3810_v31 }
0x1027   : > { %3818 = vadd.xlane.f32.xlu0 %v3817_v6 }
0x1036   : > { %3866 = vperm.xlu1 %8212, %v7053_v58  }
0x103a   : > { %3871 = vperm.xlu1 %8212, %v7054_v34  }
0x103d   : > { %3861 = vperm.xlu0 %8209, %v7052_v33  }
0x103e   : > { %3923 = vperm.xlu1 %8212, %v7061_v13  }
0x1041   : > { %3918 = vperm.xlu0 %8209, %v7060_v35  }
0x1042   : > { %3928 = vperm.xlu1 %8212, %v7062_v54  }
0x1045   : > { %3876 = vperm.xlu0 %8209, %v7055_v1  }
0x1046   : > { %3933 = vperm.xlu1 %8212, %v7063_v26  }
0x1049   : > { %3881 = vperm.xlu0 %8209, %v7056_v47  }
0x104a   : > { %3938 = vperm.xlu1 %8212, %v7064_v25  }
0x104d   : > { %3886 = vperm.xlu0 %8209, %v7057_v24  }
0x104e   : > { %3943 = vperm.xlu1 %8212, %v7065_v9  }
0x1051   : > { %3891 = vperm.xlu0 %8209, %v7058_v44  }
0x1052   : > { %3948 = vperm.xlu1 %8212, %v7066_v50  }
0x1055   : > { %3896 = vperm.xlu0 %8209, %v7059_v38  }
0x1056   : > { %4008 = vperm.xlu1 %8212, %v7068_v36  }
0x1059   : > { %3953 = vperm.xlu0 %8209, %v7067_v16  }
0x105a   : > { %8213 = vset.pattern.permute.xlu1 %v11969_v63 }
0x105b   : > { %4055 = vperm.xlu1 %8213, %v7068_v36  }
0x105d   : > { %8214 = vset.pattern.permute.xlu0 %v11969_v63 }
0x105e   : > { %4059 = vperm.xlu0 %8214, %v7069_v10  }
0x105f   : > { %8215 = vset.pattern.permute.xlu1 %v11970_v56 }
0x1060   : > { %4018 = vperm.xlu1 %8215, %v7070_v22  }
0x1062   : > { %4067 = vperm.xlu0 %8214, %v7071_v40  }
0x1064   : > { %8216 = vset.pattern.permute.xlu1 %v11969_v63 }
0x1065   : > { %4063 = vperm.xlu1 %8216, %v7070_v22  }
0x1066   : > { %4071 = vperm.xlu0 %8214, %v7072_v42  }
0x1069   : > { %8217 = vset.pattern.permute.xlu1 %v11971_v18 }
0x106a   : > { %4131 = vperm.xlu1 %8217, %v7069_v10   ;;  %8221 = vset.pattern.permute.xlu0 %v11971_v18 }
0x106b   : > { %4127 = vperm.xlu0 %8221, %v7068_v36  }
0x106e   : > { %8218 = vset.pattern.permute.xlu1 %v11970_v56 }
0x106f   : > { %4023 = vperm.xlu1 %8218, %v7071_v40   ;;  %4143 = vperm.xlu0 %8221, %v7072_v42  }
0x1073   : > { %8219 = vset.pattern.permute.xlu1 %v11971_v18  ;;  %4147 = vperm.xlu0 %8221, %v7073_v14  }
0x1074   : > { %4135 = vperm.xlu1 %8219, %v7070_v22  }
0x1077   : > { %4151 = vperm.xlu0 %8221, %v7074_v23  }
0x1078   : > { %8220 = vset.pattern.permute.xlu1 %v11970_v56 }
0x1079   : > { %4028 = vperm.xlu1 %8220, %v7072_v42  }
0x107b   : > { %8229 = vset.pattern.permute.xlu0 %v11970_v56 }
0x107c   : > { %4013 = vperm.xlu0 %8229, %v7069_v10  }
0x107d   : > { %8222 = vset.pattern.permute.xlu1 %v11971_v18 }
0x107e   : > { %4139 = vperm.xlu1 %8222, %v7071_v40  }
0x1080   : > { %4176 = vperm.xlu0 %8229, %v7076_v51  }
0x1082   : > { %8223 = vset.pattern.permute.xlu1 %v11970_v56 }
0x1083   : > { %4181 = vperm.xlu1 %8223, %v7077_v12  }
0x1084   : > { %4033 = vperm.xlu0 %8229, %v7073_v14  }
0x1087   : > { %8224 = vset.pattern.permute.xlu1 %v11969_v63 }
0x1088   : > { %4075 = vperm.xlu1 %8224, %v7073_v14   ;;  %4038 = vperm.xlu0 %8229, %v7074_v23  }
0x108c   : > { %8225 = vset.pattern.permute.xlu1 %v11970_v56  ;;  %4043 = vperm.xlu0 %8229, %v7075_v61  }
0x108d   : > { %4186 = vperm.xlu1 %8225, %v7078_v45  }
0x1090   : > { %4201 = vperm.xlu0 %8229, %v7081_v62  }
0x1091   : > { %8226 = vset.pattern.permute.xlu1 %v11969_v63 }
0x1092   : > { %4079 = vperm.xlu1 %8226, %v7074_v23  }
0x1094   : > { %4206 = vperm.xlu0 %8229, %v7082_v52  }
0x1096   : > { %8227 = vset.pattern.permute.xlu1 %v11970_v56 }
0x1097   : > { %4191 = vperm.xlu1 %8227, %v7079_v46  }
0x109b   : > { %8228 = vset.pattern.permute.xlu1 %v11969_v63 }
0x109c   : > { %4083 = vperm.xlu1 %8228, %v7075_v61  }
0x10a0   : > { %8230 = vset.pattern.permute.xlu1 %v11970_v56 }
0x10a1   : > { %4196 = vperm.xlu1 %8230, %v7080_v55  }
0x10a5   : > { %8231 = vset.pattern.permute.xlu1 %v11971_v18 }
0x10a6   : > { %4155 = vperm.xlu1 %8231, %v7075_v61  }
0x10aa   : > { %8232 = vset.pattern.permute.xlu1 %v11970_v56 }
0x10b2   : > { %v3793_v39 = vpop.xlane.xlu1 %3792 }
0x10b3   : > { %v3794_v30 = vrot.slane %v3793_v39, 4 }
0x10b4   : > { %v3819_v15 = vpop.xlane.xlu0 %3818 }
0x10b5   : > { %v3795_v3 = vadd.f32 %v3794_v30, %v3793_v39  ;;  %v3820_v41 = vrot.slane %v3819_v15, 4 }
0x10b6   : > { %v3867_v48 = vpop.permute.xlu1 %3866 }
0x10b7   : > { %v3821_v2 = vadd.f32 %v3820_v41, %v3819_v15  ;;  %v3796_v20 = vrot.slane %v3795_v3, 2 }
0x10b9   : > { %v3797_v28 = vadd.f32 %v3796_v20, %v3795_v3  ;;  %v3822_v27 = vrot.slane %v3821_v2, 2 }
0x10ba   : > { %v3872_v34 = vpop.permute.xlu1 %3871 }
0x10bb   : > { %v3798_v29 = vrot.slane %v3797_v28, 1  ;;  %v3823_v60 = vadd.f32 %v3822_v27, %v3821_v2 }
0x10bc   : > { %v3862_v6 = vpop.permute.xlu0 %3861 }
0x10bd   : > { %v3799_v7 = vadd.f32 %v3798_v29, %v3797_v28  ;;  %v3824_v21 = vrot.slane %v3823_v60, 1 }
0x10be   : > { %v3924_v47 = vpop.permute.xlu1 %3923 }
0x10bf   : > { %8069 = vpush %v3799_v7  ;;  %v3825_v31 = vadd.f32 %v3824_v21, %v3823_v60 }
0x10c0   : > { %v3919_v1 = vpop.permute.xlu0 %3918 }
0x10c1   : > { %8071 = vpush %v3825_v31 }
0x10c2   : > { %v3929_v44 = vpop.permute.xlu1 %3928 }
0x10c4   : > { %v3877_v9 = vpop.permute.xlu0 %3876 }
0x10c6   : > { %v3934_v38 = vpop.permute.xlu1 %3933 }
0x10c8   : > { %v3882_v50 = vpop.permute.xlu0 %3881 }
0x10ca   : > { %v3939_v45 = vpop.permute.xlu1 %3938 }
0x10cc   : > { %v3887_v42 = vpop.permute.xlu0 %3886 }
0x10ce   : > { %v3944_v30 = vpop.permute.xlu1 %3943 }
0x10d2   : > { %v3949_v27 = vpop.permute.xlu1 %3948 }
0x10f0   : > { %s8070_s1 = spop %8069 }
0x10f1   : > { %v3801_v58 = vstv %s8070_s1  ;;  %s11979_s1 = smov 2  }
0x10f2   : > { %v10403_v33 = vmul.f32 0.00012207031, %v3801_v58  ;;  %s8072_s30 = spop %8071 }
0x10f3   : > { %v3827_v13 = vstv %s8072_s30 }
0x10f4   : > { %v3828_v35 = vmul.f32 0.00012207031, %v3827_v13  ;;  %v3829_v54 = vmul.f32 %v10403_v33, %v10403_v33  ;;  %v3833_v36 = vsub.f32 %v10250_v8, %v10403_v33  ;;  %v3832_v22 = vsub.f32 %v10254_v4, %v10403_v33 }
0x10f5   : > { %v3834_v10 = vsub.f32 %v10262_v49, %v10403_v33  ;;  %v3836_v12 = vsub.f32 %v10272_v0, %v10403_v33  ;;  %v3838_v4 = vsub.f32 %v10282_v53, %v10403_v33  ;;  %v3892_v49 = vpop.permute.xlu0 %3891  ;;  %v3835_v55 = vsub.f32 %v10260_v19, %v10403_v33 }
0x10f6   : > { %v3830_v26 = vsub.f32 %v3828_v35, %v3829_v54  ;;  %v3839_v41 = vsub.f32 %v10280_v11, %v10403_v33  ;;  %v3837_v31 = vsub.f32 %v10270_v17, %v10403_v33  ;;  %v7083_v54 = vld [vmem:[%s11890_s9 + $0xf8] sm:$0xff] }
0x10f8   : > { %v3831_v25 = vmax.f32 %v3830_v26, 0.0 }
0x10f9   : > { %v3897_v20 = vpop.permute.xlu0 %3896 }
0x10fa   : > { %v3840_v24 = vadd.f32 1e-08, %v3831_v25 }
0x10fc   : > { %8287 = vrsqrt.f32 %v3840_v24 }
0x10fd   : > { %v3954_v7 = vpop.permute.xlu0 %3953 }
0x1101   : > { %v4060_v26 = vpop.permute.xlu0 %4059 }
0x1105   : > { %v4068_v25 = vpop.permute.xlu0 %4067 }
0x1106   : > { %v8288_v16 = vpop.eup %8287 }
0x1107   : > { %v3843_v40 = vmul.f32 %v8288_v16, %v3833_v36  ;;  %v3842_v14 = vmul.f32 %v8288_v16, %v3832_v22  ;;  %v3844_v23 = vmul.f32 %v8288_v16, %v3834_v10  ;;  %v3846_v8 = vmul.f32 %v8288_v16, %v3836_v12 }
0x1108   : > { %v3848_v39 = vmul.f32 %v8288_v16, %v3838_v4  ;;  %v3845_v15 = vmul.f32 %v8288_v16, %v3835_v55  ;;  %v3849_v2 = vmul.f32 %v8288_v16, %v3839_v41 }
0x1109   : > { %v3900_v51 = vmul.f32 %v3867_v48, %v3843_v40  ;;  %v3899_v61 = vmul.f32 %v3862_v6, %v3842_v14  ;;  %v3901_v46 = vmul.f32 %v3872_v34, %v3844_v23  ;;  %v3903_v0 = vmul.f32 %v3882_v50, %v3846_v8  ;;  %v4009_v48 = vpop.permute.xlu1 %4008 }
0x110a   : > { %v3905_v19 = vmul.f32 %v3892_v49, %v3848_v39  ;;  %v3902_v28 = vmul.f32 %v3877_v9, %v3845_v15  ;;  %v3906_v60 = vmul.f32 %v3897_v20, %v3849_v2  ;;  %v3847_v6 = vmul.f32 %v8288_v16, %v3837_v31  ;;  %v10476_v9 = vpop.permute.xlu0 %4071 }
0x110b   : > { %v10415_v62 = vadd.f32 %v3924_v47, %v3900_v51  ;;  %v10417_v52 = vadd.f32 %v3919_v1, %v3899_v61  ;;  %v10427_v3 = vadd.f32 %v3929_v44, %v3901_v46  ;;  %v10435_v53 = vadd.f32 %v3939_v45, %v3903_v0 }
0x110c   : > { %v10441_v29 = vadd.f32 %v3949_v27, %v3905_v19  ;;  %v10443_v11 = vadd.f32 %v3934_v38, %v3902_v28  ;;  %v10449_v21 = vadd.f32 %v3954_v7, %v3906_v60  ;;  %v3904_v34 = vmul.f32 %v3887_v42, %v3847_v6 }
0x110d   : > { %3984 = vrot.lane.b32.xlu0 %v10415_v62, %s11972_s18  ;;  %3982 = vrot.lane.b32.xlu1 %v10417_v52, %s11972_s18  ;;  %v4056_v58 = vpop.permute.xlu1 %4055 }
0x110e   : > { %v10461_v13 = vadd.f32 %v3944_v30, %v3904_v34  ;;  %v4128_v44 = vpop.permute.xlu0 %4127 }
0x1111   : > { %4102 = vrot.lane.b32.xlu0 %v10417_v52, %s11973_s23  ;;  %3986 = vrot.lane.b32.xlu1 %v10427_v3, %s11972_s18  ;;  %v4019_v35 = vpop.permute.xlu1 %4018 }
0x1112   : > { %v10478_v38 = vpop.permute.xlu0 %4143 }
0x1115   : > { %4110 = vrot.lane.b32.xlu0 %v10435_v53, %s11973_s23  ;;  %4104 = vrot.lane.b32.xlu1 %v10415_v62, %s11973_s23  ;;  %v4064_v17 = vpop.permute.xlu1 %4063 }
0x1116   : > { %v10480_v16 = vpop.permute.xlu0 %4147 }
0x1119   : > { %4114 = vrot.lane.b32.xlu0 %v10441_v29, %s11973_s23  ;;  %3988 = vrot.lane.b32.xlu1 %v10443_v11, %s11972_s18  ;;  %v4132_v33 = vpop.permute.xlu1 %4131 }
0x111a   : > { %v10484_v10 = vpop.permute.xlu0 %4151 }
0x111d   : > { %4116 = vrot.lane.b32.xlu0 %v10449_v21, %s11973_s23  ;;  %4106 = vrot.lane.b32.xlu1 %v10427_v3, %s11973_s23  ;;  %v4024_v1 = vpop.permute.xlu1 %4023 }
0x111e   : > { %v4014_v42 = vpop.permute.xlu0 %4013 }
0x1121   : > { %3990 = vrot.lane.b32.xlu1 %v10435_v53, %s11972_s18  ;;  %v4136_v47 = vpop.permute.xlu1 %4135 }
0x1122   : > { %v4177_v51 = vpop.permute.xlu0 %4176 }
0x1125   : > { %4108 = vrot.lane.b32.xlu1 %v10443_v11, %s11973_s23  ;;  %v10474_v24 = vpop.permute.xlu1 %4028 }
0x1126   : > { %v4034_v45 = vpop.permute.xlu0 %4033 }
0x1129   : > { %3992 = vrot.lane.b32.xlu1 %v10461_v13, %s11972_s18  ;;  %v4140_v50 = vpop.permute.xlu1 %4139 }
0x112a   : > { %v10496_v8 = vpop.permute.xlu0 %4038 }
0x112d   : > { %3994 = vrot.lane.b32.xlu1 %v10441_v29, %s11972_s18  ;;  %v4182_v36 = vpop.permute.xlu1 %4181 }
0x112e   : > { %v10500_v4 = vpop.permute.xlu0 %4043 }
0x1131   : > { %4112 = vrot.lane.b32.xlu1 %v10461_v13, %s11973_s23  ;;  %v10482_v22 = vpop.permute.xlu1 %4075  ;;  %s7215_s23 = sld [smem:[#allocation2 + $0xa]] }
0x1132   : > { %v10502_v55 = vpop.permute.xlu0 %4201 }
0x1135   : > { %3996 = vrot.lane.b32.xlu1 %v10449_v21, %s11972_s18  ;;  %v10486_v40 = vpop.permute.xlu1 %4186 }
0x1136   : > { %v10504_v30 = vpop.permute.xlu0 %4206 }
0x1139   : > { %4211 = vperm.xlu1 %8232, %v7083_v54   ;;  %v10488_v14 = vpop.permute.xlu1 %4079  ;;  %v4087_v54 = vmul.f32 %v4060_v26, %v10415_v62  ;;  %v4088_v26 = vmul.f32 %v4064_v17, %v10427_v3 }
0x113d   : > { %v10490_v23 = vpop.permute.xlu1 %4191 }
0x1141   : > { %v10492_v12 = vpop.permute.xlu1 %4083 }
0x1145   : > { %v10494_v61 = vpop.permute.xlu1 %4196 }
0x1149   : > { %v10498_v46 = vpop.permute.xlu1 %4155 }
0x117f   : > { %v3983_v49 = vpop.permute.xlu1 %3982  ;;  %v3985_v41 = vpop.permute.xlu0 %3984 }
0x1180   : > { %v3999_v20 = vsel %vm537_vm10, %v3985_v41, 0.0  ;;  %v3998_v60 = vsel %vm537_vm10, %v3983_v49, 0.0 }
0x1181   : > { %v4047_v6 = vmul.f32 %v4014_v42, %v3999_v20  ;;  %v4046_v18 = vmul.f32 %v4009_v48, %v3998_v60  ;;  %v4086_v42 = vmul.f32 %v4056_v58, %v10417_v52 }
0x1183   : > { %v3987_v0 = vpop.permute.xlu1 %3986  ;;  %v4103_v27 = vpop.permute.xlu0 %4102 }
0x1184   : > { %v4000_v34 = vsel %vm537_vm10, %v3987_v0, 0.0  ;;  %v4118_v43 = vsel %vm542_vm11, %v4103_v27, 0.0  ;;  %v4094_v27 = vadd.f32 %v4086_v42, %v4046_v18  ;;  %v4090_v18 = vmul.f32 %v10476_v9, %v10435_v53 }
0x1185   : > { %v4048_v63 = vmul.f32 %v4019_v35, %v4000_v34  ;;  %v4158_v20 = vmul.f32 %v4128_v44, %v4118_v43  ;;  %v4089_v35 = vmul.f32 %v4068_v25, %v10443_v11 }
0x1187   : > { %v4105_v39 = vpop.permute.xlu1 %4104  ;;  %v4166_v52 = vadd.f32 %v4158_v20, %v4094_v27  ;;  %v4111_v43 = vpop.permute.xlu0 %4110 }
0x1188   : > { %v4119_v31 = vsel %vm542_vm11, %v4105_v39, 0.0  ;;  %v4095_v39 = vadd.f32 %v4087_v54, %v4047_v6 }
0x1189   : > { %v4159_v41 = vmul.f32 %v4132_v33, %v4119_v31 }
0x118b   : > { %v3989_v15 = vpop.permute.xlu1 %3988  ;;  %v4167_v60 = vadd.f32 %v4159_v41, %v4095_v39  ;;  %v4115_v34 = vpop.permute.xlu0 %4114 }
0x118c   : > { %v4001_v56 = vsel %vm537_vm10, %v3989_v15, 0.0  ;;  %v4124_v41 = vsel %vm542_vm11, %v4115_v34, 0.0 }
0x118d   : > { %v4049_v0 = vmul.f32 %v4024_v1, %v4001_v56  ;;  %v4215_v17 = vadd.f32 %v4182_v36, %v4167_v60  ;;  %v4122_v1 = vsel %vm542_vm11, %v4111_v43, 0.0 }
0x118e   : > { %v4162_v53 = vmul.f32 %v10478_v38, %v4122_v1 }
0x118f   : > { %v4107_v19 = vpop.permute.xlu1 %4106  ;;  %v4097_v58 = vadd.f32 %v4089_v35, %v4049_v0  ;;  %vm4224_vm14 = vcmp.ge.f32.partialorder %v4215_v17, 0.0 }
0x1190   : > { %v4120_v49 = vsel %vm542_vm11, %v4107_v19, 0.0  ;;  %v4096_v19 = vadd.f32 %v4088_v26, %v4048_v63 }
0x1191   : > { %v4160_v48 = vmul.f32 %v4136_v47, %v4120_v49  ;;  %v4214_v47 = vadd.f32 %v4177_v51, %v4166_v52 }
0x1193   : > { %v3991_v28 = vpop.permute.xlu1 %3990  ;;  %v4168_v44 = vadd.f32 %v4160_v48, %v4096_v19  ;;  %vm4223_vm15 = vcmp.ge.f32.partialorder %v4214_v47, 0.0 }
0x1194   : > { %v4002_v15 = vsel %vm537_vm10, %v3991_v28, 0.0  ;;  %v10539_v28 = vstv %s7084_s26 }
0x1195   : > { %v4050_v56 = vmul.f32 %v10474_v24, %v4002_v15  ;;  %v4216_v24 = vadd.f32 %v10486_v40, %v4168_v44  ;;  %v4233_v9 = vmul.f32 %v10539_v28, %v4215_v17  ;;  %v4092_v40 = vmul.f32 %v10488_v14, %v10441_v29 }
0x1196   : > { %v4232_v38 = vmul.f32 %v10539_v28, %v4214_v47  ;;  %v4164_v29 = vmul.f32 %v10484_v10, %v4124_v41  ;;  %v7096_v41 = vld [vmem:[%s11892_s11 + $0xd8] sm:$0xff] }
0x1197   : > { %v4109_v57 = vpop.permute.xlu1 %4108  ;;  %v4098_v36 = vadd.f32 %v4090_v18, %v4050_v56  ;;  %v4234_v49 = vmul.f32 %v10539_v28, %v4216_v24  ;;  %v10555_v20 = vsel %vm4224_vm14, %v4215_v17, %v4233_v9  ;;  %vm4225_vm4 = vcmp.ge.f32.partialorder %v4216_v24, 0.0 }
0x1198   : > { %v4121_v62 = vsel %vm542_vm11, %v4109_v57, 0.0  ;;  %v4267_v14 = vmul.f32 %v10555_v20, %v10555_v20 }
0x1199   : > { %v4161_v31 = vmul.f32 %v4140_v50, %v4121_v62  ;;  %v4091_v50 = vmul.f32 %v10482_v22, %v10461_v13  ;;  %v4170_v39 = vadd.f32 %v4162_v53, %v4098_v36  ;;  %v10558_v62 = vsel %vm4223_vm15, %v4214_v47, %v4232_v38  ;;  %v7117_v38 = vld [vmem:[%s11886_s5 + $0x100] sm:$0xff] }
0x119a   : > { %v10563_v26 = vsel %vm4225_vm4, %v4216_v24, %v4234_v49  ;;  %v4266_v27 = vmul.f32 %v10558_v62, %v10558_v62  ;;  %v4248_v10 = vadd.f32 %v10555_v20, %v10558_v62  ;;  %v7119_v49 = vld [vmem:[%s11886_s5 + $0x110] sm:$0xff] }
0x119b   : > { %v3993_v33 = vpop.permute.xlu1 %3992  ;;  %v4169_v11 = vadd.f32 %v4161_v31, %v4097_v58  ;;  %v4218_v0 = vadd.f32 %v10494_v61, %v4170_v39  ;;  %v4268_v35 = vmul.f32 %v10563_v26, %v10563_v26  ;;  %v4117_v31 = vpop.permute.xlu0 %4116  ;;  %v7118_v39 = vld [vmem:[%s11886_s5 + $0x108] sm:$0xff] }
0x119c   : > { %v4003_v57 = vsel %vm537_vm10, %v3993_v33, 0.0  ;;  %v4274_v19 = vadd.f32 %v4267_v14, %v4266_v27  ;;  %v4249_v52 = vadd.f32 %v4248_v10, %v10563_v26  ;;  %v4125_v44 = vsel %vm542_vm11, %v4117_v31, 0.0  ;;  %v7007_v14 = vld [vmem:[%s11891_s10 + $0xa0] sm:$0xff] }
0x119d   : > { %v4051_v63 = vmul.f32 %v4034_v45, %v4003_v57  ;;  %v4217_v45 = vadd.f32 %v10490_v23, %v4169_v11  ;;  %v4236_v61 = vmul.f32 %v10539_v28, %v4218_v0  ;;  %v4093_v57 = vmul.f32 %v10492_v12, %v10449_v21  ;;  %7649 = vmatprep.mubr.msk.f32.mxu1 %vm661_vm0, %v7007_v14  ;;  %v7085_v27 = vld [vmem:[%s11891_s10 + $0xc0] sm:$0xff] }
0x119e   : > { %v4165_v11 = vmul.f32 %v10498_v46, %v4125_v44 }
0x119f   : > { %v3995_v3 = vpop.permute.xlu1 %3994  ;;  %v4099_v54 = vadd.f32 %v4091_v50, %v4051_v63  ;;  %v4235_v23 = vmul.f32 %v10539_v28, %v4217_v45  ;;  %vm4226_vm5 = vcmp.ge.f32.partialorder %v4217_v45, 0.0 }
0x11a0   : > { %v4004_v25 = vsel %vm537_vm10, %v3995_v3, 0.0  ;;  %v4275_v3 = vadd.f32 %v4274_v19, %v4268_v35 }
0x11a1   : > { %v4052_v13 = vmul.f32 %v10496_v8, %v4004_v25  ;;  %v10571_v60 = vsel %vm4226_vm5, %v4217_v45, %v4235_v23  ;;  %v7120_v23 = vld [vmem:[%s11886_s5 + $0x118] sm:$0xff] }
0x11a2   : > { %v4269_v43 = vmul.f32 %v10571_v60, %v10571_v60  ;;  %v4250_v56 = vadd.f32 %v4249_v52, %v10571_v60 }
0x11a3   : > { %v4113_v6 = vpop.permute.xlu1 %4112  ;;  %v4100_v8 = vadd.f32 %v4092_v40, %v4052_v13  ;;  %v7093_v40 = vld [vmem:[%s11892_s11 + $0xc0] sm:$0xff] }
0x11a4   : > { %v4123_v51 = vsel %vm542_vm11, %v4113_v6, 0.0  ;;  %v4276_v1 = vadd.f32 %v4275_v3, %v4269_v43 }
0x11a5   : > { %v4163_v22 = vmul.f32 %v10480_v16, %v4123_v51  ;;  %v4172_v15 = vadd.f32 %v4164_v29, %v4100_v8  ;;  %v7123_v8 = vld [vmem:[%s11886_s5 + $0x130] sm:$0xff]  ;;  %v7124_v29 = vld [vmem:[%s11886_s5 + $0x138] sm:$0xff] }
0x11a7   : > { %v4171_v42 = vadd.f32 %v4163_v22, %v4099_v54  ;;  %v3997_v16 = vpop.permute.xlu1 %3996  ;;  %v4220_v58 = vadd.f32 %v10504_v30, %v4172_v15  ;;  %v7095_v22 = vld [vmem:[%s11892_s11 + $0xd0] sm:$0xff] }
0x11a8   : > { %v4005_v33 = vsel %vm537_vm10, %v3997_v16, 0.0  ;;  %vm4227_vm10 = vcmp.ge.f32.partialorder %v4218_v0, 0.0  ;;  %v7122_v16 = vld [vmem:[%s11886_s5 + $0x128] sm:$0xff] }
0x11a9   : > { %v4219_v48 = vadd.f32 %v10502_v55, %v4171_v42  ;;  %v4053_v2 = vmul.f32 %v10500_v4, %v4005_v33  ;;  %v10589_v4 = vsel %vm4227_vm10, %v4218_v0, %v4236_v61  ;;  %v4238_v63 = vmul.f32 %v10539_v28, %v4220_v58  ;;  %v7121_v42 = vld [vmem:[%s11886_s5 + $0x120] sm:$0xff]  ;;  %v7008_v0 = vld [vmem:[%s11891_s10 + $0xa8] sm:$0xff]  ;;  %v7010_v33 = vld [vmem:[%s11891_s10 + $0xb8] sm:$0xff] }
0x11aa   : > { %vm4229_vm7 = vcmp.ge.f32.partialorder %v4220_v58, 0.0  ;;  %v4251_v21 = vadd.f32 %v4250_v56, %v10589_v4  ;;  %v4270_v12 = vmul.f32 %v10589_v4, %v10589_v4  ;;  %7650 = vmatmul.mubr.msk.f32.gmra.mrb[12].mxu1 %vm661_vm0, %v7008_v0 }
0x11ab   : > { %v4237_v55 = vmul.f32 %v10539_v28, %v4219_v48  ;;  %vm4228_vm6 = vcmp.ge.f32.partialorder %v4219_v48, 0.0  ;;  %v4101_v17 = vadd.f32 %v4093_v57, %v4053_v2  ;;  %v10601_v36 = vsel %vm4229_vm7, %v4220_v58, %v4238_v63 }
0x11ac   : > { %v4277_v50 = vadd.f32 %v4276_v1, %v4270_v12  ;;  %v4272_v9 = vmul.f32 %v10601_v36, %v10601_v36 }
0x11ad   : > { %v10591_v18 = vsel %vm4228_vm6, %v4219_v48, %v4237_v55  ;;  %v4173_v7 = vadd.f32 %v4165_v11, %v4101_v17  ;;  %v7009_v48 = vld [vmem:[%s11891_s10 + $0xb0] sm:$0xff] }
0x11ae   : > { %v4271_v30 = vmul.f32 %v10591_v18, %v10591_v18  ;;  %v4252_v25 = vadd.f32 %v4251_v21, %v10591_v18  ;;  %7652 = vmatprep.mubr.msk.f32.mxu1 %vm661_vm0, %v7009_v48 }
0x11af   : > { %7653 = vmatmul.mubr.msk.f32.gmra.mrb[14].mxu1 %vm661_vm0, %v7010_v33 }
0x11b0   : > { %v4278_v46 = vadd.f32 %v4277_v50, %v4271_v30  ;;  %v4253_v53 = vadd.f32 %v4252_v25, %v10601_v36  ;;  %7691 = vmatprep.mubr.msk.f32.mxu1 %vm661_vm0, %v7085_v27 }
0x11b2   : > { %v4279_v54 = vadd.f32 %v4278_v46, %v4272_v9 }
0x11b8   : > { %v4212_v47 = vpop.permute.xlu1 %4211 }
0x11b9   : > { %v4221_v24 = vadd.f32 %v4212_v47, %v4173_v7 }
0x11bb   : > { %vm4230_vm11 = vcmp.ge.f32.partialorder %v4221_v24, 0.0  ;;  %v4239_v6 = vmul.f32 %v10539_v28, %v4221_v24  ;;  %v7094_v28 = vld [vmem:[%s11892_s11 + $0xc8] sm:$0xff] }
0x11bd   : > { %v10607_v34 = vsel %vm4230_vm11, %v4221_v24, %v4239_v6 }
0x11be   : > { %v4254_v51 = vadd.f32 %v4253_v53, %v10607_v34  ;;  %v4273_v45 = vmul.f32 %v10607_v34, %v10607_v34 }
0x11c0   : > { %4255 = vadd.xlane.f32.xlu1 %v4254_v51  ;;  %v4280_v13 = vadd.f32 %v4279_v54, %v4273_v45 }
0x11c2   : > { %4281 = vadd.xlane.f32.xlu0 %v4280_v13 }
0x11d1   : > { %4338 = vperm.xlu1 %8232, %v7094_v28  }
0x11d5   : > { %4343 = vperm.xlu1 %8232, %v7095_v22  }
0x11d8   : > { %4333 = vperm.xlu0 %8229, %v7093_v40  }
0x11d9   : > { %4528 = vperm.xlu1 %8232, %v7117_v38  }
0x11dc   : > { %4348 = vperm.xlu0 %8229, %v7096_v41  }
0x11dd   : > { %4538 = vperm.xlu1 %8232, %v7119_v49  }
0x11e0   : > { %4533 = vperm.xlu0 %8229, %v7118_v39  }
0x11e1   : > { %4548 = vperm.xlu1 %8232, %v7121_v42  }
0x11e4   : > { %4543 = vperm.xlu0 %8229, %v7120_v23  }
0x11e5   : > { %4558 = vperm.xlu1 %8232, %v7123_v8  }
0x11e8   : > { %4553 = vperm.xlu0 %8229, %v7122_v16  }
0x11ec   : > { %4563 = vperm.xlu0 %8229, %v7124_v29  }
0x124d   : > { %v4256_v15 = vpop.xlane.xlu1 %4255 }
0x124e   : > { %v4257_v10 = vrot.slane %v4256_v15, 4 }
0x124f   : > { %v4282_v35 = vpop.xlane.xlu0 %4281 }
0x1250   : > { %v4258_v19 = vadd.f32 %v4257_v10, %v4256_v15  ;;  %v4283_v31 = vrot.slane %v4282_v35, 4 }
0x1251   : > { %v4339_v49 = vpop.permute.xlu1 %4338 }
0x1252   : > { %v4284_v61 = vadd.f32 %v4283_v31, %v4282_v35  ;;  %v4259_v55 = vrot.slane %v4258_v19, 2  ;;  %v7111_v31 = vld [vmem:[%s11885_s4 + $0x110] sm:$0xff] }
0x1254   : > { %v4260_v2 = vadd.f32 %v4259_v55, %v4258_v19  ;;  %v4285_v52 = vrot.slane %v4284_v61, 2  ;;  %v7115_v55 = vld [vmem:[%s11885_s4 + $0x130] sm:$0xff] }
0x1255   : > { %v4344_v48 = vpop.permute.xlu1 %4343 }
0x1256   : > { %v4261_v43 = vrot.slane %v4260_v2, 1  ;;  %v4286_v57 = vadd.f32 %v4285_v52, %v4284_v61  ;;  %v7114_v61 = vld [vmem:[%s11885_s4 + $0x128] sm:$0xff] }
0x1257   : > { %v4334_v41 = vpop.permute.xlu0 %4333 }
0x1258   : > { %v4262_v58 = vadd.f32 %v4261_v43, %v4260_v2  ;;  %v4287_v44 = vrot.slane %v4286_v57, 1  ;;  %v7116_v2 = vld [vmem:[%s11885_s4 + $0x138] sm:$0xff] }
0x1259   : > { %v4529_v43 = vpop.permute.xlu1 %4528 }
0x125a   : > { %8073 = vpush %v4262_v58  ;;  %v4288_v56 = vadd.f32 %v4287_v44, %v4286_v57  ;;  %v4704_v44 = vstv %s7133_s28  ;;  %s7253_s28 = sld [smem:[#allocation2 + $0xc]] }
0x125b   : > { %v4349_v29 = vpop.permute.xlu0 %4348 }
0x125c   : > { %8075 = vpush %v4288_v56 }
0x125d   : > { %v4539_v56 = vpop.permute.xlu1 %4538 }
0x125f   : > { %v4534_v52 = vpop.permute.xlu0 %4533 }
0x1263   : > { %v4544_v57 = vpop.permute.xlu0 %4543 }
0x128b   : > { %s8074_s30 = spop %8073 }
0x128c   : > { %v4264_v3 = vstv %s8074_s30  ;;  %s11980_s30 = smov 126  }
0x128d   : > { %v4265_v17 = vmul.f32 0.00012207031, %v4264_v3  ;;  %s8076_s18 = spop %8075 }
0x128e   : > { %v4290_v1 = vstv %s8076_s18  ;;  %s7248_s18 = sld [smem:[#allocation2 + $0xb]] }
0x128f   : > { %v4291_v11 = vmul.f32 0.00012207031, %v4290_v1  ;;  %v4292_v63 = vmul.f32 %v4265_v17, %v4265_v17  ;;  %v4295_v7 = vsub.f32 %v10558_v62, %v4265_v17  ;;  %v4296_v47 = vsub.f32 %v10555_v20, %v4265_v17 }
0x1290   : > { %v4297_v25 = vsub.f32 %v10563_v26, %v4265_v17  ;;  %v4298_v50 = vsub.f32 %v10571_v60, %v4265_v17  ;;  %v4299_v45 = vsub.f32 %v10589_v4, %v4265_v17  ;;  %v4300_v54 = vsub.f32 %v10591_v18, %v4265_v17  ;;  %v7086_v4 = vld [vmem:[%s11891_s10 + $0xc8] sm:$0xff]  ;;  %v7087_v18 = vld [vmem:[%s11891_s10 + $0xd0] sm:$0xff] }
0x1291   : > { %v4293_v21 = vsub.f32 %v4291_v11, %v4292_v63  ;;  %v4301_v20 = vsub.f32 %v10601_v36, %v4265_v17  ;;  %v4302_v26 = vsub.f32 %v10607_v34, %v4265_v17  ;;  %v7088_v36 = vld [vmem:[%s11891_s10 + $0xd8] sm:$0xff]  ;;  %v7109_v34 = vld [vmem:[%s11885_s4 + $0x100] sm:$0xff] }
0x1292   : > { %7711 = vmatprep.mubr.msk.f32.mxu0 %vm815_vm1, %v7109_v34 }
0x1293   : > { %v4294_v12 = vmax.f32 %v4293_v21, 0.0 }
0x1295   : > { %v4303_v30 = vadd.f32 1e-08, %v4294_v12 }
0x1297   : > { %8289 = vrsqrt.f32 %v4303_v30 }
0x12a1   : > { %v8290_v24 = vpop.eup %8289 }
0x12a2   : > { %v4305_v46 = vmul.f32 %v8290_v24, %v4295_v7  ;;  %v4306_v6 = vmul.f32 %v8290_v24, %v4296_v47  ;;  %v4307_v53 = vmul.f32 %v8290_v24, %v4297_v25  ;;  %v4308_v9 = vmul.f32 %v8290_v24, %v4298_v50  ;;  %v4554_v47 = vpop.permute.xlu0 %4553 }
0x12a3   : > { %v4309_v28 = vmul.f32 %v8290_v24, %v4299_v45  ;;  %v4310_v62 = vmul.f32 %v8290_v24, %v4300_v54  ;;  %v4311_v22 = vmul.f32 %v8290_v24, %v4301_v20  ;;  %v4312_v40 = vmul.f32 %v8290_v24, %v4302_v26 }
0x12a4   : > { %v7921_v51 = vpack.c.bf16 %v4306_v6, %v4305_v46  ;;  %v7925_v13 = vpack.c.bf16 %v4308_v9, %v4307_v53  ;;  %v4549_v46 = vpop.permute.xlu1 %4548 }
0x12a5   : > { %v7929_v60 = vpack.c.bf16 %v4310_v62, %v4309_v28  ;;  %v7933_v38 = vpack.c.bf16 %v4312_v40, %v4311_v22 }
0x12a6   : > { %7922 = vmatprep.subr.bf16.mxu1 %v7921_v51 }
0x12a7   : > { %7924 = vmatpush3.bf16.msra.mxu1 %v7921_v51 }
0x12a8   : > { %7926 = vmatprep.subr.bf16.mxu1 %v7925_v13 }
0x12ab   : > { %7928 = vmatpush3.bf16.msra.mxu1 %v7925_v13 }
0x12ac   : > { %7930 = vmatprep.subr.bf16.mxu1 %v7929_v60 }
0x12af   : > { %7932 = vmatpush3.bf16.msra.mxu1 %v7929_v60 }
0x12b0   : > { %7934 = vmatprep.subr.bf16.mxu1 %v7933_v38 }
0x12b3   : > { %7936 = vmatpush3.bf16.msra.mxu1 %v7933_v38  ;;  %v4564_v38 = vpop.permute.xlu0 %4563 }
0x12b6   : > { %7692 = vmatmul.mubr.msk.f32.vlgmr.msra.gmra.mrb[24].mxu1 %vm661_vm0, %v7086_v4 }
0x12b7   : > { %7694 = vmatprep.mubr.msk.f32.mxu1 %vm661_vm0, %v7087_v18 }
0x12ba   : > { %7695 = vmatmul.mubr.msk.f32.gmra.mrb[26].mxu1 %vm661_vm0, %v7088_v36  ;;  %v4559_v36 = vpop.permute.xlu1 %4558 }
0x1389   : > { %v7693_v39 = vpop.f32.mrb[24].mxu1 }
0x138a   : > { %v4467_v42 = vadd.f32 %v7693_v39, %v4339_v49  ;;  %v4461_v23 = vpop.f32.mrb[25].mxu1 }
0x138b   : > { %v4462_v8 = vadd.f32 %v4461_v23, %v4334_v41 }
0x138c   : > { %v10693_v16 = vadd.f32 %v4467_v42, %v10207_v5 }
0x138d   : > { %v10696_v14 = vadd.f32 %v4462_v8, %v10210_v37  ;;  %v7696_v0 = vpop.f32.mrb[26].mxu1  ;;  %v7110_v37 = vld [vmem:[%s11885_s4 + $0x108] sm:$0xff] }
0x138e   : > { %v4477_v33 = vadd.f32 %v7696_v0, %v4349_v29  ;;  %v4471_v27 = vpop.f32.mrb[27].mxu1 }
0x138f   : > { %v4472_v15 = vadd.f32 %v4471_v27, %v4344_v48  ;;  %v7937_v10 = vpack.c.bf16 %v10693_v16, %v10696_v14 }
0x1390   : > { %v10701_v35 = vadd.f32 %v4477_v33, %v10215_v59  ;;  %v7112_v59 = vld [vmem:[%s11885_s4 + $0x118] sm:$0xff] }
0x1391   : > { %v10704_v19 = vadd.f32 %v4472_v15, %v10218_v32  ;;  %7938 = vmatprep.subr.bf16.mxu0 %v7937_v10  ;;  %v7113_v32 = vld [vmem:[%s11885_s4 + $0x120] sm:$0xff] }
0x1392   : > { %7940 = vmatpush3.bf16.msra.mxu0 %v7937_v10 }
0x1393   : > { %v7941_v5 = vpack.c.bf16 %v10701_v35, %v10704_v19 }
0x1395   : > { %7942 = vmatprep.subr.bf16.mxu0 %v7941_v5 }
0x1396   : > { %7944 = vmatpush3.bf16.msra.mxu0 %v7941_v5 }
0x1399   : > { %7712 = vmatmul.mubr.msk.f32.vlgmr.msra.gmra.mrb[28].mxu0 %vm815_vm1, %v7110_v37 }
0x139a   : > { %7714 = vmatprep.mubr.msk.f32.mxu0 %vm815_vm1, %v7111_v31 }
0x139d   : > { %7715 = vmatmul.mubr.msk.f32.gmra.mrb[30].mxu0 %vm815_vm1, %v7112_v59 }
0x139e   : > { %7717 = vmatprep.mubr.msk.f32.mxu0 %vm815_vm1, %v7113_v32 }
0x13a1   : > { %7718 = vmatmul.mubr.msk.f32.gmra.mrb[32].mxu0 %vm815_vm1, %v7114_v61 }
0x13a2   : > { %7720 = vmatprep.mubr.msk.f32.mxu0 %vm815_vm1, %v7115_v55 }
0x13a5   : > { %7721 = vmatmul.mubr.msk.f32.gmra.mrb[34].mxu0 %vm815_vm1, %v7116_v2 }
0x146c   : > { %v7713_v58 = vpop.f32.mrb[28].mxu0 }
0x146d   : > { %v4662_v3 = vadd.f32 %v7713_v58, %v4534_v52  ;;  %v4656_v17 = vpop.f32.mrb[29].mxu0  ;;  %v7135_v58 = vld [vmem:[%s11887_s6 + $0x108] sm:$0xff] }
0x146e   : > { %v4657_v1 = vadd.f32 %v4656_v17, %v4529_v43  ;;  %v7142_v17 = vld [vmem:[%s11888_s7 + $0x100] sm:$0xff] }
0x146f   : > { %vm4697_vm8 = vcmp.ge.f32.partialorder %v4662_v3, 0.0  ;;  %v4706_v11 = vmul.f32 %v4704_v44, %v4662_v3 }
0x1470   : > { %vm4696_vm9 = vcmp.ge.f32.partialorder %v4657_v1, 0.0  ;;  %v4705_v63 = vmul.f32 %v4704_v44, %v4657_v1  ;;  %v7716_v21 = vpop.f32.mrb[30].mxu0 }
0x1471   : > { %v10736_v12 = vsel %vm4697_vm8, %v4662_v3, %v4706_v11  ;;  %v4672_v30 = vadd.f32 %v7716_v21, %v4544_v57  ;;  %v4666_v7 = vpop.f32.mrb[31].mxu0  ;;  %v7143_v3 = vld [vmem:[%s11888_s7 + $0x108] sm:$0xff]  ;;  %v7137_v11 = vld [vmem:[%s11887_s6 + $0x118] sm:$0xff]  ;;  %v7138_v21 = vld [vmem:[%s11887_s6 + $0x120] sm:$0xff] }
0x1472   : > { %v4740_v25 = vmul.f32 %v10736_v12, %v10736_v12  ;;  %v10740_v50 = vsel %vm4696_vm9, %v4657_v1, %v4705_v63  ;;  %v4667_v24 = vadd.f32 %v4666_v7, %v4539_v56  ;;  %v7134_v56 = vld [vmem:[%s11887_s6 + $0x100] sm:$0xff]  ;;  %v7144_v1 = vld [vmem:[%s11888_s7 + $0x110] sm:$0xff]  ;;  %v7145_v63 = vld [vmem:[%s11888_s7 + $0x118] sm:$0xff] }
0x1473   : > { %v4739_v6 = vmul.f32 %v10740_v50, %v10740_v50  ;;  %vm4699_vm14 = vcmp.ge.f32.partialorder %v4672_v30, 0.0  ;;  %v4708_v53 = vmul.f32 %v4704_v44, %v4672_v30  ;;  %v4721_v45 = vadd.f32 %v10736_v12, %v10740_v50  ;;  %v7139_v7 = vld [vmem:[%s11887_s6 + $0x128] sm:$0xff] }
0x1474   : > { %vm4698_vm15 = vcmp.ge.f32.partialorder %v4667_v24, 0.0  ;;  %v4707_v9 = vmul.f32 %v4704_v44, %v4667_v24  ;;  %v7719_v51 = vpop.f32.mrb[32].mxu0 }
0x1475   : > { %v4682_v54 = vadd.f32 %v7719_v51, %v4554_v47  ;;  %v4676_v13 = vpop.f32.mrb[33].mxu0  ;;  %v4747_v28 = vadd.f32 %v4740_v25, %v4739_v6  ;;  %v10746_v62 = vsel %vm4699_vm14, %v4672_v30, %v4708_v53  ;;  %v7146_v30 = vld [vmem:[%s11888_s7 + $0x120] sm:$0xff]  ;;  %v7147_v47 = vld [vmem:[%s11888_s7 + $0x128] sm:$0xff]  ;;  %v7140_v25 = vld [vmem:[%s11887_s6 + $0x130] sm:$0xff] }
0x1476   : > { %v10748_v20 = vsel %vm4698_vm15, %v4667_v24, %v4707_v9  ;;  %v4677_v26 = vadd.f32 %v4676_v13, %v4549_v46  ;;  %v4742_v34 = vmul.f32 %v10746_v62, %v10746_v62  ;;  %v7148_v24 = vld [vmem:[%s11888_s7 + $0x130] sm:$0xff]  ;;  %v7141_v46 = vld [vmem:[%s11887_s6 + $0x138] sm:$0xff]  ;;  %v7150_v6 = vld [vmem:[%s11889_s8 + $0x100] sm:$0xff]  ;;  %v11976_v9 = vmov 1  }
0x1477   : > { %v4722_v60 = vadd.f32 %v4721_v45, %v10748_v20  ;;  %v4741_v22 = vmul.f32 %v10748_v20, %v10748_v20  ;;  %vm4701_vm4 = vcmp.ge.f32.partialorder %v4682_v54, 0.0  ;;  %v4710_v40 = vmul.f32 %v4704_v44, %v4682_v54  ;;  %v7149_v53 = vld [vmem:[%s11888_s7 + $0x138] sm:$0xff]  ;;  %v7152_v51 = vld [vmem:[%s11889_s8 + $0x110] sm:$0xff]  ;;  %v7151_v45 = vld [vmem:[%s11889_s8 + $0x108] sm:$0xff] }
0x1478   : > { %vm4700_vm5 = vcmp.ge.f32.partialorder %v4677_v26, 0.0  ;;  %v4709_v4 = vmul.f32 %v4704_v44, %v4677_v26  ;;  %v7722_v18 = vpop.f32.mrb[34].mxu0  ;;  %v7153_v13 = vld [vmem:[%s11889_s8 + $0x118] sm:$0xff] }
0x1479   : > { %v4748_v41 = vadd.f32 %v4747_v28, %v4741_v22  ;;  %v4723_v49 = vadd.f32 %v4722_v60, %v10746_v62  ;;  %v4692_v39 = vadd.f32 %v7722_v18, %v4564_v38  ;;  %v4686_v42 = vpop.f32.mrb[35].mxu0  ;;  %v10756_v23 = vsel %vm4701_vm4, %v4682_v54, %v4710_v40  ;;  %v7154_v28 = vld [vmem:[%s11889_s8 + $0x120] sm:$0xff]  ;;  %v7155_v60 = vld [vmem:[%s11889_s8 + $0x128] sm:$0xff]  ;;  %v7156_v22 = vld [vmem:[%s11889_s8 + $0x130] sm:$0xff] }
0x147a   : > { %v10758_v8 = vsel %vm4700_vm5, %v4677_v26, %v4709_v4  ;;  %v4687_v29 = vadd.f32 %v4686_v42, %v4559_v36  ;;  %v4744_v10 = vmul.f32 %v10756_v23, %v10756_v23  ;;  %v11977_v54 = vmov 0   ;;  %v7158_v40 = vld [vmem:[%s11890_s9 + $0x100] sm:$0xff]  ;;  %v7159_v38 = vld [vmem:[%s11890_s9 + $0x108] sm:$0xff]  ;;  %v7160_v4 = vld [vmem:[%s11890_s9 + $0x110] sm:$0xff] }
0x147b   : > { %v4724_v0 = vadd.f32 %v4723_v49, %v10758_v8  ;;  %v4743_v48 = vmul.f32 %v10758_v8, %v10758_v8  ;;  %v4749_v33 = vadd.f32 %v4748_v41, %v4742_v34  ;;  %vm4703_vm10 = vcmp.ge.f32.partialorder %v4692_v39, 0.0  ;;  %v7157_v18 = vld [vmem:[%s11889_s8 + $0x138] sm:$0xff]  ;;  %v7163_v36 = vld [vmem:[%s11890_s9 + $0x128] sm:$0xff]  ;;  %v7164_v34 = vld [vmem:[%s11890_s9 + $0x130] sm:$0xff] }
0x147c   : > { %v4712_v27 = vmul.f32 %v4704_v44, %v4692_v39  ;;  %vm4702_vm6 = vcmp.ge.f32.partialorder %v4687_v29, 0.0  ;;  %v4711_v15 = vmul.f32 %v4704_v44, %v4687_v29  ;;  %v7136_v44 = vld [vmem:[%s11887_s6 + $0x110] sm:$0xff]  ;;  %v11978_v26 = vmov 2   ;;  %v7161_v41 = vld [vmem:[%s11890_s9 + $0x118] sm:$0xff]  ;;  %v7162_v49 = vld [vmem:[%s11890_s9 + $0x120] sm:$0xff] }
0x147d   : > { %v4750_v5 = vadd.f32 %v4749_v33, %v4743_v48  ;;  %v4725_v37 = vadd.f32 %v4724_v0, %v10756_v23 }
0x147e   : > { %v10766_v31 = vsel %vm4703_vm10, %v4692_v39, %v4712_v27  ;;  %v10768_v59 = vsel %vm4702_vm6, %v4687_v29, %v4711_v15 }
0x147f   : > { %v4745_v32 = vmul.f32 %v10768_v59, %v10768_v59  ;;  %v4726_v61 = vadd.f32 %v4725_v37, %v10768_v59  ;;  %v4751_v55 = vadd.f32 %v4750_v5, %v4744_v10  ;;  %v4746_v52 = vmul.f32 %v10766_v31, %v10766_v31 }
0x1481   : > { %v4727_v2 = vadd.f32 %v4726_v61, %v10766_v31  ;;  %v4752_v43 = vadd.f32 %v4751_v55, %v4745_v32 }
0x1483   : > { %4728 = vadd.xlane.f32.xlu1 %v4727_v2  ;;  %v4753_v57 = vadd.f32 %v4752_v43, %v4746_v52 }
0x1485   : > { %4754 = vadd.xlane.f32.xlu0 %v4753_v57 }
0x1494   : > { %4802 = vperm.xlu1 %8232, %v7135_v58  }
0x1498   : > { %4807 = vperm.xlu1 %8232, %v7136_v44  }
0x149b   : > { %4797 = vperm.xlu0 %8229, %v7134_v56  }
0x149c   : > { %4859 = vperm.xlu1 %8232, %v7143_v3  }
0x149f   : > { %4854 = vperm.xlu0 %8229, %v7142_v17  }
0x14a0   : > { %4864 = vperm.xlu1 %8232, %v7144_v1  }
0x14a3   : > { %4812 = vperm.xlu0 %8229, %v7137_v11  }
0x14a4   : > { %4869 = vperm.xlu1 %8232, %v7145_v63  }
0x14a7   : > { %4817 = vperm.xlu0 %8229, %v7138_v21  }
0x14a8   : > { %4874 = vperm.xlu1 %8232, %v7146_v30  }
0x14ab   : > { %4822 = vperm.xlu0 %8229, %v7139_v7  }
0x14ac   : > { %4879 = vperm.xlu1 %8232, %v7147_v47  }
0x14af   : > { %4827 = vperm.xlu0 %8229, %v7140_v25  }
0x14b0   : > { %4884 = vperm.xlu1 %8232, %v7148_v24  }
0x14b3   : > { %4832 = vperm.xlu0 %8229, %v7141_v46  }
0x14b4   : > { %4944 = vperm.xlu1 %8232, %v7150_v6  }
0x14b7   : > { %4889 = vperm.xlu0 %8229, %v7149_v53  }
0x14b8   : > { %8233 = vset.pattern.permute.xlu1 %v11976_v9 }
0x14b9   : > { %4991 = vperm.xlu1 %8233, %v7150_v6  }
0x14bb   : > { %8234 = vset.pattern.permute.xlu0 %v11976_v9 }
0x14bc   : > { %4995 = vperm.xlu0 %8234, %v7151_v45  }
0x14bd   : > { %8235 = vset.pattern.permute.xlu1 %v11977_v54 }
0x14be   : > { %4954 = vperm.xlu1 %8235, %v7152_v51  }
0x14c0   : > { %5003 = vperm.xlu0 %8234, %v7153_v13  }
0x14c2   : > { %8236 = vset.pattern.permute.xlu1 %v11976_v9 }
0x14c3   : > { %4999 = vperm.xlu1 %8236, %v7152_v51  }
0x14c4   : > { %5007 = vperm.xlu0 %8234, %v7154_v28  }
0x14c7   : > { %8237 = vset.pattern.permute.xlu1 %v11978_v26 }
0x14c8   : > { %5067 = vperm.xlu1 %8237, %v7151_v45   ;;  %8241 = vset.pattern.permute.xlu0 %v11978_v26 }
0x14c9   : > { %5063 = vperm.xlu0 %8241, %v7150_v6  }
0x14cc   : > { %8238 = vset.pattern.permute.xlu1 %v11977_v54 }
0x14cd   : > { %4959 = vperm.xlu1 %8238, %v7153_v13   ;;  %5079 = vperm.xlu0 %8241, %v7154_v28  }
0x14d1   : > { %8239 = vset.pattern.permute.xlu1 %v11978_v26  ;;  %5083 = vperm.xlu0 %8241, %v7155_v60  }
0x14d2   : > { %5071 = vperm.xlu1 %8239, %v7152_v51  }
0x14d5   : > { %5087 = vperm.xlu0 %8241, %v7156_v22  }
0x14d6   : > { %8240 = vset.pattern.permute.xlu1 %v11977_v54 }
0x14d7   : > { %4964 = vperm.xlu1 %8240, %v7154_v28  }
0x14d9   : > { %8249 = vset.pattern.permute.xlu0 %v11977_v54 }
0x14da   : > { %4949 = vperm.xlu0 %8249, %v7151_v45  }
0x14db   : > { %8242 = vset.pattern.permute.xlu1 %v11978_v26 }
0x14dc   : > { %5075 = vperm.xlu1 %8242, %v7153_v13  }
0x14de   : > { %5112 = vperm.xlu0 %8249, %v7158_v40  }
0x14e0   : > { %8243 = vset.pattern.permute.xlu1 %v11977_v54 }
0x14e1   : > { %5117 = vperm.xlu1 %8243, %v7159_v38  }
0x14e2   : > { %4969 = vperm.xlu0 %8249, %v7155_v60  }
0x14e5   : > { %8244 = vset.pattern.permute.xlu1 %v11976_v9 }
0x14e6   : > { %5011 = vperm.xlu1 %8244, %v7155_v60   ;;  %4974 = vperm.xlu0 %8249, %v7156_v22  }
0x14ea   : > { %8245 = vset.pattern.permute.xlu1 %v11977_v54  ;;  %4979 = vperm.xlu0 %8249, %v7157_v18  }
0x14eb   : > { %5122 = vperm.xlu1 %8245, %v7160_v4  }
0x14ee   : > { %5137 = vperm.xlu0 %8249, %v7163_v36  }
0x14ef   : > { %8246 = vset.pattern.permute.xlu1 %v11976_v9 }
0x14f0   : > { %5015 = vperm.xlu1 %8246, %v7156_v22  }
0x14f2   : > { %5142 = vperm.xlu0 %8249, %v7164_v34  }
0x14f4   : > { %8247 = vset.pattern.permute.xlu1 %v11977_v54 }
0x14f5   : > { %5127 = vperm.xlu1 %8247, %v7161_v41  }
0x14f9   : > { %8248 = vset.pattern.permute.xlu1 %v11976_v9 }
0x14fa   : > { %5019 = vperm.xlu1 %8248, %v7157_v18  }
0x14fe   : > { %8250 = vset.pattern.permute.xlu1 %v11977_v54 }
0x14ff   : > { %5132 = vperm.xlu1 %8250, %v7162_v49  }
0x1503   : > { %8251 = vset.pattern.permute.xlu1 %v11978_v26 }
0x1504   : > { %5091 = vperm.xlu1 %8251, %v7157_v18  }
0x1508   : > { %8252 = vset.pattern.permute.xlu1 %v11977_v54 }
0x1510   : > { %v4729_v39 = vpop.xlane.xlu1 %4728 }
0x1511   : > { %v4730_v42 = vrot.slane %v4729_v39, 4 }
0x1512   : > { %v4755_v29 = vpop.xlane.xlu0 %4754 }
0x1513   : > { %v4731_v0 = vadd.f32 %v4730_v42, %v4729_v39  ;;  %v4756_v48 = vrot.slane %v4755_v29, 4 }
0x1514   : > { %v4803_v2 = vpop.permute.xlu1 %4802 }
0x1515   : > { %v4757_v33 = vadd.f32 %v4756_v48, %v4755_v29  ;;  %v4732_v27 = vrot.slane %v4731_v0, 2 }
0x1517   : > { %v4733_v15 = vadd.f32 %v4732_v27, %v4731_v0  ;;  %v4758_v10 = vrot.slane %v4757_v33, 2 }
0x1518   : > { %v4808_v57 = vpop.permute.xlu1 %4807 }
0x1519   : > { %v4734_v5 = vrot.slane %v4733_v15, 1  ;;  %v4759_v37 = vadd.f32 %v4758_v10, %v4757_v33 }
0x151a   : > { %v4798_v52 = vpop.permute.xlu0 %4797 }
0x151b   : > { %v4735_v32 = vadd.f32 %v4734_v5, %v4733_v15  ;;  %v4760_v61 = vrot.slane %v4759_v37, 1 }
0x151c   : > { %v4860_v11 = vpop.permute.xlu1 %4859 }
0x151d   : > { %8077 = vpush %v4735_v32  ;;  %v4761_v55 = vadd.f32 %v4760_v61, %v4759_v37 }
0x151e   : > { %v4855_v17 = vpop.permute.xlu0 %4854 }
0x151f   : > { %8079 = vpush %v4761_v55 }
0x1520   : > { %v4865_v7 = vpop.permute.xlu1 %4864 }
0x1522   : > { %v4813_v30 = vpop.permute.xlu0 %4812 }
0x1524   : > { %v4870_v25 = vpop.permute.xlu1 %4869 }
0x1526   : > { %v4818_v47 = vpop.permute.xlu0 %4817 }
0x1528   : > { %v4875_v40 = vpop.permute.xlu1 %4874 }
0x152a   : > { %v4823_v45 = vpop.permute.xlu0 %4822 }
0x152c   : > { %v4880_v49 = vpop.permute.xlu1 %4879 }
0x1530   : > { %v4885_v27 = vpop.permute.xlu1 %4884 }
0x1534   : > { %v4945_v61 = vpop.permute.xlu1 %4944 }
0x154e   : > { %s8078_s20 = spop %8077 }
0x154f   : > { %v4737_v43 = vstv %s8078_s20  ;;  %s11986_s20 = smov 4  }
0x1550   : > { %v10889_v58 = vmul.f32 0.00012207031, %v4737_v43  ;;  %s8080_s29 = spop %8079 }
0x1551   : > { %v4763_v44 = vstv %s8080_s29 }
0x1552   : > { %v4764_v56 = vmul.f32 0.00012207031, %v4763_v44  ;;  %v4765_v3 = vmul.f32 %v10889_v58, %v10889_v58  ;;  %v4769_v24 = vsub.f32 %v10736_v12, %v10889_v58  ;;  %v4768_v6 = vsub.f32 %v10740_v50, %v10889_v58  ;;  %v7165_v44 = vld [vmem:[%s11890_s9 + $0x138] sm:$0xff] }
0x1553   : > { %v4770_v53 = vsub.f32 %v10748_v20, %v10889_v58  ;;  %v4772_v22 = vsub.f32 %v10758_v8, %v10889_v58  ;;  %v4774_v50 = vsub.f32 %v10768_v59, %v10889_v58  ;;  %v4828_v20 = vpop.permute.xlu0 %4827  ;;  %v4771_v34 = vsub.f32 %v10746_v62, %v10889_v58 }
0x1554   : > { %v4766_v1 = vsub.f32 %v4764_v56, %v4765_v3  ;;  %v4775_v29 = vsub.f32 %v10766_v31, %v10889_v58  ;;  %v4773_v32 = vsub.f32 %v10756_v23, %v10889_v58 }
0x1556   : > { %v4767_v63 = vmax.f32 %v4766_v1, 0.0 }
0x1557   : > { %v4833_v48 = vpop.permute.xlu0 %4832 }
0x1558   : > { %v4776_v21 = vadd.f32 1e-08, %v4767_v63 }
0x155a   : > { %8291 = vrsqrt.f32 %v4776_v21 }
0x155b   : > { %v4890_v5 = vpop.permute.xlu0 %4889 }
0x155f   : > { %v4996_v3 = vpop.permute.xlu0 %4995 }
0x1563   : > { %v5004_v1 = vpop.permute.xlu0 %5003 }
0x1564   : > { %v8292_v46 = vpop.eup %8291 }
0x1565   : > { %v4779_v51 = vmul.f32 %v8292_v46, %v4769_v24  ;;  %v4778_v13 = vmul.f32 %v8292_v46, %v4768_v6  ;;  %v4780_v28 = vmul.f32 %v8292_v46, %v4770_v53  ;;  %v4782_v12 = vmul.f32 %v8292_v46, %v4772_v22 }
0x1566   : > { %v4784_v41 = vmul.f32 %v8292_v46, %v4774_v50  ;;  %v4781_v39 = vmul.f32 %v8292_v46, %v4771_v34  ;;  %v4785_v0 = vmul.f32 %v8292_v46, %v4775_v29  ;;  %v4783_v55 = vmul.f32 %v8292_v46, %v4773_v32 }
0x1567   : > { %v4836_v60 = vmul.f32 %v4803_v2, %v4779_v51  ;;  %v4835_v38 = vmul.f32 %v4798_v52, %v4778_v13  ;;  %v4837_v36 = vmul.f32 %v4808_v57, %v4780_v28  ;;  %v4839_v8 = vmul.f32 %v4818_v47, %v4782_v12  ;;  %v4992_v2 = vpop.permute.xlu1 %4991  ;;  %v10962_v63 = vpop.permute.xlu0 %5007 }
0x1568   : > { %v4841_v62 = vmul.f32 %v4828_v20, %v4784_v41  ;;  %v4838_v33 = vmul.f32 %v4813_v30, %v4781_v39  ;;  %v4842_v10 = vmul.f32 %v4833_v48, %v4785_v0  ;;  %v4840_v52 = vmul.f32 %v4823_v45, %v4783_v55 }
0x1569   : > { %v10901_v4 = vadd.f32 %v4860_v11, %v4836_v60  ;;  %v10903_v18 = vadd.f32 %v4855_v17, %v4835_v38  ;;  %v10913_v42 = vadd.f32 %v4865_v7, %v4837_v36  ;;  %v10921_v59 = vadd.f32 %v4875_v40, %v4839_v8 }
0x156a   : > { %v10927_v15 = vadd.f32 %v4885_v27, %v4841_v62  ;;  %v10929_v31 = vadd.f32 %v4870_v25, %v4838_v33  ;;  %v10935_v37 = vadd.f32 %v4890_v5, %v4842_v10  ;;  %v10947_v43 = vadd.f32 %v4880_v49, %v4840_v52 }
0x156b   : > { %4920 = vrot.lane.b32.xlu0 %v10901_v4, %s11979_s1  ;;  %4918 = vrot.lane.b32.xlu1 %v10903_v18, %s11979_s1  ;;  %v4955_v57 = vpop.permute.xlu1 %4954  ;;  %v5064_v21 = vpop.permute.xlu0 %5063  ;;  %v5023_v55 = vmul.f32 %v4996_v3, %v10901_v4 }
0x156f   : > { %5038 = vrot.lane.b32.xlu0 %v10903_v18, %s11980_s30  ;;  %4922 = vrot.lane.b32.xlu1 %v10913_v42, %s11979_s1  ;;  %v5000_v23 = vpop.permute.xlu1 %4999  ;;  %v10964_v7 = vpop.permute.xlu0 %5079 }
0x1570   : > { %v5024_v3 = vmul.f32 %v5000_v23, %v10913_v42 }
0x1573   : > { %5046 = vrot.lane.b32.xlu0 %v10921_v59, %s11980_s30  ;;  %5040 = vrot.lane.b32.xlu1 %v10901_v4, %s11980_s30  ;;  %v5068_v58 = vpop.permute.xlu1 %5067  ;;  %v10966_v25 = vpop.permute.xlu0 %5083 }
0x1577   : > { %5050 = vrot.lane.b32.xlu0 %v10927_v15, %s11980_s30  ;;  %4924 = vrot.lane.b32.xlu1 %v10929_v31, %s11979_s1  ;;  %v4960_v56 = vpop.permute.xlu1 %4959  ;;  %v10970_v46 = vpop.permute.xlu0 %5087 }
0x157b   : > { %5052 = vrot.lane.b32.xlu0 %v10935_v37, %s11980_s30  ;;  %5042 = vrot.lane.b32.xlu1 %v10913_v42, %s11980_s30  ;;  %v5072_v17 = vpop.permute.xlu1 %5071  ;;  %v4950_v53 = vpop.permute.xlu0 %4949 }
0x157f   : > { %4926 = vrot.lane.b32.xlu1 %v10921_v59, %s11979_s1  ;;  %v10960_v11 = vpop.permute.xlu1 %4964  ;;  %v5113_v13 = vpop.permute.xlu0 %5112 }
0x1583   : > { %5044 = vrot.lane.b32.xlu1 %v10929_v31, %s11980_s30  ;;  %v5076_v30 = vpop.permute.xlu1 %5075  ;;  %v4970_v60 = vpop.permute.xlu0 %4969 }
0x1587   : > { %4928 = vrot.lane.b32.xlu1 %v10947_v43, %s11979_s1  ;;  %v5118_v47 = vpop.permute.xlu1 %5117  ;;  %v10982_v40 = vpop.permute.xlu0 %4974 }
0x158b   : > { %4930 = vrot.lane.b32.xlu1 %v10927_v15, %s11979_s1  ;;  %v10968_v24 = vpop.permute.xlu1 %5011  ;;  %v10986_v12 = vpop.permute.xlu0 %4979 }
0x158f   : > { %5048 = vrot.lane.b32.xlu1 %v10947_v43, %s11980_s30  ;;  %v10972_v6 = vpop.permute.xlu1 %5122  ;;  %v10988_v50 = vpop.permute.xlu0 %5137 }
0x1593   : > { %4932 = vrot.lane.b32.xlu1 %v10935_v37, %s11979_s1  ;;  %v10974_v51 = vpop.permute.xlu1 %5015  ;;  %v10990_v8 = vpop.permute.xlu0 %5142 }
0x1597   : > { %5147 = vperm.xlu1 %8252, %v7165_v44   ;;  %v10976_v45 = vpop.permute.xlu1 %5127 }
0x159b   : > { %v10978_v28 = vpop.permute.xlu1 %5019 }
0x159f   : > { %v10980_v22 = vpop.permute.xlu1 %5132 }
0x15a3   : > { %v10984_v38 = vpop.permute.xlu1 %5091 }
0x15dd   : > { %v4919_v36 = vpop.permute.xlu1 %4918  ;;  %v4921_v49 = vpop.permute.xlu0 %4920 }
0x15de   : > { %v4935_v62 = vsel %vm545_vm2, %v4921_v49, 0.0  ;;  %v4934_v33 = vsel %vm545_vm2, %v4919_v36, 0.0 }
0x15df   : > { %v4983_v5 = vmul.f32 %v4950_v53, %v4935_v62  ;;  %v4982_v26 = vmul.f32 %v4945_v61, %v4934_v33  ;;  %v5022_v53 = vmul.f32 %v4992_v2, %v10903_v18 }
0x15e1   : > { %v4923_v20 = vpop.permute.xlu1 %4922  ;;  %v5039_v48 = vpop.permute.xlu0 %5038 }
0x15e2   : > { %v4936_v32 = vsel %vm545_vm2, %v4923_v20, 0.0  ;;  %v5054_v52 = vsel %vm550_vm3, %v5039_v48, 0.0  ;;  %v5030_v48 = vadd.f32 %v5022_v53, %v4982_v26  ;;  %v5026_v26 = vmul.f32 %v10962_v63, %v10921_v59 }
0x15e3   : > { %v4984_v9 = vmul.f32 %v4955_v57, %v4936_v32  ;;  %v5094_v62 = vmul.f32 %v5064_v21, %v5054_v52  ;;  %v5025_v57 = vmul.f32 %v5004_v1, %v10929_v31 }
0x15e5   : > { %v5041_v34 = vpop.permute.xlu1 %5040  ;;  %v5102_v18 = vadd.f32 %v5094_v62, %v5030_v48  ;;  %v5047_v2 = vpop.permute.xlu0 %5046 }
0x15e6   : > { %v5055_v10 = vsel %vm550_vm3, %v5041_v34, 0.0  ;;  %v5031_v34 = vadd.f32 %v5023_v55, %v4983_v5 }
0x15e7   : > { %v5095_v49 = vmul.f32 %v5068_v58, %v5055_v10 }
0x15e9   : > { %v4925_v41 = vpop.permute.xlu1 %4924  ;;  %v5103_v33 = vadd.f32 %v5095_v49, %v5031_v34  ;;  %v5051_v52 = vpop.permute.xlu0 %5050 }
0x15ea   : > { %v4937_v54 = vsel %vm545_vm2, %v4925_v41, 0.0  ;;  %v5060_v49 = vsel %vm550_vm3, %v5051_v52, 0.0 }
0x15eb   : > { %v4985_v20 = vmul.f32 %v4960_v56, %v4937_v54  ;;  %v5151_v23 = vadd.f32 %v5118_v47, %v5103_v33  ;;  %v5058_v56 = vsel %vm550_vm3, %v5047_v2, 0.0 }
0x15ec   : > { %v5098_v59 = vmul.f32 %v10964_v7, %v5058_v56 }
0x15ed   : > { %v5043_v39 = vpop.permute.xlu1 %5042  ;;  %v5033_v5 = vadd.f32 %v5025_v57, %v4985_v20  ;;  %vm5160_vm7 = vcmp.ge.f32.partialorder %v5151_v23, 0.0 }
0x15ee   : > { %v5056_v36 = vsel %vm550_vm3, %v5043_v39, 0.0  ;;  %v5032_v39 = vadd.f32 %v5024_v3, %v4984_v9 }
0x15ef   : > { %v5096_v61 = vmul.f32 %v5072_v17, %v5056_v36  ;;  %v5150_v17 = vadd.f32 %v5113_v13, %v5102_v18 }
0x15f1   : > { %v4927_v0 = vpop.permute.xlu1 %4926  ;;  %v5104_v32 = vadd.f32 %v5096_v61, %v5032_v39  ;;  %vm5159_vm11 = vcmp.ge.f32.partialorder %v5150_v17, 0.0 }
0x15f2   : > { %v4938_v41 = vsel %vm545_vm2, %v4927_v0, 0.0  ;;  %v11025_v0 = vstv %s7166_s27 }
0x15f3   : > { %v4986_v54 = vmul.f32 %v10960_v11, %v4938_v41  ;;  %v5152_v11 = vadd.f32 %v10972_v6, %v5104_v32  ;;  %v5169_v63 = vmul.f32 %v11025_v0, %v5151_v23  ;;  %v5028_v6 = vmul.f32 %v10974_v51, %v10927_v15 }
0x15f4   : > { %v5168_v7 = vmul.f32 %v11025_v0, %v5150_v17  ;;  %v5100_v15 = vmul.f32 %v10970_v46, %v5060_v49  ;;  %v7178_v49 = vld [vmem:[%s11892_s11 + $0x118] sm:$0xff] }
0x15f5   : > { %v5045_v44 = vpop.permute.xlu1 %5044  ;;  %v5034_v47 = vadd.f32 %v5026_v26, %v4986_v54  ;;  %v5170_v36 = vmul.f32 %v11025_v0, %v5152_v11  ;;  %v11041_v62 = vsel %vm5160_vm7, %v5151_v23, %v5169_v63  ;;  %vm5161_vm8 = vcmp.ge.f32.partialorder %v5152_v11, 0.0 }
0x15f6   : > { %v5057_v4 = vsel %vm550_vm3, %v5045_v44, 0.0  ;;  %v5203_v51 = vmul.f32 %v11041_v62, %v11041_v62 }
0x15f7   : > { %v5097_v10 = vmul.f32 %v5076_v30, %v5057_v4  ;;  %v5027_v30 = vmul.f32 %v10968_v24, %v10947_v43  ;;  %v5106_v34 = vadd.f32 %v5098_v59, %v5034_v47  ;;  %v11044_v4 = vsel %vm5159_vm11, %v5150_v17, %v5168_v7  ;;  %v7199_v7 = vld [vmem:[%s11886_s5 + $0x140] sm:$0xff] }
0x15f8   : > { %v11049_v3 = vsel %vm5161_vm8, %v5152_v11, %v5170_v36  ;;  %v5202_v48 = vmul.f32 %v11044_v4, %v11044_v4  ;;  %v5184_v46 = vadd.f32 %v11041_v62, %v11044_v4  ;;  %v7201_v36 = vld [vmem:[%s11886_s5 + $0x150] sm:$0xff] }
0x15f9   : > { %v4929_v58 = vpop.permute.xlu1 %4928  ;;  %v5105_v31 = vadd.f32 %v5097_v10, %v5033_v5  ;;  %v5154_v20 = vadd.f32 %v10980_v22, %v5106_v34  ;;  %v5204_v57 = vmul.f32 %v11049_v3, %v11049_v3  ;;  %v5053_v10 = vpop.permute.xlu0 %5052  ;;  %v7200_v34 = vld [vmem:[%s11886_s5 + $0x148] sm:$0xff] }
0x15fa   : > { %v4939_v21 = vsel %vm545_vm2, %v4929_v58, 0.0  ;;  %v5210_v39 = vadd.f32 %v5203_v51, %v5202_v48  ;;  %v5185_v18 = vadd.f32 %v5184_v46, %v11049_v3  ;;  %v5061_v32 = vsel %vm550_vm3, %v5053_v10, 0.0  ;;  %v7089_v51 = vld [vmem:[%s11891_s10 + $0xe0] sm:$0xff] }
0x15fb   : > { %v4987_v9 = vmul.f32 %v4970_v60, %v4939_v21  ;;  %v5153_v60 = vadd.f32 %v10976_v45, %v5105_v31  ;;  %v5172_v22 = vmul.f32 %v11025_v0, %v5154_v20  ;;  %v5029_v21 = vmul.f32 %v10978_v28, %v10935_v37  ;;  %7697 = vmatprep.mubr.msk.f32.mxu1 %vm661_vm0, %v7089_v51  ;;  %v7167_v48 = vld [vmem:[%s11891_s10 + $0x100] sm:$0xff] }
0x15fc   : > { %v5101_v31 = vmul.f32 %v10984_v38, %v5061_v32 }
0x15fd   : > { %v4931_v42 = vpop.permute.xlu1 %4930  ;;  %v5035_v44 = vadd.f32 %v5027_v30, %v4987_v9  ;;  %v5171_v45 = vmul.f32 %v11025_v0, %v5153_v60  ;;  %vm5162_vm9 = vcmp.ge.f32.partialorder %v5153_v60, 0.0 }
0x15fe   : > { %v4940_v1 = vsel %vm545_vm2, %v4931_v42, 0.0  ;;  %v5211_v42 = vadd.f32 %v5210_v39, %v5204_v57 }
0x15ff   : > { %v4988_v43 = vmul.f32 %v10982_v40, %v4940_v1  ;;  %v11057_v33 = vsel %vm5162_vm9, %v5153_v60, %v5171_v45  ;;  %v7202_v45 = vld [vmem:[%s11886_s5 + $0x158] sm:$0xff] }
0x1600   : > { %v5205_v2 = vmul.f32 %v11057_v33, %v11057_v33  ;;  %v5186_v54 = vadd.f32 %v5185_v18, %v11057_v33 }
0x1601   : > { %v5049_v55 = vpop.permute.xlu1 %5048  ;;  %v5036_v40 = vadd.f32 %v5028_v6, %v4988_v43  ;;  %v7175_v6 = vld [vmem:[%s11892_s11 + $0x100] sm:$0xff] }
0x1602   : > { %v5059_v13 = vsel %vm550_vm3, %v5049_v55, 0.0  ;;  %v5212_v56 = vadd.f32 %v5211_v42, %v5205_v2 }
0x1603   : > { %v5099_v24 = vmul.f32 %v10966_v25, %v5059_v13  ;;  %v5108_v41 = vadd.f32 %v5100_v15, %v5036_v40  ;;  %v7205_v40 = vld [vmem:[%s11886_s5 + $0x170] sm:$0xff]  ;;  %v7206_v15 = vld [vmem:[%s11886_s5 + $0x178] sm:$0xff] }
0x1605   : > { %v5107_v53 = vadd.f32 %v5099_v24, %v5035_v44  ;;  %v4933_v25 = vpop.permute.xlu1 %4932  ;;  %v5156_v5 = vadd.f32 %v10990_v8, %v5108_v41  ;;  %v7177_v24 = vld [vmem:[%s11892_s11 + $0x110] sm:$0xff] }
0x1606   : > { %v4941_v58 = vsel %vm545_vm2, %v4933_v25, 0.0  ;;  %vm5163_vm2 = vcmp.ge.f32.partialorder %v5154_v20, 0.0  ;;  %v7204_v25 = vld [vmem:[%s11886_s5 + $0x168] sm:$0xff] }
0x1607   : > { %v5155_v61 = vadd.f32 %v10988_v50, %v5107_v53  ;;  %v4989_v29 = vmul.f32 %v10986_v12, %v4941_v58  ;;  %v11075_v12 = vsel %vm5163_vm2, %v5154_v20, %v5172_v22  ;;  %v5174_v9 = vmul.f32 %v11025_v0, %v5156_v5  ;;  %v7203_v53 = vld [vmem:[%s11886_s5 + $0x160] sm:$0xff]  ;;  %v7090_v20 = vld [vmem:[%s11891_s10 + $0xe8] sm:$0xff]  ;;  %v7092_v58 = vld [vmem:[%s11891_s10 + $0xf8] sm:$0xff] }
0x1608   : > { %vm5165_vm15 = vcmp.ge.f32.partialorder %v5156_v5, 0.0  ;;  %v5187_v37 = vadd.f32 %v5186_v54, %v11075_v12  ;;  %v5206_v28 = vmul.f32 %v11075_v12, %v11075_v12  ;;  %7698 = vmatmul.mubr.msk.f32.gmra.mrb[12].mxu1 %vm661_vm0, %v7090_v20 }
0x1609   : > { %v5173_v50 = vmul.f32 %v11025_v0, %v5155_v61  ;;  %vm5164_vm14 = vcmp.ge.f32.partialorder %v5155_v61, 0.0  ;;  %v5037_v23 = vadd.f32 %v5029_v21, %v4989_v29  ;;  %v11087_v47 = vsel %vm5165_vm15, %v5156_v5, %v5174_v9 }
0x160a   : > { %v5213_v30 = vadd.f32 %v5212_v56, %v5206_v28  ;;  %v5208_v63 = vmul.f32 %v11087_v47, %v11087_v47 }
0x160b   : > { %v11077_v26 = vsel %vm5164_vm14, %v5155_v61, %v5173_v50  ;;  %v5109_v27 = vadd.f32 %v5101_v31, %v5037_v23  ;;  %v7091_v61 = vld [vmem:[%s11891_s10 + $0xf0] sm:$0xff] }
0x160c   : > { %v5207_v8 = vmul.f32 %v11077_v26, %v11077_v26  ;;  %v5188_v1 = vadd.f32 %v5187_v37, %v11077_v26  ;;  %7700 = vmatprep.mubr.msk.f32.mxu1 %vm661_vm0, %v7091_v61 }
0x160d   : > { %7701 = vmatmul.mubr.msk.f32.gmra.mrb[14].mxu1 %vm661_vm0, %v7092_v58 }
0x160e   : > { %v5214_v38 = vadd.f32 %v5213_v30, %v5207_v8  ;;  %v5189_v59 = vadd.f32 %v5188_v1, %v11087_v47  ;;  %7739 = vmatprep.mubr.msk.f32.mxu1 %vm661_vm0, %v7167_v48 }
0x1610   : > { %v5215_v44 = vadd.f32 %v5214_v38, %v5208_v63 }
0x1616   : > { %v5148_v17 = vpop.permute.xlu1 %5147 }
0x1617   : > { %v5157_v11 = vadd.f32 %v5148_v17, %v5109_v27 }
0x1619   : > { %vm5166_vm3 = vcmp.ge.f32.partialorder %v5157_v11, 0.0  ;;  %v5175_v55 = vmul.f32 %v11025_v0, %v5157_v11  ;;  %v7176_v0 = vld [vmem:[%s11892_s11 + $0x108] sm:$0xff] }
0x161b   : > { %v11093_v52 = vsel %vm5166_vm3, %v5157_v11, %v5175_v55 }
0x161c   : > { %v5190_v13 = vadd.f32 %v5189_v59, %v11093_v52  ;;  %v5209_v60 = vmul.f32 %v11093_v52, %v11093_v52 }
0x161e   : > { %5191 = vadd.xlane.f32.xlu1 %v5190_v13  ;;  %v5216_v43 = vadd.f32 %v5215_v44, %v5209_v60 }
0x1620   : > { %5217 = vadd.xlane.f32.xlu0 %v5216_v43 }
0x162f   : > { %5274 = vperm.xlu1 %8252, %v7176_v0  }
0x1633   : > { %5279 = vperm.xlu1 %8252, %v7177_v24  }
0x1636   : > { %5269 = vperm.xlu0 %8249, %v7175_v6  }
0x1637   : > { %5464 = vperm.xlu1 %8252, %v7199_v7  }
0x163a   : > { %5284 = vperm.xlu0 %8249, %v7178_v49  }
0x163b   : > { %5474 = vperm.xlu1 %8252, %v7201_v36  }
0x163e   : > { %5469 = vperm.xlu0 %8249, %v7200_v34  }
0x163f   : > { %5484 = vperm.xlu1 %8252, %v7203_v53  }
0x1642   : > { %5479 = vperm.xlu0 %8249, %v7202_v45  }
0x1643   : > { %5494 = vperm.xlu1 %8252, %v7205_v40  }
0x1646   : > { %5489 = vperm.xlu0 %8249, %v7204_v25  }
0x164a   : > { %5499 = vperm.xlu0 %8249, %v7206_v15  }
0x16ab   : > { %v5192_v41 = vpop.xlane.xlu1 %5191 }
0x16ac   : > { %v5193_v46 = vrot.slane %v5192_v41, 4 }
0x16ad   : > { %v5218_v57 = vpop.xlane.xlu0 %5217 }
0x16ae   : > { %v5194_v39 = vadd.f32 %v5193_v46, %v5192_v41  ;;  %v5219_v10 = vrot.slane %v5218_v57, 4 }
0x16af   : > { %v5275_v36 = vpop.permute.xlu1 %5274 }
0x16b0   : > { %v5220_v22 = vadd.f32 %v5219_v10, %v5218_v57  ;;  %v5195_v50 = vrot.slane %v5194_v39, 2 }
0x16b2   : > { %v5196_v29 = vadd.f32 %v5195_v50, %v5194_v39  ;;  %v5221_v18 = vrot.slane %v5220_v22, 2  ;;  %v7197_v50 = vld [vmem:[%s11885_s4 + $0x170] sm:$0xff] }
0x16b3   : > { %v5280_v61 = vpop.permute.xlu1 %5279 }
0x16b4   : > { %v5197_v2 = vrot.slane %v5196_v29, 1  ;;  %v5222_v21 = vadd.f32 %v5221_v18, %v5220_v22  ;;  %v7196_v22 = vld [vmem:[%s11885_s4 + $0x168] sm:$0xff] }
0x16b5   : > { %v5270_v49 = vpop.permute.xlu0 %5269 }
0x16b6   : > { %v5198_v5 = vadd.f32 %v5197_v2, %v5196_v29  ;;  %v5223_v32 = vrot.slane %v5222_v21, 1  ;;  %v7198_v29 = vld [vmem:[%s11885_s4 + $0x178] sm:$0xff] }
0x16b7   : > { %v5465_v2 = vpop.permute.xlu1 %5464 }
0x16b8   : > { %8081 = vpush %v5198_v5  ;;  %v5224_v54 = vadd.f32 %v5223_v32, %v5222_v21  ;;  %v5640_v32 = vstv %s7215_s23 }
0x16b9   : > { %v5285_v15 = vpop.permute.xlu0 %5284 }
0x16ba   : > { %8083 = vpush %v5224_v54 }
0x16bb   : > { %v5475_v54 = vpop.permute.xlu1 %5474 }
0x16bd   : > { %v5470_v18 = vpop.permute.xlu0 %5469 }
0x16c1   : > { %v5480_v21 = vpop.permute.xlu0 %5479 }
0x16e9   : > { %s8082_s29 = spop %8081 }
0x16ea   : > { %v5200_v42 = vstv %s8082_s29  ;;  %s11987_s29 = smov 124  }
0x16eb   : > { %v5201_v23 = vmul.f32 0.00012207031, %v5200_v42  ;;  %s8084_s1 = spop %8083 }
0x16ec   : > { %v5226_v56 = vstv %s8084_s1 }
0x16ed   : > { %v5227_v31 = vmul.f32 0.00012207031, %v5226_v56  ;;  %v5228_v9 = vmul.f32 %v5201_v23, %v5201_v23  ;;  %v5231_v27 = vsub.f32 %v11044_v4, %v5201_v23  ;;  %v5232_v17 = vsub.f32 %v11041_v62, %v5201_v23 }
0x16ee   : > { %v5233_v1 = vsub.f32 %v11049_v3, %v5201_v23  ;;  %v5234_v30 = vsub.f32 %v11057_v33, %v5201_v23  ;;  %v5235_v60 = vsub.f32 %v11075_v12, %v5201_v23  ;;  %v5236_v44 = vsub.f32 %v11077_v26, %v5201_v23  ;;  %v7168_v12 = vld [vmem:[%s11891_s10 + $0x108] sm:$0xff]  ;;  %v7169_v26 = vld [vmem:[%s11891_s10 + $0x110] sm:$0xff] }
0x16ef   : > { %v5229_v37 = vsub.f32 %v5227_v31, %v5228_v9  ;;  %v5237_v62 = vsub.f32 %v11087_v47, %v5201_v23  ;;  %v5238_v3 = vsub.f32 %v11093_v52, %v5201_v23  ;;  %v7170_v47 = vld [vmem:[%s11891_s10 + $0x118] sm:$0xff]  ;;  %v7191_v52 = vld [vmem:[%s11885_s4 + $0x140] sm:$0xff] }
0x16f0   : > { %7759 = vmatprep.mubr.msk.f32.mxu0 %vm815_vm1, %v7191_v52 }
0x16f1   : > { %v5230_v28 = vmax.f32 %v5229_v37, 0.0 }
0x16f3   : > { %v5239_v8 = vadd.f32 1e-08, %v5230_v28 }
0x16f5   : > { %8293 = vrsqrt.f32 %v5239_v8 }
0x16ff   : > { %v8294_v11 = vpop.eup %8293 }
0x1700   : > { %v5241_v38 = vmul.f32 %v8294_v11, %v5231_v27  ;;  %v5242_v55 = vmul.f32 %v8294_v11, %v5232_v17  ;;  %v5243_v59 = vmul.f32 %v8294_v11, %v5233_v1  ;;  %v5244_v63 = vmul.f32 %v8294_v11, %v5234_v30  ;;  %v5490_v17 = vpop.permute.xlu0 %5489 }
0x1701   : > { %v5245_v0 = vmul.f32 %v8294_v11, %v5235_v60  ;;  %v5246_v4 = vmul.f32 %v8294_v11, %v5236_v44  ;;  %v5247_v24 = vmul.f32 %v8294_v11, %v5237_v62  ;;  %v5248_v6 = vmul.f32 %v8294_v11, %v5238_v3 }
0x1702   : > { %v7945_v13 = vpack.c.bf16 %v5242_v55, %v5241_v38  ;;  %v7949_v43 = vpack.c.bf16 %v5244_v63, %v5243_v59  ;;  %v5485_v38 = vpop.permute.xlu1 %5484 }
0x1703   : > { %v7953_v33 = vpack.c.bf16 %v5246_v4, %v5245_v0  ;;  %v7957_v7 = vpack.c.bf16 %v5248_v6, %v5247_v24 }
0x1704   : > { %7946 = vmatprep.subr.bf16.mxu1 %v7945_v13 }
0x1705   : > { %7948 = vmatpush3.bf16.msra.mxu1 %v7945_v13 }
0x1706   : > { %7950 = vmatprep.subr.bf16.mxu1 %v7949_v43 }
0x1709   : > { %7952 = vmatpush3.bf16.msra.mxu1 %v7949_v43 }
0x170a   : > { %7954 = vmatprep.subr.bf16.mxu1 %v7953_v33 }
0x170d   : > { %7956 = vmatpush3.bf16.msra.mxu1 %v7953_v33 }
0x170e   : > { %7958 = vmatprep.subr.bf16.mxu1 %v7957_v7 }
0x1711   : > { %7960 = vmatpush3.bf16.msra.mxu1 %v7957_v7  ;;  %v5500_v7 = vpop.permute.xlu0 %5499 }
0x1714   : > { %7740 = vmatmul.mubr.msk.f32.vlgmr.msra.gmra.mrb[28].mxu1 %vm661_vm0, %v7168_v12 }
0x1715   : > { %7742 = vmatprep.mubr.msk.f32.mxu1 %vm661_vm0, %v7169_v26 }
0x1718   : > { %7743 = vmatmul.mubr.msk.f32.gmra.mrb[30].mxu1 %vm661_vm0, %v7170_v47  ;;  %v5495_v47 = vpop.permute.xlu1 %5494 }
0x17e7   : > { %v7741_v34 = vpop.f32.mrb[28].mxu1 }
0x17e8   : > { %v5403_v53 = vadd.f32 %v7741_v34, %v5275_v36  ;;  %v5397_v45 = vpop.f32.mrb[29].mxu1 }
0x17e9   : > { %v5398_v40 = vadd.f32 %v5397_v45, %v5270_v49 }
0x17ea   : > { %v5437_v25 = vadd.f32 %v5403_v53, %v10693_v16  ;;  %v7192_v16 = vld [vmem:[%s11885_s4 + $0x148] sm:$0xff] }
0x17eb   : > { %v5436_v51 = vadd.f32 %v5398_v40, %v10696_v14  ;;  %v7744_v20 = vpop.f32.mrb[30].mxu1  ;;  %v7193_v14 = vld [vmem:[%s11885_s4 + $0x150] sm:$0xff] }
0x17ec   : > { %v5413_v58 = vadd.f32 %v7744_v20, %v5285_v15  ;;  %v5407_v48 = vpop.f32.mrb[31].mxu1 }
0x17ed   : > { %v5408_v41 = vadd.f32 %v5407_v48, %v5280_v61  ;;  %v7961_v46 = vpack.c.bf16 %v5437_v25, %v5436_v51 }
0x17ee   : > { %v5439_v57 = vadd.f32 %v5413_v58, %v10701_v35  ;;  %v7194_v35 = vld [vmem:[%s11885_s4 + $0x158] sm:$0xff] }
0x17ef   : > { %v5438_v39 = vadd.f32 %v5408_v41, %v10704_v19  ;;  %7962 = vmatprep.subr.bf16.mxu0 %v7961_v46  ;;  %v7195_v19 = vld [vmem:[%s11885_s4 + $0x160] sm:$0xff] }
0x17f0   : > { %7964 = vmatpush3.bf16.msra.mxu0 %v7961_v46 }
0x17f1   : > { %v7965_v10 = vpack.c.bf16 %v5439_v57, %v5438_v39 }
0x17f3   : > { %7966 = vmatprep.subr.bf16.mxu0 %v7965_v10 }
0x17f4   : > { %7968 = vmatpush3.bf16.msra.mxu0 %v7965_v10 }
0x17f7   : > { %7760 = vmatmul.mubr.msk.f32.vlgmr.msra.gmra.mrb[36].mxu0 %vm815_vm1, %v7192_v16 }
0x17f8   : > { %7762 = vmatprep.mubr.msk.f32.mxu0 %vm815_vm1, %v7193_v14 }
0x17fb   : > { %7763 = vmatmul.mubr.msk.f32.gmra.mrb[38].mxu0 %vm815_vm1, %v7194_v35 }
0x17fc   : > { %7765 = vmatprep.mubr.msk.f32.mxu0 %vm815_vm1, %v7195_v19 }
0x17ff   : > { %7766 = vmatmul.mubr.msk.f32.gmra.mrb[40].mxu0 %vm815_vm1, %v7196_v22 }
0x1800   : > { %7768 = vmatprep.mubr.msk.f32.mxu0 %vm815_vm1, %v7197_v50 }
0x1803   : > { %7769 = vmatmul.mubr.msk.f32.gmra.mrb[42].mxu0 %vm815_vm1, %v7198_v29  ;;  %v7217_v29 = vld [vmem:[%s11887_s6 + $0x148] sm:$0xff] }
0x18ca   : > { %v7761_v5 = vpop.f32.mrb[36].mxu0 }
0x18cb   : > { %v5598_v42 = vadd.f32 %v7761_v5, %v5470_v18  ;;  %v5592_v23 = vpop.f32.mrb[37].mxu0  ;;  %v7218_v18 = vld [vmem:[%s11887_s6 + $0x150] sm:$0xff]  ;;  %v7224_v5 = vld [vmem:[%s11888_s7 + $0x140] sm:$0xff] }
0x18cc   : > { %v5593_v56 = vadd.f32 %v5592_v23, %v5465_v2  ;;  %v7216_v2 = vld [vmem:[%s11887_s6 + $0x140] sm:$0xff] }
0x18cd   : > { %vm5633_vm4 = vcmp.ge.f32.partialorder %v5598_v42, 0.0  ;;  %v5642_v31 = vmul.f32 %v5640_v32, %v5598_v42  ;;  %v7220_v23 = vld [vmem:[%s11887_s6 + $0x160] sm:$0xff] }
0x18ce   : > { %vm5632_vm5 = vcmp.ge.f32.partialorder %v5593_v56, 0.0  ;;  %v5641_v9 = vmul.f32 %v5640_v32, %v5593_v56  ;;  %v7764_v37 = vpop.f32.mrb[38].mxu0 }
0x18cf   : > { %v11210_v28 = vsel %vm5633_vm4, %v5598_v42, %v5642_v31  ;;  %v5608_v8 = vadd.f32 %v7764_v37, %v5480_v21  ;;  %v5602_v27 = vpop.f32.mrb[39].mxu0  ;;  %v7225_v21 = vld [vmem:[%s11888_s7 + $0x148] sm:$0xff]  ;;  %v7227_v42 = vld [vmem:[%s11888_s7 + $0x158] sm:$0xff]  ;;  %v7222_v37 = vld [vmem:[%s11887_s6 + $0x170] sm:$0xff] }
0x18d0   : > { %v5676_v1 = vmul.f32 %v11210_v28, %v11210_v28  ;;  %v11214_v30 = vsel %vm5632_vm5, %v5593_v56, %v5641_v9  ;;  %v5603_v11 = vadd.f32 %v5602_v27, %v5475_v54  ;;  %v7219_v54 = vld [vmem:[%s11887_s6 + $0x158] sm:$0xff]  ;;  %v7228_v56 = vld [vmem:[%s11888_s7 + $0x160] sm:$0xff]  ;;  %v7221_v31 = vld [vmem:[%s11887_s6 + $0x168] sm:$0xff] }
0x18d1   : > { %v5675_v55 = vmul.f32 %v11214_v30, %v11214_v30  ;;  %vm5635_vm10 = vcmp.ge.f32.partialorder %v5608_v8, 0.0  ;;  %v5644_v59 = vmul.f32 %v5640_v32, %v5608_v8  ;;  %v5657_v60 = vadd.f32 %v11210_v28, %v11214_v30  ;;  %v7229_v9 = vld [vmem:[%s11888_s7 + $0x168] sm:$0xff]  ;;  %v7223_v27 = vld [vmem:[%s11887_s6 + $0x178] sm:$0xff] }
0x18d2   : > { %vm5634_vm6 = vcmp.ge.f32.partialorder %v5603_v11, 0.0  ;;  %v5643_v63 = vmul.f32 %v5640_v32, %v5603_v11  ;;  %v7767_v13 = vpop.f32.mrb[40].mxu0 }
0x18d3   : > { %v5618_v44 = vadd.f32 %v7767_v13, %v5490_v17  ;;  %v5612_v43 = vpop.f32.mrb[41].mxu0  ;;  %v5683_v0 = vadd.f32 %v5676_v1, %v5675_v55  ;;  %v11220_v4 = vsel %vm5635_vm10, %v5608_v8, %v5644_v59  ;;  %v7230_v8 = vld [vmem:[%s11888_s7 + $0x170] sm:$0xff]  ;;  %v7232_v17 = vld [vmem:[%s11889_s8 + $0x140] sm:$0xff]  ;;  %v7231_v1 = vld [vmem:[%s11888_s7 + $0x178] sm:$0xff]  ;;  %v11984_v59 = vmov 0  }
0x18d4   : > { %v11222_v62 = vsel %vm5634_vm6, %v5603_v11, %v5643_v63  ;;  %v5613_v3 = vadd.f32 %v5612_v43, %v5485_v38  ;;  %v5678_v52 = vmul.f32 %v11220_v4, %v11220_v4  ;;  %v11983_v11 = vmov 1   ;;  %v7234_v38 = vld [vmem:[%s11889_s8 + $0x150] sm:$0xff]  ;;  %v7233_v55 = vld [vmem:[%s11889_s8 + $0x148] sm:$0xff]  ;;  %v7235_v63 = vld [vmem:[%s11889_s8 + $0x158] sm:$0xff] }
0x18d5   : > { %v5658_v33 = vadd.f32 %v5657_v60, %v11222_v62  ;;  %v5677_v24 = vmul.f32 %v11222_v62, %v11222_v62  ;;  %vm5637_vm7 = vcmp.ge.f32.partialorder %v5618_v44, 0.0  ;;  %v5646_v6 = vmul.f32 %v5640_v32, %v5618_v44  ;;  %v7236_v13 = vld [vmem:[%s11889_s8 + $0x160] sm:$0xff]  ;;  %v7238_v43 = vld [vmem:[%s11889_s8 + $0x170] sm:$0xff] }
0x18d6   : > { %vm5636_vm11 = vcmp.ge.f32.partialorder %v5613_v3, 0.0  ;;  %v5645_v12 = vmul.f32 %v5640_v32, %v5613_v3  ;;  %v7770_v26 = vpop.f32.mrb[42].mxu0  ;;  %v11985_v60 = vmov 2  }
0x18d7   : > { %v5684_v49 = vadd.f32 %v5683_v0, %v5677_v24  ;;  %v5659_v36 = vadd.f32 %v5658_v33, %v11220_v4  ;;  %v5628_v34 = vadd.f32 %v7770_v26, %v5500_v7  ;;  %v5622_v53 = vpop.f32.mrb[43].mxu0  ;;  %v11230_v45 = vsel %vm5637_vm7, %v5618_v44, %v5646_v6  ;;  %v7237_v44 = vld [vmem:[%s11889_s8 + $0x168] sm:$0xff]  ;;  %v7240_v0 = vld [vmem:[%s11890_s9 + $0x140] sm:$0xff]  ;;  %v7242_v33 = vld [vmem:[%s11890_s9 + $0x150] sm:$0xff] }
0x18d8   : > { %v11232_v40 = vsel %vm5636_vm11, %v5613_v3, %v5645_v12  ;;  %v5623_v25 = vadd.f32 %v5622_v53, %v5495_v47  ;;  %v5680_v48 = vmul.f32 %v11230_v45, %v11230_v45  ;;  %v7241_v3 = vld [vmem:[%s11890_s9 + $0x148] sm:$0xff]  ;;  %v7239_v24 = vld [vmem:[%s11889_s8 + $0x178] sm:$0xff]  ;;  %v7246_v7 = vld [vmem:[%s11890_s9 + $0x170] sm:$0xff] }
0x18d9   : > { %v5660_v15 = vadd.f32 %v5659_v36, %v11232_v40  ;;  %v5679_v51 = vmul.f32 %v11232_v40, %v11232_v40  ;;  %v5685_v20 = vadd.f32 %v5684_v49, %v5678_v52  ;;  %vm5639_vm8 = vcmp.ge.f32.partialorder %v5628_v34, 0.0  ;;  %v7245_v6 = vld [vmem:[%s11890_s9 + $0x168] sm:$0xff]  ;;  %v7243_v12 = vld [vmem:[%s11890_s9 + $0x158] sm:$0xff]  ;;  %v7244_v26 = vld [vmem:[%s11890_s9 + $0x160] sm:$0xff] }
0x18da   : > { %v5648_v61 = vmul.f32 %v5640_v32, %v5628_v34  ;;  %vm5638_vm9 = vcmp.ge.f32.partialorder %v5623_v25, 0.0  ;;  %v5647_v58 = vmul.f32 %v5640_v32, %v5623_v25  ;;  %v7226_v32 = vld [vmem:[%s11888_s7 + $0x150] sm:$0xff] }
0x18db   : > { %v5686_v41 = vadd.f32 %v5685_v20, %v5679_v51  ;;  %v5661_v46 = vadd.f32 %v5660_v15, %v11230_v45 }
0x18dc   : > { %v11240_v57 = vsel %vm5639_vm8, %v5628_v34, %v5648_v61  ;;  %v11242_v39 = vsel %vm5638_vm9, %v5623_v25, %v5647_v58 }
0x18dd   : > { %v5681_v10 = vmul.f32 %v11242_v39, %v11242_v39  ;;  %v5662_v16 = vadd.f32 %v5661_v46, %v11242_v39  ;;  %v5687_v14 = vadd.f32 %v5686_v41, %v5680_v48  ;;  %v5682_v19 = vmul.f32 %v11240_v57, %v11240_v57 }
0x18df   : > { %v5663_v35 = vadd.f32 %v5662_v16, %v11240_v57  ;;  %v5688_v22 = vadd.f32 %v5687_v14, %v5681_v10 }
0x18e1   : > { %5664 = vadd.xlane.f32.xlu1 %v5663_v35  ;;  %v5689_v50 = vadd.f32 %v5688_v22, %v5682_v19 }
0x18e3   : > { %5690 = vadd.xlane.f32.xlu0 %v5689_v50 }
0x18f2   : > { %5738 = vperm.xlu1 %8252, %v7217_v29  }
0x18f6   : > { %5743 = vperm.xlu1 %8252, %v7218_v18  }
0x18f9   : > { %5733 = vperm.xlu0 %8249, %v7216_v2  }
0x18fa   : > { %5795 = vperm.xlu1 %8252, %v7225_v21  }
0x18fd   : > { %5790 = vperm.xlu0 %8249, %v7224_v5  }
0x18fe   : > { %5800 = vperm.xlu1 %8252, %v7226_v32  }
0x1901   : > { %5748 = vperm.xlu0 %8249, %v7219_v54  }
0x1902   : > { %5805 = vperm.xlu1 %8252, %v7227_v42  }
0x1905   : > { %5753 = vperm.xlu0 %8249, %v7220_v23  }
0x1906   : > { %5810 = vperm.xlu1 %8252, %v7228_v56  }
0x1909   : > { %5758 = vperm.xlu0 %8249, %v7221_v31  }
0x190a   : > { %5815 = vperm.xlu1 %8252, %v7229_v9  }
0x190d   : > { %5763 = vperm.xlu0 %8249, %v7222_v37  }
0x190e   : > { %5820 = vperm.xlu1 %8252, %v7230_v8  }
0x1911   : > { %5768 = vperm.xlu0 %8249, %v7223_v27  }
0x1912   : > { %5880 = vperm.xlu1 %8252, %v7232_v17  }
0x1915   : > { %5825 = vperm.xlu0 %8249, %v7231_v1  }
0x1916   : > { %8253 = vset.pattern.permute.xlu1 %v11983_v11 }
0x1917   : > { %5927 = vperm.xlu1 %8253, %v7232_v17  }
0x1919   : > { %8254 = vset.pattern.permute.xlu0 %v11983_v11 }
0x191a   : > { %5931 = vperm.xlu0 %8254, %v7233_v55  }
0x191b   : > { %8255 = vset.pattern.permute.xlu1 %v11984_v59 }
0x191c   : > { %5890 = vperm.xlu1 %8255, %v7234_v38  }
0x191e   : > { %5939 = vperm.xlu0 %8254, %v7235_v63  }
0x1920   : > { %8256 = vset.pattern.permute.xlu1 %v11983_v11 }
0x1921   : > { %5935 = vperm.xlu1 %8256, %v7234_v38  }
0x1922   : > { %5943 = vperm.xlu0 %8254, %v7236_v13  }
0x1925   : > { %8257 = vset.pattern.permute.xlu1 %v11985_v60 }
0x1926   : > { %6003 = vperm.xlu1 %8257, %v7233_v55   ;;  %8261 = vset.pattern.permute.xlu0 %v11985_v60 }
0x1927   : > { %5999 = vperm.xlu0 %8261, %v7232_v17  }
0x192a   : > { %8258 = vset.pattern.permute.xlu1 %v11984_v59 }
0x192b   : > { %5895 = vperm.xlu1 %8258, %v7235_v63   ;;  %6015 = vperm.xlu0 %8261, %v7236_v13  }
0x192f   : > { %8259 = vset.pattern.permute.xlu1 %v11985_v60  ;;  %6019 = vperm.xlu0 %8261, %v7237_v44  }
0x1930   : > { %6007 = vperm.xlu1 %8259, %v7234_v38  }
0x1933   : > { %6023 = vperm.xlu0 %8261, %v7238_v43  }
0x1934   : > { %8260 = vset.pattern.permute.xlu1 %v11984_v59 }
0x1935   : > { %5900 = vperm.xlu1 %8260, %v7236_v13  }
0x1937   : > { %8269 = vset.pattern.permute.xlu0 %v11984_v59 }
0x1938   : > { %5885 = vperm.xlu0 %8269, %v7233_v55  }
0x1939   : > { %8262 = vset.pattern.permute.xlu1 %v11985_v60 }
0x193a   : > { %6011 = vperm.xlu1 %8262, %v7235_v63  }
0x193c   : > { %6048 = vperm.xlu0 %8269, %v7240_v0  }
0x193e   : > { %8263 = vset.pattern.permute.xlu1 %v11984_v59 }
0x193f   : > { %6053 = vperm.xlu1 %8263, %v7241_v3  }
0x1940   : > { %5905 = vperm.xlu0 %8269, %v7237_v44  }
0x1943   : > { %8264 = vset.pattern.permute.xlu1 %v11983_v11 }
0x1944   : > { %5947 = vperm.xlu1 %8264, %v7237_v44   ;;  %5910 = vperm.xlu0 %8269, %v7238_v43  }
0x1948   : > { %8265 = vset.pattern.permute.xlu1 %v11984_v59  ;;  %5915 = vperm.xlu0 %8269, %v7239_v24  }
0x1949   : > { %6058 = vperm.xlu1 %8265, %v7242_v33  }
0x194c   : > { %6073 = vperm.xlu0 %8269, %v7245_v6  }
0x194d   : > { %8266 = vset.pattern.permute.xlu1 %v11983_v11 }
0x194e   : > { %5951 = vperm.xlu1 %8266, %v7238_v43  }
0x1950   : > { %6078 = vperm.xlu0 %8269, %v7246_v7  }
0x1952   : > { %8267 = vset.pattern.permute.xlu1 %v11984_v59 }
0x1953   : > { %6063 = vperm.xlu1 %8267, %v7243_v12  }
0x1957   : > { %8268 = vset.pattern.permute.xlu1 %v11983_v11 }
0x1958   : > { %5955 = vperm.xlu1 %8268, %v7239_v24  }
0x195c   : > { %8270 = vset.pattern.permute.xlu1 %v11984_v59 }
0x195d   : > { %6068 = vperm.xlu1 %8270, %v7244_v26  }
0x1961   : > { %8271 = vset.pattern.permute.xlu1 %v11985_v60 }
0x1962   : > { %6027 = vperm.xlu1 %8271, %v7239_v24  }
0x1966   : > { %8272 = vset.pattern.permute.xlu1 %v11984_v59 }
0x196e   : > { %v5665_v47 = vpop.xlane.xlu1 %5664 }
0x196f   : > { %v5666_v52 = vrot.slane %v5665_v47, 4 }
0x1970   : > { %v5691_v49 = vpop.xlane.xlu0 %5690 }
0x1971   : > { %v5667_v36 = vadd.f32 %v5666_v52, %v5665_v47  ;;  %v5692_v34 = vrot.slane %v5691_v49, 4 }
0x1972   : > { %v5739_v53 = vpop.permute.xlu1 %5738 }
0x1973   : > { %v5693_v25 = vadd.f32 %v5692_v34, %v5691_v49  ;;  %v5668_v15 = vrot.slane %v5667_v36, 2 }
0x1975   : > { %v5694_v51 = vrot.slane %v5693_v25, 2  ;;  %v5669_v20 = vadd.f32 %v5668_v15, %v5667_v36 }
0x1976   : > { %v5744_v61 = vpop.permute.xlu1 %5743 }
0x1977   : > { %v5670_v58 = vrot.slane %v5669_v20, 1  ;;  %v5695_v48 = vadd.f32 %v5694_v51, %v5693_v25 }
0x1978   : > { %v5734_v54 = vpop.permute.xlu0 %5733 }
0x1979   : > { %v5671_v41 = vadd.f32 %v5670_v58, %v5669_v20  ;;  %v5696_v46 = vrot.slane %v5695_v48, 1 }
0x197a   : > { %v5796_v10 = vpop.permute.xlu1 %5795 }
0x197b   : > { %8085 = vpush %v5671_v41  ;;  %v5697_v16 = vadd.f32 %v5696_v46, %v5695_v48 }
0x197c   : > { %v5791_v8 = vpop.permute.xlu0 %5790 }
0x197d   : > { %8087 = vpush %v5697_v16 }
0x197e   : > { %v5801_v14 = vpop.permute.xlu1 %5800 }
0x1980   : > { %v5749_v38 = vpop.permute.xlu0 %5748 }
0x1982   : > { %v11363_v35 = vpop.permute.xlu1 %5805 }
0x1984   : > { %v5754_v59 = vpop.permute.xlu0 %5753 }
0x1986   : > { %v11365_v19 = vpop.permute.xlu1 %5810 }
0x1988   : > { %v5759_v24 = vpop.permute.xlu0 %5758 }
0x198a   : > { %v5816_v22 = vpop.permute.xlu1 %5815 }
0x198e   : > { %v11367_v50 = vpop.permute.xlu1 %5820 }
0x1992   : > { %v11369_v29 = vpop.permute.xlu1 %5880 }
0x1996   : > { %v5928_v18 = vpop.permute.xlu1 %5927 }
0x199b   : > { %v11371_v2 = vpop.permute.xlu1 %5890 }
0x19a0   : > { %v5936_v21 = vpop.permute.xlu1 %5935 }
0x19a5   : > { %v11373_v5 = vpop.permute.xlu1 %6003 }
0x19aa   : > { %v11375_v32 = vpop.permute.xlu1 %5895 }
0x19ac   : > { %s8086_s26 = spop %8085 }
0x19ad   : > { %v5673_v42 = vstv %s8086_s26 }
0x19ae   : > { %v5674_v23 = vmul.f32 0.00012207031, %v5673_v42  ;;  %s8088_s19 = spop %8087 }
0x19af   : > { %v5699_v56 = vstv %s8088_s19  ;;  %v11377_v37 = vpop.permute.xlu1 %6007  ;;  %s7292_s19 = sshll.u32 %s8565_s25, 11 }
0x19b0   : > { %v5700_v31 = vmul.f32 0.00012207031, %v5699_v56  ;;  %v5701_v9 = vmul.f32 %v5674_v23, %v5674_v23  ;;  %v5705_v63 = vsub.f32 %v11210_v28, %v5674_v23  ;;  %v5709_v13 = vsub.f32 %v11230_v45, %v5674_v23  ;;  %s11831_s30 = scalar_lea.hbm %s11897_s16, %s7292_s19 }
0x19b1   : > { %v5704_v43 = vsub.f32 %v11214_v30, %v5674_v23  ;;  %v5706_v0 = vsub.f32 %v11222_v62, %v5674_v23  ;;  %v5708_v47 = vsub.f32 %v11232_v40, %v5674_v23  ;;  %v5710_v62 = vsub.f32 %v11242_v39, %v5674_v23 }
0x19b2   : > { %v5702_v27 = vsub.f32 %v5700_v31, %v5701_v9  ;;  %v5707_v51 = vsub.f32 %v11220_v4, %v5674_v23  ;;  %v5711_v41 = vsub.f32 %v11240_v57, %v5674_v23 }
0x19b4   : > { %v5703_v17 = vmax.f32 %v5702_v27, 0.0  ;;  %v11379_v11 = vpop.permute.xlu1 %5900 }
0x19b6   : > { %v5712_v1 = vadd.f32 1e-08, %v5703_v17 }
0x19b8   : > { %8295 = vrsqrt.f32 %v5712_v1 }
0x19b9   : > { %v11381_v55 = vpop.permute.xlu1 %6011 }
0x19be   : > { %v11385_v44 = vpop.permute.xlu1 %6053 }
0x19c2   : > { %v8296_v60 = vpop.eup %8295 }
0x19c3   : > { %v5715_v3 = vmul.f32 %v8296_v60, %v5705_v63  ;;  %v5719_v33 = vmul.f32 %v8296_v60, %v5709_v13  ;;  %v5714_v6 = vmul.f32 %v8296_v60, %v5704_v43  ;;  %v5716_v7 = vmul.f32 %v8296_v60, %v5706_v0  ;;  %v5948_v34 = vpop.permute.xlu1 %5947 }
0x19c4   : > { %v5718_v36 = vmul.f32 %v8296_v60, %v5708_v47  ;;  %v5720_v58 = vmul.f32 %v8296_v60, %v5710_v62  ;;  %v5717_v48 = vmul.f32 %v8296_v60, %v5707_v51  ;;  %v5721_v4 = vmul.f32 %v8296_v60, %v5711_v41 }
0x19c5   : > { %v5772_v12 = vmul.f32 %v5739_v53, %v5715_v3  ;;  %v5776_v26 = vmul.f32 %v5759_v24, %v5719_v33  ;;  %v5771_v52 = vmul.f32 %v5734_v54, %v5714_v6  ;;  %v5773_v28 = vmul.f32 %v5744_v61, %v5716_v7  ;;  %v5764_v53 = vpop.permute.xlu0 %5763 }
0x19c6   : > { %v5775_v61 = vmul.f32 %v5754_v59, %v5718_v36  ;;  %v5777_v46 = vmul.f32 %v5764_v53, %v5720_v58  ;;  %v5774_v16 = vmul.f32 %v5749_v38, %v5717_v48 }
0x19c7   : > { %v11390_v49 = vadd.f32 %v5796_v10, %v5772_v12  ;;  %v5833_v45 = vadd.f32 %v5816_v22, %v5776_v26  ;;  %v5828_v25 = vadd.f32 %v5791_v8, %v5771_v52  ;;  %v5830_v30 = vadd.f32 %v5801_v14, %v5773_v28 }
0x19c8   : > { %v11407_v39 = vadd.f32 %v11365_v19, %v5775_v61  ;;  %v11414_v14 = vadd.f32 %v11367_v50, %v5777_v46  ;;  %v11417_v57 = vadd.f32 %v11363_v35, %v5774_v16  ;;  %v6059_v27 = vpop.permute.xlu1 %6058 }
0x19c9   : > { %v11392_v15 = vmul.f32 %v5948_v34, %v5833_v45  ;;  %5856 = vrot.lane.b32.xlu0 %v11390_v49, %s11986_s20  ;;  %5854 = vrot.lane.b32.xlu1 %v5828_v25, %s11986_s20  ;;  %v11399_v40 = vmul.f32 %v5928_v18, %v5828_v25  ;;  %v11401_v20 = vmul.f32 %v5936_v21, %v5830_v30  ;;  %v5769_v10 = vpop.permute.xlu0 %5768  ;;  %v7247_v21 = vld [vmem:[%s11890_s9 + $0x178] sm:$0xff] }
0x19ca   : > { %v5778_v22 = vmul.f32 %v5769_v10, %v5721_v4 }
0x19cd   : > { %5974 = vrot.lane.b32.xlu0 %v5828_v25, %s11987_s29  ;;  %5858 = vrot.lane.b32.xlu1 %v5830_v30, %s11986_s20  ;;  %v5826_v19 = vpop.permute.xlu0 %5825  ;;  %v11447_v1 = vpop.permute.xlu1 %5951 }
0x19ce   : > { %v11423_v18 = vadd.f32 %v5826_v19, %v5778_v22 }
0x19d1   : > { %5982 = vrot.lane.b32.xlu0 %v11407_v39, %s11987_s29  ;;  %5976 = vrot.lane.b32.xlu1 %v11390_v49, %s11987_s29  ;;  %v5932_v35 = vpop.permute.xlu0 %5931 }
0x19d2   : > { %v11451_v59 = vpop.permute.xlu1 %6063  ;;  %v5959_v47 = vmul.f32 %v5932_v35, %v11390_v49 }
0x19d5   : > { %5986 = vrot.lane.b32.xlu0 %v11414_v14, %s11987_s29  ;;  %5860 = vrot.lane.b32.xlu1 %v11417_v57, %s11986_s20  ;;  %v5940_v50 = vpop.permute.xlu0 %5939 }
0x19d7   : > { %v11455_v13 = vpop.permute.xlu1 %5955 }
0x19d9   : > { %5988 = vrot.lane.b32.xlu0 %v11423_v18, %s11987_s29  ;;  %5978 = vrot.lane.b32.xlu1 %v5830_v30, %s11987_s29  ;;  %v5944_v54 = vpop.permute.xlu0 %5943 }
0x19dc   : > { %v11459_v43 = vpop.permute.xlu1 %6068 }
0x19dd   : > { %5862 = vrot.lane.b32.xlu1 %v11407_v39, %s11986_s20  ;;  %v6000_v42 = vpop.permute.xlu0 %5999 }
0x19e1   : > { %5980 = vrot.lane.b32.xlu1 %v11417_v57, %s11987_s29  ;;  %v11441_v23 = vpop.permute.xlu0 %6015  ;;  %v11463_v3 = vpop.permute.xlu1 %6027 }
0x19e5   : > { %5864 = vrot.lane.b32.xlu1 %v5833_v45, %s11986_s20  ;;  %v11443_v56 = vpop.permute.xlu0 %6019 }
0x19e9   : > { %5866 = vrot.lane.b32.xlu1 %v11414_v14, %s11986_s20  ;;  %v11445_v31 = vpop.permute.xlu0 %6023 }
0x19ed   : > { %5984 = vrot.lane.b32.xlu1 %v5833_v45, %s11987_s29  ;;  %v5886_v9 = vpop.permute.xlu0 %5885 }
0x19f1   : > { %5868 = vrot.lane.b32.xlu1 %v11423_v18, %s11986_s20  ;;  %v6049_v8 = vpop.permute.xlu0 %6048 }
0x19f5   : > { %6083 = vperm.xlu1 %8272, %v7247_v21   ;;  %v5906_v17 = vpop.permute.xlu0 %5905 }
0x19f9   : > { %v11449_v38 = vpop.permute.xlu0 %5910 }
0x19fd   : > { %v11453_v63 = vpop.permute.xlu0 %5915 }
0x1a01   : > { %v11457_v60 = vpop.permute.xlu0 %6073 }
0x1a05   : > { %v11461_v0 = vpop.permute.xlu0 %6078 }
0x1a3b   : > { %v5857_v33 = vpop.permute.xlu0 %5856  ;;  %v5855_v24 = vpop.permute.xlu1 %5854 }
0x1a3c   : > { %v5871_v7 = vsel %vm553_vm12, %v5857_v33, 0.0  ;;  %v5870_v58 = vsel %vm553_vm12, %v5855_v24, 0.0 }
0x1a3d   : > { %v5919_v26 = vmul.f32 %v5886_v9, %v5871_v7  ;;  %v5918_v46 = vmul.f32 %v11369_v29, %v5870_v58  ;;  %v5961_v9 = vmul.f32 %v5940_v50, %v11417_v57 }
0x1a3f   : > { %v5859_v12 = vpop.permute.xlu1 %5858  ;;  %v5967_v36 = vadd.f32 %v5959_v47, %v5919_v26  ;;  %v5975_v61 = vpop.permute.xlu0 %5974  ;;  %v5966_v29 = vadd.f32 %v11399_v40, %v5918_v46  ;;  %v5962_v40 = vmul.f32 %v5944_v54, %v11407_v39 }
0x1a40   : > { %v5872_v49 = vsel %vm553_vm12, %v5859_v12, 0.0  ;;  %v5990_v48 = vsel %vm558_vm13, %v5975_v61, 0.0 }
0x1a41   : > { %v5920_v4 = vmul.f32 %v11371_v2, %v5872_v49  ;;  %v6030_v10 = vmul.f32 %v6000_v42, %v5990_v48 }
0x1a43   : > { %v5977_v52 = vpop.permute.xlu1 %5976  ;;  %v5968_v33 = vadd.f32 %v11401_v20, %v5920_v4  ;;  %v6038_v42 = vadd.f32 %v6030_v10, %v5966_v29  ;;  %v5983_v24 = vpop.permute.xlu0 %5982 }
0x1a44   : > { %v5991_v45 = vsel %vm558_vm13, %v5977_v52, 0.0  ;;  %v5994_v47 = vsel %vm558_vm13, %v5983_v24, 0.0  ;;  %v11502_v52 = vstv %s7248_s18 }
0x1a45   : > { %v6031_v34 = vmul.f32 %v11373_v5, %v5991_v45  ;;  %v6086_v20 = vadd.f32 %v6049_v8, %v6038_v42 }
0x1a47   : > { %v6039_v25 = vadd.f32 %v6031_v34, %v5967_v36  ;;  %v5861_v30 = vpop.permute.xlu1 %5860  ;;  %v5987_v39 = vpop.permute.xlu0 %5986  ;;  %vm6095_vm14 = vcmp.ge.f32.partialorder %v6086_v20, 0.0 }
0x1a48   : > { %v5873_v5 = vsel %vm553_vm12, %v5861_v30, 0.0 }
0x1a49   : > { %v6087_v62 = vadd.f32 %v11385_v44, %v6039_v25  ;;  %v5921_v22 = vmul.f32 %v11375_v32, %v5873_v5  ;;  %v6034_v25 = vmul.f32 %v11441_v23, %v5994_v47  ;;  %v6104_v23 = vmul.f32 %v11502_v52, %v6086_v20 }
0x1a4b   : > { %v5979_v53 = vpop.permute.xlu1 %5978  ;;  %v5969_v32 = vadd.f32 %v5961_v9, %v5921_v22  ;;  %vm6096_vm2 = vcmp.ge.f32.partialorder %v6087_v62, 0.0  ;;  %v11521_v48 = vsel %vm6095_vm14, %v6086_v20, %v6104_v23  ;;  %v6935_v23 = vld [vmem:[%s11892_s11 + $0x70] sm:$0xff] }
0x1a4c   : > { %v5992_v44 = vsel %vm558_vm13, %v5979_v53, 0.0 }
0x1a4d   : > { %v6032_v19 = vmul.f32 %v11377_v37, %v5992_v44  ;;  %v6138_v44 = vmul.f32 %v11521_v48, %v11521_v48 }
0x1a4f   : > { %v5863_v51 = vpop.permute.xlu1 %5862  ;;  %v6040_v12 = vadd.f32 %v6032_v19, %v5968_v33  ;;  %v5989_v19 = vpop.permute.xlu0 %5988 }
0x1a50   : > { %v5874_v21 = vsel %vm553_vm12, %v5863_v51, 0.0  ;;  %v5996_v51 = vsel %vm558_vm13, %v5987_v39, 0.0  ;;  %v5997_v33 = vsel %vm558_vm13, %v5989_v19, 0.0  ;;  %v6346_v19 = vld [vmem:[%s11896_s15 + $0x10] sm:$0xff] }
0x1a51   : > { %v5922_v37 = vmul.f32 %v11379_v11, %v5874_v21  ;;  %v6088_v45 = vadd.f32 %v6059_v27, %v6040_v12  ;;  %v6105_v11 = vmul.f32 %v11502_v52, %v6087_v62  ;;  %v5964_v27 = vmul.f32 %v11447_v1, %v11414_v14 }
0x1a52   : > { %v6036_v14 = vmul.f32 %v11445_v31, %v5996_v51  ;;  %v5965_v21 = vmul.f32 %v11455_v13, %v11423_v18  ;;  %v6037_v12 = vmul.f32 %v11463_v3, %v5997_v33  ;;  %v1514_v51 = vld [vmem:[%s11892_s11 + $0x38] sm:$0xff]  ;;  %v6354_v33 = vld [vmem:[%s11896_s15 + $0x50] sm:$0xff] }
0x1a53   : > { %v5981_v41 = vpop.permute.xlu1 %5980  ;;  %v5970_v36 = vadd.f32 %v5962_v40, %v5922_v37  ;;  %v6106_v61 = vmul.f32 %v11502_v52, %v6088_v45  ;;  %vm6097_vm15 = vcmp.ge.f32.partialorder %v6088_v45, 0.0 }
0x1a54   : > { %v5993_v16 = vsel %vm558_vm13, %v5981_v41, 0.0 }
0x1a55   : > { %v6033_v2 = vmul.f32 %v11381_v55, %v5993_v16  ;;  %v6042_v58 = vadd.f32 %v6034_v25, %v5970_v36  ;;  %v11526_v41 = vsel %vm6097_vm15, %v6088_v45, %v6106_v61  ;;  %v7097_v61 = vld [vmem:[%s11892_s11 + $0xe0] sm:$0xff] }
0x1a56   : > { %v6140_v16 = vmul.f32 %v11526_v41, %v11526_v41 }
0x1a57   : > { %v5865_v35 = vpop.permute.xlu1 %5864  ;;  %v6041_v57 = vadd.f32 %v6033_v2, %v5969_v32  ;;  %v6090_v46 = vadd.f32 %v11459_v43, %v6042_v58  ;;  %v6936_v58 = vld [vmem:[%s11892_s11 + $0x78] sm:$0xff] }
0x1a58   : > { %v5875_v7 = vsel %vm553_vm12, %v5865_v35, 0.0 }
0x1a59   : > { %v5923_v50 = vmul.f32 %v5906_v17, %v5875_v7  ;;  %v6089_v17 = vadd.f32 %v11451_v59, %v6041_v57  ;;  %v11518_v59 = vsel %vm6096_vm2, %v6087_v62, %v6105_v11  ;;  %v6108_v43 = vmul.f32 %v11502_v52, %v6090_v46 }
0x1a5a   : > { %v6139_v1 = vmul.f32 %v11518_v59, %v11518_v59  ;;  %v6120_v31 = vadd.f32 %v11518_v59, %v11521_v48 }
0x1a5b   : > { %v5867_v26 = vpop.permute.xlu1 %5866  ;;  %v5971_v8 = vadd.f32 %v11392_v15, %v5923_v50  ;;  %v6107_v15 = vmul.f32 %v11502_v52, %v6089_v17  ;;  %vm6098_vm3 = vcmp.ge.f32.partialorder %v6089_v17, 0.0 }
0x1a5c   : > { %v5876_v55 = vsel %vm553_vm12, %v5867_v26, 0.0  ;;  %v6146_v22 = vadd.f32 %v6139_v1, %v6138_v44  ;;  %v6121_v35 = vadd.f32 %v6120_v31, %v11526_v41  ;;  %v7180_v1 = vld [vmem:[%s11892_s11 + $0x128] sm:$0xff]  ;;  %v7182_v31 = vld [vmem:[%s11892_s11 + $0x138] sm:$0xff] }
0x1a5d   : > { %v5924_v30 = vmul.f32 %v11449_v38, %v5876_v55  ;;  %v11534_v4 = vsel %vm6098_vm3, %v6089_v17, %v6107_v15  ;;  %v1511_v17 = vld [vmem:[%s11892_s11 + $0x20] sm:$0xff]  ;;  %v7098_v15 = vld [vmem:[%s11892_s11 + $0xe8] sm:$0xff] }
0x1a5e   : > { %v6141_v29 = vmul.f32 %v11534_v4, %v11534_v4  ;;  %v6122_v2 = vadd.f32 %v6121_v35, %v11534_v4  ;;  %v6147_v42 = vadd.f32 %v6146_v22, %v6140_v16  ;;  %v6190_v44 = vld [vmem:[%s11894_s13 + $0x8] sm:$0xff]  ;;  %v6344_v16 = vld [vmem:[%s11896_s15] sm:$0xff]  ;;  %v6192_v22 = vld [vmem:[%s11894_s13 + $0x18] sm:$0xff] }
0x1a5f   : > { %v5985_v34 = vpop.permute.xlu1 %5984  ;;  %v5972_v38 = vadd.f32 %v5964_v27, %v5924_v30  ;;  %v6934_v30 = vld [vmem:[%s11892_s11 + $0x68] sm:$0xff]  ;;  %v6350_v35 = vld [vmem:[%s11896_s15 + $0x30] sm:$0xff] }
0x1a60   : > { %v5995_v54 = vsel %vm558_vm13, %v5985_v34, 0.0  ;;  %v6148_v32 = vadd.f32 %v6147_v42, %v6141_v29  ;;  %v7016_v27 = vld [vmem:[%s11892_s11 + $0xa8] sm:$0xff]  ;;  %v6356_v42 = vld [vmem:[%s11896_s15 + $0x60] sm:$0xff] }
0x1a61   : > { %v6035_v53 = vmul.f32 %v11443_v56, %v5995_v54  ;;  %v6044_v10 = vadd.f32 %v6036_v14, %v5972_v38  ;;  %v6933_v54 = vld [vmem:[%s11892_s11 + $0x60] sm:$0xff]  ;;  %v7099_v14 = vld [vmem:[%s11892_s11 + $0xf0] sm:$0xff]  ;;  %v6349_v29 = vld [vmem:[%s11896_s15 + $0x28] sm:$0xff] }
0x1a62   : > { %v7179_v38 = vld [vmem:[%s11892_s11 + $0x120] sm:$0xff] }
0x1a63   : > { %v6043_v49 = vadd.f32 %v6035_v53, %v5971_v8  ;;  %v5869_v56 = vpop.permute.xlu1 %5868  ;;  %v6092_v9 = vadd.f32 %v11461_v0, %v6044_v10  ;;  %v7015_v8 = vld [vmem:[%s11892_s11 + $0xa0] sm:$0xff]  ;;  %v1513_v53 = vld [vmem:[%s11892_s11 + $0x30] sm:$0xff] }
0x1a64   : > { %v5877_v5 = vsel %vm553_vm12, %v5869_v56, 0.0  ;;  %vm6099_vm12 = vcmp.ge.f32.partialorder %v6090_v46, 0.0  ;;  %v7018_v56 = vld [vmem:[%s11892_s11 + $0xb8] sm:$0xff]  ;;  %v6191_v10 = vld [vmem:[%s11894_s13 + $0x10] sm:$0xff] }
0x1a65   : > { %v6091_v62 = vadd.f32 %v11457_v60, %v6043_v49  ;;  %v5925_v6 = vmul.f32 %v11453_v63, %v5877_v5  ;;  %v11552_v24 = vsel %vm6099_vm12, %v6090_v46, %v6108_v43  ;;  %v6110_v37 = vmul.f32 %v11502_v52, %v6092_v9  ;;  %v7017_v49 = vld [vmem:[%s11892_s11 + $0xb0] sm:$0xff]  ;;  %v6189_v46 = vld [vmem:[%s11894_s13] sm:$0xff]  ;;  %v6345_v43 = vld [vmem:[%s11896_s15 + $0x8] sm:$0xff] }
0x1a66   : > { %vm6101_vm5 = vcmp.ge.f32.partialorder %v6092_v9, 0.0  ;;  %v6123_v18 = vadd.f32 %v6122_v2, %v11552_v24  ;;  %v6142_v13 = vmul.f32 %v11552_v24, %v11552_v24  ;;  %v7181_v5 = vld [vmem:[%s11892_s11 + $0x130] sm:$0xff]  ;;  %v6353_v2 = vld [vmem:[%s11896_s15 + $0x48] sm:$0xff] }
0x1a67   : > { %v6109_v60 = vmul.f32 %v11502_v52, %v6091_v62  ;;  %vm6100_vm4 = vcmp.ge.f32.partialorder %v6091_v62, 0.0  ;;  %v5973_v7 = vadd.f32 %v5965_v21, %v5925_v6  ;;  %v11564_v50 = vsel %vm6101_vm5, %v6092_v9, %v6110_v37  ;;  %v6347_v6 = vld [vmem:[%s11896_s15 + $0x18] sm:$0xff]  ;;  %v6352_v21 = vld [vmem:[%s11896_s15 + $0x40] sm:$0xff] }
0x1a68   : > { %v6149_v47 = vadd.f32 %v6148_v32, %v6142_v13  ;;  %v6144_v45 = vmul.f32 %v11564_v50, %v11564_v50  ;;  %v6351_v9 = vld [vmem:[%s11896_s15 + $0x38] sm:$0xff]  ;;  %v6358_v32 = vld [vmem:[%s11896_s15 + $0x70] sm:$0xff]  ;;  %v7172_v13 = vld [vmem:[%s11891_s10 + $0x128] sm:$0xff] }
0x1a69   : > { %v11554_v63 = vsel %vm6100_vm4, %v6091_v62, %v6109_v60  ;;  %v6045_v28 = vadd.f32 %v6037_v12, %v5973_v7  ;;  %v7100_v62 = vld [vmem:[%s11892_s11 + $0xf8] sm:$0xff]  ;;  %v6348_v60 = vld [vmem:[%s11896_s15 + $0x20] sm:$0xff]  ;;  %v6357_v12 = vld [vmem:[%s11896_s15 + $0x68] sm:$0xff] }
0x1a6a   : > { %v6143_v0 = vmul.f32 %v11554_v63, %v11554_v63  ;;  %v6124_v40 = vadd.f32 %v6123_v18, %v11554_v63  ;;  %v6355_v7 = vld [vmem:[%s11896_s15 + $0x58] sm:$0xff]  ;;  %v7171_v18 = vld [vmem:[%s11891_s10 + $0x120] sm:$0xff] }
0x1a6b   : > { %v6359_v37 = vld [vmem:[%s11896_s15 + $0x78] sm:$0xff]  ;;  %7745 = vmatprep.mubr.msk.f32.mxu1 %vm661_vm0, %v7171_v18 }
0x1a6c   : > { %v6150_v3 = vadd.f32 %v6149_v47, %v6143_v0  ;;  %v6125_v55 = vadd.f32 %v6124_v40, %v11564_v50  ;;  %7746 = vmatmul.mubr.msk.f32.gmra.mrb[12].mxu1 %vm661_vm0, %v7172_v13  ;;  %v7173_v0 = vld [vmem:[%s11891_s10 + $0x130] sm:$0xff] }
0x1a6d   : > { %7748 = vmatprep.mubr.msk.f32.mxu1 %vm661_vm0, %v7173_v0 }
0x1a6e   : > { %v6151_v11 = vadd.f32 %v6150_v3, %v6144_v45 }
0x1a74   : > { %v6084_v26 = vpop.permute.xlu1 %6083 }
0x1a75   : > { %v6093_v57 = vadd.f32 %v6084_v26, %v6045_v28  ;;  %v7174_v28 = vld [vmem:[%s11891_s10 + $0x138] sm:$0xff]  ;;  %v6185_v26 = vld [vmem:[%s11893_s12] sm:$0xff] }
0x1a76   : > { %7749 = vmatmul.mubr.msk.f32.gmra.mrb[14].mxu1 %vm661_vm0, %v7174_v28 }
0x1a77   : > { %vm6102_vm13 = vcmp.ge.f32.partialorder %v6093_v57, 0.0  ;;  %v6111_v20 = vmul.f32 %v11502_v52, %v6093_v57  ;;  %v1512_v52 = vld [vmem:[%s11892_s11 + $0x28] sm:$0xff]  ;;  %7787 = vmatprep.mubr.msk.f32.mxu1 %vm661_vm0, %v6185_v26 }
0x1a79   : > { %v11570_v36 = vsel %vm6102_vm13, %v6093_v57, %v6111_v20 }
0x1a7a   : > { %v6126_v34 = vadd.f32 %v6125_v55, %v11570_v36  ;;  %v6145_v25 = vmul.f32 %v11570_v36, %v11570_v36 }
0x1a7c   : > { %6127 = vadd.xlane.f32.xlu1 %v6126_v34  ;;  %v6152_v39 = vadd.f32 %v6151_v11, %v6145_v25 }
0x1a7e   : > { %6153 = vadd.xlane.f32.xlu0 %v6152_v39 }
0x1a8d   : > { %1542 = vperm.xlu1 %8272, %v1512_v52  }
0x1a91   : > { %2477 = vperm.xlu1 %8272, %v6933_v54  }
0x1a94   : > { %1537 = vperm.xlu0 %8269, %v1511_v17  }
0x1a95   : > { %3417 = vperm.xlu1 %8272, %v7015_v8  }
0x1a98   : > { %2482 = vperm.xlu0 %8269, %v6934_v30  }
0x1a99   : > { %1547 = vperm.xlu1 %8272, %v1513_v53  }
0x1a9c   : > { %3422 = vperm.xlu0 %8269, %v7016_v27  }
0x1a9d   : > { %2487 = vperm.xlu1 %8272, %v6935_v23  }
0x1aa0   : > { %1552 = vperm.xlu0 %8269, %v1514_v51  }
0x1aa1   : > { %4353 = vperm.xlu1 %8272, %v7097_v61  }
0x1aa4   : > { %2492 = vperm.xlu0 %8269, %v6936_v58  }
0x1aa5   : > { %3427 = vperm.xlu1 %8272, %v7017_v49  }
0x1aa8   : > { %4358 = vperm.xlu0 %8269, %v7098_v15  }
0x1aa9   : > { %5289 = vperm.xlu1 %8272, %v7179_v38  }
0x1aac   : > { %3432 = vperm.xlu0 %8269, %v7018_v56  }
0x1aad   : > { %4363 = vperm.xlu1 %8272, %v7099_v14  }
0x1ab0   : > { %5294 = vperm.xlu0 %8269, %v7180_v1  }
0x1ab1   : > { %6195 = vperm.xlu1 %8272, %v6189_v46  }
0x1ab4   : > { %4368 = vperm.xlu0 %8269, %v7100_v62  }
0x1ab5   : > { %5299 = vperm.xlu1 %8272, %v7181_v5  }
0x1ab8   : > { %6200 = vperm.xlu0 %8269, %v6190_v44  }
0x1ab9   : > { %6205 = vperm.xlu1 %8272, %v6191_v10  }
0x1abc   : > { %5304 = vperm.xlu0 %8269, %v7182_v31  }
0x1abd   : > { %6362 = vperm.xlu1 %8272, %v6344_v16  }
0x1ac0   : > { %6210 = vperm.xlu0 %8269, %v6192_v22  }
0x1ac1   : > { %6372 = vperm.xlu1 %8272, %v6346_v19  }
0x1ac4   : > { %6367 = vperm.xlu0 %8269, %v6345_v43  }
0x1ac5   : > { %6382 = vperm.xlu1 %8272, %v6348_v60  }
0x1ac8   : > { %6377 = vperm.xlu0 %8269, %v6347_v6   ;;  %v6338_v6 = vld [vmem:[%s11895_s14 + $0x50] sm:$0xff] }
0x1ac9   : > { %6392 = vperm.xlu1 %8272, %v6350_v35  }
0x1acc   : > { %6387 = vperm.xlu0 %8269, %v6349_v29  }
0x1acd   : > { %6402 = vperm.xlu1 %8272, %v6352_v21  }
0x1ad0   : > { %6397 = vperm.xlu0 %8269, %v6351_v9  }
0x1ad1   : > { %6412 = vperm.xlu1 %8272, %v6354_v33  }
0x1ad4   : > { %6407 = vperm.xlu0 %8269, %v6353_v2  }
0x1ad5   : > { %6422 = vperm.xlu1 %8272, %v6356_v42  }
0x1ad8   : > { %6417 = vperm.xlu0 %8269, %v6355_v7  }
0x1ad9   : > { %6432 = vperm.xlu1 %8272, %v6358_v32  }
0x1adc   : > { %6427 = vperm.xlu0 %8269, %v6357_v12  }
0x1ae0   : > { %6437 = vperm.xlu0 %8269, %v6359_v37  }
0x1b09   : > { %v6128_v40 = vpop.xlane.xlu1 %6127 }
0x1b0a   : > { %v6129_v47 = vrot.slane %v6128_v40, 4 }
0x1b0b   : > { %v6154_v57 = vpop.xlane.xlu0 %6153 }
0x1b0c   : > { %v6130_v3 = vadd.f32 %v6129_v47, %v6128_v40  ;;  %v6155_v20 = vrot.slane %v6154_v57, 4 }
0x1b0d   : > { %v1543_v29 = vpop.permute.xlu1 %1542 }
0x1b0e   : > { %v6131_v55 = vrot.slane %v6130_v3, 2  ;;  %v6156_v45 = vadd.f32 %v6155_v20, %v6154_v57 }
0x1b10   : > { %v6157_v34 = vrot.slane %v6156_v45, 2  ;;  %v6132_v25 = vadd.f32 %v6131_v55, %v6130_v3 }
0x1b11   : > { %v2478_v9 = vpop.permute.xlu1 %2477 }
0x1b12   : > { %v6133_v11 = vrot.slane %v6132_v25, 1  ;;  %v6158_v39 = vadd.f32 %v6157_v34, %v6156_v45 }
0x1b13   : > { %v1538_v35 = vpop.permute.xlu0 %1537 }
0x1b14   : > { %v6134_v52 = vadd.f32 %v6133_v11, %v6132_v25  ;;  %v6159_v54 = vrot.slane %v6158_v39, 1  ;;  %v8003_v20 = vadd.f32 %v2478_v9, %v1538_v35  ;;  %v6339_v35 = vld [vmem:[%s11895_s14 + $0x58] sm:$0xff] }
0x1b15   : > { %v3418_v2 = vpop.permute.xlu1 %3417  ;;  %v6331_v9 = vld [vmem:[%s11895_s14 + $0x18] sm:$0xff] }
0x1b16   : > { %8089 = vpush %v6134_v52  ;;  %v6160_v17 = vadd.f32 %v6159_v54, %v6158_v39  ;;  %v8004_v34 = vadd.f32 %v8003_v20, %v3418_v2  ;;  %v6332_v2 = vld [vmem:[%s11895_s14 + $0x20] sm:$0xff] }
0x1b17   : > { %v2483_v21 = vpop.permute.xlu0 %2482 }
0x1b18   : > { %8091 = vpush %v6160_v17  ;;  %v7997_v55 = vadd.f32 %v2483_v21, %v1543_v29  ;;  %v6330_v29 = vld [vmem:[%s11895_s14 + $0x10] sm:$0xff]  ;;  %v6340_v21 = vld [vmem:[%s11895_s14 + $0x60] sm:$0xff] }
0x1b19   : > { %v1548_v7 = vpop.permute.xlu1 %1547 }
0x1b1b   : > { %v3423_v33 = vpop.permute.xlu0 %3422 }
0x1b1c   : > { %v7998_v45 = vadd.f32 %v7997_v55, %v3423_v33  ;;  %v6341_v33 = vld [vmem:[%s11895_s14 + $0x68] sm:$0xff] }
0x1b1d   : > { %v2488_v12 = vpop.permute.xlu1 %2487 }
0x1b1e   : > { %v8015_v54 = vadd.f32 %v2488_v12, %v1548_v7  ;;  %v6333_v7 = vld [vmem:[%s11895_s14 + $0x28] sm:$0xff]  ;;  %v6334_v12 = vld [vmem:[%s11895_s14 + $0x30] sm:$0xff] }
0x1b1f   : > { %v1553_v42 = vpop.permute.xlu0 %1552 }
0x1b21   : > { %v4354_v18 = vpop.permute.xlu1 %4353 }
0x1b22   : > { %v8005_v17 = vadd.f32 %v8004_v34, %v4354_v18  ;;  %v6336_v18 = vld [vmem:[%s11895_s14 + $0x40] sm:$0xff] }
0x1b23   : > { %v2493_v32 = vpop.permute.xlu0 %2492 }
0x1b24   : > { %v8009_v11 = vadd.f32 %v2493_v32, %v1553_v42  ;;  %v6342_v42 = vld [vmem:[%s11895_s14 + $0x70] sm:$0xff]  ;;  %v6343_v32 = vld [vmem:[%s11895_s14 + $0x78] sm:$0xff] }
0x1b25   : > { %v3428_v0 = vpop.permute.xlu1 %3427 }
0x1b27   : > { %v4359_v37 = vpop.permute.xlu0 %4358 }
0x1b28   : > { %v7999_v39 = vadd.f32 %v7998_v45, %v4359_v37  ;;  %v6335_v37 = vld [vmem:[%s11895_s14 + $0x38] sm:$0xff] }
0x1b29   : > { %v5290_v26 = vpop.permute.xlu1 %5289 }
0x1b2b   : > { %v3433_v13 = vpop.permute.xlu0 %3432 }
0x1b2d   : > { %v4364_v47 = vpop.permute.xlu1 %4363 }
0x1b2f   : > { %v5295_v28 = vpop.permute.xlu0 %5294 }
0x1b31   : > { %v6196_v3 = vpop.permute.xlu1 %6195 }
0x1b33   : > { %v4369_v40 = vpop.permute.xlu0 %4368 }
0x1b35   : > { %v5300_v52 = vpop.permute.xlu1 %5299 }
0x1b37   : > { %v6201_v57 = vpop.permute.xlu0 %6200 }
0x1b3b   : > { %v5305_v25 = vpop.permute.xlu0 %5304 }
0x1b47   : > { %s8090_s23 = spop %8089 }
0x1b48   : > { %v6136_v8 = vstv %s8090_s23  ;;  %s8456_s23 = smov [#allocation5]  }
0x1b49   : > { %v6137_v30 = vmul.f32 0.00012207031, %v6136_v8  ;;  %s8092_s27 = spop %8091  ;;  %v8010_v8 = vadd.f32 %v8009_v11, %v3433_v13  ;;  %v6337_v13 = vld [vmem:[%s11895_s14 + $0x48] sm:$0xff] }
0x1b4a   : > { %v6162_v53 = vstv %s8092_s27  ;;  %s526_s27 = sand.u32 1, %s8436_s22  }
0x1b4b   : > { %v6163_v27 = vmul.f32 0.00012207031, %v6162_v53  ;;  %v6164_v23 = vmul.f32 %v6137_v30, %v6137_v30  ;;  %v6167_v49 = vsub.f32 %v11521_v48, %v6137_v30  ;;  %v6168_v15 = vsub.f32 %v11518_v59, %v6137_v30  ;;  %s11840_s18 = scalar_lea.sflag [#allocation3], %s526_s27 }
0x1b4c   : > { %v6169_v38 = vsub.f32 %v11526_v41, %v6137_v30  ;;  %v6170_v56 = vsub.f32 %v11534_v4, %v6137_v30  ;;  %v6171_v10 = vsub.f32 %v11552_v24, %v6137_v30  ;;  %v6172_v31 = vsub.f32 %v11554_v63, %v6137_v30  ;;  %v6186_v24 = vld [vmem:[%s11893_s12 + $0x8] sm:$0xff]  ;;  %v6187_v63 = vld [vmem:[%s11893_s12 + $0x10] sm:$0xff] }
0x1b4d   : > { %v6165_v51 = vsub.f32 %v6163_v27, %v6164_v23  ;;  %v6173_v59 = vsub.f32 %v11564_v50, %v6137_v30  ;;  %v6174_v41 = vsub.f32 %v11570_v36, %v6137_v30  ;;  %v6188_v50 = vld [vmem:[%s11893_s12 + $0x18] sm:$0xff]  ;;  %v6328_v36 = vld [vmem:[%s11895_s14] sm:$0xff]  ;;  %v8000_v30 = vadd.f32 %v7999_v39, %v5295_v28 }
0x1b4e   : > { %7801 = vmatprep.mubr.msk.f32.mxu0 %vm815_vm1, %v6328_v36  ;;  %v8016_v53 = vadd.f32 %v8015_v54, %v3428_v0  ;;  %v8006_v27 = vadd.f32 %v8005_v17, %v5290_v26  ;;  %v8011_v23 = vadd.f32 %v8010_v8, %v4369_v40 }
0x1b4f   : > { %v6166_v61 = vmax.f32 %v6165_v51, 0.0  ;;  %v8001_v51 = vadd.f32 %v8000_v30, %v6201_v57 }
0x1b51   : > { %v6175_v58 = vadd.f32 1e-08, %v6166_v61  ;;  %v8017_v61 = vadd.f32 %v8016_v53, %v4364_v47 }
0x1b53   : > { %8297 = vrsqrt.f32 %v6175_v58  ;;  %v8007_v58 = vadd.f32 %v8006_v27, %v6196_v3 }
0x1b5d   : > { %v8298_v14 = vpop.eup %8297 }
0x1b5e   : > { %v6177_v1 = vmul.f32 %v8298_v14, %v6167_v49  ;;  %v6178_v46 = vmul.f32 %v8298_v14, %v6168_v15  ;;  %v6179_v62 = vmul.f32 %v8298_v14, %v6169_v38  ;;  %v6180_v5 = vmul.f32 %v8298_v14, %v6170_v56  ;;  %v6211_v49 = vpop.permute.xlu0 %6210  ;;  %v6206_v56 = vpop.permute.xlu1 %6205 }
0x1b5f   : > { %v6181_v22 = vmul.f32 %v8298_v14, %v6171_v10  ;;  %v6182_v48 = vmul.f32 %v8298_v14, %v6172_v31  ;;  %v6183_v19 = vmul.f32 %v8298_v14, %v6173_v59  ;;  %v6184_v43 = vmul.f32 %v8298_v14, %v6174_v41 }
0x1b60   : > { %v7969_v44 = vpack.c.bf16 %v6178_v46, %v6177_v1  ;;  %v7973_v16 = vpack.c.bf16 %v6180_v5, %v6179_v62  ;;  %v6319_v38 = vstv %s7253_s28  ;;  %v8012_v14 = vadd.f32 %v8011_v23, %v5305_v25  ;;  %s6839_s28 = sshll.u32 %s526_s27, 7 }
0x1b61   : > { %v7977_v4 = vpack.c.bf16 %v6182_v48, %v6181_v22  ;;  %v7981_v60 = vpack.c.bf16 %v6184_v43, %v6183_v19  ;;  %v8018_v62 = vadd.f32 %v8017_v61, %v5300_v52  ;;  %s11811_s26 = scalar_lea.vmem [#allocation5], %s6839_s28  ;;  %s8382_s28 = sshll.u32 %s8456_s23, 4  ;;  %s8383_s28 = int_to_ptr.vmem [resolvable:$false] %s8382_s28 }
0x1b62   : > { %7970 = vmatprep.subr.bf16.mxu1 %v7969_v44  ;;  %v6363_v0 = vpop.permute.xlu1 %6362  ;;  %v6368_v28 = vpop.permute.xlu0 %6367  ;;  %s6759_s20 = sshll.u32 %s11811_s26, 4  ;;  %s8384_s19 = scalar_lea.vmem %s8383_s28, 4096  ;;  %s11833_s20 = int_to_ptr.vmem [resolvable:$true] %s6759_s20 }
0x1b63   : > { %7972 = vmatpush3.bf16.msra.mxu1 %v7969_v44  ;;  %v8013_v44 = vadd.f32 %v8012_v14, %v6211_v49  ;;  %v8019_v31 = vadd.f32 %v8018_v62, %v6206_v56  ;;  %s8378_s25 = scalar_lea.vmem %s11833_s20, 2048  ;;  %p8385_p13 = scmp.lt.s32.totalorder %s11833_s20, %s8383_s28 }
0x1b64   : > { %7974 = vmatprep.subr.bf16.mxu1 %v7973_v16  ;;  %p8379_p9 = scmp.ne.s32.totalorder %s11833_s20, %s8378_s25  ;;  %p8386_p0 = scmp.lt.s32.totalorder %s8384_s19, %s8378_s25 }
0x1b66   : > { %v6373_v26 = vpop.permute.xlu1 %6372  ;;  %v6378_v40 = vpop.permute.xlu0 %6377  ;;  %p8380_p10 = pnand %p8379_p9, %p8582_p5  ;;  %p8387_p1 = por %p8386_p0, %p8385_p13 }
0x1b67   : > { %7976 = vmatpush3.bf16.msra.mxu1 %v7973_v16 }
0x1b68   : > { %7978 = vmatprep.subr.bf16.mxu1 %v7977_v4  ;;  %p8381_p12 = pneg %p8380_p10 }
0x1b6a   : > { %v6383_v47 = vpop.permute.xlu1 %6382  ;;  %v6388_v57 = vpop.permute.xlu0 %6387  ;;  %p8388_p2 = pnand %p8387_p1, %p8381_p12 }
0x1b6b   : > { %7980 = vmatpush3.bf16.msra.mxu1 %v7977_v4 }
0x1b6c   : > { %7982 = vmatprep.subr.bf16.mxu1 %v7981_v60 }
0x1b6e   : > { %v11799_v3 = vpop.permute.xlu1 %6392  ;;  %v6398_v20 = vpop.permute.xlu0 %6397 }
0x1b6f   : > { %7984 = vmatpush3.bf16.msra.mxu1 %v7981_v60 }
0x1b72   : > { %7788 = vmatmul.mubr.msk.f32.vlgmr.msra.gmra.mrb[12].mxu1 %vm661_vm0, %v6186_v24  ;;  %v11801_v55 = vpop.permute.xlu1 %6402  ;;  %v11803_v45 = vpop.permute.xlu0 %6407 }
0x1b73   : > { %7790 = vmatprep.mubr.msk.f32.mxu1 %vm661_vm0, %v6187_v63 }
0x1b76   : > { %7791 = vmatmul.mubr.msk.f32.gmra.mrb[14].mxu1 %vm661_vm0, %v6188_v50  ;;  %v6413_v34 = vpop.permute.xlu1 %6412  ;;  %v6418_v25 = vpop.permute.xlu0 %6417 }
0x1b77   : > { %7816 = vmatprep.mubr.msk.f32.mxu1 %vm815_vm1, %v6338_v6  ;;  %v6329_v6 = vld [vmem:[%s11895_s14 + $0x8] sm:$0xff] }
0x1b7a   : > { %v6423_v11 = vpop.permute.xlu1 %6422  ;;  %v6428_v39 = vpop.permute.xlu0 %6427 }
0x1c45   : > { %v7789_v15 = vpop.f32.mrb[12].mxu1 }
0x1c46   : > { %v8002_v1 = vadd.f32 %v8001_v51, %v7789_v15  ;;  %v6291_v46 = vpop.f32.mrb[13].mxu1 }
0x1c47   : > { %v8008_v5 = vadd.f32 %v8007_v58, %v6291_v46 }
0x1c48   : > { %vm6316_vm0 = vcmp.ge.f32.partialorder %v8002_v1, 0.0  ;;  %v6321_v10 = vmul.f32 %v8002_v1, %v6319_v38 }
0x1c49   : > { %vm6315_vm10 = vcmp.ge.f32.partialorder %v8008_v5, 0.0  ;;  %v6320_v16 = vmul.f32 %v8008_v5, %v6319_v38  ;;  %v7792_v22 = vpop.f32.mrb[14].mxu1 }
0x1c4a   : > { %v6325_v48 = vsel %vm6316_vm0, %v8002_v1, %v6321_v10  ;;  %v8014_v59 = vadd.f32 %v8013_v44, %v7792_v22  ;;  %v6301_v41 = vpop.f32.mrb[15].mxu1  ;;  %v6433_v44 = vpop.permute.xlu1 %6432 }
0x1c4b   : > { %v6324_v4 = vsel %vm6315_vm10, %v8008_v5, %v6320_v16  ;;  %v8020_v19 = vadd.f32 %v8019_v31, %v6301_v41  ;;  %v6438_v10 = vpop.permute.xlu0 %6437 }
0x1c4c   : > { %v7985_v43 = vpack.c.bf16 %v6325_v48, %v6324_v4  ;;  %vm6318_vm6 = vcmp.ge.f32.partialorder %v8014_v59, 0.0  ;;  %v6323_v60 = vmul.f32 %v8014_v59, %v6319_v38 }
0x1c4d   : > { %vm6317_vm7 = vcmp.ge.f32.partialorder %v8020_v19, 0.0  ;;  %v6322_v24 = vmul.f32 %v8020_v19, %v6319_v38 }
0x1c4e   : > { %v6327_v63 = vsel %vm6318_vm6, %v8014_v59, %v6323_v60  ;;  %7986 = vmatprep.subr.bf16.mxu0 %v7985_v43  ;;  %7993 = vmatprep.subr.bf16.mxu1 %v7985_v43 }
0x1c4f   : > { %v6326_v50 = vsel %vm6317_vm7, %v8020_v19, %v6322_v24  ;;  %7988 = vmatpush3.bf16.msra.mxu0 %v7985_v43  ;;  %7995 = vmatpush3.bf16.msra.mxu1 %v7985_v43 }
0x1c50   : > { %v7989_v36 = vpack.c.bf16 %v6327_v63, %v6326_v50 }
0x1c52   : > { %7990 = vmatprep.subr.bf16.mxu0 %v7989_v36  ;;  %7994 = vmatprep.subr.bf16.mxu1 %v7989_v36 }
0x1c53   : > { %7992 = vmatpush3.bf16.msra.mxu0 %v7989_v36  ;;  %7996 = vmatpush3.bf16.msra.mxu1 %v7989_v36 }
0x1c56   : > { %7802 = vmatmul.mubr.msk.f32.vlgmr.msra.gmra.mrb[44].mxu0 %vm815_vm1, %v6329_v6  ;;  %7817 = vmatmul.mubr.msk.f32.vlgmr.msra.gmra.mrb[32].mxu1 %vm815_vm1, %v6339_v35 }
0x1c57   : > { %7804 = vmatprep.mubr.msk.f32.mxu0 %vm815_vm1, %v6330_v29  ;;  %7819 = vmatprep.mubr.msk.f32.mxu1 %vm815_vm1, %v6340_v21 }
0x1c5a   : > { %7805 = vmatmul.mubr.msk.f32.gmra.mrb[46].mxu0 %vm815_vm1, %v6331_v9  ;;  %7820 = vmatmul.mubr.msk.f32.gmra.mrb[34].mxu1 %vm815_vm1, %v6341_v33 }
0x1c5b   : > { %7807 = vmatprep.mubr.msk.f32.mxu0 %vm815_vm1, %v6332_v2  ;;  %7822 = vmatprep.mubr.msk.f32.mxu1 %vm815_vm1, %v6342_v42 }
0x1c5e   : > { %7808 = vmatmul.mubr.msk.f32.gmra.mrb[48].mxu0 %vm815_vm1, %v6333_v7  ;;  %7823 = vmatmul.mubr.msk.f32.gmra.mrb[36].mxu1 %vm815_vm1, %v6343_v32 }
0x1c5f   : > { %7810 = vmatprep.mubr.msk.f32.mxu0 %vm815_vm1, %v6334_v12 }
0x1c62   : > { %7811 = vmatmul.mubr.msk.f32.gmra.mrb[50].mxu0 %vm815_vm1, %v6335_v37 }
0x1c63   : > { %7813 = vmatprep.mubr.msk.f32.mxu0 %vm815_vm1, %v6336_v18 }
0x1c66   : > { %7814 = vmatmul.mubr.msk.f32.gmra.mrb[52].mxu0 %vm815_vm1, %v6337_v13 }
0x1d29   : > { %v7803_v52 = vpop.f32.mrb[44].mxu0  ;;  %v7818_v54 = vpop.f32.mrb[32].mxu1 }
0x1d2a   : > { %v6560_v17 = vadd.f32 %v7803_v52, %v6368_v28  ;;  %v6610_v8 = vadd.f32 %v7818_v54, %v6418_v25  ;;  %v6554_v30 = vpop.f32.mrb[45].mxu0  ;;  %v6604_v53 = vpop.f32.mrb[33].mxu1 }
0x1d2b   : > { %v6555_v27 = vadd.f32 %v6554_v30, %v6363_v0  ;;  %v6605_v23 = vadd.f32 %v6604_v53, %v6413_v34 }
0x1d2c   : > { %v7271_v51 = vmul.f32 -1.442695, %v6560_v17  ;;  %v7281_v61 = vmul.f32 -1.442695, %v6610_v8 }
0x1d2d   : > { %v7270_v58 = vmul.f32 -1.442695, %v6555_v27  ;;  %v7280_v49 = vmul.f32 -1.442695, %v6605_v23  ;;  %v7806_v15 = vpop.f32.mrb[46].mxu0  ;;  %v7821_v38 = vpop.f32.mrb[34].mxu1 }
0x1d2e   : > { %8299 = vpow2.f32 %v7271_v51  ;;  %v6570_v56 = vadd.f32 %v7806_v15, %v6378_v40  ;;  %v6620_v14 = vadd.f32 %v7821_v38, %v6428_v39  ;;  %v6564_v1 = vpop.f32.mrb[47].mxu0  ;;  %v6614_v46 = vpop.f32.mrb[35].mxu1 }
0x1d2f   : > { %8301 = vpow2.f32 %v7281_v61  ;;  %v6565_v62 = vadd.f32 %v6564_v1, %v6373_v26  ;;  %v6615_v5 = vadd.f32 %v6614_v46, %v6423_v11 }
0x1d30   : > { %8303 = vpow2.f32 %v7270_v58  ;;  %v7273_v31 = vmul.f32 -1.442695, %v6570_v56  ;;  %v7283_v16 = vmul.f32 -1.442695, %v6620_v14 }
0x1d31   : > { %8305 = vpow2.f32 %v7280_v49  ;;  %v7272_v22 = vmul.f32 -1.442695, %v6565_v62  ;;  %v7282_v48 = vmul.f32 -1.442695, %v6615_v5  ;;  %v7809_v59 = vpop.f32.mrb[48].mxu0  ;;  %v7824_v41 = vpop.f32.mrb[36].mxu1 }
0x1d32   : > { %8307 = vpow2.f32 %v7273_v31  ;;  %v6580_v4 = vadd.f32 %v7809_v59, %v6388_v57  ;;  %v6630_v19 = vadd.f32 %v7824_v41, %v6438_v10  ;;  %v6574_v43 = vpop.f32.mrb[49].mxu0  ;;  %v6624_v60 = vpop.f32.mrb[37].mxu1 }
0x1d33   : > { %8309 = vpow2.f32 %v7283_v16  ;;  %v6575_v24 = vadd.f32 %v6574_v43, %v6383_v47  ;;  %v6625_v63 = vadd.f32 %v6624_v60, %v6433_v44 }
0x1d34   : > { %8311 = vpow2.f32 %v7272_v22  ;;  %v7275_v50 = vmul.f32 -1.442695, %v6580_v4  ;;  %v7285_v36 = vmul.f32 -1.442695, %v6630_v19 }
0x1d35   : > { %8313 = vpow2.f32 %v7282_v48  ;;  %v7274_v6 = vmul.f32 -1.442695, %v6575_v24  ;;  %v7284_v35 = vmul.f32 -1.442695, %v6625_v63  ;;  %v7812_v29 = vpop.f32.mrb[50].mxu0 }
0x1d36   : > { %8315 = vpow2.f32 %v7275_v50  ;;  %v6590_v21 = vadd.f32 %v7812_v29, %v6398_v20  ;;  %v6584_v9 = vpop.f32.mrb[51].mxu0 }
0x1d37   : > { %8317 = vpow2.f32 %v7285_v36  ;;  %v6585_v52 = vadd.f32 %v6584_v9, %v11799_v3 }
0x1d38   : > { %v8300_v33 = vpop.eup %8299  ;;  %8319 = vpow2.f32 %v7274_v6  ;;  %v7277_v2 = vmul.f32 -1.442695, %v6590_v21 }
0x1d39   : > { %v8302_v42 = vpop.eup %8301  ;;  %v6682_v7 = vadd.f32 1.0, %v8300_v33  ;;  %8321 = vpow2.f32 %v7284_v35  ;;  %v7815_v32 = vpop.f32.mrb[52].mxu0  ;;  %v7276_v49 = vmul.f32 -1.442695, %v6585_v52 }
0x1d3a   : > { %v8304_v12 = vpop.eup %8303  ;;  %v6692_v37 = vadd.f32 1.0, %v8302_v42  ;;  %8323 = vpow2.f32 %v7277_v2  ;;  %v6594_v18 = vpop.f32.mrb[53].mxu0  ;;  %v6600_v8 = vadd.f32 %v7815_v32, %v11803_v45 }
0x1d3b   : > { %v8306_v13 = vpop.eup %8305  ;;  %8325 = vrcp.f32 %v6682_v7  ;;  %v6681_v0 = vadd.f32 1.0, %v8304_v12  ;;  %v6595_v27 = vadd.f32 %v6594_v18, %v11801_v55 }
0x1d3c   : > { %v8308_v28 = vpop.eup %8307  ;;  %8327 = vrcp.f32 %v6692_v37  ;;  %v6691_v26 = vadd.f32 1.0, %v8306_v13  ;;  %v7279_v38 = vmul.f32 -1.442695, %v6600_v8 }
0x1d3d   : > { %v8310_v40 = vpop.eup %8309  ;;  %8329 = vrcp.f32 %v6681_v0  ;;  %v6684_v47 = vadd.f32 1.0, %v8308_v28  ;;  %v7278_v55 = vmul.f32 -1.442695, %v6595_v27 }
0x1d3e   : > { %v8312_v57 = vpop.eup %8311  ;;  %8331 = vrcp.f32 %v6691_v26  ;;  %v6694_v20 = vadd.f32 1.0, %v8310_v40 }
0x1d3f   : > { %v8314_v34 = vpop.eup %8313  ;;  %8333 = vrcp.f32 %v6684_v47  ;;  %v6683_v25 = vadd.f32 1.0, %v8312_v57 }
0x1d40   : > { %v8316_v11 = vpop.eup %8315  ;;  %8335 = vrcp.f32 %v6694_v20  ;;  %v6693_v39 = vadd.f32 1.0, %v8314_v34 }
0x1d41   : > { %v8318_v54 = vpop.eup %8317  ;;  %8337 = vrcp.f32 %v6683_v25  ;;  %v6686_v17 = vadd.f32 1.0, %v8316_v11 }
0x1d42   : > { %v8320_v30 = vpop.eup %8319  ;;  %8339 = vrcp.f32 %v6693_v39  ;;  %v6696_v53 = vadd.f32 1.0, %v8318_v54 }
0x1d43   : > { %v8322_v23 = vpop.eup %8321  ;;  %8341 = vrcp.f32 %v6686_v17  ;;  %v6685_v51 = vadd.f32 1.0, %v8320_v30 }
0x1d44   : > { %v8324_v61 = vpop.eup %8323  ;;  %8343 = vrcp.f32 %v6696_v53  ;;  %v6695_v58 = vadd.f32 1.0, %v8322_v23 }
0x1d45   : > { %v8326_v15 = vpop.eup %8325  ;;  %8345 = vrcp.f32 %v6685_v51  ;;  %v6688_v3 = vadd.f32 1.0, %v8324_v61 }
0x1d46   : > { %v8328_v56 = vpop.eup %8327  ;;  %6730 = vst [vmem:[%s11811_s26 + $0x8] sm:$0xff] %v8326_v15  ;;  %8347 = vrcp.f32 %v6695_v58 }
0x1d47   : > { %v8330_v45 = vpop.eup %8329  ;;  %6740 = vst [vmem:[%s11811_s26 + $0x58] sm:$0xff] %v8328_v56  ;;  %8349 = vrcp.f32 %v6688_v3 }
0x1d48   : > { %v8332_v14 = vpop.eup %8331  ;;  %6729 = vst [vmem:[%s11811_s26] sm:$0xff] %v8330_v45  ;;  %8351 = vpow2.f32 %v7276_v49 }
0x1d49   : > { %v8334_v1 = vpop.eup %8333  ;;  %6739 = vst [vmem:[%s11811_s26 + $0x50] sm:$0xff] %v8332_v14  ;;  %8353 = vpow2.f32 %v7279_v38 }
0x1d4a   : > { %v8336_v46 = vpop.eup %8335  ;;  %6732 = vst [vmem:[%s11811_s26 + $0x18] sm:$0xff] %v8334_v1  ;;  %8355 = vpow2.f32 %v7278_v55 }
0x1d4b   : > { %v8338_v62 = vpop.eup %8337  ;;  %6742 = vst [vmem:[%s11811_s26 + $0x68] sm:$0xff] %v8336_v46 }
0x1d4c   : > { %v8340_v5 = vpop.eup %8339  ;;  %6731 = vst [vmem:[%s11811_s26 + $0x10] sm:$0xff] %v8338_v62 }
0x1d4d   : > { %v8342_v44 = vpop.eup %8341  ;;  %6741 = vst [vmem:[%s11811_s26 + $0x60] sm:$0xff] %v8340_v5 }
0x1d4e   : > { %v8344_v10 = vpop.eup %8343  ;;  %6734 = vst [vmem:[%s11811_s26 + $0x28] sm:$0xff] %v8342_v44 }
0x1d4f   : > { %v8346_v31 = vpop.eup %8345  ;;  %6744 = vst [vmem:[%s11811_s26 + $0x78] sm:$0xff] %v8344_v10 }
0x1d50   : > { %v8348_v16 = vpop.eup %8347  ;;  %6733 = vst [vmem:[%s11811_s26 + $0x20] sm:$0xff] %v8346_v31 }
0x1d51   : > { %v8350_v22 = vpop.eup %8349  ;;  %6743 = vst [vmem:[%s11811_s26 + $0x70] sm:$0xff] %v8348_v16 }
0x1d52   : > { %v8352_v48 = vpop.eup %8351  ;;  %6736 = vst [vmem:[%s11811_s26 + $0x38] sm:$0xff] %v8350_v22 }
0x1d53   : > { %v8354_v59 = vpop.eup %8353  ;;  %v6687_v41 = vadd.f32 1.0, %v8352_v48 }
0x1d54   : > { %v8356_v4 = vpop.eup %8355  ;;  %v6690_v19 = vadd.f32 1.0, %v8354_v59 }
0x1d55   : > { %8357 = vrcp.f32 %v6687_v41  ;;  %v6689_v43 = vadd.f32 1.0, %v8356_v4 }
0x1d56   : > { %8359 = vrcp.f32 %v6690_v19 }
0x1d57   : > { %8361 = vrcp.f32 %v6689_v43 }
0x1d5f   : > { %v8358_v60 = vpop.eup %8357 }
0x1d60   : > { %v8360_v24 = vpop.eup %8359  ;;  %6735 = vst [vmem:[%s11811_s26 + $0x30] sm:$0xff] %v8358_v60 }
0x1d61   : > { %v8362_v63 = vpop.eup %8361  ;;  %6738 = vst [vmem:[%s11811_s26 + $0x48] sm:$0xff] %v8360_v24 }
0x1d62   : > { %6737 = vst [vmem:[%s11811_s26 + $0x40] sm:$0xff] %v8362_v63 }
0x1d63   : > { %8391 = shalt.err (!%p8388_p2)
}
0x1d64   : > { %s8392_s27 = scalar_lea.hbm %s11831_s30, 2048  ;;  %s8396_s1 = scalar_lea.hbm %s11897_s16, 4096 }
0x1d65   : > { %p8393_p3 = scmp.ne.s32.totalorder %s11831_s30, %s8392_s27  ;;  %p8397_p8 = scmp.lt.u32.totalorder %s11831_s30, %s11897_s16 }
0x1d66   : > { %p8398_p11 = scmp.lt.u32.totalorder %s8396_s1, %s8392_s27  ;;  %p8400_p10 = scmp.lt.u32.totalorder %s8392_s27, %s11831_s30 }
0x1d67   : > { %p8394_p4 = pnand %p8393_p3, %p8582_p5 }
0x1d68   : > { %p8399_p9 = por %p8398_p11, %p8397_p8 }
0x1d69   : > { %p8395_p7 = pneg %p8394_p4 }
0x1d6a   : > { %p8401_p12 = por %p8400_p10, %p8399_p9 }
0x1d6c   : > { %p8402_p13 = pnand %p8401_p12, %p8395_p7 }
0x1d6e   : > { %8405 = shalt.err (!%p8402_p13)
}
0x1d6f   : > { %s8457_s25 = smov 128   ;;  %s8458_s19 = smov 8  }
0x1d70   : > { %8097 = dma.vmem_to_hbm [thread:$0]  (%p8582_p5), %s11833_s20, 2048, %s11831_s30, %s11840_s18, %s8457_s25, %s8457_s25, %s8458_s19  }
0x1d71 PF: > { %p8109_p0 = scmp.ge.s32.totalorder %s8444_s24, 2  ;;  %s6774_s26 = sand.u32 1, %s8432_s21  }
0x1d72   : > { %s6775_s27 = scalar_lea.sflag [#allocation3], %s6774_s26 }
0x1d73   : > { %p8104_p1 = pnand %p8109_p0, %p8586_p6 }
0x1d75   : > { %8427 = dma.done.wait (!%p8104_p1), %s6775_s27, 2048  }
0x1d76   : > { %8429 = vsyncadd (!%p8104_p1), %s6775_s27, 4294965248  ;;  %s11990_s24 = sld [smem:[#allocation9_spill]]  ;;  %s11991_s29 = sld [smem:[#allocation8_spill]] }
0x1d77   : > { %s11992_s23 = sld [smem:[#allocation10_spill]]  ;;  %s11993_s21 = smov %s8436_s22 }
0x1d7c   : > { %p27_p2 = scmp.ge.s32.totalorder %s11990_s24, 4   ;;  %s11994_s22 = smov %s11991_s29 }
0x1d7e   :  { %29 = sbr.rel (!%p27_p2) target bundleno = 7 (0x7), region = 162 }
0x1d85   :  { %6780 = vsyncpa [#allocation3], 1 }
0x1d86   :  { %6782 = vsyncpa [#allocation3 + $0x1], 1 }
0x1d87   :  { %6783 = vsyncpa [#allocation4], 1 }
0x1d88   :  { %6785 = vsyncpa [#allocation4 + $0x1], 1 }

</bundles_post_ra>
